<compile_context>
chip_gen: v7x
topology: tpu7x:2x2x1
jax: 0.10.0
libtpu: 0.0.40
codegen_flags: <defaults>
</compile_context>

<pallas_src>
import functools

import jax
import jax.numpy as jnp
import numpy as np
from jax.experimental import pallas as pl
from jax.experimental.pallas import tpu as pltpu


# ----------------------------- Pallas kernel ------------------------------ #

def _kpw_kernel(x_ref, wcat_ref, b1_ref, w2_ref, b2_ref, bo_ref,
                out_ref, score_ref):
    """Fused: y = x @ [Wout | W1]; h = relu(y[:,D:]+b1); s = sigmoid(<h,w2>+b2);
              out = s * y[:,:D] + bout ; score emitted lane-dense."""
    d_out = out_ref.shape[1]

    xv = x_ref[...]
    w = wcat_ref[...]
    if xv.dtype != w.dtype:
        # in-kernel cast: single-pass bf16 MXU while x keeps its HBM dtype
        # (avoids a separate wrapper-side f32->bf16 pass over the whole x).
        xv = xv.astype(w.dtype)

    # single MXU pass over the big x tile, f32 accumulation
    y = jnp.dot(xv, w, preferred_element_type=jnp.float32)   # (tm, D_out + H)

    out_raw = y[:, :d_out]                                    # (tm, D_out) lane-aligned
    h = jnp.maximum(y[:, d_out:] + b1_ref[...], 0.0)          # (tm, H)

    # degenerate 1-column matmul -> VPU multiply + lane reduction (XLU slot)
    logit = jnp.sum(h * w2_ref[...], axis=-1, keepdims=True) + b2_ref[0, 0]
    score = jax.nn.sigmoid(logit)                             # (tm, 1) f32

    # score is a per-row scalar: diag(s)·X·W == s ⊙ (X·W) row-wise
    out_ref[...] = (score * out_raw + bo_ref[...]).astype(out_ref.dtype)

    # lane-dense score store: (tm, 1) column -> (tm,) on lanes
    score_ref[0, :] = score[:, 0].astype(score_ref.dtype)


def _vmem_budget_bytes(tile_m, C, D_out, H, x_bytes, w_bytes, out_bytes):
    """Explicit scoped-VMEM cap derived from the actual tile footprint
    (double-buffered streamed tiles + resident weights + 2x headroom for
    compiler temporaries such as y/h and dtype casts)."""
    x_tile = tile_m * C * x_bytes
    out_tile = tile_m * D_out * out_bytes
    score_tile = tile_m * 4
    weights = C * (D_out + H) * w_bytes + (2 * H + D_out + 8) * 4
    need = 2 * (x_tile + out_tile + score_tile) + 2 * weights
    budget = 2 * need + (4 << 20)
    return int(min(max(budget, 16 << 20), 64 << 20))


@functools.partial(jax.jit, static_argnames=("tile_m", "out_dtype"))
def kpw_forward_core(x, wcat, b1, w2_row, b2, bo, *, tile_m=1024,
                     out_dtype=jnp.float32):
    """x: (M, C) -> (out_feats (M, D_out), scores (M,) f32). No HBM-side padding."""
    M, C = x.shape
    D_out = bo.shape[1]
    H = wcat.shape[1] - D_out
    assert wcat.shape[0] == C and w2_row.shape == (1, H) and b1.shape == (1, H)

    num_tiles = pl.cdiv(M, tile_m)          # partial last block handled by Pallas
    vmem_bytes = _vmem_budget_bytes(
        tile_m, C, D_out, H,
        jnp.dtype(x.dtype).itemsize,
        jnp.dtype(wcat.dtype).itemsize,
        jnp.dtype(out_dtype).itemsize)

    out_feats, scores = pl.pallas_call(
        _kpw_kernel,
        out_shape=(
            jax.ShapeDtypeStruct((M, D_out), out_dtype),
            jax.ShapeDtypeStruct((1, M), jnp.float32),          # lane-dense scores
        ),
        grid_spec=pltpu.PrefetchScalarGridSpec(
            num_scalar_prefetch=0,
            grid=(num_tiles,),
            in_specs=[
                # x streamed once per tile.  (Add pipeline_mode=pl.Buffered(3)
                # here only if a v7x profile shows exposed DMA-issue gaps.)
                pl.BlockSpec((tile_m, C), lambda i: (i, 0)),        # x tile
                pl.BlockSpec((C, D_out + H), lambda i: (0, 0)),     # [Wout | W1]
                pl.BlockSpec((1, H), lambda i: (0, 0)),             # b1
                pl.BlockSpec((1, H), lambda i: (0, 0)),             # w2 (row)
                pl.BlockSpec(memory_space=pltpu.MemorySpace.SMEM),  # b2 scalar
                pl.BlockSpec((1, D_out), lambda i: (0, 0)),         # bout
            ],
            out_specs=[
                pl.BlockSpec((tile_m, D_out), lambda i: (i, 0)),
                pl.BlockSpec((1, tile_m), lambda i: (0, i)),
            ],
        ),
        compiler_params=pltpu.CompilerParams(
            dimension_semantics=("parallel",),
            vmem_limit_bytes=vmem_bytes,
        ),
    )(x, wcat, b1, w2_row, b2, bo)

    return out_feats, scores.reshape(-1)


# ------------------------------ parameters -------------------------------- #

def init_params(key, input_dim, hidden_dim, output_dim):
    """Synthetic parameters with the shapes of KeypointWeighting.__init__."""
    k1, k2, k3 = jax.random.split(key, 3)
    s1 = 1.0 / np.sqrt(input_dim)
    s2 = 1.0 / np.sqrt(hidden_dim)
    s3 = 1.0 / np.sqrt(640)     # out_layer is hard-coded nn.Linear(640, output_dim)
    return dict(
        w1=jax.random.uniform(k1, (input_dim, hidden_dim), jnp.float32, -s1, s1),
        b1=jnp.zeros((1, hidden_dim), jnp.float32),
        w2=jax.random.uniform(k2, (hidden_dim, 1), jnp.float32, -s2, s2),
        b2=jnp.zeros((1, 1), jnp.float32),
        wo=jax.random.uniform(k3, (640, output_dim), jnp.float32, -s3, s3),
        bo=jnp.zeros((1, output_dim), jnp.float32),
    )


def fuse_params(params, matmul_dtype=jnp.bfloat16):
    """Kernel-side parameter layout: concatenated [Wout | W1], row-form w2.
    bf16 matmul operands are the deployment default (mandatory on v5e to stay
    HBM-bound); biases stay f32, accumulation is always f32."""
    wcat = jnp.concatenate([params["wo"], params["w1"]], axis=1)  # (C, D_out+H)
    return dict(
        wcat=wcat.astype(matmul_dtype),
        b1=params["b1"],
        w2=params["w2"].T,          # (1, H)
        b2=params["b2"],            # (1, 1) -> SMEM
        bo=params["bo"],            # (1, D_out)
    )


# --------------------- on-device selection / compaction -------------------- #

@jax.jit
def _select_and_pad(feats, coords, scores):
    """Per batch: compact rows with score > 0.4 to the front, zero-fill rest.
    Scatter-free: stable argsort moves selected indices (in order) to the front,
    then a gather + mask; avoids TPU scatter serialization."""
    B, N, D = feats.shape
    mask = scores > 0.4
    sizes = mask.sum(axis=-1).astype(jnp.int32)

    order = jnp.argsort(jnp.logical_not(mask), axis=-1, stable=True)  # (B, N)
    feats_c = jnp.take_along_axis(feats, order[..., None], axis=1)
    coords_c = jnp.take_along_axis(coords, order[..., None], axis=1)
    valid = jnp.arange(N)[None, :] < sizes[:, None]
    feats_c = jnp.where(valid[..., None], feats_c, 0.0)
    coords_c = jnp.where(valid[..., None], coords_c, 0.0)
    return feats_c, coords_c, sizes


def _choose_tile_m(M, tile_m=1024):
    """Row-tile picker.  Real alignment need: 8 sublanes for the (tile_m, C) /
    (tile_m, D_out) blocks and 128 lanes for the (1, tile_m) score block, so a
    multiple of 128 suffices.  Prefer >=2 grid steps (pipelining) and an even
    grid length (v7x: the 'parallel' axis splits 50/50 across the 2 TCs)."""
    rup = lambda v: max(128, -(-int(v) // 128) * 128)
    M = max(int(M), 1)
    tile_m = rup(min(tile_m, M))
    if M > 256 and -(-M // tile_m) == 1:            # keep >= 2 steps when M allows
        tile_m = rup(-(-M // 2))
    nt = -(-M // tile_m)
    if nt > 1 and nt % 2 == 1:                      # prefer an even grid length
        alt = rup(-(-M // (nt + 1)))
        if -(-M // alt) % 2 == 0:
            nt = -(-M // alt)
            tile_m = alt
    return rup(-(-M // nt))                         # re-balance the last step


# ------------------------------ Module glue ------------------------------- #

def keypoint_weighting_forward(data_dict, params, cfg=None, tile_m=1024,
                               matmul_dtype=jnp.bfloat16, out_dtype=jnp.float32):
    """Inference-mode forward of KeypointWeighting."""
    cfg = cfg or {}
    if cfg.get("USE_POINT_FEATURES_BEFORE_FUSION", False):
        point_features = data_dict["point_features_before_fusion"]
    else:
        point_features = data_dict["point_features"]
    point_coords = data_dict["point_coords"]
    B, N, C = point_features.shape

    fused = fuse_params(params, matmul_dtype)
    x = point_features.reshape(B * N, C)   # keeps its HBM dtype; cast is in-kernel
    tm = _choose_tile_m(B * N, tile_m)
    out_flat, scores_flat = kpw_forward_core(
        x, fused["wcat"], fused["b1"], fused["w2"], fused["b2"], fused["bo"],
        tile_m=tm, out_dtype=out_dtype)

    D_out = out_flat.shape[-1]
    feats_full = out_flat.reshape(B, N, D_out)
    scores_b = scores_flat.reshape(B, N)

    # heavy compaction stays on device (gather-based); only the scalar max(sizes)
    # (a dynamic output shape, exactly as in the PyTorch per-batch loop) is a
    # host sync — an unavoidable pipeline stall per call.
    feats_c, coords_c, sizes = _select_and_pad(feats_full, point_coords, scores_b)
    max_size = int(jax.device_get(jnp.max(sizes)))

    out = dict(data_dict)
    out["point_features"] = feats_c[:, :max_size]
    out["selected_kpoints"] = coords_c[:, :max_size]
    # NOTE: same (quirky) semantics as the PyTorch module: any point with one
    # coordinate exactly 0.0 is also flagged as padding.
    out["point_mask"] = (out["selected_kpoints"] == 0).sum(axis=-1) != 0
    out["keypoint_scores"] = scores_b
    # TODO(synk): training branch (points_in_boxes_gpu labels, cross_entropy2d_binary
    # loss, kpoints_obj, wandb histogram logging) relies on external CUDA ops /
    # logging and is omitted.
    return out


# ----------------------------- references --------------------------------- #

def _reference_kernel_order(x, p):
    h = jnp.maximum(x @ p["w1"] + p["b1"], 0.0)
    logit = jnp.sum(h * p["w2"].T, axis=-1, keepdims=True) + p["b2"]
    s = jax.nn.sigmoid(logit)
    out = s * (x @ p["wo"]) + p["bo"]
    return out, s


def _reference_pytorch_order(x, p):
    h = jnp.maximum(x @ p["w1"] + p["b1"], 0.0)
    logit = h @ p["w2"] + p["b2"]
    s = jax.nn.sigmoid(logit)
    out = (x * s) @ p["wo"] + p["bo"]
    return out, s


# --------------------------------- main ------------------------------------ #

if __name__ == "__main__":
    B, N = 2, 600               # M = 1200 points -> tile_m=640, even 2-step grid
    C = 640                     # out_layer is hard-coded Linear(640, output_dim)
    HIDDEN = 32
    D_OUT = 128

    key = jax.random.PRNGKey(0)
    k_feat, k_coord, k_param = jax.random.split(key, 3)
    point_features = jax.random.normal(k_feat, (B, N, C), jnp.float32)
    point_coords = jax.random.normal(k_coord, (B, N, 3), jnp.float32) * 10.0
    params = init_params(k_param, C, HIDDEN, D_OUT)

    M = B * N
    tm = _choose_tile_m(M)
    x_flat = point_features.reshape(M, C)

    # ---- f32-weight kernel path: tight check vs plain-JAX references ----
    fused_f32 = fuse_params(params, jnp.float32)
    f32_out, f32_s = kpw_forward_core(
        x_flat, fused_f32["wcat"], fused_f32["b1"], fused_f32["w2"],
        fused_f32["b2"], fused_f32["bo"], tile_m=tm)
    f32_out = np.asarray(f32_out)
    f32_s = np.asarray(f32_s)

    ref_out, ref_s = _reference_kernel_order(x_flat, params)
    np.testing.assert_allclose(f32_out, np.asarray(ref_out), rtol=1e-4, atol=1e-4)
    np.testing.assert_allclose(f32_s, np.asarray(ref_s)[:, 0], rtol=1e-4, atol=1e-5)

    # algebraically-identical PyTorch ordering (looser: rounding points differ
    # under the default TPU matmul precision)
    ref_out2, ref_s2 = _reference_pytorch_order(x_flat, params)
    np.testing.assert_allclose(f32_out, np.asarray(ref_out2), rtol=5e-2, atol=5e-2)
    np.testing.assert_allclose(f32_s, np.asarray(ref_s2)[:, 0], rtol=1e-2, atol=1e-2)

    # ---- bf16-weight path (deployment default; in-kernel cast of f32 x) ----
    fused_bf16 = fuse_params(params, jnp.bfloat16)
    bf_out, bf_s = kpw_forward_core(
        x_flat, fused_bf16["wcat"], fused_bf16["b1"], fused_bf16["w2"],
        fused_bf16["b2"], fused_bf16["bo"], tile_m=tm)
    bf_out = np.asarray(bf_out)
    bf_s = np.asarray(bf_s)
    np.testing.assert_allclose(bf_out, f32_out, rtol=5e-2, atol=5e-2)
    np.testing.assert_allclose(bf_s, f32_s, rtol=5e-2, atol=3e-2)

    # ---- full forward (bf16 default) + selection/compaction check ----
    data_dict = {"point_features": point_features, "point_coords": point_coords}
    out_dict = keypoint_weighting_forward(data_dict, params)
    jax.block_until_ready(out_dict["point_features"])
    jax.block_until_ready(out_dict["selected_kpoints"])
    jax.block_until_ready(out_dict["point_mask"])

    feats_full = bf_out.reshape(B, N, D_OUT)
    scores_b = bf_s.reshape(B, N)
    sel = scores_b > 0.4
    sizes = [int(m.sum()) for m in sel]
    max_size = max(sizes)
    coords_np = np.asarray(point_coords)
    exp_feats = np.zeros((B, max_size, D_OUT), np.float32)
    exp_coords = np.zeros((B, max_size, 3), np.float32)
    for i in range(B):
        exp_feats[i, :sizes[i]] = feats_full[i, sel[i]]
        exp_coords[i, :sizes[i]] = coords_np[i, sel[i]]
    np.testing.assert_allclose(np.asarray(out_dict["point_features"]), exp_feats,
                               rtol=0, atol=1e-6)
    np.testing.assert_allclose(np.asarray(out_dict["selected_kpoints"]), exp_coords,
                               rtol=0, atol=1e-6)
    # explicit check that the selected index set matches (bf16 is the default path)
    np.testing.assert_array_equal(np.asarray(out_dict["keypoint_scores"] > 0.4), sel)

    print("KERNEL_OK")
</pallas_src>

<mosaic_0001>
module attributes {stable_mosaic.version = 11 : i64} {
  func.func @_kpw_kernel(%arg0: i32, %arg1: memref<640x640xf32, #tpu.memory_space<vmem>>, %arg2: memref<640x160xf32, #tpu.memory_space<vmem>>, %arg3: memref<1x32xf32, #tpu.memory_space<vmem>>, %arg4: memref<1x32xf32, #tpu.memory_space<vmem>>, %arg5: memref<1x1xf32, #tpu.memory_space<smem>>, %arg6: memref<1x128xf32, #tpu.memory_space<vmem>>, %arg7: memref<640x128xf32, #tpu.memory_space<vmem>>, %arg8: memref<1x640xf32, #tpu.memory_space<vmem>>) attributes {dimension_semantics = [#tpu.dimension_semantics<parallel>], iteration_bounds = array<i64: 2>, scalar_prefetch = 0 : i64, scratch_operands = 0 : i64, tpu.core_type = #tpu.core_type<tc>, window_params = [{transform_indices = @transform_0, window_bounds = array<i64: 640, 640>}, {pipeline_mode = #tpu.pipeline_mode<synchronous>, transform_indices = @transform_1, window_bounds = array<i64: 640, 160>}, {pipeline_mode = #tpu.pipeline_mode<synchronous>, transform_indices = @transform_2, window_bounds = array<i64: 1, 32>}, {pipeline_mode = #tpu.pipeline_mode<synchronous>, transform_indices = @transform_3, window_bounds = array<i64: 1, 32>}, {transform_indices = @transform_4, window_bounds = array<i64: 1, 1>}, {pipeline_mode = #tpu.pipeline_mode<synchronous>, transform_indices = @transform_5, window_bounds = array<i64: 1, 128>}, {transform_indices = @transform_6, window_bounds = array<i64: 640, 128>}, {transform_indices = @transform_7, window_bounds = array<i64: 1, 640>}]} {
    %c0 = arith.constant 0 : index
    %c0_0 = arith.constant 0 : index
    %0 = vector.load %arg1[%c0, %c0_0] : memref<640x640xf32, #tpu.memory_space<vmem>>, vector<640x640xf32>
    %c0_1 = arith.constant 0 : index
    %c0_2 = arith.constant 0 : index
    %1 = vector.load %arg2[%c0_1, %c0_2] : memref<640x160xf32, #tpu.memory_space<vmem>>, vector<640x160xf32>
    %cst = arith.constant dense<0.000000e+00> : vector<640x160xf32>
    %2 = tpu.matmul %0, %1, %cst {dimension_numbers = #tpu.dot_dimension_numbers<[1], [0], [0], [1], [0, 0, 1, 1], [], []>} : vector<640x640xf32>, vector<640x160xf32>, vector<640x160xf32> -> vector<640x160xf32>
    %3 = vector.extract_strided_slice %2 {offsets = [0, 0], sizes = [640, 128], strides = [1, 1]} : vector<640x160xf32> to vector<640x128xf32>
    %4 = vector.extract_strided_slice %2 {offsets = [0, 128], sizes = [640, 32], strides = [1, 1]} : vector<640x160xf32> to vector<640x32xf32>
    %c0_3 = arith.constant 0 : index
    %c0_4 = arith.constant 0 : index
    %5 = vector.load %arg3[%c0_3, %c0_4] : memref<1x32xf32, #tpu.memory_space<vmem>>, vector<1x32xf32>
    %6 = vector.broadcast %5 : vector<1x32xf32> to vector<640x32xf32>
    %7 = arith.addf %4, %6 : vector<640x32xf32>
    %cst_5 = arith.constant 0.000000e+00 : f32
    %8 = vector.broadcast %cst_5 : f32 to vector<640x32xf32>
    %9 = arith.maximumf %7, %8 : vector<640x32xf32>
    %c0_6 = arith.constant 0 : index
    %c0_7 = arith.constant 0 : index
    %10 = vector.load %arg4[%c0_6, %c0_7] : memref<1x32xf32, #tpu.memory_space<vmem>>, vector<1x32xf32>
    %11 = vector.broadcast %10 : vector<1x32xf32> to vector<640x32xf32>
    %12 = arith.mulf %9, %11 : vector<640x32xf32>
    %cst_8 = arith.constant dense<0.000000e+00> : vector<640xf32>
    %13 = vector.multi_reduction <add>, %12, %cst_8 [1] : vector<640x32xf32> to vector<640xf32>
    %14 = vector.shape_cast %13 : vector<640xf32> to vector<640x1xf32>
    %c0_9 = arith.constant 0 : index
    %c0_10 = arith.constant 0 : index
    %15 = memref.load %arg5[%c0_9, %c0_10] : memref<1x1xf32, #tpu.memory_space<smem>>
    %16 = vector.broadcast %15 : f32 to vector<640x1xf32>
    %17 = arith.addf %14, %16 : vector<640x1xf32>
    %18 = arith.negf %17 : vector<640x1xf32>
    %19 = math.exp %18 : vector<640x1xf32>
    %cst_11 = arith.constant 1.000000e+00 : f32
    %20 = vector.broadcast %cst_11 : f32 to vector<640x1xf32>
    %21 = arith.addf %20, %19 : vector<640x1xf32>
    %22 = arith.divf %20, %21 : vector<640x1xf32>
    %23 = vector.broadcast %22 : vector<640x1xf32> to vector<640x128xf32>
    %24 = arith.mulf %23, %3 : vector<640x128xf32>
    %c0_12 = arith.constant 0 : index
    %c0_13 = arith.constant 0 : index
    %25 = vector.load %arg6[%c0_12, %c0_13] : memref<1x128xf32, #tpu.memory_space<vmem>>, vector<1x128xf32>
    %26 = vector.broadcast %25 : vector<1x128xf32> to vector<640x128xf32>
    %27 = arith.addf %24, %26 : vector<640x128xf32>
    %c0_14 = arith.constant 0 : index
    %c0_15 = arith.constant 0 : index
    %28 = vector.load %arg7[%c0_14, %c0_15] : memref<640x128xf32, #tpu.memory_space<vmem>>, vector<640x128xf32>
    tpu.vector_store %arg7[%c0_14, %c0_15], %27 {strides = array<i32>} : memref<640x128xf32, #tpu.memory_space<vmem>>, vector<640x128xf32>,
    %29 = vector.shape_cast %22 : vector<640x1xf32> to vector<640xf32>
    %c0_16 = arith.constant 0 : index
    %c0_17 = arith.constant 0 : index
    %30 = vector.load %arg8[%c0_16, %c0_17] : memref<1x640xf32, #tpu.memory_space<vmem>>, vector<1x640xf32>
    %31 = vector.shape_cast %30 : vector<1x640xf32> to vector<640xf32>
    %32 = vector.shape_cast %29 : vector<640xf32> to vector<1x640xf32>
    tpu.vector_store %arg8[%c0_16, %c0_17], %32 {strides = array<i32>} : memref<1x640xf32, #tpu.memory_space<vmem>>, vector<1x640xf32>,
    return
  }
  func.func @transform_0(%arg0: i32) -> (i32, i32) {
    %c0_i32 = arith.constant 0 : i32
    %c0_i32_0 = arith.constant 0 : i32
    return %arg0, %c0_i32 : i32, i32
  }
  func.func @transform_1(%arg0: i32) -> (i32, i32) {
    %c0_i32 = arith.constant 0 : i32
    %c0_i32_0 = arith.constant 0 : i32
    %c0_i32_1 = arith.constant 0 : i32
    return %c0_i32, %c0_i32_0 : i32, i32
  }
  func.func @transform_2(%arg0: i32) -> (i32, i32) {
    %c0_i32 = arith.constant 0 : i32
    %c0_i32_0 = arith.constant 0 : i32
    %c0_i32_1 = arith.constant 0 : i32
    return %c0_i32, %c0_i32_0 : i32, i32
  }
  func.func @transform_3(%arg0: i32) -> (i32, i32) {
    %c0_i32 = arith.constant 0 : i32
    %c0_i32_0 = arith.constant 0 : i32
    %c0_i32_1 = arith.constant 0 : i32
    return %c0_i32, %c0_i32_0 : i32, i32
  }
  func.func @transform_4(%arg0: i32) -> (i32, i32) {
    %c0_i32 = arith.constant 0 : i32
    %c0_i32_0 = arith.constant 0 : i32
    %c0_i32_1 = arith.constant 0 : i32
    return %c0_i32, %c0_i32_0 : i32, i32
  }
  func.func @transform_5(%arg0: i32) -> (i32, i32) {
    %c0_i32 = arith.constant 0 : i32
    %c0_i32_0 = arith.constant 0 : i32
    %c0_i32_1 = arith.constant 0 : i32
    return %c0_i32, %c0_i32_0 : i32, i32
  }
  func.func @transform_6(%arg0: i32) -> (i32, i32) {
    %c0_i32 = arith.constant 0 : i32
    %c0_i32_0 = arith.constant 0 : i32
    return %arg0, %c0_i32 : i32, i32
  }
  func.func @transform_7(%arg0: i32) -> (i32, i32) {
    %c0_i32 = arith.constant 0 : i32
    %c0_i32_0 = arith.constant 0 : i32
    return %c0_i32, %arg0 : i32, i32
  }
}

</mosaic_0001>

<bundles_post_ra>
// kernel: kpw_forward_core.1
= control target key start
LH: loop header
LB: loop body
LE: loop exit
PB: predicated region body
PF: predicated region fallthrough
CT: control target
= control target key end

     0   :  { %s17718_s0 = inlined_call_operand.hbm [shape: f32[1200,640], index: 0, kind: input, shape index: {}]   ;;  %s17719_s1 = inlined_call_operand.vmem [shape: f32[640,160], index: 1, kind: input, shape index: {}]   ;;  %s17720_s2 = inlined_call_operand.hbm [shape: f32[1,32], index: 2, kind: input, shape index: {}]   ;;  %s17721_s3 = inlined_call_operand.hbm [shape: f32[1,32], index: 3, kind: input, shape index: {}]   ;;  %s17722_s4 = inlined_call_operand.<no memory space> [shape: f32[1,1], index: 4, kind: input, shape index: {}]   ;;  %s17723_s5 = inlined_call_operand.hbm [shape: f32[1,128], index: 5, kind: input, shape index: {}]   ;;  %s17724_s6 = inlined_call_operand.hbm [shape: f32[1200,128], index: 6, kind: output, shape index: {0}]   ;;  %s17725_s7 = inlined_call_operand.vmem [shape: f32[1,1200], index: 7, kind: output, shape index: {1}]  }
   0x1   :  { %13 = sst [smem:[#allocation2]] %s17722_s4 }
   0x2   :  { %14 = vsyncpa [#allocation4], 0 }
   0x3   :  { %16 = vsyncpa [#allocation4 + $0x1], 0 }
   0x4   :  { %17 = vsyncpa [#allocation7], 0 }
   0x5   :  { %18 = vsyncpa [#allocation10], 0 }
   0x6   :  { %19 = vsyncpa [#allocation5], 0 }
   0x7   :  { %21 = vsyncpa [#allocation5 + $0x1], 0  ;;  %s12568_s26 = smov 0   ;;  %s12570_s27 = smov 0  }
   0x8   :  { %s12572_s28 = smov 0   ;;  %s12574_s29 = smov 0  }
   0x9 LB: > { %s12589_s4 = sadd.s32 4294967295, %s12511_s29   ;;  %s11288_s30 = sadd.s32 4294967294, %s12511_s29   ;;  %s12511_s29 = sphi %s12574_s29, %s18280_s29   ;;  %s12507_s28 = sphi %s12572_s28, %s18284_s28   ;;  %s12503_s27 = sphi %s12570_s27, %s18283_s27   ;;  %s12499_s26 = sphi %s12568_s26, %s18282_s26  }
   0xa   : > { %s12593_s8 = sadd.s32 1, %s12511_s29   ;;  %s34_s9 = sadd.s32 1, %s12507_s28 }
   0xb   : > { %17870 = sst [smem:[#allocation16_spill]] %s12593_s8  ;;  %s31_s10 = ssub.s32 %s12511_s29, %s12593_s8 }
   0xc   : > { %p41_p0 = scmp.ne.s32.totalorder %s12507_s28, %s12503_s27  ;;  %p32_p1 = scmp.eq.s32.totalorder %s31_s10, 0 }
   0xd   : > { %p42_p2 = scmp.eq.s32.totalorder %s12511_s29, 0  ;;  %p47_p3 = scmp.ne.s32.totalorder %s12503_s27, %s12499_s26 }
   0xe   : > { %p17726_p4 = scmp.eq.s32.totalorder %s12589_s4, 0  ;;  %p176_p7 = scmp.eq.s32.totalorder %s12589_s4, 1 }
   0xf   : > { %s12605_s11 = scalar_select %p32_p1, %s12507_s28, %s34_s9  }
  0x10   : > { %p12607_p5 = por %p42_p2, %p41_p0  ;;  %p12613_p6 = por %p17726_p4, %p47_p3 }
  0x11   : > { %17871 = sst [smem:[#allocation17_spill]] %s12605_s11  ;;  %p182_p8 = scmp.eq.s32.totalorder %s11288_s30, 1 }
  0x12   : > { %s17872_s12 = scalar_select %p12607_p5, 1, 0 }
  0x13   : > { %s17873_s13 = scalar_select %p12613_p6, 1, 0 }
  0x14   : > { %p11289_p9 = scmp.ge.s32.totalorder %s12511_s29, 1  ;;  %p215_p10 = scmp.lt.s32.totalorder %s12511_s29, 3 }
  0x15   : > { %p12620_p11 = por %p176_p7, %p41_p0  ;;  %p12624_p12 = por %p182_p8, %p47_p3 }
  0x16   : > { %p12628_p13 = pnand %p11289_p9, %p215_p10  ;;  %s12513_s17 = smov [#allocation6]  }
  0x17   : > { %s17874_s14 = scalar_select %p12620_p11, 1, 0 }
  0x18   : > { %s17875_s15 = scalar_select %p12624_p12, 1, 0 }
  0x19   : > { %s17876_s16 = scalar_select %p12628_p13, 1, 0 }
  0x1a   : > { %p11924_p1 = pneg %p12628_p13  ;;  %s231_s18 = sshll.u32 %s12513_s17, 4  ;;  %s232_s18 = int_to_ptr.vmem [resolvable:$true] %s231_s18 }
  0x1b   : > { %s12514_s19 = smov [#allocation8]   ;;  %s12515_s22 = smov [#allocation9]  }
  0x1c   : > { %s242_s20 = sshll.u32 %s12514_s19, 4  ;;  %p12636_p0 = pnand %p11924_p1, %p17726_p4  ;;  %s12640_s20 = int_to_ptr.vmem [resolvable:$true] %s242_s20 }
  0x1d   : > { %s12642_s23 = sshll.u32 %s12515_s22, 4  ;;  %s12325_s30 = scalar_lea.hbm %s17720_s2, 16  ;;  %s257_s23 = int_to_ptr.vmem [resolvable:$true] %s12642_s23 }
  0x1e   : > { %p12326_p2 = scmp.ne.s32.totalorder %s17720_s2, %s12325_s30  ;;  %p12652_p3 = pneg %p12636_p0 }
  0x1f   : > { %p12332_p9 = scmp.lt.u32.totalorder %s12325_s30, %s17720_s2 }
  0x20   : > { %p12328_p7 = pnand %p12652_p3, %p12326_p2 }
  0x22   : > { %p12329_p8 = pneg %p12328_p7 }
  0x24   : > { %p12334_p10 = pnand %p12332_p9, %p12329_p8 }
  0x26   : > { %12337 = shalt.err (!%p12334_p10)
}
  0x27   : > { %s12338_s24 = scalar_lea.vmem %s232_s18, 16  ;;  %s12345_s25 = scalar_lea.vmem %s232_s18, 32 }
  0x28   : > { %p12339_p1 = scmp.ne.s32.totalorder %s232_s18, %s12338_s24  ;;  %p12346_p11 = scmp.lt.s32.totalorder %s232_s18, %s232_s18 }
  0x29   : > { %p12347_p6 = scmp.lt.s32.totalorder %s12345_s25, %s12338_s24 }
  0x2a   : > { %p12341_p4 = pnand %p12339_p1, %p12652_p3 }
  0x2b   : > { %p12348_p13 = por %p12347_p6, %p12346_p11 }
  0x2c   : > { %p12342_p12 = pneg %p12341_p4 }
  0x2e   : > { %p12349_p5 = pnand %p12348_p13, %p12342_p12 }
  0x30   : > { %12352 = shalt.err (!%p12349_p5)
}
  0x31   : > { %11927 = dma.hbm_to_vmem [thread:$0]  (!%p12636_p0), %s17720_s2, 16, %s232_s18, [#allocation7]  }
  0x32   : > { %s12353_s22 = scalar_lea.hbm %s17721_s3, 16 }
  0x33   : > { %p12354_p4 = scmp.ne.s32.totalorder %s17721_s3, %s12353_s22  ;;  %p12360_p5 = scmp.lt.u32.totalorder %s12353_s22, %s17721_s3 }
  0x35   : > { %p12356_p2 = pnand %p12354_p4, %p12652_p3 }
  0x37   : > { %p12357_p6 = pneg %p12356_p2 }
  0x39   : > { %p12362_p11 = pnand %p12360_p5, %p12357_p6 }
  0x3b   : > { %12365 = shalt.err (!%p12362_p11)
}
  0x3c   : > { %s12366_s18 = scalar_lea.vmem %s12640_s20, 16  ;;  %s12373_s8 = scalar_lea.vmem %s12640_s20, 32 }
  0x3d   : > { %p12367_p12 = scmp.ne.s32.totalorder %s12640_s20, %s12366_s18  ;;  %p12374_p8 = scmp.lt.s32.totalorder %s12640_s20, %s12640_s20 }
  0x3e   : > { %p12375_p9 = scmp.lt.s32.totalorder %s12373_s8, %s12366_s18 }
  0x3f   : > { %p12369_p13 = pnand %p12367_p12, %p12652_p3 }
  0x40   : > { %p12376_p10 = por %p12375_p9, %p12374_p8 }
  0x41   : > { %p12370_p7 = pneg %p12369_p13 }
  0x43   : > { %p12377_p1 = pnand %p12376_p10, %p12370_p7 }
  0x45   : > { %12380 = shalt.err (!%p12377_p1)
}
  0x46   : > { %11930 = dma.hbm_to_vmem [thread:$0]  (!%p12636_p0), %s17721_s3, 16, %s12640_s20, [#allocation7]  }
  0x47   : > { %s12381_s19 = scalar_lea.hbm %s17723_s5, 16 }
  0x48   : > { %p12382_p4 = scmp.ne.s32.totalorder %s17723_s5, %s12381_s19  ;;  %p12388_p5 = scmp.lt.u32.totalorder %s12381_s19, %s17723_s5 }
  0x4a   : > { %p12384_p2 = pnand %p12382_p4, %p12652_p3 }
  0x4c   : > { %p12385_p6 = pneg %p12384_p2 }
  0x4e   : > { %p12390_p11 = pnand %p12388_p5, %p12385_p6 }
  0x50   : > { %12393 = shalt.err (!%p12390_p11)
}
  0x51   : > { %s12394_s8 = scalar_lea.vmem %s257_s23, 16  ;;  %s12401_s20 = scalar_lea.vmem %s257_s23, 32 }
  0x52   : > { %p12395_p12 = scmp.ne.s32.totalorder %s257_s23, %s12394_s8  ;;  %p12402_p8 = scmp.lt.s32.totalorder %s257_s23, %s257_s23 }
  0x53   : > { %p12403_p9 = scmp.lt.s32.totalorder %s12401_s20, %s12394_s8 }
  0x54   : > { %p12397_p13 = pnand %p12395_p12, %p12652_p3 }
  0x55   : > { %p12404_p10 = por %p12403_p9, %p12402_p8 }
  0x56   : > { %p12398_p7 = pneg %p12397_p13 }
  0x58   : > { %p12405_p1 = pnand %p12404_p10, %p12398_p7 }
  0x5a   : > { %12408 = shalt.err (!%p12405_p1)
}
  0x5b   : > { %11933 = dma.hbm_to_vmem [thread:$0]  (!%p12636_p0), %s17723_s5, 16, %s257_s23, [#allocation10]  }
  0x5c   : > { %p11293_p4 = scmp.ge.s32.totalorder %s12511_s29, 2 }
  0x5d   : > { %p17879_p3 = scmp.ne.s32.totalorder (!%p11293_p4), %s17872_s12, 0 }
  0x5e   : > { %263 = sbr.rel (%p11293_p4) target bundleno = 137 (0x89), region = 36 }
  0x65   : > { %266 = sbr.rel (!%p17879_p3) target bundleno = 137 (0x89), region = 40  ;;  %s267_s17 = sand.u32 (%p17879_p3), 1, %s12507_s28  }
  0x66   : > { %s272_s10 = smul.u32 (%p17879_p3), 80, %s12511_s29  ;;  %s12721_s22 = scalar_lea.sflag (%p17879_p3), [#allocation4], %s267_s17 }
  0x67   : > { %s11906_s30 = smul.u32 (%p17879_p3), 3200, %s267_s17 }
  0x68   : > { %s273_s19 = ssub.s32 (%p17879_p3), 150, %s272_s10 }
  0x69   : > { %p274_p2 = scmp.lt.s32.totalorder (%p17879_p3), %s273_s19, 80  ;;  %s271_s24 = scalar_lea.vmem (%p17879_p3), [#allocation3], %s11906_s30 }
  0x6c   : > { %s18286_s19 = smov (!%p274_p2, %s273_s19), 80 }
  0x6d   : > { %s12718_s21 = smul.u32 640, %s18286_s19 }
  0x6f   : > { %s279_s23 = ssub.s32 51200, %s12718_s21 }
  0x70   : > { %280 = vsyncadd %s12721_s22, %s279_s23  ;;  %p11296_p0 = scmp.ne.s32.totalorder %s12718_s21, 0  ;;  %s11941_s12 = smul.u32 51200, %s12511_s29 }
  0x71   : > { %s286_s25 = sshll.u32 %s271_s24, 4  ;;  %s12413_s10 = scalar_lea.hbm %s17718_s0, 96000  ;;  %s12731_s25 = int_to_ptr.vmem [resolvable:$true] %s286_s25 }
  0x72   : > { %s12729_s20 = scalar_lea.hbm %s17718_s0, %s11941_s12 }
  0x73   : > { %s12409_s11 = scalar_lea.hbm %s12729_s20, %s12718_s21  ;;  %p12414_p12 = scmp.lt.u32.totalorder %s12729_s20, %s17718_s0 }
  0x74   : > { %p12410_p6 = scmp.ne.s32.totalorder %s12729_s20, %s12409_s11  ;;  %p12415_p13 = scmp.lt.u32.totalorder %s12413_s10, %s12409_s11 }
  0x75   : > { %p12417_p8 = scmp.lt.u32.totalorder %s12409_s11, %s12729_s20 }
  0x76   : > { %p12411_p5 = pnand %p12410_p6, %p11296_p0  ;;  %p12416_p7 = por %p12415_p13, %p12414_p12 }
  0x78   : > { %p12412_p11 = pneg %p12411_p5  ;;  %p12418_p9 = por %p12417_p8, %p12416_p7 }
  0x7a   : > { %p12419_p10 = pnand %p12418_p9, %p12412_p11 }
  0x7c   : > { %12422 = shalt.err (!%p12419_p10)
}
  0x7d   : > { %s12423_s23 = scalar_lea.vmem %s12731_s25, %s12718_s21  ;;  %s12516_s24 = smov [#allocation3]  }
  0x7e   : > { %p12424_p1 = scmp.ne.s32.totalorder %s12731_s25, %s12423_s23  ;;  %s12427_s12 = sshll.u32 %s12516_s24, 4  ;;  %s12428_s12 = int_to_ptr.vmem [resolvable:$false] %s12427_s12 }
  0x7f   : > { %s12429_s18 = scalar_lea.vmem %s12428_s12, 102400  ;;  %p12430_p6 = scmp.lt.s32.totalorder %s12731_s25, %s12428_s12 }
  0x80   : > { %p12425_p3 = pnand %p12424_p1, %p11296_p0  ;;  %p12431_p5 = scmp.lt.s32.totalorder %s12429_s18, %s12423_s23 }
  0x82   : > { %p12426_p2 = pneg %p12425_p3  ;;  %p12432_p12 = por %p12431_p5, %p12430_p6 }
  0x84   : > { %p12433_p13 = pnand %p12432_p12, %p12426_p2 }
  0x86   : > { %12436 = shalt.err (!%p12433_p13)
}
  0x87   : > { %s12517_s8 = smov 640   ;;  %s12518_s11 = smov 40  }
  0x88   : > { %292 = dma.hbm_to_vmem [thread:$0]  (%p11296_p0), %s12729_s20, %s12718_s21, %s12731_s25, %s12721_s22, %s12517_s8, %s12517_s8, %s12518_s11  }
  0x89 PF: > { %p17880_p11 = scmp.ne.s32.totalorder %s17876_s16, 0 }
  0x8b   : > { %298 = sbr.rel (%p17880_p11) target bundleno = 2054 (0x806), region = 44 }
  0x92   : > { %s12761_s9 = sand.u32 1, %s12503_s27   ;;  %p17881_p7 = scmp.ne.s32.totalorder %s17873_s13, 0 }
  0x93   : > { %s11908_s17 = smul.u32 3200, %s12761_s9  ;;  %s301_s10 = scalar_lea.sflag [#allocation4], %s12761_s9 }
  0x95   : > { %s12765_s30 = scalar_lea.vmem [#allocation3], %s11908_s17 }
  0x96   : > { %12482 = dma.done.wait (%p17881_p7), %s301_s10, 51200  }
  0x97   : > { %12484 = vsyncadd (%p17881_p7), %s301_s10, 4294916096  ;;  %p17882_p0 = scmp.eq.s32.totalorder %s12589_s4, 0 }
  0x99   : > { %12486 = dma.done.wait (%p17882_p0), [#allocation7], 32   ;;  %p17883_p8 = pmov %p17882_p0 }
  0x9a   : > { %p17884_p9 = pmov %p17882_p0 }
  0x9b   : > { %12488 = vsyncadd (%p17883_p8), [#allocation7], 4294967264 }
  0x9c   : > { %12490 = dma.done.wait (%p17884_p9), [#allocation10], 16   ;;  %p17885_p10 = pmov %p17882_p0 }
  0x9d   : > { %v768_v0 = vld [vmem:[%s17719_s1 + $0x8] sm:$0xff]  ;;  %v770_v1 = vld [vmem:[%s17719_s1 + $0x18] sm:$0xff]  ;;  %v767_v5 = vld [vmem:[%s17719_s1] sm:$0xff]  ;;  %vm2816_vm0 = vcmask 261120   ;;  %s11909_s20 = smul.u32 640, %s12761_s9  ;;  %vm10677_vm1 = vcmask 130112  }
  0x9e   : > { %12492 = vsyncadd (%p17885_p10), [#allocation10], 4294967280  ;;  %v832_v2 = vld [vmem:[%s17719_s1 + $0x208] sm:$0xff]  ;;  %v11394_v3 = vpack.c.bf16 %v770_v1, %v768_v0  ;;  %v834_v4 = vld [vmem:[%s17719_s1 + $0x218] sm:$0xff]  ;;  %vm10684_vm2 = vcmask 195712   ;;  %vm10691_vm3 = vcmask 261312  }
  0x9f   : > { %v769_v6 = vld [vmem:[%s17719_s1 + $0x10] sm:$0xff]  ;;  %v12797_v7 = vpack.c.bf16 %v834_v4, %v832_v2  ;;  %v831_v9 = vld [vmem:[%s17719_s1 + $0x200] sm:$0xff]  ;;  %v772_v11 = vld [vmem:[%s17719_s1 + $0x28] sm:$0xff]  ;;  %s14387_s19 = scalar_lea.vmem [#allocation11], %s11909_s20  ;;  %vm10698_vm4 = vcmask 326912   ;;  %vm10705_vm5 = vcmask 392512  }
  0xa0   : > { %v11396_v8 = vpack.c.bf16 %v769_v6, %v767_v5  ;;  %v833_v10 = vld [vmem:[%s17719_s1 + $0x210] sm:$0xff]  ;;  %11395 = vmatprep.subr.bf16.mxu1 %v11394_v3  ;;  %v774_v13 = vld [vmem:[%s17719_s1 + $0x38] sm:$0xff]  ;;  %v836_v14 = vld [vmem:[%s17719_s1 + $0x228] sm:$0xff]  ;;  %vm10712_vm6 = vcmask 458112   ;;  %vm10719_vm7 = vcmask 523712   ;;  %vm10726_vm8 = vcmask 589312  }
  0xa1   : > { %v12808_v12 = vpack.c.bf16 %v833_v10, %v831_v9  ;;  %v838_v15 = vld [vmem:[%s17719_s1 + $0x238] sm:$0xff]  ;;  %11459 = vmatprep.subr.bf16.mxu0 %v12797_v7  ;;  %v11398_v16 = vpack.c.bf16 %v774_v13, %v772_v11  ;;  %v771_v18 = vld [vmem:[%s17719_s1 + $0x20] sm:$0xff]  ;;  %v773_v19 = vld [vmem:[%s17719_s1 + $0x30] sm:$0xff]  ;;  %vm10733_vm9 = vcmask 654912   ;;  %vm10740_vm10 = vcmask 720512   ;;  %s362_s23 = smul.u32 5, %s12589_s4 }
  0xa2   : > { %11397 = vmatpush1.bf16.msra.mxu1 %v11396_v8  ;;  %v12820_v17 = vpack.c.bf16 %v838_v15, %v836_v14  ;;  %v835_v20 = vld [vmem:[%s17719_s1 + $0x220] sm:$0xff]  ;;  %v11400_v21 = vpack.c.bf16 %v773_v19, %v771_v18  ;;  %v837_v22 = vld [vmem:[%s17719_s1 + $0x230] sm:$0xff]  ;;  %v776_v23 = vld [vmem:[%s17719_s1 + $0x48] sm:$0xff]  ;;  %vm10747_vm11 = vcmask 786112   ;;  %vm10754_vm12 = vcmask 851712   ;;  %s11139_s8 = scalar_lea.sflag [#allocation5], %s12761_s9 }
  0xa3   : > { %11461 = vmatpush1.bf16.msra.mxu0 %v12808_v12  ;;  %v778_v24 = vld [vmem:[%s17719_s1 + $0x58] sm:$0xff]  ;;  %11399 = vmatprep.subr.bf16.mxu1 %v11398_v16  ;;  %v12842_v25 = vpack.c.bf16 %v837_v22, %v835_v20  ;;  %v840_v27 = vld [vmem:[%s17719_s1 + $0x248] sm:$0xff]  ;;  %v775_v29 = vld [vmem:[%s17719_s1 + $0x40] sm:$0xff]  ;;  %vm10761_vm13 = vcmask 917312   ;;  %vm10768_vm14 = vcmask 982912   ;;  %vm10775_vm15 = vcmask 1048512  }
  0xa4   : > { %11463 = vmatprep.subr.bf16.mxu0 %v12820_v17  ;;  %v11402_v26 = vpack.c.bf16 %v778_v24, %v776_v23  ;;  %v842_v28 = vld [vmem:[%s17719_s1 + $0x258] sm:$0xff]  ;;  %v777_v31 = vld [vmem:[%s17719_s1 + $0x50] sm:$0xff]  ;;  %v839_v32 = vld [vmem:[%s17719_s1 + $0x240] sm:$0xff]  ;;  %p363_p1 = scmp.lt.s32.totalorder %s362_s23, 9  ;;  %p18278_p3 = scmp.ne.s32.totalorder %s17874_s14, 0 }
  0xa5   : > { %v12853_v30 = vpack.c.bf16 %v842_v28, %v840_v27  ;;  %v841_v33 = vld [vmem:[%s17719_s1 + $0x250] sm:$0xff]  ;;  %v11404_v34 = vpack.c.bf16 %v777_v31, %v775_v29  ;;  %v780_v35 = vld [vmem:[%s17719_s1 + $0x68] sm:$0xff]  ;;  %v782_v36 = vld [vmem:[%s17719_s1 + $0x78] sm:$0xff]  ;;  %s11150_s11 = smul.u32 (%p18278_p3), 80, %s12589_s4 }
  0xa6   : > { %11401 = vmatpush1.bf16.msra.mxu1 %v11400_v21  ;;  %v844_v37 = vld [vmem:[%s17719_s1 + $0x268] sm:$0xff]  ;;  %v12874_v38 = vpack.c.bf16 %v841_v33, %v839_v32  ;;  %v11406_v39 = vpack.c.bf16 %v782_v36, %v780_v35  ;;  %v846_v40 = vld [vmem:[%s17719_s1 + $0x278] sm:$0xff]  ;;  %v779_v41 = vld [vmem:[%s17719_s1 + $0x60] sm:$0xff]  ;;  %s18288_s23 = smov (!%p363_p1, %s362_s23), 9 }
  0xa7   : > { %11465 = vmatpush1.bf16.msra.mxu0 %v12842_v25  ;;  %11403 = vmatprep.subr.bf16.mxu1 %v11402_v26  ;;  %v781_v42 = vld [vmem:[%s17719_s1 + $0x70] sm:$0xff]  ;;  %v12886_v43 = vpack.c.bf16 %v846_v40, %v844_v37  ;;  %v843_v44 = vld [vmem:[%s17719_s1 + $0x260] sm:$0xff]  ;;  %v784_v46 = vld [vmem:[%s17719_s1 + $0x88] sm:$0xff]  ;;  %s365_s18 = scalar_lea.vmem %s17725_s7, %s18288_s23  ;;  %s11151_s17 = ssub.s32 (%p18278_p3), 150, %s11150_s11 }
  0xa8   : > { %11467 = vmatprep.subr.bf16.mxu0 %v12853_v30  ;;  %v845_v45 = vld [vmem:[%s17719_s1 + $0x270] sm:$0xff]  ;;  %v786_v47 = vld [vmem:[%s17719_s1 + $0x98] sm:$0xff]  ;;  %v848_v48 = vld [vmem:[%s17719_s1 + $0x288] sm:$0xff]  ;;  %v11408_v50 = vpack.c.bf16 %v781_v42, %v779_v41  ;;  %p11152_p2 = scmp.lt.s32.totalorder (%p18278_p3), %s11151_s17, 80 }
  0xa9   : > { %v850_v49 = vld [vmem:[%s17719_s1 + $0x298] sm:$0xff]  ;;  %v12907_v51 = vpack.c.bf16 %v845_v45, %v843_v44  ;;  %v11410_v52 = vpack.c.bf16 %v786_v47, %v784_v46  ;;  %v783_v53 = vld [vmem:[%s17719_s1 + $0x80] sm:$0xff]  ;;  %v785_v54 = vld [vmem:[%s17719_s1 + $0x90] sm:$0xff] }
  0xaa   : > { %11405 = vmatpush1.bf16.msra.mxu1 %v11404_v34  ;;  %v847_v55 = vld [vmem:[%s17719_s1 + $0x280] sm:$0xff]  ;;  %v12919_v56 = vpack.c.bf16 %v850_v49, %v848_v48  ;;  %v849_v57 = vld [vmem:[%s17719_s1 + $0x290] sm:$0xff]  ;;  %v788_v58 = vld [vmem:[%s17719_s1 + $0xa8] sm:$0xff]  ;;  %v11412_v62 = vpack.c.bf16 %v785_v54, %v783_v53 }
  0xab   : > { %11469 = vmatpush1.bf16.msra.mxu0 %v12874_v38  ;;  %11407 = vmatprep.subr.bf16.mxu1 %v11406_v39  ;;  %v790_v59 = vld [vmem:[%s17719_s1 + $0xb8] sm:$0xff]  ;;  %v852_v60 = vld [vmem:[%s17719_s1 + $0x2a8] sm:$0xff]  ;;  %v12937_v63 = vpack.c.bf16 %v849_v57, %v847_v55  ;;  %v787_v1 = vld [vmem:[%s17719_s1 + $0xa0] sm:$0xff] }
  0xac   : > { %11471 = vmatprep.subr.bf16.mxu0 %v12886_v43  ;;  %v854_v61 = vld [vmem:[%s17719_s1 + $0x2b8] sm:$0xff]  ;;  %v11414_v0 = vpack.c.bf16 %v790_v59, %v788_v58  ;;  %v789_v2 = vld [vmem:[%s17719_s1 + $0xb0] sm:$0xff]  ;;  %v851_v3 = vld [vmem:[%s17719_s1 + $0x2a0] sm:$0xff] }
  0xad   : > { %v12949_v4 = vpack.c.bf16 %v854_v61, %v852_v60  ;;  %v853_v5 = vld [vmem:[%s17719_s1 + $0x2b0] sm:$0xff]  ;;  %v792_v6 = vld [vmem:[%s17719_s1 + $0xc8] sm:$0xff]  ;;  %v794_v8 = vld [vmem:[%s17719_s1 + $0xd8] sm:$0xff]  ;;  %v11416_v11 = vpack.c.bf16 %v789_v2, %v787_v1 }
  0xae   : > { %11409 = vmatpush1.bf16.msra.mxu1 %v11408_v50  ;;  %v856_v9 = vld [vmem:[%s17719_s1 + $0x2c8] sm:$0xff]  ;;  %v858_v10 = vld [vmem:[%s17719_s1 + $0x2d8] sm:$0xff]  ;;  %v12967_v13 = vpack.c.bf16 %v853_v5, %v851_v3  ;;  %v11418_v14 = vpack.c.bf16 %v794_v8, %v792_v6  ;;  %v791_v15 = vld [vmem:[%s17719_s1 + $0xc0] sm:$0xff] }
  0xaf   : > { %11473 = vmatpush1.bf16.msra.mxu0 %v12907_v51  ;;  %11411 = vmatprep.subr.bf16.mxu1 %v11410_v52  ;;  %v793_v16 = vld [vmem:[%s17719_s1 + $0xd0] sm:$0xff]  ;;  %v855_v18 = vld [vmem:[%s17719_s1 + $0x2c0] sm:$0xff]  ;;  %v12979_v19 = vpack.c.bf16 %v858_v10, %v856_v9  ;;  %v796_v21 = vld [vmem:[%s17719_s1 + $0xe8] sm:$0xff] }
  0xb0   : > { %11475 = vmatprep.subr.bf16.mxu0 %v12919_v56  ;;  %v857_v20 = vld [vmem:[%s17719_s1 + $0x2d0] sm:$0xff]  ;;  %v798_v22 = vld [vmem:[%s17719_s1 + $0xf8] sm:$0xff]  ;;  %v860_v23 = vld [vmem:[%s17719_s1 + $0x2e8] sm:$0xff]  ;;  %v11420_v26 = vpack.c.bf16 %v793_v16, %v791_v15 }
  0xb1   : > { %v862_v24 = vld [vmem:[%s17719_s1 + $0x2f8] sm:$0xff]  ;;  %v12997_v27 = vpack.c.bf16 %v857_v20, %v855_v18  ;;  %v11422_v28 = vpack.c.bf16 %v798_v22, %v796_v21  ;;  %v795_v29 = vld [vmem:[%s17719_s1 + $0xe0] sm:$0xff]  ;;  %v797_v31 = vld [vmem:[%s17719_s1 + $0xf0] sm:$0xff] }
  0xb2   : > { %11413 = vmatpush1.bf16.msra.mxu1 %v11412_v62  ;;  %v859_v32 = vld [vmem:[%s17719_s1 + $0x2e0] sm:$0xff]  ;;  %v13009_v33 = vpack.c.bf16 %v862_v24, %v860_v23  ;;  %v861_v34 = vld [vmem:[%s17719_s1 + $0x2f0] sm:$0xff]  ;;  %v800_v35 = vld [vmem:[%s17719_s1 + $0x108] sm:$0xff]  ;;  %v11424_v40 = vpack.c.bf16 %v797_v31, %v795_v29 }
  0xb3   : > { %11477 = vmatpush1.bf16.msra.mxu0 %v12937_v63  ;;  %11415 = vmatprep.subr.bf16.mxu1 %v11414_v0  ;;  %v802_v36 = vld [vmem:[%s17719_s1 + $0x118] sm:$0xff]  ;;  %v864_v37 = vld [vmem:[%s17719_s1 + $0x308] sm:$0xff]  ;;  %v13027_v41 = vpack.c.bf16 %v861_v34, %v859_v32  ;;  %v799_v44 = vld [vmem:[%s17719_s1 + $0x100] sm:$0xff] }
  0xb4   : > { %11479 = vmatprep.subr.bf16.mxu0 %v12949_v4  ;;  %v866_v39 = vld [vmem:[%s17719_s1 + $0x318] sm:$0xff]  ;;  %v11426_v42 = vpack.c.bf16 %v802_v36, %v800_v35  ;;  %v801_v45 = vld [vmem:[%s17719_s1 + $0x110] sm:$0xff]  ;;  %v863_v46 = vld [vmem:[%s17719_s1 + $0x300] sm:$0xff] }
  0xb5   : > { %v13039_v47 = vpack.c.bf16 %v866_v39, %v864_v37  ;;  %v865_v48 = vld [vmem:[%s17719_s1 + $0x310] sm:$0xff]  ;;  %v804_v49 = vld [vmem:[%s17719_s1 + $0x128] sm:$0xff]  ;;  %v806_v50 = vld [vmem:[%s17719_s1 + $0x138] sm:$0xff]  ;;  %v11428_v54 = vpack.c.bf16 %v801_v45, %v799_v44 }
  0xb6   : > { %11417 = vmatpush1.bf16.msra.mxu1 %v11416_v11  ;;  %v868_v52 = vld [vmem:[%s17719_s1 + $0x328] sm:$0xff]  ;;  %v870_v53 = vld [vmem:[%s17719_s1 + $0x338] sm:$0xff]  ;;  %v13057_v55 = vpack.c.bf16 %v865_v48, %v863_v46  ;;  %v11430_v57 = vpack.c.bf16 %v806_v50, %v804_v49  ;;  %v803_v58 = vld [vmem:[%s17719_s1 + $0x120] sm:$0xff] }
  0xb7   : > { %11481 = vmatpush1.bf16.msra.mxu0 %v12967_v13  ;;  %11419 = vmatprep.subr.bf16.mxu1 %v11418_v14  ;;  %v805_v59 = vld [vmem:[%s17719_s1 + $0x130] sm:$0xff]  ;;  %v867_v60 = vld [vmem:[%s17719_s1 + $0x320] sm:$0xff]  ;;  %v13069_v61 = vpack.c.bf16 %v870_v53, %v868_v52  ;;  %v808_v0 = vld [vmem:[%s17719_s1 + $0x148] sm:$0xff] }
  0xb8   : > { %11483 = vmatprep.subr.bf16.mxu0 %v12979_v19  ;;  %v869_v62 = vld [vmem:[%s17719_s1 + $0x330] sm:$0xff]  ;;  %v810_v1 = vld [vmem:[%s17719_s1 + $0x158] sm:$0xff]  ;;  %v872_v2 = vld [vmem:[%s17719_s1 + $0x348] sm:$0xff]  ;;  %v11432_v5 = vpack.c.bf16 %v805_v59, %v803_v58 }
  0xb9   : > { %v874_v3 = vld [vmem:[%s17719_s1 + $0x358] sm:$0xff]  ;;  %v13087_v6 = vpack.c.bf16 %v869_v62, %v867_v60  ;;  %v11434_v8 = vpack.c.bf16 %v810_v1, %v808_v0  ;;  %v807_v9 = vld [vmem:[%s17719_s1 + $0x140] sm:$0xff]  ;;  %v809_v10 = vld [vmem:[%s17719_s1 + $0x150] sm:$0xff] }
  0xba   : > { %11421 = vmatpush1.bf16.msra.mxu1 %v11420_v26  ;;  %v871_v11 = vld [vmem:[%s17719_s1 + $0x340] sm:$0xff]  ;;  %v13099_v14 = vpack.c.bf16 %v874_v3, %v872_v2  ;;  %v873_v15 = vld [vmem:[%s17719_s1 + $0x350] sm:$0xff]  ;;  %v812_v16 = vld [vmem:[%s17719_s1 + $0x168] sm:$0xff]  ;;  %v11436_v22 = vpack.c.bf16 %v809_v10, %v807_v9 }
  0xbb   : > { %11485 = vmatpush1.bf16.msra.mxu0 %v12997_v27  ;;  %11423 = vmatprep.subr.bf16.mxu1 %v11422_v28  ;;  %v814_v18 = vld [vmem:[%s17719_s1 + $0x178] sm:$0xff]  ;;  %v876_v20 = vld [vmem:[%s17719_s1 + $0x368] sm:$0xff]  ;;  %v811_v23 = vld [vmem:[%s17719_s1 + $0x160] sm:$0xff]  ;;  %v13120_v24 = vpack.c.bf16 %v873_v15, %v871_v11 }
  0xbc   : > { %11487 = vmatprep.subr.bf16.mxu0 %v13009_v33  ;;  %v878_v21 = vld [vmem:[%s17719_s1 + $0x378] sm:$0xff]  ;;  %v11438_v26 = vpack.c.bf16 %v814_v18, %v812_v16  ;;  %v813_v28 = vld [vmem:[%s17719_s1 + $0x170] sm:$0xff]  ;;  %v875_v29 = vld [vmem:[%s17719_s1 + $0x360] sm:$0xff] }
  0xbd   : > { %v877_v31 = vld [vmem:[%s17719_s1 + $0x370] sm:$0xff]  ;;  %v13132_v32 = vpack.c.bf16 %v878_v21, %v876_v20  ;;  %v816_v34 = vld [vmem:[%s17719_s1 + $0x188] sm:$0xff]  ;;  %v818_v35 = vld [vmem:[%s17719_s1 + $0x198] sm:$0xff] }
  0xbe   : > { %11425 = vmatpush1.bf16.msra.mxu1 %v11424_v40  ;;  %v368_v36 = vld [vmem:[%s12765_s30 + $0x8] sm:$0xff]  ;;  %v882_v39 = vld [vmem:[%s17719_s1 + $0x398] sm:$0xff]  ;;  %v13149_v44 = vpack.c.bf16 %v877_v31, %v875_v29  ;;  %v11442_v45 = vpack.c.bf16 %v818_v35, %v816_v34  ;;  %v815_v46 = vld [vmem:[%s17719_s1 + $0x180] sm:$0xff] }
  0xbf   : > { %11489 = vmatpush1.bf16.msra.mxu0 %v13027_v41  ;;  %11427 = vmatprep.subr.bf16.mxu1 %v11426_v42  ;;  %v880_v37 = vld [vmem:[%s17719_s1 + $0x388] sm:$0xff]  ;;  %v370_v40 = vld [vmem:[%s12765_s30 + $0x18] sm:$0xff]  ;;  %v11440_v42 = vpack.c.bf16 %v813_v28, %v811_v23  ;;  %v817_v48 = vld [vmem:[%s17719_s1 + $0x190] sm:$0xff] }
  0xc0   : > { %11491 = vmatprep.subr.bf16.mxu0 %v13039_v47  ;;  %991 = vmatprep.mubr.f32.mxu1 %v368_v36  ;;  %v879_v49 = vld [vmem:[%s17719_s1 + $0x380] sm:$0xff]  ;;  %v13161_v50 = vpack.c.bf16 %v882_v39, %v880_v37  ;;  %v881_v52 = vld [vmem:[%s17719_s1 + $0x390] sm:$0xff]  ;;  %v820_v53 = vld [vmem:[%s17719_s1 + $0x1a8] sm:$0xff]  ;;  %v11444_v59 = vpack.c.bf16 %v817_v48, %v815_v46 }
  0xc1   : > { %1536 = vmatprep.mubr.f32.mxu0 %v370_v40  ;;  %v886_v58 = vld [vmem:[%s17719_s1 + $0x3b8] sm:$0xff]  ;;  %v13179_v60 = vpack.c.bf16 %v881_v52, %v879_v49  ;;  %v819_v0 = vld [vmem:[%s17719_s1 + $0x1a0] sm:$0xff]  ;;  %v821_v1 = vld [vmem:[%s17719_s1 + $0x1b0] sm:$0xff] }
  0xc2   : > { %11429 = vmatpush1.bf16.msra.mxu1 %v11428_v54  ;;  %v822_v54 = vld [vmem:[%s17719_s1 + $0x1b8] sm:$0xff]  ;;  %v883_v2 = vld [vmem:[%s17719_s1 + $0x3a0] sm:$0xff]  ;;  %v888_v10 = vld [vmem:[%s17719_s1 + $0x3c8] sm:$0xff]  ;;  %v11448_v15 = vpack.c.bf16 %v821_v1, %v819_v0 }
  0xc3   : > { %11493 = vmatpush1.bf16.msra.mxu0 %v13057_v55  ;;  %11431 = vmatprep.subr.bf16.mxu1 %v11430_v57  ;;  %v884_v57 = vld [vmem:[%s17719_s1 + $0x3a8] sm:$0xff]  ;;  %v11446_v62 = vpack.c.bf16 %v822_v54, %v820_v53  ;;  %v826_v9 = vld [vmem:[%s17719_s1 + $0x1d8] sm:$0xff]  ;;  %v823_v20 = vld [vmem:[%s17719_s1 + $0x1c0] sm:$0xff] }
  0xc4   : > { %11495 = vmatprep.subr.bf16.mxu0 %v13069_v61  ;;  %v13191_v3 = vpack.c.bf16 %v886_v58, %v884_v57  ;;  %v890_v11 = vld [vmem:[%s17719_s1 + $0x3d8] sm:$0xff]  ;;  %v825_v21 = vld [vmem:[%s17719_s1 + $0x1d0] sm:$0xff]  ;;  %v828_v28 = vld [vmem:[%s17719_s1 + $0x1e8] sm:$0xff] }
  0xc5   : > { %v13221_v23 = vpack.c.bf16 %v890_v11, %v888_v10  ;;  %v830_v29 = vld [vmem:[%s17719_s1 + $0x1f8] sm:$0xff]  ;;  %v892_v31 = vld [vmem:[%s17719_s1 + $0x3e8] sm:$0xff]  ;;  %v11452_v35 = vpack.c.bf16 %v825_v21, %v823_v20  ;;  %v827_v39 = vld [vmem:[%s17719_s1 + $0x1e0] sm:$0xff] }
  0xc6   : > { %11433 = vmatpush1.bf16.msra.mxu1 %v11432_v5  ;;  %v885_v5 = vld [vmem:[%s17719_s1 + $0x3b0] sm:$0xff]  ;;  %v894_v34 = vld [vmem:[%s17719_s1 + $0x3f8] sm:$0xff]  ;;  %v11454_v37 = vpack.c.bf16 %v830_v29, %v828_v28  ;;  %v896_v48 = vld [vmem:[%s17719_s1 + $0x408] sm:$0xff] }
  0xc7   : > { %11497 = vmatpush1.bf16.msra.mxu0 %v13087_v6  ;;  %11435 = vmatprep.subr.bf16.mxu1 %v11434_v8  ;;  %v824_v8 = vld [vmem:[%s17719_s1 + $0x1c8] sm:$0xff]  ;;  %v13209_v16 = vpack.c.bf16 %v885_v5, %v883_v2  ;;  %v829_v40 = vld [vmem:[%s17719_s1 + $0x1f0] sm:$0xff]  ;;  %v898_v49 = vld [vmem:[%s17719_s1 + $0x418] sm:$0xff] }
  0xc8   : > { %11499 = vmatprep.subr.bf16.mxu0 %v13099_v14  ;;  %v11450_v18 = vpack.c.bf16 %v826_v9, %v824_v8  ;;  %v893_v46 = vld [vmem:[%s17719_s1 + $0x3f0] sm:$0xff]  ;;  %v11456_v52 = vpack.c.bf16 %v829_v40, %v827_v39  ;;  %v11522_v54 = vpack.c.bf16 %v898_v49, %v896_v48  ;;  %v895_v57 = vld [vmem:[%s17719_s1 + $0x400] sm:$0xff]  ;;  %v902_v0 = vld [vmem:[%s17719_s1 + $0x438] sm:$0xff] }
  0xc9   : > { %v897_v58 = vld [vmem:[%s17719_s1 + $0x410] sm:$0xff]  ;;  %v375_v8 = vld [vmem:[%s12765_s30 + $0x40] sm:$0xff]  ;;  %v374_v20 = vld [vmem:[%s12765_s30 + $0x38] sm:$0xff] }
  0xca   : > { %11437 = vmatpush1.bf16.msra.mxu1 %v11436_v22  ;;  %v887_v22 = vld [vmem:[%s17719_s1 + $0x3c0] sm:$0xff]  ;;  %v369_v1 = vld [vmem:[%s12765_s30 + $0x10] sm:$0xff]  ;;  %v11524_v2 = vpack.c.bf16 %v897_v58, %v895_v57  ;;  %v378_v21 = vld [vmem:[%s12765_s30 + $0x58] sm:$0xff] }
  0xcb   : > { %11501 = vmatpush1.bf16.msra.mxu0 %v13120_v24  ;;  %11439 = vmatprep.subr.bf16.mxu1 %v11438_v26  ;;  %v889_v26 = vld [vmem:[%s17719_s1 + $0x3d0] sm:$0xff]  ;;  %v899_v10 = vld [vmem:[%s17719_s1 + $0x420] sm:$0xff]  ;;  %v914_v49 = vld [vmem:[%s17719_s1 + $0x498] sm:$0xff] }
  0xcc   : > { %11503 = vmatprep.subr.bf16.mxu0 %v13132_v32  ;;  %v13239_v36 = vpack.c.bf16 %v889_v26, %v887_v22  ;;  %v373_v5 = vld [vmem:[%s12765_s30 + $0x30] sm:$0xff]  ;;  %v380_v22 = vld [vmem:[%s12765_s30 + $0x68] sm:$0xff]  ;;  %v903_v28 = vld [vmem:[%s17719_s1 + $0x440] sm:$0xff] }
  0xcd   : > { %v901_v11 = vld [vmem:[%s17719_s1 + $0x430] sm:$0xff]  ;;  %v390_v57 = vld [vmem:[%s12765_s30 + $0xb8] sm:$0xff] }
  0xce   : > { %11441 = vmatpush1.bf16.msra.mxu1 %v11440_v42  ;;  %v13248_v42 = vpack.c.bf16 %v894_v34, %v892_v31  ;;  %v905_v29 = vld [vmem:[%s17719_s1 + $0x450] sm:$0xff]  ;;  %v910_v34 = vld [vmem:[%s17719_s1 + $0x478] sm:$0xff] }
  0xcf   : > { %11505 = vmatpush1.bf16.msra.mxu0 %v13149_v44  ;;  %11443 = vmatprep.subr.bf16.mxu1 %v11442_v45  ;;  %v891_v45 = vld [vmem:[%s17719_s1 + $0x3e0] sm:$0xff]  ;;  %v377_v31 = vld [vmem:[%s12765_s30 + $0x50] sm:$0xff]  ;;  %v11532_v40 = vpack.c.bf16 %v905_v29, %v903_v28  ;;  %v922_v28 = vld [vmem:[%s17719_s1 + $0x4d8] sm:$0xff] }
  0xd0   : > { %11507 = vmatprep.subr.bf16.mxu0 %v13161_v50  ;;  %v13263_v53 = vpack.c.bf16 %v893_v46, %v891_v45  ;;  %v385_v39 = vld [vmem:[%s12765_s30 + $0x90] sm:$0xff]  ;;  %v907_v46 = vld [vmem:[%s17719_s1 + $0x460] sm:$0xff]  ;;  %v408_v29 = vld [vmem:[%s12765_s30 + $0x148] sm:$0xff] }
  0xd1   : > { %v909_v48 = vld [vmem:[%s17719_s1 + $0x470] sm:$0xff] }
  0xd2   : > { %11445 = vmatpush1.bf16.msra.mxu1 %v11444_v59  ;;  %v367_v59 = vld [vmem:[%s12765_s30] sm:$0xff]  ;;  %v11536_v58 = vpack.c.bf16 %v909_v48, %v907_v46  ;;  %v926_v46 = vld [vmem:[%s17719_s1 + $0x4f8] sm:$0xff] }
  0xd3   : > { %11509 = vmatpush1.bf16.msra.mxu0 %v13179_v60  ;;  %11447 = vmatprep.subr.bf16.mxu1 %v11446_v62  ;;  %v900_v62 = vld [vmem:[%s17719_s1 + $0x428] sm:$0xff]  ;;  %v414_v48 = vld [vmem:[%s12765_s30 + $0x178] sm:$0xff] }
  0xd4   : > { %11511 = vmatprep.subr.bf16.mxu0 %v13191_v3  ;;  %v11526_v9 = vpack.c.bf16 %v902_v0, %v900_v62  ;;  %v911_v62 = vld [vmem:[%s17719_s1 + $0x480] sm:$0xff]  ;;  %v913_v0 = vld [vmem:[%s17719_s1 + $0x490] sm:$0xff] }
  0xd6   : > { %11449 = vmatpush1.bf16.msra.mxu1 %v11448_v15  ;;  %v904_v15 = vld [vmem:[%s17719_s1 + $0x448] sm:$0xff] }
  0xd7   : > { %11513 = vmatpush1.bf16.msra.mxu0 %v13209_v16  ;;  %11451 = vmatprep.subr.bf16.mxu1 %v11450_v18  ;;  %v906_v18 = vld [vmem:[%s17719_s1 + $0x458] sm:$0xff] }
  0xd8   : > { %11515 = vmatprep.subr.bf16.mxu0 %v13221_v23  ;;  %v11530_v26 = vpack.c.bf16 %v906_v18, %v904_v15  ;;  %v917_v15 = vld [vmem:[%s17719_s1 + $0x4b0] sm:$0xff]  ;;  %v400_v18 = vld [vmem:[%s12765_s30 + $0x108] sm:$0xff] }
  0xda   : > { %11453 = vmatpush1.bf16.msra.mxu1 %v11452_v35  ;;  %v379_v35 = vld [vmem:[%s12765_s30 + $0x60] sm:$0xff] }
  0xdb   : > { %11517 = vmatpush1.bf16.msra.mxu0 %v13239_v36  ;;  %11455 = vmatprep.subr.bf16.mxu1 %v11454_v37  ;;  %v383_v37 = vld [vmem:[%s12765_s30 + $0x80] sm:$0xff] }
  0xdc   : > { %11519 = vmatprep.subr.bf16.mxu0 %v13248_v42 }
  0xde   : > { %11457 = vmatpush1.bf16.msra.mxu1 %v11456_v52  ;;  %v384_v52 = vld [vmem:[%s12765_s30 + $0x88] sm:$0xff] }
  0xdf   : > { %11521 = vmatpush1.bf16.msra.mxu0 %v13263_v53  ;;  %11554 = vmatprep.subr.bf16.mxu1 %v12797_v7  ;;  %v372_v7 = vld [vmem:[%s12765_s30 + $0x28] sm:$0xff] }
  0xe0   : > { %11523 = vmatprep.subr.bf16.mxu0 %v11522_v54  ;;  %v388_v54 = vld [vmem:[%s12765_s30 + $0xa8] sm:$0xff] }
  0xe1   : > { %992 = vmatmul.mubr.f32.vlgmr.msra.gmra.mrb[0].mxu1 %v367_v59 }
  0xe2   : > { %1537 = vmatmul.mubr.f32.vlgmr.msra.gmra.mrb[0].mxu0 %v369_v1  ;;  %11570 = vmatpush1.bf16.msra.mxu1 %v12808_v12  ;;  %v11528_v12 = vpack.c.bf16 %v901_v11, %v899_v10  ;;  %v389_v1 = vld [vmem:[%s12765_s30 + $0xb0] sm:$0xff]  ;;  %v918_v10 = vld [vmem:[%s17719_s1 + $0x4b8] sm:$0xff] }
  0xe3   : > { %11525 = vmatpush1.bf16.msra.mxu0 %v11524_v2  ;;  %997 = vmatprep.mubr.f32.mxu1 %v373_v5  ;;  %v395_v2 = vld [vmem:[%s12765_s30 + $0xe0] sm:$0xff]  ;;  %v11540_v5 = vpack.c.bf16 %v913_v0, %v911_v62  ;;  %v398_v11 = vld [vmem:[%s12765_s30 + $0xf8] sm:$0xff]  ;;  %v424_v62 = vld [vmem:[%s12765_s30 + $0x1c8] sm:$0xff] }
  0xe4   : > { %1542 = vmatprep.mubr.f32.mxu0 %v375_v8  ;;  %11555 = vmatprep.subr.bf16.mxu1 %v12820_v17  ;;  %v908_v17 = vld [vmem:[%s17719_s1 + $0x468] sm:$0xff] }
  0xe5   : > { %998 = vmatmul.mubr.f32.gmra.mrb[2].mxu1 %v372_v7  ;;  %11527 = vmatprep.subr.bf16.mxu0 %v11526_v9  ;;  %v11534_v45 = vpack.c.bf16 %v910_v34, %v908_v17  ;;  %v392_v8 = vld [vmem:[%s12765_s30 + $0xc8] sm:$0xff]  ;;  %v921_v17 = vld [vmem:[%s17719_s1 + $0x4d0] sm:$0xff]  ;;  %v410_v34 = vld [vmem:[%s12765_s30 + $0x158] sm:$0xff] }
  0xe6   : > { %1543 = vmatmul.mubr.f32.gmra.mrb[2].mxu0 %v374_v20  ;;  %1003 = vmatprep.mubr.f32.mxu1 %v378_v21  ;;  %v916_v9 = vld [vmem:[%s17719_s1 + $0x4a8] sm:$0xff]  ;;  %v397_v21 = vld [vmem:[%s12765_s30 + $0xf0] sm:$0xff] }
  0xe7   : > { %1548 = vmatprep.mubr.f32.mxu0 %v380_v22  ;;  %11571 = vmatpush1.bf16.msra.mxu1 %v12842_v25  ;;  %v382_v25 = vld [vmem:[%s12765_s30 + $0x78] sm:$0xff]  ;;  %v11542_v7 = vpack.c.bf16 %v918_v10, %v916_v9  ;;  %v403_v22 = vld [vmem:[%s12765_s30 + $0x120] sm:$0xff]  ;;  %v428_v0 = vld [vmem:[%s12765_s30 + $0x1e8] sm:$0xff] }
  0xe8   : > { %11529 = vmatpush1.bf16.msra.mxu0 %v11528_v12  ;;  %11556 = vmatprep.subr.bf16.mxu1 %v12853_v30  ;;  %v912_v30 = vld [vmem:[%s17719_s1 + $0x488] sm:$0xff]  ;;  %v405_v12 = vld [vmem:[%s12765_s30 + $0x130] sm:$0xff]  ;;  %v443_v9 = vld [vmem:[%s12765_s30 + $0x260] sm:$0xff] }
  0xe9   : > { %1004 = vmatmul.mubr.f32.gmra.mrb[4].mxu1 %v377_v31  ;;  %11531 = vmatprep.subr.bf16.mxu0 %v11530_v26  ;;  %v11538_v59 = vpack.c.bf16 %v914_v49, %v912_v30  ;;  %v920_v26 = vld [vmem:[%s17719_s1 + $0x4c8] sm:$0xff]  ;;  %v925_v30 = vld [vmem:[%s17719_s1 + $0x4f0] sm:$0xff] }
  0xea   : > { %1549 = vmatmul.mubr.f32.gmra.mrb[4].mxu0 %v379_v35  ;;  %1009 = vmatprep.mubr.f32.mxu1 %v383_v37  ;;  %v11546_v31 = vpack.c.bf16 %v922_v28, %v920_v26  ;;  %v407_v37 = vld [vmem:[%s12765_s30 + $0x140] sm:$0xff]  ;;  %v420_v49 = vld [vmem:[%s12765_s30 + $0x1a8] sm:$0xff]  ;;  %v445_v10 = vld [vmem:[%s12765_s30 + $0x270] sm:$0xff] }
  0xeb   : > { %1554 = vmatprep.mubr.f32.mxu0 %v385_v39  ;;  %11572 = vmatpush1.bf16.msra.mxu1 %v12874_v38  ;;  %v387_v38 = vld [vmem:[%s12765_s30 + $0xa0] sm:$0xff]  ;;  %v409_v39 = vld [vmem:[%s12765_s30 + $0x150] sm:$0xff] }
  0xec   : > { %11533 = vmatpush1.bf16.msra.mxu0 %v11532_v40  ;;  %11557 = vmatprep.subr.bf16.mxu1 %v12886_v43  ;;  %v393_v43 = vld [vmem:[%s12765_s30 + $0xd0] sm:$0xff] }
  0xed   : > { %1010 = vmatmul.mubr.f32.gmra.mrb[6].mxu1 %v382_v25  ;;  %11535 = vmatprep.subr.bf16.mxu0 %v11534_v45  ;;  %v413_v40 = vld [vmem:[%s12765_s30 + $0x170] sm:$0xff]  ;;  %v412_v45 = vld [vmem:[%s12765_s30 + $0x168] sm:$0xff] }
  0xee   : > { %1555 = vmatmul.mubr.f32.gmra.mrb[6].mxu0 %v384_v52  ;;  %1015 = vmatprep.mubr.f32.mxu1 %v388_v54  ;;  %v417_v54 = vld [vmem:[%s12765_s30 + $0x190] sm:$0xff] }
  0xef   : > { %1560 = vmatprep.mubr.f32.mxu0 %v390_v57  ;;  %11573 = vmatpush1.bf16.msra.mxu1 %v12907_v51  ;;  %v915_v51 = vld [vmem:[%s17719_s1 + $0x4a0] sm:$0xff]  ;;  %v469_v26 = vld [vmem:[%s12765_s30 + $0x330] sm:$0xff] }
  0xf0   : > { %11537 = vmatpush1.bf16.msra.mxu0 %v11536_v58  ;;  %11558 = vmatprep.subr.bf16.mxu1 %v12919_v56  ;;  %v394_v56 = vld [vmem:[%s12765_s30 + $0xd8] sm:$0xff]  ;;  %v11544_v20 = vpack.c.bf16 %v917_v15, %v915_v51  ;;  %v419_v57 = vld [vmem:[%s12765_s30 + $0x1a0] sm:$0xff]  ;;  %v448_v51 = vld [vmem:[%s12765_s30 + $0x288] sm:$0xff] }
  0xf1   : > { %1016 = vmatmul.mubr.f32.gmra.mrb[8].mxu1 %v387_v38  ;;  %11539 = vmatprep.subr.bf16.mxu0 %v11538_v59  ;;  %v423_v58 = vld [vmem:[%s12765_s30 + $0x1c0] sm:$0xff]  ;;  %v425_v59 = vld [vmem:[%s12765_s30 + $0x1d0] sm:$0xff]  ;;  %v430_v38 = vld [vmem:[%s12765_s30 + $0x1f8] sm:$0xff] }
  0xf2   : > { %1561 = vmatmul.mubr.f32.gmra.mrb[8].mxu0 %v389_v1  ;;  %1021 = vmatprep.mubr.f32.mxu1 %v393_v43  ;;  %v429_v1 = vld [vmem:[%s12765_s30 + $0x1f0] sm:$0xff]  ;;  %v458_v15 = vld [vmem:[%s12765_s30 + $0x2d8] sm:$0xff] }
  0xf3   : > { %1566 = vmatprep.mubr.f32.mxu0 %v395_v2  ;;  %11574 = vmatpush1.bf16.msra.mxu1 %v12937_v63  ;;  %v399_v63 = vld [vmem:[%s12765_s30 + $0x100] sm:$0xff]  ;;  %v433_v43 = vld [vmem:[%s12765_s30 + $0x210] sm:$0xff] }
  0xf4   : > { %11541 = vmatpush1.bf16.msra.mxu0 %v11540_v5  ;;  %11559 = vmatprep.subr.bf16.mxu1 %v12949_v4  ;;  %v402_v4 = vld [vmem:[%s12765_s30 + $0x118] sm:$0xff]  ;;  %v435_v2 = vld [vmem:[%s12765_s30 + $0x220] sm:$0xff]  ;;  %v473_v28 = vld [vmem:[%s12765_s30 + $0x350] sm:$0xff] }
  0xf5   : > { %1022 = vmatmul.mubr.f32.gmra.mrb[10].mxu1 %v392_v8  ;;  %11543 = vmatprep.subr.bf16.mxu0 %v11542_v7  ;;  %v438_v5 = vld [vmem:[%s12765_s30 + $0x238] sm:$0xff]  ;;  %v440_v8 = vld [vmem:[%s12765_s30 + $0x248] sm:$0xff]  ;;  %v455_v7 = vld [vmem:[%s12765_s30 + $0x2c0] sm:$0xff] }
  0xf6   : > { %1567 = vmatmul.mubr.f32.gmra.mrb[10].mxu0 %v394_v56  ;;  %1027 = vmatprep.mubr.f32.mxu1 %v398_v11  ;;  %v450_v56 = vld [vmem:[%s12765_s30 + $0x298] sm:$0xff]  ;;  %v453_v11 = vld [vmem:[%s12765_s30 + $0x2b0] sm:$0xff] }
  0xf7   : > { %1572 = vmatprep.mubr.f32.mxu0 %v400_v18  ;;  %11575 = vmatpush1.bf16.msra.mxu1 %v12967_v13  ;;  %v919_v13 = vld [vmem:[%s17719_s1 + $0x4c0] sm:$0xff]  ;;  %v460_v18 = vld [vmem:[%s12765_s30 + $0x2e8] sm:$0xff] }
  0xf8   : > { %11545 = vmatpush1.bf16.msra.mxu0 %v11544_v20  ;;  %11560 = vmatprep.subr.bf16.mxu1 %v12979_v19  ;;  %v404_v19 = vld [vmem:[%s12765_s30 + $0x128] sm:$0xff]  ;;  %v11548_v35 = vpack.c.bf16 %v921_v17, %v919_v13  ;;  %v463_v20 = vld [vmem:[%s12765_s30 + $0x300] sm:$0xff] }
  0xf9   : > { %1028 = vmatmul.mubr.f32.gmra.mrb[12].mxu1 %v397_v21  ;;  %11547 = vmatprep.subr.bf16.mxu0 %v11546_v31  ;;  %v465_v21 = vld [vmem:[%s12765_s30 + $0x310] sm:$0xff]  ;;  %v475_v13 = vld [vmem:[%s12765_s30 + $0x360] sm:$0xff]  ;;  %v478_v31 = vld [vmem:[%s12765_s30 + $0x378] sm:$0xff] }
  0xfa   : > { %1573 = vmatmul.mubr.f32.gmra.mrb[12].mxu0 %v399_v63  ;;  %1033 = vmatprep.mubr.f32.mxu1 %v403_v22  ;;  %v462_v63 = vld [vmem:[%s12765_s30 + $0x2f8] sm:$0xff]  ;;  %v468_v22 = vld [vmem:[%s12765_s30 + $0x328] sm:$0xff] }
  0xfb   : > { %1578 = vmatprep.mubr.f32.mxu0 %v405_v12  ;;  %11576 = vmatpush1.bf16.msra.mxu1 %v12997_v27  ;;  %v415_v27 = vld [vmem:[%s12765_s30 + $0x180] sm:$0xff]  ;;  %v470_v12 = vld [vmem:[%s12765_s30 + $0x338] sm:$0xff]  ;;  %v480_v17 = vld [vmem:[%s12765_s30 + $0x388] sm:$0xff] }
  0xfc   : > { %11561 = vmatprep.subr.bf16.mxu1 %v13009_v33  ;;  %11549 = vmatpush1.bf16.msra.mxu0 %v11548_v35  ;;  %v924_v33 = vld [vmem:[%s17719_s1 + $0x4e8] sm:$0xff]  ;;  %v479_v35 = vld [vmem:[%s12765_s30 + $0x380] sm:$0xff] }
  0xfd   : > { %1034 = vmatmul.mubr.f32.gmra.mrb[14].mxu1 %v402_v4  ;;  %v11550_v25 = vpack.c.bf16 %v926_v46, %v924_v33  ;;  %v467_v4 = vld [vmem:[%s12765_s30 + $0x320] sm:$0xff]  ;;  %v490_v33 = vld [vmem:[%s12765_s30 + $0x3d8] sm:$0xff] }
  0xfe   : > { %1579 = vmatmul.mubr.f32.gmra.mrb[14].mxu0 %v404_v19  ;;  %1039 = vmatprep.mubr.f32.mxu1 %v408_v29  ;;  %v472_v19 = vld [vmem:[%s12765_s30 + $0x348] sm:$0xff]  ;;  %v474_v29 = vld [vmem:[%s12765_s30 + $0x358] sm:$0xff]  ;;  %v487_v46 = vld [vmem:[%s12765_s30 + $0x3c0] sm:$0xff] }
  0xff   : > { %1584 = vmatprep.mubr.f32.mxu0 %v410_v34  ;;  %11577 = vmatpush1.bf16.msra.mxu1 %v13027_v41  ;;  %v923_v41 = vld [vmem:[%s17719_s1 + $0x4e0] sm:$0xff]  ;;  %v477_v34 = vld [vmem:[%s12765_s30 + $0x370] sm:$0xff] }
 0x100   : > { %11562 = vmatprep.subr.bf16.mxu1 %v13039_v47  ;;  %v418_v47 = vld [vmem:[%s12765_s30 + $0x198] sm:$0xff]  ;;  %v11552_v52 = vpack.c.bf16 %v925_v30, %v923_v41  ;;  %11551 = vmatprep.subr.bf16.mxu0 %v11550_v25  ;;  %v489_v41 = vld [vmem:[%s12765_s30 + $0x3d0] sm:$0xff]  ;;  %v492_v25 = vld [vmem:[%s12765_s30 + $0x3e8] sm:$0xff] }
 0x101   : > { %1040 = vmatmul.mubr.f32.gmra.mrb[16].mxu1 %v407_v37  ;;  %v483_v37 = vld [vmem:[%s12765_s30 + $0x3a0] sm:$0xff]  ;;  %v494_v30 = vld [vmem:[%s12765_s30 + $0x3f8] sm:$0xff] }
 0x102   : > { %1585 = vmatmul.mubr.f32.gmra.mrb[16].mxu0 %v409_v39  ;;  %1045 = vmatprep.mubr.f32.mxu1 %v413_v40  ;;  %v485_v39 = vld [vmem:[%s12765_s30 + $0x3b0] sm:$0xff]  ;;  %v482_v40 = vld [vmem:[%s12765_s30 + $0x398] sm:$0xff] }
 0x103   : > { %1590 = vmatprep.mubr.f32.mxu0 %v415_v27  ;;  %11578 = vmatpush1.bf16.msra.mxu1 %v13057_v55  ;;  %v422_v55 = vld [vmem:[%s12765_s30 + $0x1b8] sm:$0xff]  ;;  %v484_v27 = vld [vmem:[%s12765_s30 + $0x3a8] sm:$0xff] }
 0x104   : > { %11553 = vmatpush1.bf16.msra.mxu0 %v11552_v52  ;;  %11563 = vmatprep.subr.bf16.mxu1 %v13069_v61  ;;  %v427_v61 = vld [vmem:[%s12765_s30 + $0x1e0] sm:$0xff]  ;;  %v500_v52 = vld [vmem:[%s12765_s30 + $0x428] sm:$0xff] }
 0x105   : > { %1046 = vmatmul.mubr.f32.gmra.mrb[18].mxu1 %v412_v45  ;;  %v488_v45 = vld [vmem:[%s12765_s30 + $0x3c8] sm:$0xff] }
 0x106   : > { %1591 = vmatmul.mubr.f32.gmra.mrb[18].mxu0 %v414_v48  ;;  %1051 = vmatprep.mubr.f32.mxu1 %v418_v47  ;;  %v493_v48 = vld [vmem:[%s12765_s30 + $0x3f0] sm:$0xff]  ;;  %v495_v47 = vld [vmem:[%s12765_s30 + $0x400] sm:$0xff] }
 0x107   : > { %1596 = vmatprep.mubr.f32.mxu0 %v420_v49  ;;  %11579 = vmatpush1.bf16.msra.mxu1 %v13087_v6  ;;  %v432_v6 = vld [vmem:[%s12765_s30 + $0x208] sm:$0xff]  ;;  %v498_v49 = vld [vmem:[%s12765_s30 + $0x418] sm:$0xff] }
 0x108   : > { %11564 = vmatprep.subr.bf16.mxu1 %v13099_v14  ;;  %v434_v14 = vld [vmem:[%s12765_s30 + $0x218] sm:$0xff] }
 0x109   : > { %1052 = vmatmul.mubr.f32.gmra.mrb[20].mxu1 %v417_v54  ;;  %v497_v54 = vld [vmem:[%s12765_s30 + $0x410] sm:$0xff] }
 0x10a   : > { %1597 = vmatmul.mubr.f32.gmra.mrb[20].mxu0 %v419_v57  ;;  %1057 = vmatprep.mubr.f32.mxu1 %v423_v58  ;;  %v499_v57 = vld [vmem:[%s12765_s30 + $0x420] sm:$0xff] }
 0x10b   : > { %1602 = vmatprep.mubr.f32.mxu0 %v425_v59  ;;  %11580 = vmatpush1.bf16.msra.mxu1 %v13120_v24  ;;  %v437_v24 = vld [vmem:[%s12765_s30 + $0x230] sm:$0xff]  ;;  %v503_v58 = vld [vmem:[%s12765_s30 + $0x440] sm:$0xff] }
 0x10c   : > { %11565 = vmatprep.subr.bf16.mxu1 %v13132_v32  ;;  %v439_v32 = vld [vmem:[%s12765_s30 + $0x240] sm:$0xff]  ;;  %v505_v59 = vld [vmem:[%s12765_s30 + $0x450] sm:$0xff] }
 0x10d   : > { %1058 = vmatmul.mubr.f32.gmra.mrb[22].mxu1 %v422_v55  ;;  %v502_v55 = vld [vmem:[%s12765_s30 + $0x438] sm:$0xff] }
 0x10e   : > { %1603 = vmatmul.mubr.f32.gmra.mrb[22].mxu0 %v424_v62  ;;  %1063 = vmatprep.mubr.f32.mxu1 %v428_v0  ;;  %v504_v62 = vld [vmem:[%s12765_s30 + $0x448] sm:$0xff] }
 0x10f   : > { %1608 = vmatprep.mubr.f32.mxu0 %v430_v38  ;;  %11581 = vmatpush1.bf16.msra.mxu1 %v13149_v44  ;;  %v442_v44 = vld [vmem:[%s12765_s30 + $0x258] sm:$0xff]  ;;  %v508_v0 = vld [vmem:[%s12765_s30 + $0x468] sm:$0xff] }
 0x110   : > { %11566 = vmatprep.subr.bf16.mxu1 %v13161_v50  ;;  %v444_v50 = vld [vmem:[%s12765_s30 + $0x268] sm:$0xff]  ;;  %v510_v38 = vld [vmem:[%s12765_s30 + $0x478] sm:$0xff] }
 0x111   : > { %1064 = vmatmul.mubr.f32.gmra.mrb[24].mxu1 %v427_v61  ;;  %v507_v61 = vld [vmem:[%s12765_s30 + $0x460] sm:$0xff] }
 0x112   : > { %1609 = vmatmul.mubr.f32.gmra.mrb[24].mxu0 %v429_v1  ;;  %1069 = vmatprep.mubr.f32.mxu1 %v433_v43  ;;  %v509_v1 = vld [vmem:[%s12765_s30 + $0x470] sm:$0xff] }
 0x113   : > { %1614 = vmatprep.mubr.f32.mxu0 %v435_v2  ;;  %11582 = vmatpush1.bf16.msra.mxu1 %v13179_v60  ;;  %v447_v60 = vld [vmem:[%s12765_s30 + $0x280] sm:$0xff]  ;;  %v513_v43 = vld [vmem:[%s12765_s30 + $0x490] sm:$0xff] }
 0x114   : > { %11567 = vmatprep.subr.bf16.mxu1 %v13191_v3  ;;  %v449_v3 = vld [vmem:[%s12765_s30 + $0x290] sm:$0xff]  ;;  %v515_v2 = vld [vmem:[%s12765_s30 + $0x4a0] sm:$0xff] }
 0x115   : > { %1070 = vmatmul.mubr.f32.gmra.mrb[26].mxu1 %v432_v6  ;;  %v512_v6 = vld [vmem:[%s12765_s30 + $0x488] sm:$0xff] }
 0x116   : > { %1615 = vmatmul.mubr.f32.gmra.mrb[26].mxu0 %v434_v14  ;;  %1075 = vmatprep.mubr.f32.mxu1 %v438_v5  ;;  %v514_v14 = vld [vmem:[%s12765_s30 + $0x498] sm:$0xff] }
 0x117   : > { %1620 = vmatprep.mubr.f32.mxu0 %v440_v8  ;;  %11583 = vmatpush1.bf16.msra.mxu1 %v13209_v16  ;;  %v452_v16 = vld [vmem:[%s12765_s30 + $0x2a8] sm:$0xff]  ;;  %v518_v5 = vld [vmem:[%s12765_s30 + $0x4b8] sm:$0xff] }
 0x118   : > { %11568 = vmatprep.subr.bf16.mxu1 %v13221_v23  ;;  %v454_v23 = vld [vmem:[%s12765_s30 + $0x2b8] sm:$0xff]  ;;  %v520_v8 = vld [vmem:[%s12765_s30 + $0x4c8] sm:$0xff] }
 0x119   : > { %1076 = vmatmul.mubr.f32.gmra.mrb[28].mxu1 %v437_v24  ;;  %v517_v24 = vld [vmem:[%s12765_s30 + $0x4b0] sm:$0xff] }
 0x11a   : > { %1621 = vmatmul.mubr.f32.gmra.mrb[28].mxu0 %v439_v32  ;;  %1081 = vmatprep.mubr.f32.mxu1 %v443_v9  ;;  %v519_v32 = vld [vmem:[%s12765_s30 + $0x4c0] sm:$0xff] }
 0x11b   : > { %1626 = vmatprep.mubr.f32.mxu0 %v445_v10  ;;  %11584 = vmatpush1.bf16.msra.mxu1 %v13239_v36  ;;  %v457_v36 = vld [vmem:[%s12765_s30 + $0x2d0] sm:$0xff]  ;;  %v523_v9 = vld [vmem:[%s12765_s30 + $0x4e0] sm:$0xff] }
 0x11c   : > { %11569 = vmatprep.subr.bf16.mxu1 %v13248_v42  ;;  %v459_v42 = vld [vmem:[%s12765_s30 + $0x2e0] sm:$0xff]  ;;  %v525_v10 = vld [vmem:[%s12765_s30 + $0x4f0] sm:$0xff] }
 0x11d   : > { %1082 = vmatmul.mubr.f32.gmra.mrb[30].mxu1 %v442_v44  ;;  %v522_v44 = vld [vmem:[%s12765_s30 + $0x4d8] sm:$0xff] }
 0x11e   : > { %1627 = vmatmul.mubr.f32.gmra.mrb[30].mxu0 %v444_v50  ;;  %1087 = vmatprep.mubr.f32.mxu1 %v448_v51  ;;  %v524_v50 = vld [vmem:[%s12765_s30 + $0x4e8] sm:$0xff] }
 0x11f   : > { %1632 = vmatprep.mubr.f32.mxu0 %v450_v56  ;;  %11585 = vmatpush1.bf16.msra.mxu1 %v13263_v53  ;;  %v464_v53 = vld [vmem:[%s12765_s30 + $0x308] sm:$0xff]  ;;  %v530_v56 = vld [vmem:[%s12765_s30 + $0x518] sm:$0xff] }
 0x120   : > { %v528_v51 = vld [vmem:[%s12765_s30 + $0x508] sm:$0xff] }
 0x121   : > { %1088 = vmatmul.mubr.f32.gmra.mrb[32].mxu1 %v447_v60  ;;  %v527_v60 = vld [vmem:[%s12765_s30 + $0x500] sm:$0xff] }
 0x122   : > { %1633 = vmatmul.mubr.f32.gmra.mrb[32].mxu0 %v449_v3  ;;  %1093 = vmatprep.mubr.f32.mxu1 %v453_v11  ;;  %v529_v3 = vld [vmem:[%s12765_s30 + $0x510] sm:$0xff] }
 0x123   : > { %1638 = vmatprep.mubr.f32.mxu0 %v455_v7  ;;  %v533_v11 = vld [vmem:[%s12765_s30 + $0x530] sm:$0xff]  ;;  %v535_v7 = vld [vmem:[%s12765_s30 + $0x540] sm:$0xff] }
 0x125   : > { %1094 = vmatmul.mubr.f32.gmra.mrb[34].mxu1 %v452_v16  ;;  %v532_v16 = vld [vmem:[%s12765_s30 + $0x528] sm:$0xff] }
 0x126   : > { %1639 = vmatmul.mubr.f32.gmra.mrb[34].mxu0 %v454_v23  ;;  %1099 = vmatprep.mubr.f32.mxu1 %v458_v15  ;;  %v534_v23 = vld [vmem:[%s12765_s30 + $0x538] sm:$0xff] }
 0x127   : > { %1644 = vmatprep.mubr.f32.mxu0 %v460_v18  ;;  %v538_v15 = vld [vmem:[%s12765_s30 + $0x558] sm:$0xff]  ;;  %v540_v18 = vld [vmem:[%s12765_s30 + $0x568] sm:$0xff] }
 0x129   : > { %1100 = vmatmul.mubr.f32.gmra.mrb[36].mxu1 %v457_v36  ;;  %v537_v36 = vld [vmem:[%s12765_s30 + $0x550] sm:$0xff] }
 0x12a   : > { %1645 = vmatmul.mubr.f32.gmra.mrb[36].mxu0 %v459_v42  ;;  %1105 = vmatprep.mubr.f32.mxu1 %v463_v20  ;;  %v539_v42 = vld [vmem:[%s12765_s30 + $0x560] sm:$0xff] }
 0x12b   : > { %1650 = vmatprep.mubr.f32.mxu0 %v465_v21  ;;  %v543_v20 = vld [vmem:[%s12765_s30 + $0x580] sm:$0xff]  ;;  %v545_v21 = vld [vmem:[%s12765_s30 + $0x590] sm:$0xff] }
 0x12d   : > { %1106 = vmatmul.mubr.f32.gmra.mrb[38].mxu1 %v462_v63  ;;  %v542_v63 = vld [vmem:[%s12765_s30 + $0x578] sm:$0xff] }
 0x12e   : > { %1651 = vmatmul.mubr.f32.gmra.mrb[38].mxu0 %v464_v53  ;;  %1111 = vmatprep.mubr.f32.mxu1 %v468_v22  ;;  %v544_v53 = vld [vmem:[%s12765_s30 + $0x588] sm:$0xff] }
 0x12f   : > { %1656 = vmatprep.mubr.f32.mxu0 %v470_v12  ;;  %v548_v22 = vld [vmem:[%s12765_s30 + $0x5a8] sm:$0xff]  ;;  %v550_v12 = vld [vmem:[%s12765_s30 + $0x5b8] sm:$0xff] }
 0x131   : > { %1112 = vmatmul.mubr.f32.gmra.mrb[40].mxu1 %v467_v4  ;;  %v547_v4 = vld [vmem:[%s12765_s30 + $0x5a0] sm:$0xff] }
 0x132   : > { %1657 = vmatmul.mubr.f32.gmra.mrb[40].mxu0 %v469_v26  ;;  %1117 = vmatprep.mubr.f32.mxu1 %v473_v28  ;;  %v549_v26 = vld [vmem:[%s12765_s30 + $0x5b0] sm:$0xff] }
 0x133   : > { %1662 = vmatprep.mubr.f32.mxu0 %v475_v13  ;;  %v553_v28 = vld [vmem:[%s12765_s30 + $0x5d0] sm:$0xff]  ;;  %v555_v13 = vld [vmem:[%s12765_s30 + $0x5e0] sm:$0xff] }
 0x135   : > { %1118 = vmatmul.mubr.f32.gmra.mrb[42].mxu1 %v472_v19  ;;  %v552_v19 = vld [vmem:[%s12765_s30 + $0x5c8] sm:$0xff] }
 0x136   : > { %1663 = vmatmul.mubr.f32.gmra.mrb[42].mxu0 %v474_v29  ;;  %1123 = vmatprep.mubr.f32.mxu1 %v478_v31  ;;  %v554_v29 = vld [vmem:[%s12765_s30 + $0x5d8] sm:$0xff] }
 0x137   : > { %1668 = vmatprep.mubr.f32.mxu0 %v480_v17  ;;  %v558_v31 = vld [vmem:[%s12765_s30 + $0x5f8] sm:$0xff]  ;;  %v560_v17 = vld [vmem:[%s12765_s30 + $0x608] sm:$0xff] }
 0x139   : > { %1124 = vmatmul.mubr.f32.gmra.mrb[44].mxu1 %v477_v34  ;;  %v557_v34 = vld [vmem:[%s12765_s30 + $0x5f0] sm:$0xff] }
 0x13a   : > { %1669 = vmatmul.mubr.f32.gmra.mrb[44].mxu0 %v479_v35  ;;  %1129 = vmatprep.mubr.f32.mxu1 %v483_v37  ;;  %v559_v35 = vld [vmem:[%s12765_s30 + $0x600] sm:$0xff] }
 0x13b   : > { %1674 = vmatprep.mubr.f32.mxu0 %v485_v39  ;;  %v563_v37 = vld [vmem:[%s12765_s30 + $0x620] sm:$0xff]  ;;  %v565_v39 = vld [vmem:[%s12765_s30 + $0x630] sm:$0xff] }
 0x13d   : > { %1130 = vmatmul.mubr.f32.gmra.mrb[46].mxu1 %v482_v40  ;;  %v562_v40 = vld [vmem:[%s12765_s30 + $0x618] sm:$0xff] }
 0x13e   : > { %1675 = vmatmul.mubr.f32.gmra.mrb[46].mxu0 %v484_v27  ;;  %1135 = vmatprep.mubr.f32.mxu1 %v488_v45  ;;  %v564_v27 = vld [vmem:[%s12765_s30 + $0x628] sm:$0xff] }
 0x13f   : > { %1680 = vmatprep.mubr.f32.mxu0 %v490_v33  ;;  %v568_v45 = vld [vmem:[%s12765_s30 + $0x648] sm:$0xff]  ;;  %v567_v33 = vld [vmem:[%s12765_s30 + $0x640] sm:$0xff] }
 0x141   : > { %1136 = vmatmul.mubr.f32.gmra.mrb[48].mxu1 %v487_v46  ;;  %v17731_v46 = vmov 0.0  }
 0x142   : > { %1681 = vmatmul.mubr.f32.gmra.mrb[48].mxu0 %v489_v41  ;;  %1141 = vmatprep.mubr.f32.mxu1 %v493_v48  ;;  %v371_v41 = vld [vmem:[%s12765_s30 + $0x20] sm:$0xff]  ;;  %v573_v48 = vld [vmem:[%s12765_s30 + $0x670] sm:$0xff] }
 0x143   : > { %1686 = vmatprep.mubr.f32.mxu0 %v495_v47  ;;  %v572_v47 = vld [vmem:[%s12765_s30 + $0x668] sm:$0xff] }
 0x145   : > { %1142 = vmatmul.mubr.f32.gmra.mrb[50].mxu1 %v492_v25  ;;  %v376_v25 = vld [vmem:[%s12765_s30 + $0x48] sm:$0xff] }
 0x146   : > { %1687 = vmatmul.mubr.f32.gmra.mrb[50].mxu0 %v494_v30  ;;  %1147 = vmatprep.mubr.f32.mxu1 %v498_v49  ;;  %v578_v30 = vld [vmem:[%s12765_s30 + $0x698] sm:$0xff]  ;;  %v577_v49 = vld [vmem:[%s12765_s30 + $0x690] sm:$0xff] }
 0x147   : > { %1692 = vmatprep.mubr.f32.mxu0 %v500_v52  ;;  %v381_v52 = vld [vmem:[%s12765_s30 + $0x70] sm:$0xff] }
 0x149   : > { %1148 = vmatmul.mubr.f32.gmra.mrb[52].mxu1 %v497_v54  ;;  %v583_v54 = vld [vmem:[%s12765_s30 + $0x6c0] sm:$0xff] }
 0x14a   : > { %1693 = vmatmul.mubr.f32.gmra.mrb[52].mxu0 %v499_v57  ;;  %1153 = vmatprep.mubr.f32.mxu1 %v503_v58  ;;  %v582_v57 = vld [vmem:[%s12765_s30 + $0x6b8] sm:$0xff] }
 0x14b   : > { %1698 = vmatprep.mubr.f32.mxu0 %v505_v59  ;;  %v386_v58 = vld [vmem:[%s12765_s30 + $0x98] sm:$0xff]  ;;  %v588_v59 = vld [vmem:[%s12765_s30 + $0x6e8] sm:$0xff] }
 0x14d   : > { %1154 = vmatmul.mubr.f32.gmra.mrb[54].mxu1 %v502_v55  ;;  %v587_v55 = vld [vmem:[%s12765_s30 + $0x6e0] sm:$0xff] }
 0x14e   : > { %1699 = vmatmul.mubr.f32.gmra.mrb[54].mxu0 %v504_v62  ;;  %1159 = vmatprep.mubr.f32.mxu1 %v508_v0  ;;  %v391_v62 = vld [vmem:[%s12765_s30 + $0xc0] sm:$0xff]  ;;  %v593_v0 = vld [vmem:[%s12765_s30 + $0x710] sm:$0xff] }
 0x14f   : > { %1704 = vmatprep.mubr.f32.mxu0 %v510_v38  ;;  %v592_v38 = vld [vmem:[%s12765_s30 + $0x708] sm:$0xff] }
 0x151   : > { %1160 = vmatmul.mubr.f32.gmra.mrb[56].mxu1 %v507_v61  ;;  %v396_v61 = vld [vmem:[%s12765_s30 + $0xe8] sm:$0xff] }
 0x152   : > { %1705 = vmatmul.mubr.f32.gmra.mrb[56].mxu0 %v509_v1  ;;  %1165 = vmatprep.mubr.f32.mxu1 %v513_v43  ;;  %v598_v1 = vld [vmem:[%s12765_s30 + $0x738] sm:$0xff]  ;;  %v597_v43 = vld [vmem:[%s12765_s30 + $0x730] sm:$0xff] }
 0x153   : > { %1710 = vmatprep.mubr.f32.mxu0 %v515_v2  ;;  %v401_v2 = vld [vmem:[%s12765_s30 + $0x110] sm:$0xff] }
 0x155   : > { %1166 = vmatmul.mubr.f32.gmra.mrb[58].mxu1 %v512_v6  ;;  %v603_v6 = vld [vmem:[%s12765_s30 + $0x760] sm:$0xff] }
 0x156   : > { %1711 = vmatmul.mubr.f32.gmra.mrb[58].mxu0 %v514_v14  ;;  %1171 = vmatprep.mubr.f32.mxu1 %v518_v5  ;;  %v602_v14 = vld [vmem:[%s12765_s30 + $0x758] sm:$0xff] }
 0x157   : > { %1716 = vmatprep.mubr.f32.mxu0 %v520_v8  ;;  %v406_v5 = vld [vmem:[%s12765_s30 + $0x138] sm:$0xff]  ;;  %v608_v8 = vld [vmem:[%s12765_s30 + $0x788] sm:$0xff] }
 0x159   : > { %1172 = vmatmul.mubr.f32.gmra.mrb[60].mxu1 %v517_v24  ;;  %v607_v24 = vld [vmem:[%s12765_s30 + $0x780] sm:$0xff] }
 0x15a   : > { %1717 = vmatmul.mubr.f32.gmra.mrb[60].mxu0 %v519_v32  ;;  %1177 = vmatprep.mubr.f32.mxu1 %v523_v9  ;;  %v411_v32 = vld [vmem:[%s12765_s30 + $0x160] sm:$0xff]  ;;  %v613_v9 = vld [vmem:[%s12765_s30 + $0x7b0] sm:$0xff] }
 0x15b   : > { %1722 = vmatprep.mubr.f32.mxu0 %v525_v10  ;;  %v612_v10 = vld [vmem:[%s12765_s30 + $0x7a8] sm:$0xff] }
 0x15d   : > { %1178 = vmatmul.mubr.f32.gmra.mrb[62].mxu1 %v522_v44  ;;  %v416_v44 = vld [vmem:[%s12765_s30 + $0x188] sm:$0xff] }
 0x15e   : > { %1723 = vmatmul.mubr.f32.gmra.mrb[62].mxu0 %v524_v50  ;;  %1183 = vmatprep.mubr.f32.mxu1 %v528_v51  ;;  %v618_v50 = vld [vmem:[%s12765_s30 + $0x7d8] sm:$0xff]  ;;  %v617_v51 = vld [vmem:[%s12765_s30 + $0x7d0] sm:$0xff] }
 0x15f   : > { %1728 = vmatprep.mubr.f32.mxu0 %v530_v56  ;;  %v421_v56 = vld [vmem:[%s12765_s30 + $0x1b0] sm:$0xff] }
 0x161   : > { %1184 = vmatmul.mubr.f32.gmra.mrb[64].mxu1 %v527_v60  ;;  %v623_v60 = vld [vmem:[%s12765_s30 + $0x800] sm:$0xff] }
 0x162   : > { %1729 = vmatmul.mubr.f32.gmra.mrb[64].mxu0 %v529_v3  ;;  %1189 = vmatprep.mubr.f32.mxu1 %v533_v11  ;;  %v622_v3 = vld [vmem:[%s12765_s30 + $0x7f8] sm:$0xff] }
 0x163   : > { %1734 = vmatprep.mubr.f32.mxu0 %v535_v7  ;;  %v426_v11 = vld [vmem:[%s12765_s30 + $0x1d8] sm:$0xff]  ;;  %v628_v7 = vld [vmem:[%s12765_s30 + $0x828] sm:$0xff] }
 0x165   : > { %1190 = vmatmul.mubr.f32.gmra.mrb[66].mxu1 %v532_v16  ;;  %v627_v16 = vld [vmem:[%s12765_s30 + $0x820] sm:$0xff] }
 0x166   : > { %1735 = vmatmul.mubr.f32.gmra.mrb[66].mxu0 %v534_v23  ;;  %1195 = vmatprep.mubr.f32.mxu1 %v538_v15  ;;  %v431_v23 = vld [vmem:[%s12765_s30 + $0x200] sm:$0xff]  ;;  %v633_v15 = vld [vmem:[%s12765_s30 + $0x850] sm:$0xff] }
 0x167   : > { %1740 = vmatprep.mubr.f32.mxu0 %v540_v18  ;;  %v632_v18 = vld [vmem:[%s12765_s30 + $0x848] sm:$0xff] }
 0x169   : > { %1196 = vmatmul.mubr.f32.gmra.mrb[68].mxu1 %v537_v36  ;;  %v436_v36 = vld [vmem:[%s12765_s30 + $0x228] sm:$0xff] }
 0x16a   : > { %1741 = vmatmul.mubr.f32.gmra.mrb[68].mxu0 %v539_v42  ;;  %1201 = vmatprep.mubr.f32.mxu1 %v543_v20  ;;  %v638_v42 = vld [vmem:[%s12765_s30 + $0x878] sm:$0xff] }
 0x16b   : > { %1746 = vmatprep.mubr.f32.mxu0 %v545_v21 }
 0x16d   : > { %1202 = vmatmul.mubr.f32.gmra.mrb[70].mxu1 %v542_v63  ;;  %v637_v63 = vld [vmem:[%s12765_s30 + $0x870] sm:$0xff] }
 0x16e   : > { %1747 = vmatmul.mubr.f32.gmra.mrb[70].mxu0 %v544_v53  ;;  %1207 = vmatprep.mubr.f32.mxu1 %v548_v22  ;;  %v441_v53 = vld [vmem:[%s12765_s30 + $0x250] sm:$0xff]  ;;  %v643_v22 = vld [vmem:[%s12765_s30 + $0x8a0] sm:$0xff] }
 0x16f   : > { %1752 = vmatprep.mubr.f32.mxu0 %v550_v12 }
 0x171   : > { %1208 = vmatmul.mubr.f32.gmra.mrb[72].mxu1 %v547_v4 }
 0x172   : > { %1753 = vmatmul.mubr.f32.gmra.mrb[72].mxu0 %v549_v26  ;;  %1213 = vmatprep.mubr.f32.mxu1 %v553_v28  ;;  %v642_v26 = vld [vmem:[%s12765_s30 + $0x898] sm:$0xff] }
 0x173   : > { %1758 = vmatprep.mubr.f32.mxu0 %v555_v13  ;;  %v446_v28 = vld [vmem:[%s12765_s30 + $0x278] sm:$0xff]  ;;  %v648_v13 = vld [vmem:[%s12765_s30 + $0x8c8] sm:$0xff] }
 0x175   : > { %1214 = vmatmul.mubr.f32.gmra.mrb[74].mxu1 %v552_v19 }
 0x176   : > { %1759 = vmatmul.mubr.f32.gmra.mrb[74].mxu0 %v554_v29  ;;  %1219 = vmatprep.mubr.f32.mxu1 %v558_v31  ;;  %v647_v31 = vld [vmem:[%s12765_s30 + $0x8c0] sm:$0xff] }
 0x177   : > { %1764 = vmatprep.mubr.f32.mxu0 %v560_v17  ;;  %v451_v17 = vld [vmem:[%s12765_s30 + $0x2a0] sm:$0xff] }
 0x179   : > { %1220 = vmatmul.mubr.f32.gmra.mrb[76].mxu1 %v557_v34  ;;  %v653_v34 = vld [vmem:[%s12765_s30 + $0x8f0] sm:$0xff] }
 0x17a   : > { %1765 = vmatmul.mubr.f32.gmra.mrb[76].mxu0 %v559_v35  ;;  %1225 = vmatprep.mubr.f32.mxu1 %v563_v37 }
 0x17b   : > { %1770 = vmatprep.mubr.f32.mxu0 %v565_v39  ;;  %v652_v39 = vld [vmem:[%s12765_s30 + $0x8e8] sm:$0xff] }
 0x17d   : > { %1226 = vmatmul.mubr.f32.gmra.mrb[78].mxu1 %v562_v40  ;;  %v456_v40 = vld [vmem:[%s12765_s30 + $0x2c8] sm:$0xff] }
 0x17e   : > { %1771 = vmatmul.mubr.f32.gmra.mrb[78].mxu0 %v564_v27  ;;  %1231 = vmatprep.mubr.f32.mxu1 %v568_v45  ;;  %v658_v27 = vld [vmem:[%s12765_s30 + $0x918] sm:$0xff] }
 0x17f   : > { %2081 = vmatprep.mubr.f32.mxu0 %v17731_v46 }
 0x181   : > { %1232 = vmatmul.mubr.f32.gmra.mrb[80].mxu1 %v567_v33 }
 0x182   : > { %2082 = vmatmul.mubr.f32.vlgmr.msra.gmra.mrb[0].mxu0 %v371_v41  ;;  %1237 = vmatprep.mubr.f32.mxu1 %v573_v48  ;;  %v657_v41 = vld [vmem:[%s12765_s30 + $0x910] sm:$0xff] }
 0x183   : > { %2087 = vmatprep.mubr.f32.mxu0 %v17731_v46  ;;  %v461_v48 = vld [vmem:[%s12765_s30 + $0x2f0] sm:$0xff] }
 0x185   : > { %1238 = vmatmul.mubr.f32.gmra.mrb[82].mxu1 %v572_v47  ;;  %v663_v47 = vld [vmem:[%s12765_s30 + $0x940] sm:$0xff] }
 0x186   : > { %2088 = vmatmul.mubr.f32.gmra.mrb[2].mxu0 %v376_v25  ;;  %1243 = vmatprep.mubr.f32.mxu1 %v578_v30 }
 0x187   : > { %2093 = vmatprep.mubr.f32.mxu0 %v17731_v46 }
 0x189   : > { %1244 = vmatmul.mubr.f32.gmra.mrb[84].mxu1 %v577_v49  ;;  %v662_v49 = vld [vmem:[%s12765_s30 + $0x938] sm:$0xff] }
 0x18a   : > { %2094 = vmatmul.mubr.f32.gmra.mrb[4].mxu0 %v381_v52  ;;  %1249 = vmatprep.mubr.f32.mxu1 %v583_v54  ;;  %v466_v52 = vld [vmem:[%s12765_s30 + $0x318] sm:$0xff]  ;;  %v668_v54 = vld [vmem:[%s12765_s30 + $0x968] sm:$0xff] }
 0x18b   : > { %2099 = vmatprep.mubr.f32.mxu0 %v17731_v46 }
 0x18d   : > { %1250 = vmatmul.mubr.f32.gmra.mrb[86].mxu1 %v582_v57 }
 0x18e   : > { %2100 = vmatmul.mubr.f32.gmra.mrb[6].mxu0 %v386_v58  ;;  %1255 = vmatprep.mubr.f32.mxu1 %v588_v59  ;;  %v667_v59 = vld [vmem:[%s12765_s30 + $0x960] sm:$0xff] }
 0x18f   : > { %2105 = vmatprep.mubr.f32.mxu0 %v17731_v46 }
 0x191   : > { %1256 = vmatmul.mubr.f32.gmra.mrb[88].mxu1 %v587_v55  ;;  %v471_v55 = vld [vmem:[%s12765_s30 + $0x340] sm:$0xff] }
 0x192   : > { %2106 = vmatmul.mubr.f32.gmra.mrb[8].mxu0 %v391_v62  ;;  %1261 = vmatprep.mubr.f32.mxu1 %v593_v0  ;;  %v673_v62 = vld [vmem:[%s12765_s30 + $0x990] sm:$0xff] }
 0x193   : > { %2111 = vmatprep.mubr.f32.mxu0 %v17731_v46 }
 0x195   : > { %1262 = vmatmul.mubr.f32.gmra.mrb[90].mxu1 %v592_v38 }
 0x196   : > { %2112 = vmatmul.mubr.f32.gmra.mrb[10].mxu0 %v396_v61  ;;  %1267 = vmatprep.mubr.f32.mxu1 %v598_v1  ;;  %v672_v61 = vld [vmem:[%s12765_s30 + $0x988] sm:$0xff] }
 0x197   : > { %2117 = vmatprep.mubr.f32.mxu0 %v17731_v46  ;;  %v476_v1 = vld [vmem:[%s12765_s30 + $0x368] sm:$0xff] }
 0x199   : > { %1268 = vmatmul.mubr.f32.gmra.mrb[92].mxu1 %v597_v43  ;;  %v678_v43 = vld [vmem:[%s12765_s30 + $0x9b8] sm:$0xff] }
 0x19a   : > { %2118 = vmatmul.mubr.f32.gmra.mrb[12].mxu0 %v401_v2  ;;  %1273 = vmatprep.mubr.f32.mxu1 %v603_v6 }
 0x19b   : > { %2123 = vmatprep.mubr.f32.mxu0 %v17731_v46 }
 0x19d   : > { %1274 = vmatmul.mubr.f32.gmra.mrb[94].mxu1 %v602_v14  ;;  %v677_v14 = vld [vmem:[%s12765_s30 + $0x9b0] sm:$0xff] }
 0x19e   : > { %2124 = vmatmul.mubr.f32.gmra.mrb[14].mxu0 %v406_v5  ;;  %1279 = vmatprep.mubr.f32.mxu1 %v608_v8  ;;  %v481_v5 = vld [vmem:[%s12765_s30 + $0x390] sm:$0xff]  ;;  %v683_v8 = vld [vmem:[%s12765_s30 + $0x9e0] sm:$0xff] }
 0x19f   : > { %2129 = vmatprep.mubr.f32.mxu0 %v17731_v46 }
 0x1a1   : > { %1280 = vmatmul.mubr.f32.gmra.mrb[96].mxu1 %v607_v24 }
 0x1a2   : > { %2130 = vmatmul.mubr.f32.gmra.mrb[16].mxu0 %v411_v32  ;;  %1285 = vmatprep.mubr.f32.mxu1 %v613_v9  ;;  %v682_v9 = vld [vmem:[%s12765_s30 + $0x9d8] sm:$0xff] }
 0x1a3   : > { %2135 = vmatprep.mubr.f32.mxu0 %v17731_v46 }
 0x1a5   : > { %1286 = vmatmul.mubr.f32.gmra.mrb[98].mxu1 %v612_v10  ;;  %v486_v10 = vld [vmem:[%s12765_s30 + $0x3b8] sm:$0xff] }
 0x1a6   : > { %2136 = vmatmul.mubr.f32.gmra.mrb[18].mxu0 %v416_v44  ;;  %1291 = vmatprep.mubr.f32.mxu1 %v618_v50  ;;  %v688_v44 = vld [vmem:[%s12765_s30 + $0xa08] sm:$0xff] }
 0x1a7   : > { %2141 = vmatprep.mubr.f32.mxu0 %v17731_v46 }
 0x1a9   : > { %1292 = vmatmul.mubr.f32.gmra.mrb[100].mxu1 %v617_v51 }
 0x1aa   : > { %2142 = vmatmul.mubr.f32.gmra.mrb[20].mxu0 %v421_v56  ;;  %1297 = vmatprep.mubr.f32.mxu1 %v623_v60  ;;  %v687_v56 = vld [vmem:[%s12765_s30 + $0xa00] sm:$0xff] }
 0x1ab   : > { %2147 = vmatprep.mubr.f32.mxu0 %v17731_v46  ;;  %v491_v60 = vld [vmem:[%s12765_s30 + $0x3e0] sm:$0xff] }
 0x1ad   : > { %1298 = vmatmul.mubr.f32.gmra.mrb[102].mxu1 %v622_v3  ;;  %v693_v3 = vld [vmem:[%s12765_s30 + $0xa30] sm:$0xff] }
 0x1ae   : > { %2148 = vmatmul.mubr.f32.gmra.mrb[22].mxu0 %v426_v11  ;;  %1303 = vmatprep.mubr.f32.mxu1 %v628_v7 }
 0x1af   : > { %2153 = vmatprep.mubr.f32.mxu0 %v17731_v46 }
 0x1b1   : > { %1304 = vmatmul.mubr.f32.gmra.mrb[104].mxu1 %v627_v16  ;;  %v692_v16 = vld [vmem:[%s12765_s30 + $0xa28] sm:$0xff] }
 0x1b2   : > { %2154 = vmatmul.mubr.f32.gmra.mrb[24].mxu0 %v431_v23  ;;  %1309 = vmatprep.mubr.f32.mxu1 %v633_v15  ;;  %v496_v23 = vld [vmem:[%s12765_s30 + $0x408] sm:$0xff]  ;;  %v698_v15 = vld [vmem:[%s12765_s30 + $0xa58] sm:$0xff] }
 0x1b3   : > { %2159 = vmatprep.mubr.f32.mxu0 %v17731_v46 }
 0x1b4   : > { %v13604_v20 = vpop.f32.mrb[0].mxu1 }
 0x1b5   : > { %v13606_v21 = vpop.f32.mrb[1].mxu1  ;;  %1310 = vmatmul.mubr.f32.gmra.mrb[106].mxu1 %v632_v18 }
 0x1b6   : > { %2160 = vmatmul.mubr.f32.gmra.mrb[26].mxu0 %v436_v36  ;;  %1315 = vmatprep.mubr.f32.mxu1 %v638_v42  ;;  %v697_v42 = vld [vmem:[%s12765_s30 + $0xa50] sm:$0xff] }
 0x1b7   : > { %2165 = vmatprep.mubr.f32.mxu0 %v17731_v46 }
 0x1b8   : > { %v13612_v12 = vpop.f32.mrb[2].mxu1 }
 0x1b9   : > { %v13614_v4 = vpop.f32.mrb[3].mxu1  ;;  %1316 = vmatmul.mubr.f32.gmra.mrb[108].mxu1 %v637_v63  ;;  %v501_v63 = vld [vmem:[%s12765_s30 + $0x430] sm:$0xff] }
 0x1ba   : > { %2166 = vmatmul.mubr.f32.gmra.mrb[28].mxu0 %v441_v53  ;;  %1321 = vmatprep.mubr.f32.mxu1 %v643_v22  ;;  %v703_v53 = vld [vmem:[%s12765_s30 + $0xa80] sm:$0xff] }
 0x1bb   : > { %2171 = vmatprep.mubr.f32.mxu0 %v17731_v46 }
 0x1bc   : > { %v13620_v19 = vpop.f32.mrb[4].mxu1 }
 0x1bd   : > { %v13622_v29 = vpop.f32.mrb[5].mxu1  ;;  %1322 = vmatmul.mubr.f32.gmra.mrb[110].mxu1 %v642_v26 }
 0x1be   : > { %2172 = vmatmul.mubr.f32.gmra.mrb[30].mxu0 %v446_v28  ;;  %1327 = vmatprep.mubr.f32.mxu1 %v648_v13  ;;  %v702_v28 = vld [vmem:[%s12765_s30 + $0xa78] sm:$0xff] }
 0x1bf   : > { %2177 = vmatprep.mubr.f32.mxu0 %v17731_v46  ;;  %v506_v13 = vld [vmem:[%s12765_s30 + $0x458] sm:$0xff] }
 0x1c0   : > { %v13628_v35 = vpop.f32.mrb[6].mxu1 }
 0x1c1   : > { %v13630_v37 = vpop.f32.mrb[7].mxu1  ;;  %1328 = vmatmul.mubr.f32.gmra.mrb[112].mxu1 %v647_v31  ;;  %v708_v31 = vld [vmem:[%s12765_s30 + $0xaa8] sm:$0xff] }
 0x1c2   : > { %2178 = vmatmul.mubr.f32.gmra.mrb[32].mxu0 %v451_v17  ;;  %1333 = vmatprep.mubr.f32.mxu1 %v653_v34 }
 0x1c3   : > { %2183 = vmatprep.mubr.f32.mxu0 %v17731_v46 }
 0x1c4   : > { %v13636_v45 = vpop.f32.mrb[8].mxu1 }
 0x1c5   : > { %v13638_v33 = vpop.f32.mrb[9].mxu1  ;;  %1334 = vmatmul.mubr.f32.gmra.mrb[114].mxu1 %v652_v39  ;;  %v707_v39 = vld [vmem:[%s12765_s30 + $0xaa0] sm:$0xff] }
 0x1c6   : > { %2184 = vmatmul.mubr.f32.gmra.mrb[34].mxu0 %v456_v40  ;;  %1339 = vmatprep.mubr.f32.mxu1 %v658_v27  ;;  %v511_v40 = vld [vmem:[%s12765_s30 + $0x480] sm:$0xff]  ;;  %v713_v27 = vld [vmem:[%s12765_s30 + $0xad0] sm:$0xff] }
 0x1c7   : > { %2189 = vmatprep.mubr.f32.mxu0 %v17731_v46 }
 0x1c8   : > { %v13644_v25 = vpop.f32.mrb[10].mxu1 }
 0x1c9   : > { %v13646_v30 = vpop.f32.mrb[11].mxu1  ;;  %1340 = vmatmul.mubr.f32.gmra.mrb[116].mxu1 %v657_v41 }
 0x1ca   : > { %2190 = vmatmul.mubr.f32.gmra.mrb[36].mxu0 %v461_v48  ;;  %1345 = vmatprep.mubr.f32.mxu1 %v663_v47  ;;  %v712_v47 = vld [vmem:[%s12765_s30 + $0xac8] sm:$0xff] }
 0x1cb   : > { %2195 = vmatprep.mubr.f32.mxu0 %v17731_v46 }
 0x1cc   : > { %v13652_v57 = vpop.f32.mrb[12].mxu1 }
 0x1cd   : > { %v13654_v58 = vpop.f32.mrb[13].mxu1  ;;  %1346 = vmatmul.mubr.f32.gmra.mrb[118].mxu1 %v662_v49  ;;  %v516_v49 = vld [vmem:[%s12765_s30 + $0x4a8] sm:$0xff] }
 0x1ce   : > { %2196 = vmatmul.mubr.f32.gmra.mrb[38].mxu0 %v466_v52  ;;  %1351 = vmatprep.mubr.f32.mxu1 %v668_v54  ;;  %v718_v52 = vld [vmem:[%s12765_s30 + $0xaf8] sm:$0xff] }
 0x1cf   : > { %2201 = vmatprep.mubr.f32.mxu0 %v17731_v46 }
 0x1d0   : > { %v13660_v0 = vpop.f32.mrb[14].mxu1 }
 0x1d1   : > { %v13662_v38 = vpop.f32.mrb[15].mxu1  ;;  %1352 = vmatmul.mubr.f32.gmra.mrb[120].mxu1 %v667_v59 }
 0x1d2   : > { %2202 = vmatmul.mubr.f32.gmra.mrb[40].mxu0 %v471_v55  ;;  %1357 = vmatprep.mubr.f32.mxu1 %v673_v62  ;;  %v717_v55 = vld [vmem:[%s12765_s30 + $0xaf0] sm:$0xff] }
 0x1d3   : > { %2207 = vmatprep.mubr.f32.mxu0 %v17731_v46  ;;  %v521_v62 = vld [vmem:[%s12765_s30 + $0x4d0] sm:$0xff] }
 0x1d4   : > { %v13668_v2 = vpop.f32.mrb[16].mxu1 }
 0x1d5   : > { %v13670_v6 = vpop.f32.mrb[17].mxu1  ;;  %1358 = vmatmul.mubr.f32.gmra.mrb[122].mxu1 %v672_v61  ;;  %v723_v61 = vld [vmem:[%s12765_s30 + $0xb20] sm:$0xff] }
 0x1d6   : > { %2208 = vmatmul.mubr.f32.gmra.mrb[42].mxu0 %v476_v1  ;;  %1363 = vmatprep.mubr.f32.mxu1 %v678_v43 }
 0x1d7   : > { %2213 = vmatprep.mubr.f32.mxu0 %v17731_v46 }
 0x1d8   : > { %v13676_v24 = vpop.f32.mrb[18].mxu1 }
 0x1d9   : > { %v13678_v32 = vpop.f32.mrb[19].mxu1  ;;  %1364 = vmatmul.mubr.f32.gmra.mrb[124].mxu1 %v677_v14  ;;  %v722_v14 = vld [vmem:[%s12765_s30 + $0xb18] sm:$0xff] }
 0x1da   : > { %2214 = vmatmul.mubr.f32.gmra.mrb[44].mxu0 %v481_v5  ;;  %1369 = vmatprep.mubr.f32.mxu1 %v683_v8  ;;  %v526_v5 = vld [vmem:[%s12765_s30 + $0x4f8] sm:$0xff]  ;;  %v728_v8 = vld [vmem:[%s12765_s30 + $0xb48] sm:$0xff] }
 0x1db   : > { %2219 = vmatprep.mubr.f32.mxu0 %v17731_v46 }
 0x1dc   : > { %v13684_v50 = vpop.f32.mrb[20].mxu1 }
 0x1dd   : > { %v13686_v51 = vpop.f32.mrb[21].mxu1  ;;  %1370 = vmatmul.mubr.f32.gmra.mrb[126].mxu1 %v682_v9 }
 0x1de   : > { %2220 = vmatmul.mubr.f32.gmra.mrb[46].mxu0 %v486_v10  ;;  %1375 = vmatprep.mubr.f32.mxu1 %v688_v44  ;;  %v727_v44 = vld [vmem:[%s12765_s30 + $0xb40] sm:$0xff] }
 0x1df   : > { %2225 = vmatprep.mubr.f32.mxu0 %v17731_v46 }
 0x1e0   : > { %v13692_v11 = vpop.f32.mrb[22].mxu1 }
 0x1e1   : > { %v13694_v7 = vpop.f32.mrb[23].mxu1  ;;  %1376 = vmatmul.mubr.f32.gmra.mrb[128].mxu1 %v687_v56  ;;  %v531_v56 = vld [vmem:[%s12765_s30 + $0x520] sm:$0xff] }
 0x1e2   : > { %2226 = vmatmul.mubr.f32.gmra.mrb[48].mxu0 %v491_v60  ;;  %1381 = vmatprep.mubr.f32.mxu1 %v693_v3  ;;  %v733_v60 = vld [vmem:[%s12765_s30 + $0xb70] sm:$0xff] }
 0x1e3   : > { %2231 = vmatprep.mubr.f32.mxu0 %v17731_v46 }
 0x1e4   : > { %v13700_v18 = vpop.f32.mrb[24].mxu1 }
 0x1e5   : > { %v13702_v36 = vpop.f32.mrb[25].mxu1  ;;  %1382 = vmatmul.mubr.f32.gmra.mrb[130].mxu1 %v692_v16 }
 0x1e6   : > { %2232 = vmatmul.mubr.f32.gmra.mrb[50].mxu0 %v496_v23  ;;  %1387 = vmatprep.mubr.f32.mxu1 %v698_v15  ;;  %v732_v23 = vld [vmem:[%s12765_s30 + $0xb68] sm:$0xff] }
 0x1e7   : > { %2237 = vmatprep.mubr.f32.mxu0 %v17731_v46  ;;  %v536_v15 = vld [vmem:[%s12765_s30 + $0x548] sm:$0xff] }
 0x1e8   : > { %v13708_v22 = vpop.f32.mrb[26].mxu1 }
 0x1e9   : > { %v13710_v26 = vpop.f32.mrb[27].mxu1  ;;  %1388 = vmatmul.mubr.f32.gmra.mrb[132].mxu1 %v697_v42  ;;  %v738_v42 = vld [vmem:[%s12765_s30 + $0xb98] sm:$0xff] }
 0x1ea   : > { %2238 = vmatmul.mubr.f32.gmra.mrb[52].mxu0 %v501_v63  ;;  %1393 = vmatprep.mubr.f32.mxu1 %v703_v53 }
 0x1eb   : > { %2243 = vmatprep.mubr.f32.mxu0 %v17731_v46 }
 0x1ec   : > { %v13716_v17 = vpop.f32.mrb[28].mxu1 }
 0x1ed   : > { %v13718_v34 = vpop.f32.mrb[29].mxu1  ;;  %1394 = vmatmul.mubr.f32.gmra.mrb[134].mxu1 %v702_v28  ;;  %v737_v28 = vld [vmem:[%s12765_s30 + $0xb90] sm:$0xff] }
 0x1ee   : > { %2244 = vmatmul.mubr.f32.gmra.mrb[54].mxu0 %v506_v13  ;;  %1399 = vmatprep.mubr.f32.mxu1 %v708_v31  ;;  %v541_v13 = vld [vmem:[%s12765_s30 + $0x570] sm:$0xff]  ;;  %v743_v31 = vld [vmem:[%s12765_s30 + $0xbc0] sm:$0xff] }
 0x1ef   : > { %2249 = vmatprep.mubr.f32.mxu0 %v17731_v46 }
 0x1f0   : > { %v13724_v41 = vpop.f32.mrb[30].mxu1 }
 0x1f1   : > { %v13726_v48 = vpop.f32.mrb[31].mxu1  ;;  %1400 = vmatmul.mubr.f32.gmra.mrb[136].mxu1 %v707_v39 }
 0x1f2   : > { %2250 = vmatmul.mubr.f32.gmra.mrb[56].mxu0 %v511_v40  ;;  %1405 = vmatprep.mubr.f32.mxu1 %v713_v27  ;;  %v742_v27 = vld [vmem:[%s12765_s30 + $0xbb8] sm:$0xff] }
 0x1f3   : > { %2255 = vmatprep.mubr.f32.mxu0 %v17731_v46 }
 0x1f4   : > { %v13732_v54 = vpop.f32.mrb[32].mxu1 }
 0x1f5   : > { %v13734_v59 = vpop.f32.mrb[33].mxu1  ;;  %1406 = vmatmul.mubr.f32.gmra.mrb[138].mxu1 %v712_v47  ;;  %v546_v47 = vld [vmem:[%s12765_s30 + $0x598] sm:$0xff] }
 0x1f6   : > { %2256 = vmatmul.mubr.f32.gmra.mrb[58].mxu0 %v516_v49  ;;  %1411 = vmatprep.mubr.f32.mxu1 %v718_v52  ;;  %v748_v49 = vld [vmem:[%s12765_s30 + $0xbe8] sm:$0xff] }
 0x1f7   : > { %2261 = vmatprep.mubr.f32.mxu0 %v17731_v46 }
 0x1f8   : > { %v13740_v1 = vpop.f32.mrb[34].mxu1 }
 0x1f9   : > { %v13742_v43 = vpop.f32.mrb[35].mxu1  ;;  %1412 = vmatmul.mubr.f32.gmra.mrb[140].mxu1 %v717_v55 }
 0x1fa   : > { %2262 = vmatmul.mubr.f32.gmra.mrb[60].mxu0 %v521_v62  ;;  %1417 = vmatprep.mubr.f32.mxu1 %v723_v61  ;;  %v747_v62 = vld [vmem:[%s12765_s30 + $0xbe0] sm:$0xff] }
 0x1fb   : > { %2267 = vmatprep.mubr.f32.mxu0 %v17731_v46  ;;  %v551_v61 = vld [vmem:[%s12765_s30 + $0x5c0] sm:$0xff] }
 0x1fc   : > { %v13748_v9 = vpop.f32.mrb[36].mxu1 }
 0x1fd   : > { %v13750_v10 = vpop.f32.mrb[37].mxu1  ;;  %1418 = vmatmul.mubr.f32.gmra.mrb[142].mxu1 %v722_v14  ;;  %v753_v14 = vld [vmem:[%s12765_s30 + $0xc10] sm:$0xff] }
 0x1fe   : > { %2268 = vmatmul.mubr.f32.gmra.mrb[62].mxu0 %v526_v5  ;;  %1423 = vmatprep.mubr.f32.mxu1 %v728_v8 }
 0x1ff   : > { %2273 = vmatprep.mubr.f32.mxu0 %v17731_v46 }
 0x200   : > { %v13756_v3 = vpop.f32.mrb[38].mxu1 }
 0x201   : > { %v13758_v16 = vpop.f32.mrb[39].mxu1  ;;  %1424 = vmatmul.mubr.f32.gmra.mrb[144].mxu1 %v727_v44  ;;  %v752_v44 = vld [vmem:[%s12765_s30 + $0xc08] sm:$0xff] }
 0x202   : > { %2274 = vmatmul.mubr.f32.gmra.mrb[64].mxu0 %v531_v56  ;;  %1429 = vmatprep.mubr.f32.mxu1 %v733_v60  ;;  %v556_v56 = vld [vmem:[%s12765_s30 + $0x5e8] sm:$0xff]  ;;  %v758_v60 = vld [vmem:[%s12765_s30 + $0xc38] sm:$0xff] }
 0x203   : > { %2279 = vmatprep.mubr.f32.mxu0 %v17731_v46 }
 0x204   : > { %v13764_v63 = vpop.f32.mrb[40].mxu1 }
 0x205   : > { %v13766_v53 = vpop.f32.mrb[41].mxu1  ;;  %1430 = vmatmul.mubr.f32.gmra.mrb[146].mxu1 %v732_v23 }
 0x206   : > { %2280 = vmatmul.mubr.f32.gmra.mrb[66].mxu0 %v536_v15  ;;  %1435 = vmatprep.mubr.f32.mxu1 %v738_v42  ;;  %v757_v42 = vld [vmem:[%s12765_s30 + $0xc30] sm:$0xff] }
 0x207   : > { %2285 = vmatprep.mubr.f32.mxu0 %v17731_v46 }
 0x208   : > { %v13772_v39 = vpop.f32.mrb[42].mxu1 }
 0x209   : > { %v13774_v40 = vpop.f32.mrb[43].mxu1  ;;  %1436 = vmatmul.mubr.f32.gmra.mrb[148].mxu1 %v737_v28  ;;  %v561_v28 = vld [vmem:[%s12765_s30 + $0x610] sm:$0xff] }
 0x20a   : > { %2286 = vmatmul.mubr.f32.gmra.mrb[68].mxu0 %v541_v13  ;;  %1441 = vmatprep.mubr.f32.mxu1 %v743_v31  ;;  %v763_v13 = vld [vmem:[%s12765_s30 + $0xc60] sm:$0xff] }
 0x20b   : > { %2291 = vmatprep.mubr.f32.mxu0 %v17731_v46 }
 0x20c   : > { %v13780_v52 = vpop.f32.mrb[44].mxu1 }
 0x20d   : > { %v13782_v55 = vpop.f32.mrb[45].mxu1  ;;  %1442 = vmatmul.mubr.f32.gmra.mrb[150].mxu1 %v742_v27 }
 0x20e   : > { %2292 = vmatmul.mubr.f32.gmra.mrb[70].mxu0 %v546_v47  ;;  %1447 = vmatprep.mubr.f32.mxu1 %v748_v49  ;;  %v762_v47 = vld [vmem:[%s12765_s30 + $0xc58] sm:$0xff] }
 0x20f   : > { %2297 = vmatprep.mubr.f32.mxu0 %v17731_v46  ;;  %v566_v49 = vld [vmem:[%s12765_s30 + $0x638] sm:$0xff] }
 0x210   : > { %v13788_v5 = vpop.f32.mrb[46].mxu1 }
 0x211   : > { %v13790_v8 = vpop.f32.mrb[47].mxu1  ;;  %1448 = vmatmul.mubr.f32.gmra.mrb[152].mxu1 %v747_v62  ;;  %v570_v62 = vld [vmem:[%s12765_s30 + $0x658] sm:$0xff] }
 0x212   : > { %2298 = vmatmul.mubr.f32.gmra.mrb[72].mxu0 %v551_v61  ;;  %1453 = vmatprep.mubr.f32.mxu1 %v753_v14 }
 0x213   : > { %2303 = vmatprep.mubr.f32.mxu0 %v17731_v46 }
 0x214   : > { %v13796_v23 = vpop.f32.mrb[48].mxu1 }
 0x215   : > { %v13798_v15 = vpop.f32.mrb[49].mxu1  ;;  %1454 = vmatmul.mubr.f32.gmra.mrb[154].mxu1 %v752_v44  ;;  %v569_v44 = vld [vmem:[%s12765_s30 + $0x650] sm:$0xff] }
 0x216   : > { %2304 = vmatmul.mubr.f32.gmra.mrb[74].mxu0 %v556_v56  ;;  %1459 = vmatprep.mubr.f32.mxu1 %v758_v60  ;;  %v571_v56 = vld [vmem:[%s12765_s30 + $0x660] sm:$0xff] }
 0x217   : > { %2309 = vmatprep.mubr.f32.mxu0 %v17731_v46  ;;  %v575_v60 = vld [vmem:[%s12765_s30 + $0x680] sm:$0xff] }
 0x218   : > { %v13804_v31 = vpop.f32.mrb[50].mxu1 }
 0x219   : > { %v13806_v27 = vpop.f32.mrb[51].mxu1  ;;  %1460 = vmatmul.mubr.f32.gmra.mrb[156].mxu1 %v757_v42 }
 0x21a   : > { %17886 = vst [vmem:[#allocation18_spill] sm:$0xff] %v13806_v27  ;;  %2310 = vmatmul.mubr.f32.gmra.mrb[76].mxu0 %v561_v28  ;;  %1465 = vmatprep.mubr.f32.mxu1 %v763_v13  ;;  %v574_v13 = vld [vmem:[%s12765_s30 + $0x678] sm:$0xff] }
 0x21b   : > { %2315 = vmatprep.mubr.f32.mxu0 %v17731_v46 }
 0x21c   : > { %v13812_v61 = vpop.f32.mrb[52].mxu1 }
 0x21d   : > { %17887 = vst [vmem:[#allocation19_spill] sm:$0xff] %v13812_v61  ;;  %v13814_v14 = vpop.f32.mrb[53].mxu1  ;;  %1466 = vmatmul.mubr.f32.gmra.mrb[158].mxu1 %v762_v47  ;;  %v576_v47 = vld [vmem:[%s12765_s30 + $0x688] sm:$0xff] }
 0x21e   : > { %17888 = vst [vmem:[#allocation20_spill] sm:$0xff] %v13814_v14  ;;  %2316 = vmatmul.mubr.f32.gmra.mrb[78].mxu0 %v566_v49  ;;  %1776 = vmatprep.mubr.f32.mxu1 %v570_v62  ;;  %v580_v49 = vld [vmem:[%s12765_s30 + $0x6a8] sm:$0xff] }
 0x21f   : > { %2321 = vmatprep.mubr.f32.mxu0 %v17731_v46 }
 0x220   : > { %v13820_v42 = vpop.f32.mrb[54].mxu1 }
 0x221   : > { %17889 = vst [vmem:[#allocation21_spill] sm:$0xff] %v13820_v42  ;;  %v13822_v28 = vpop.f32.mrb[55].mxu1  ;;  %1777 = vmatmul.mubr.f32.vlgmr.msra.gmra.mrb[80].mxu1 %v569_v44  ;;  %v581_v44 = vld [vmem:[%s12765_s30 + $0x6b0] sm:$0xff] }
 0x222   : > { %17890 = vst [vmem:[#allocation22_spill] sm:$0xff] %v13822_v28  ;;  %2322 = vmatmul.mubr.f32.gmra.mrb[80].mxu0 %v571_v56  ;;  %1782 = vmatprep.mubr.f32.mxu1 %v575_v60  ;;  %v579_v28 = vld [vmem:[%s12765_s30 + $0x6a0] sm:$0xff]  ;;  %v585_v56 = vld [vmem:[%s12765_s30 + $0x6d0] sm:$0xff] }
 0x223   : > { %2327 = vmatprep.mubr.f32.mxu0 %v17731_v46 }
 0x224   : > { %v13828_v62 = vpop.f32.mrb[56].mxu1 }
 0x225   : > { %17891 = vst [vmem:[#allocation23_spill] sm:$0xff] %v13828_v62  ;;  %v13830_v14 = vpop.f32.mrb[57].mxu1  ;;  %1783 = vmatmul.mubr.f32.gmra.mrb[82].mxu1 %v574_v13  ;;  %v586_v13 = vld [vmem:[%s12765_s30 + $0x6d8] sm:$0xff] }
 0x226   : > { %17892 = vst [vmem:[#allocation24_spill] sm:$0xff] %v13830_v14  ;;  %2328 = vmatmul.mubr.f32.gmra.mrb[82].mxu0 %v576_v47  ;;  %1788 = vmatprep.mubr.f32.mxu1 %v580_v49  ;;  %v584_v14 = vld [vmem:[%s12765_s30 + $0x6c8] sm:$0xff]  ;;  %v590_v47 = vld [vmem:[%s12765_s30 + $0x6f8] sm:$0xff] }
 0x227   : > { %2333 = vmatprep.mubr.f32.mxu0 %v17731_v46 }
 0x228   : > { %v13836_v60 = vpop.f32.mrb[58].mxu1 }
 0x229   : > { %17893 = vst [vmem:[#allocation25_spill] sm:$0xff] %v13836_v60  ;;  %v13838_v42 = vpop.f32.mrb[59].mxu1  ;;  %1789 = vmatmul.mubr.f32.gmra.mrb[84].mxu1 %v579_v28  ;;  %v591_v28 = vld [vmem:[%s12765_s30 + $0x700] sm:$0xff] }
 0x22a   : > { %17894 = vst [vmem:[#allocation26_spill] sm:$0xff] %v13838_v42  ;;  %2334 = vmatmul.mubr.f32.gmra.mrb[84].mxu0 %v581_v44  ;;  %1794 = vmatprep.mubr.f32.mxu1 %v585_v56  ;;  %v589_v42 = vld [vmem:[%s12765_s30 + $0x6f0] sm:$0xff]  ;;  %v595_v44 = vld [vmem:[%s12765_s30 + $0x720] sm:$0xff] }
 0x22b   : > { %2339 = vmatprep.mubr.f32.mxu0 %v17731_v46 }
 0x22c   : > { %v13844_v49 = vpop.f32.mrb[60].mxu1 }
 0x22d   : > { %17895 = vst [vmem:[#allocation27_spill] sm:$0xff] %v13844_v49  ;;  %v13846_v62 = vpop.f32.mrb[61].mxu1  ;;  %1795 = vmatmul.mubr.f32.gmra.mrb[86].mxu1 %v584_v14  ;;  %v596_v14 = vld [vmem:[%s12765_s30 + $0x728] sm:$0xff] }
 0x22e   : > { %17896 = vst [vmem:[#allocation28_spill] sm:$0xff] %v13846_v62  ;;  %2340 = vmatmul.mubr.f32.gmra.mrb[86].mxu0 %v586_v13  ;;  %1800 = vmatprep.mubr.f32.mxu1 %v590_v47  ;;  %v594_v62 = vld [vmem:[%s12765_s30 + $0x718] sm:$0xff]  ;;  %v600_v13 = vld [vmem:[%s12765_s30 + $0x748] sm:$0xff] }
 0x22f   : > { %2345 = vmatprep.mubr.f32.mxu0 %v17731_v46 }
 0x230   : > { %v13852_v56 = vpop.f32.mrb[62].mxu1 }
 0x231   : > { %17897 = vst [vmem:[#allocation29_spill] sm:$0xff] %v13852_v56  ;;  %v13854_v60 = vpop.f32.mrb[63].mxu1  ;;  %1801 = vmatmul.mubr.f32.gmra.mrb[88].mxu1 %v589_v42  ;;  %v601_v42 = vld [vmem:[%s12765_s30 + $0x750] sm:$0xff] }
 0x232   : > { %17898 = vst [vmem:[#allocation30_spill] sm:$0xff] %v13854_v60  ;;  %2346 = vmatmul.mubr.f32.gmra.mrb[88].mxu0 %v591_v28  ;;  %1806 = vmatprep.mubr.f32.mxu1 %v595_v44  ;;  %v599_v60 = vld [vmem:[%s12765_s30 + $0x740] sm:$0xff]  ;;  %v605_v28 = vld [vmem:[%s12765_s30 + $0x770] sm:$0xff] }
 0x233   : > { %2351 = vmatprep.mubr.f32.mxu0 %v17731_v46 }
 0x234   : > { %v13860_v47 = vpop.f32.mrb[64].mxu1 }
 0x235   : > { %17899 = vst [vmem:[#allocation31_spill] sm:$0xff] %v13860_v47  ;;  %v13862_v49 = vpop.f32.mrb[65].mxu1  ;;  %1807 = vmatmul.mubr.f32.gmra.mrb[90].mxu1 %v594_v62  ;;  %v606_v62 = vld [vmem:[%s12765_s30 + $0x778] sm:$0xff] }
 0x236   : > { %17900 = vst [vmem:[#allocation32_spill] sm:$0xff] %v13862_v49  ;;  %2352 = vmatmul.mubr.f32.gmra.mrb[90].mxu0 %v596_v14  ;;  %1812 = vmatprep.mubr.f32.mxu1 %v600_v13  ;;  %v604_v49 = vld [vmem:[%s12765_s30 + $0x768] sm:$0xff]  ;;  %v610_v14 = vld [vmem:[%s12765_s30 + $0x798] sm:$0xff] }
 0x237   : > { %2357 = vmatprep.mubr.f32.mxu0 %v17731_v46 }
 0x238   : > { %v13868_v44 = vpop.f32.mrb[66].mxu1 }
 0x239   : > { %17901 = vst [vmem:[#allocation33_spill] sm:$0xff] %v13868_v44  ;;  %v13870_v56 = vpop.f32.mrb[67].mxu1  ;;  %1813 = vmatmul.mubr.f32.gmra.mrb[92].mxu1 %v599_v60  ;;  %v611_v60 = vld [vmem:[%s12765_s30 + $0x7a0] sm:$0xff] }
 0x23a   : > { %17902 = vst [vmem:[#allocation34_spill] sm:$0xff] %v13870_v56  ;;  %2358 = vmatmul.mubr.f32.gmra.mrb[92].mxu0 %v601_v42  ;;  %1818 = vmatprep.mubr.f32.mxu1 %v605_v28  ;;  %v609_v56 = vld [vmem:[%s12765_s30 + $0x790] sm:$0xff]  ;;  %v615_v42 = vld [vmem:[%s12765_s30 + $0x7c0] sm:$0xff] }
 0x23b   : > { %2363 = vmatprep.mubr.f32.mxu0 %v17731_v46 }
 0x23c   : > { %v13876_v13 = vpop.f32.mrb[68].mxu1 }
 0x23d   : > { %17903 = vst [vmem:[#allocation35_spill] sm:$0xff] %v13876_v13  ;;  %v13878_v47 = vpop.f32.mrb[69].mxu1  ;;  %1819 = vmatmul.mubr.f32.gmra.mrb[94].mxu1 %v604_v49  ;;  %v616_v49 = vld [vmem:[%s12765_s30 + $0x7c8] sm:$0xff] }
 0x23e   : > { %17904 = vst [vmem:[#allocation36_spill] sm:$0xff] %v13878_v47  ;;  %2364 = vmatmul.mubr.f32.gmra.mrb[94].mxu0 %v606_v62  ;;  %1824 = vmatprep.mubr.f32.mxu1 %v610_v14  ;;  %v614_v47 = vld [vmem:[%s12765_s30 + $0x7b8] sm:$0xff]  ;;  %v620_v62 = vld [vmem:[%s12765_s30 + $0x7e8] sm:$0xff] }
 0x23f   : > { %2369 = vmatprep.mubr.f32.mxu0 %v17731_v46 }
 0x240   : > { %v13884_v28 = vpop.f32.mrb[70].mxu1 }
 0x241   : > { %17905 = vst [vmem:[#allocation37_spill] sm:$0xff] %v13884_v28  ;;  %v13886_v44 = vpop.f32.mrb[71].mxu1  ;;  %1825 = vmatmul.mubr.f32.gmra.mrb[96].mxu1 %v609_v56  ;;  %v621_v56 = vld [vmem:[%s12765_s30 + $0x7f0] sm:$0xff] }
 0x242   : > { %17906 = vst [vmem:[#allocation38_spill] sm:$0xff] %v13886_v44  ;;  %2370 = vmatmul.mubr.f32.gmra.mrb[96].mxu0 %v611_v60  ;;  %1830 = vmatprep.mubr.f32.mxu1 %v615_v42  ;;  %v619_v44 = vld [vmem:[%s12765_s30 + $0x7e0] sm:$0xff]  ;;  %v625_v60 = vld [vmem:[%s12765_s30 + $0x810] sm:$0xff] }
 0x243   : > { %2375 = vmatprep.mubr.f32.mxu0 %v17731_v46 }
 0x244   : > { %v13892_v14 = vpop.f32.mrb[72].mxu1 }
 0x245   : > { %17907 = vst [vmem:[#allocation39_spill] sm:$0xff] %v13892_v14  ;;  %v13894_v13 = vpop.f32.mrb[73].mxu1  ;;  %1831 = vmatmul.mubr.f32.gmra.mrb[98].mxu1 %v614_v47  ;;  %v626_v47 = vld [vmem:[%s12765_s30 + $0x818] sm:$0xff] }
 0x246   : > { %17908 = vst [vmem:[#allocation40_spill] sm:$0xff] %v13894_v13  ;;  %2376 = vmatmul.mubr.f32.gmra.mrb[98].mxu0 %v616_v49  ;;  %1836 = vmatprep.mubr.f32.mxu1 %v620_v62  ;;  %v624_v13 = vld [vmem:[%s12765_s30 + $0x808] sm:$0xff]  ;;  %v630_v49 = vld [vmem:[%s12765_s30 + $0x838] sm:$0xff] }
 0x247   : > { %2381 = vmatprep.mubr.f32.mxu0 %v17731_v46 }
 0x248   : > { %v13900_v42 = vpop.f32.mrb[74].mxu1 }
 0x249   : > { %17909 = vst [vmem:[#allocation41_spill] sm:$0xff] %v13900_v42  ;;  %v13902_v28 = vpop.f32.mrb[75].mxu1  ;;  %1837 = vmatmul.mubr.f32.gmra.mrb[100].mxu1 %v619_v44  ;;  %v631_v44 = vld [vmem:[%s12765_s30 + $0x840] sm:$0xff] }
 0x24a   : > { %17910 = vst [vmem:[#allocation42_spill] sm:$0xff] %v13902_v28  ;;  %2382 = vmatmul.mubr.f32.gmra.mrb[100].mxu0 %v621_v56  ;;  %1842 = vmatprep.mubr.f32.mxu1 %v625_v60  ;;  %v629_v28 = vld [vmem:[%s12765_s30 + $0x830] sm:$0xff]  ;;  %v635_v56 = vld [vmem:[%s12765_s30 + $0x860] sm:$0xff] }
 0x24b   : > { %2387 = vmatprep.mubr.f32.mxu0 %v17731_v46 }
 0x24c   : > { %v13908_v62 = vpop.f32.mrb[76].mxu1 }
 0x24d   : > { %17911 = vst [vmem:[#allocation43_spill] sm:$0xff] %v13908_v62  ;;  %v13910_v14 = vpop.f32.mrb[77].mxu1  ;;  %1843 = vmatmul.mubr.f32.gmra.mrb[102].mxu1 %v624_v13  ;;  %v636_v13 = vld [vmem:[%s12765_s30 + $0x868] sm:$0xff] }
 0x24e   : > { %17912 = vst [vmem:[#allocation44_spill] sm:$0xff] %v13910_v14  ;;  %2388 = vmatmul.mubr.f32.gmra.mrb[102].mxu0 %v626_v47  ;;  %1848 = vmatprep.mubr.f32.mxu1 %v630_v49  ;;  %v634_v14 = vld [vmem:[%s12765_s30 + $0x858] sm:$0xff]  ;;  %v640_v47 = vld [vmem:[%s12765_s30 + $0x888] sm:$0xff] }
 0x24f   : > { %2393 = vmatprep.mubr.f32.mxu0 %v17731_v46 }
 0x250   : > { %v13916_v60 = vpop.f32.mrb[78].mxu1 }
 0x251   : > { %17913 = vst [vmem:[#allocation45_spill] sm:$0xff] %v13916_v60  ;;  %v13918_v42 = vpop.f32.mrb[79].mxu1  ;;  %1849 = vmatmul.mubr.f32.gmra.mrb[104].mxu1 %v629_v28  ;;  %v13927_v60 = vld [vmem:[#allocation6] ss:$0 sm:$0xff] }
 0x252   : > { %17914 = vst [vmem:[#allocation46_spill] sm:$0xff] %v13918_v42  ;;  %2394 = vmatmul.mubr.f32.gmra.mrb[104].mxu0 %v631_v44  ;;  %1854 = vmatprep.mubr.f32.mxu1 %v635_v56  ;;  %v639_v28 = vld [vmem:[%s12765_s30 + $0x880] sm:$0xff]  ;;  %v641_v56 = vld [vmem:[%s12765_s30 + $0x890] sm:$0xff] }
 0x253   : > { %2399 = vmatprep.mubr.f32.mxu0 %v17731_v46  ;;  %v645_v42 = vld [vmem:[%s12765_s30 + $0x8b0] sm:$0xff] }
 0x255   : > { %v2083_v49 = vpop.f32.mrb[0].mxu0  ;;  %1855 = vmatmul.mubr.f32.gmra.mrb[106].mxu1 %v634_v14 }
 0x256   : > { %v13925_v62 = vadd.f32 %v2083_v49, %v13604_v20  ;;  %v2085_v61 = vpop.f32.mrb[1].mxu0  ;;  %2400 = vmatmul.mubr.f32.gmra.mrb[106].mxu0 %v636_v13  ;;  %1860 = vmatprep.mubr.f32.mxu1 %v640_v47  ;;  %v644_v13 = vld [vmem:[%s12765_s30 + $0x8a8] sm:$0xff]  ;;  %v13939_v47 = vld [vmem:[#allocation8] ss:$0 sm:$0xff] }
 0x257   : > { %v11587_v44 = vadd.f32 %v2085_v61, %v13606_v21  ;;  %2405 = vmatprep.mubr.f32.mxu0 %v17731_v46 }
 0x258   : > { %17915 = vst [vmem:[#allocation47_spill] sm:$0xff] %v13925_v62  ;;  %v646_v62 = vld [vmem:[%s12765_s30 + $0x8b8] sm:$0xff] }
 0x259   : > { %v2569_v14 = vadd.f32 %v11587_v44, %v13927_v60  ;;  %v2089_v27 = vpop.f32.mrb[2].mxu0  ;;  %1861 = vmatmul.mubr.f32.gmra.mrb[108].mxu1 %v639_v28  ;;  %v650_v44 = vld [vmem:[%s12765_s30 + $0x8d8] sm:$0xff] }
 0x25a   : > { %v13936_v20 = vadd.f32 %v2089_v27, %v13612_v12  ;;  %v2091_v49 = vpop.f32.mrb[3].mxu0  ;;  %2406 = vmatmul.mubr.f32.gmra.mrb[108].mxu0 %v641_v56  ;;  %1866 = vmatprep.mubr.f32.mxu1 %v645_v42 }
 0x25b   : > { %v2649_v21 = vmax.f32 %v2569_v14, 0.0  ;;  %v11589_v61 = vadd.f32 %v2091_v49, %v13614_v4  ;;  %2411 = vmatprep.mubr.f32.mxu0 %v17731_v46  ;;  %v649_v4 = vld [vmem:[%s12765_s30 + $0x8d0] sm:$0xff] }
 0x25c   : > { %17916 = vst [vmem:[#allocation48_spill] sm:$0xff] %v13936_v20  ;;  %v17917_v20 = vmov 0.0  }
 0x25d   : > { %v2570_v12 = vadd.f32 %v11589_v61, %v13927_v60  ;;  %v2095_v27 = vpop.f32.mrb[4].mxu0  ;;  %1867 = vmatmul.mubr.f32.gmra.mrb[110].mxu1 %v644_v13  ;;  %v2736_v42 = vmul.f32 %v13939_v47, %v2649_v21  ;;  %v651_v61 = vld [vmem:[%s12765_s30 + $0x8e0] sm:$0xff] }
 0x25e   : > { %v13948_v28 = vadd.f32 %v2095_v27, %v13620_v19  ;;  %v2097_v56 = vpop.f32.mrb[5].mxu0  ;;  %2412 = vmatmul.mubr.f32.gmra.mrb[110].mxu0 %v646_v62  ;;  %1872 = vmatprep.mubr.f32.mxu1 %v650_v44  ;;  %v655_v13 = vld [vmem:[%s12765_s30 + $0x900] sm:$0xff] }
 0x25f   : > { %v2650_v14 = vmax.f32 %v2570_v12, 0.0  ;;  %v11591_v49 = vadd.f32 %v2097_v56, %v13622_v29  ;;  %v2817_v46 = vsel %vm2816_vm0, %v2736_v42, 0.0  ;;  %2417 = vmatprep.mubr.f32.mxu0 %v17917_v20  ;;  %v654_v29 = vld [vmem:[%s12765_s30 + $0x8f8] sm:$0xff] }
 0x260   : > { %2818 = vadd.xlane.f32.xlu0 %v2817_v46  ;;  %v656_v46 = vld [vmem:[%s12765_s30 + $0x908] sm:$0xff] }
 0x261   : > { %v2571_v19 = vadd.f32 %v11591_v49, %v13927_v60  ;;  %v2101_v21 = vpop.f32.mrb[6].mxu0  ;;  %1873 = vmatmul.mubr.f32.gmra.mrb[112].mxu1 %v649_v4  ;;  %v2737_v62 = vmul.f32 %v13939_v47, %v2650_v14  ;;  %v660_v4 = vld [vmem:[%s12765_s30 + $0x928] sm:$0xff] }
 0x262   : > { %v13959_v44 = vadd.f32 %v2101_v21, %v13628_v35  ;;  %v2103_v12 = vpop.f32.mrb[7].mxu0  ;;  %2418 = vmatmul.mubr.f32.gmra.mrb[112].mxu0 %v651_v61  ;;  %1878 = vmatprep.mubr.f32.mxu1 %v655_v13 }
 0x263   : > { %v2651_v27 = vmax.f32 %v2571_v19, 0.0  ;;  %v11593_v42 = vadd.f32 %v2103_v12, %v13630_v37  ;;  %v2820_v56 = vsel %vm2816_vm0, %v2737_v62, 0.0  ;;  %2423 = vmatprep.mubr.f32.mxu0 %v17917_v20  ;;  %v659_v37 = vld [vmem:[%s12765_s30 + $0x920] sm:$0xff]  ;;  %v661_v12 = vld [vmem:[%s12765_s30 + $0x930] sm:$0xff] }
 0x264   : > { %2821 = vadd.xlane.f32.xlu0 %v2820_v56 }
 0x265   : > { %v2572_v35 = vadd.f32 %v11593_v42, %v13927_v60  ;;  %v2107_v14 = vpop.f32.mrb[8].mxu0  ;;  %1879 = vmatmul.mubr.f32.gmra.mrb[114].mxu1 %v654_v29  ;;  %v2738_v49 = vmul.f32 %v13939_v47, %v2651_v27  ;;  %v665_v29 = vld [vmem:[%s12765_s30 + $0x950] sm:$0xff] }
 0x266   : > { %v13970_v61 = vadd.f32 %v2107_v14, %v13636_v45  ;;  %v2109_v13 = vpop.f32.mrb[9].mxu0  ;;  %2424 = vmatmul.mubr.f32.gmra.mrb[114].mxu0 %v656_v46  ;;  %1884 = vmatprep.mubr.f32.mxu1 %v660_v4 }
 0x267   : > { %v2652_v19 = vmax.f32 %v2572_v35, 0.0  ;;  %v11595_v21 = vadd.f32 %v2109_v13, %v13638_v33  ;;  %v2823_v62 = vsel %vm2816_vm0, %v2738_v49, 0.0  ;;  %2429 = vmatprep.mubr.f32.mxu0 %v17917_v20  ;;  %v664_v33 = vld [vmem:[%s12765_s30 + $0x948] sm:$0xff]  ;;  %v666_v49 = vld [vmem:[%s12765_s30 + $0x958] sm:$0xff] }
 0x268   : > { %2824 = vadd.xlane.f32.xlu1 %v2823_v62  ;;  %v670_v13 = vld [vmem:[%s12765_s30 + $0x978] sm:$0xff] }
 0x269   : > { %v2573_v45 = vadd.f32 %v11595_v21, %v13927_v60  ;;  %v2113_v27 = vpop.f32.mrb[10].mxu0  ;;  %1885 = vmatmul.mubr.f32.gmra.mrb[116].mxu1 %v659_v37  ;;  %v2739_v42 = vmul.f32 %v13939_v47, %v2652_v19 }
 0x26a   : > { %v13981_v56 = vadd.f32 %v2113_v27, %v13644_v25  ;;  %v2115_v46 = vpop.f32.mrb[11].mxu0  ;;  %2430 = vmatmul.mubr.f32.gmra.mrb[116].mxu0 %v661_v12  ;;  %1890 = vmatprep.mubr.f32.mxu1 %v665_v29  ;;  %v671_v27 = vld [vmem:[%s12765_s30 + $0x980] sm:$0xff] }
 0x26b   : > { %v2653_v4 = vmax.f32 %v2573_v45, 0.0  ;;  %v11597_v35 = vadd.f32 %v2115_v46, %v13646_v30  ;;  %v2826_v14 = vsel %vm2816_vm0, %v2739_v42, 0.0  ;;  %2435 = vmatprep.mubr.f32.mxu0 %v17917_v20  ;;  %v669_v30 = vld [vmem:[%s12765_s30 + $0x970] sm:$0xff]  ;;  %v675_v42 = vld [vmem:[%s12765_s30 + $0x9a0] sm:$0xff] }
 0x26c   : > { %2827 = vadd.xlane.f32.xlu1 %v2826_v14 }
 0x26d   : > { %v2574_v25 = vadd.f32 %v11597_v35, %v13927_v60  ;;  %v2119_v37 = vpop.f32.mrb[12].mxu0  ;;  %1891 = vmatmul.mubr.f32.gmra.mrb[118].mxu1 %v664_v33  ;;  %v2740_v19 = vmul.f32 %v13939_v47, %v2653_v4 }
 0x26e   : > { %v13992_v21 = vadd.f32 %v2119_v37, %v13652_v57  ;;  %v2121_v62 = vpop.f32.mrb[13].mxu0  ;;  %2436 = vmatmul.mubr.f32.gmra.mrb[118].mxu0 %v666_v49  ;;  %1896 = vmatprep.mubr.f32.mxu1 %v670_v13  ;;  %v680_v37 = vld [vmem:[%s12765_s30 + $0x9c8] sm:$0xff] }
 0x26f   : > { %v2654_v12 = vmax.f32 %v2574_v25, 0.0  ;;  %v11599_v29 = vadd.f32 %v2121_v62, %v13654_v58  ;;  %v2829_v45 = vsel %vm2816_vm0, %v2740_v19, 0.0  ;;  %2441 = vmatprep.mubr.f32.mxu0 %v17917_v20  ;;  %v674_v58 = vld [vmem:[%s12765_s30 + $0x998] sm:$0xff]  ;;  %v676_v25 = vld [vmem:[%s12765_s30 + $0x9a8] sm:$0xff] }
 0x270   : > { %2830 = vadd.xlane.f32.xlu0 %v2829_v45 }
 0x271   : > { %v2575_v57 = vadd.f32 %v11599_v29, %v13927_v60  ;;  %v2125_v46 = vpop.f32.mrb[14].mxu0  ;;  %1897 = vmatmul.mubr.f32.gmra.mrb[120].mxu1 %v669_v30  ;;  %v2741_v33 = vmul.f32 %v13939_v47, %v2654_v12 }
 0x272   : > { %v14003_v4 = vadd.f32 %v2125_v46, %v13660_v0  ;;  %v2127_v35 = vpop.f32.mrb[15].mxu0  ;;  %2442 = vmatmul.mubr.f32.gmra.mrb[120].mxu0 %v671_v27  ;;  %1902 = vmatprep.mubr.f32.mxu1 %v675_v42  ;;  %v681_v42 = vld [vmem:[%s12765_s30 + $0x9d0] sm:$0xff] }
 0x273   : > { %v2655_v14 = vmax.f32 %v2575_v57, 0.0  ;;  %v11601_v49 = vadd.f32 %v2127_v35, %v13662_v38  ;;  %v2832_v13 = vsel %vm2816_vm0, %v2741_v33, 0.0  ;;  %2447 = vmatprep.mubr.f32.mxu0 %v17917_v20  ;;  %v679_v38 = vld [vmem:[%s12765_s30 + $0x9c0] sm:$0xff]  ;;  %v685_v57 = vld [vmem:[%s12765_s30 + $0x9f0] sm:$0xff] }
 0x274   : > { %2833 = vadd.xlane.f32.xlu1 %v2832_v13 }
 0x275   : > { %v2576_v0 = vadd.f32 %v11601_v49, %v13927_v60  ;;  %v2131_v19 = vpop.f32.mrb[16].mxu0  ;;  %1903 = vmatmul.mubr.f32.gmra.mrb[122].mxu1 %v674_v58  ;;  %v2742_v62 = vmul.f32 %v13939_v47, %v2655_v14 }
 0x276   : > { %v14014_v30 = vadd.f32 %v2131_v19, %v13668_v2  ;;  %v2133_v12 = vpop.f32.mrb[17].mxu0  ;;  %2448 = vmatmul.mubr.f32.gmra.mrb[122].mxu0 %v676_v25  ;;  %1908 = vmatprep.mubr.f32.mxu1 %v680_v37  ;;  %v686_v25 = vld [vmem:[%s12765_s30 + $0x9f8] sm:$0xff] }
 0x277   : > { %v2656_v29 = vmax.f32 %v2576_v0, 0.0  ;;  %v11603_v45 = vadd.f32 %v2133_v12, %v13670_v6  ;;  %v2835_v27 = vsel %vm2816_vm0, %v2742_v62, 0.0  ;;  %2453 = vmatprep.mubr.f32.mxu0 %v17917_v20  ;;  %v684_v6 = vld [vmem:[%s12765_s30 + $0x9e8] sm:$0xff]  ;;  %v690_v37 = vld [vmem:[%s12765_s30 + $0xa18] sm:$0xff] }
 0x278   : > { %2836 = vadd.xlane.f32.xlu0 %v2835_v27  ;;  %v691_v27 = vld [vmem:[%s12765_s30 + $0xa20] sm:$0xff] }
 0x279   : > { %v2577_v2 = vadd.f32 %v11603_v45, %v13927_v60  ;;  %v2137_v46 = vpop.f32.mrb[18].mxu0  ;;  %1909 = vmatmul.mubr.f32.gmra.mrb[124].mxu1 %v679_v38  ;;  %v2743_v33 = vmul.f32 %v13939_v47, %v2656_v29 }
 0x27a   : > { %v14025_v35 = vadd.f32 %v2137_v46, %v13676_v24  ;;  %v2139_v58 = vpop.f32.mrb[19].mxu0  ;;  %2454 = vmatmul.mubr.f32.gmra.mrb[124].mxu0 %v681_v42  ;;  %1914 = vmatprep.mubr.f32.mxu1 %v685_v57  ;;  %v695_v42 = vld [vmem:[%s12765_s30 + $0xa40] sm:$0xff] }
 0x27b   : > { %v2657_v14 = vmax.f32 %v2577_v2, 0.0  ;;  %v11605_v49 = vadd.f32 %v2139_v58, %v13678_v32  ;;  %v2838_v13 = vsel %vm2816_vm0, %v2743_v33, 0.0  ;;  %2459 = vmatprep.mubr.f32.mxu0 %v17917_v20  ;;  %v689_v32 = vld [vmem:[%s12765_s30 + $0xa10] sm:$0xff] }
 0x27c   : > { %2839 = vadd.xlane.f32.xlu1 %v2838_v13  ;;  %v700_v13 = vld [vmem:[%s12765_s30 + $0xa68] sm:$0xff] }
 0x27d   : > { %v2578_v24 = vadd.f32 %v11605_v49, %v13927_v60  ;;  %v2143_v0 = vpop.f32.mrb[20].mxu0  ;;  %1915 = vmatmul.mubr.f32.gmra.mrb[126].mxu1 %v684_v6  ;;  %v2744_v19 = vmul.f32 %v13939_v47, %v2657_v14  ;;  %v696_v49 = vld [vmem:[%s12765_s30 + $0xa48] sm:$0xff] }
 0x27e   : > { %v14036_v62 = vadd.f32 %v2143_v0, %v13684_v50  ;;  %v2145_v12 = vpop.f32.mrb[21].mxu0  ;;  %2460 = vmatmul.mubr.f32.gmra.mrb[126].mxu0 %v686_v25  ;;  %1920 = vmatprep.mubr.f32.mxu1 %v690_v37 }
 0x27f   : > { %v2658_v38 = vmax.f32 %v2578_v24, 0.0  ;;  %v11607_v29 = vadd.f32 %v2145_v12, %v13686_v51  ;;  %v2841_v45 = vsel %vm2816_vm0, %v2744_v19, 0.0  ;;  %2465 = vmatprep.mubr.f32.mxu0 %v17917_v20  ;;  %v694_v51 = vld [vmem:[%s12765_s30 + $0xa38] sm:$0xff] }
 0x280   : > { %2842 = vadd.xlane.f32.xlu0 %v2841_v45 }
 0x281   : > { %v2579_v50 = vadd.f32 %v11607_v29, %v13927_v60  ;;  %v2149_v57 = vpop.f32.mrb[22].mxu0  ;;  %1921 = vmatmul.mubr.f32.gmra.mrb[128].mxu1 %v689_v32  ;;  %v2745_v2 = vmul.f32 %v13939_v47, %v2658_v38  ;;  %v701_v38 = vld [vmem:[%s12765_s30 + $0xa70] sm:$0xff] }
 0x282   : > { %v14047_v46 = vadd.f32 %v2149_v57, %v13692_v11  ;;  %v2151_v33 = vpop.f32.mrb[23].mxu0  ;;  %2466 = vmatmul.mubr.f32.gmra.mrb[128].mxu0 %v691_v27  ;;  %1926 = vmatprep.mubr.f32.mxu1 %v695_v42  ;;  %v705_v29 = vld [vmem:[%s12765_s30 + $0xa90] sm:$0xff] }
 0x283   : > { %v2659_v58 = vmax.f32 %v2579_v50, 0.0  ;;  %v11609_v6 = vadd.f32 %v2151_v33, %v13694_v7  ;;  %v2844_v14 = vsel %vm2816_vm0, %v2745_v2, 0.0  ;;  %2471 = vmatprep.mubr.f32.mxu0 %v17917_v20  ;;  %v699_v7 = vld [vmem:[%s12765_s30 + $0xa60] sm:$0xff] }
 0x284   : > { %2845 = vadd.xlane.f32.xlu1 %v2844_v14 }
 0x285   : > { %v2580_v11 = vadd.f32 %v11609_v6, %v13927_v60  ;;  %v2155_v25 = vpop.f32.mrb[24].mxu0  ;;  %1927 = vmatmul.mubr.f32.gmra.mrb[130].mxu1 %v694_v51  ;;  %v2746_v37 = vmul.f32 %v13939_v47, %v2659_v58  ;;  %v706_v51 = vld [vmem:[%s12765_s30 + $0xa98] sm:$0xff] }
 0x286   : > { %v14058_v24 = vadd.f32 %v2155_v25, %v13700_v18  ;;  %v2157_v0 = vpop.f32.mrb[25].mxu0  ;;  %2472 = vmatmul.mubr.f32.gmra.mrb[130].mxu0 %v696_v49  ;;  %1932 = vmatprep.mubr.f32.mxu1 %v700_v13  ;;  %v710_v58 = vld [vmem:[%s12765_s30 + $0xab8] sm:$0xff] }
 0x287   : > { %v2660_v19 = vmax.f32 %v2580_v11, 0.0  ;;  %v11611_v12 = vadd.f32 %v2157_v0, %v13702_v36  ;;  %v2847_v32 = vsel %vm2816_vm0, %v2746_v37, 0.0  ;;  %2477 = vmatprep.mubr.f32.mxu0 %v17917_v20  ;;  %v704_v36 = vld [vmem:[%s12765_s30 + $0xa88] sm:$0xff]  ;;  %v711_v0 = vld [vmem:[%s12765_s30 + $0xac0] sm:$0xff] }
 0x288   : > { %2848 = vadd.xlane.f32.xlu0 %v2847_v32 }
 0x289   : > { %v2581_v18 = vadd.f32 %v11611_v12, %v13927_v60  ;;  %v2161_v45 = vpop.f32.mrb[26].mxu0  ;;  %1933 = vmatmul.mubr.f32.gmra.mrb[132].mxu1 %v699_v7  ;;  %v2747_v27 = vmul.f32 %v13939_v47, %v2660_v19  ;;  %v715_v7 = vld [vmem:[%s12765_s30 + $0xae0] sm:$0xff] }
 0x28a   : > { %v14069_v42 = vadd.f32 %v2161_v45, %v13708_v22  ;;  %v2163_v50 = vpop.f32.mrb[27].mxu0  ;;  %2478 = vmatmul.mubr.f32.gmra.mrb[132].mxu0 %v701_v38  ;;  %1938 = vmatprep.mubr.f32.mxu1 %v705_v29 }
 0x28b   : > { %v2661_v57 = vmax.f32 %v2581_v18, 0.0  ;;  %v11613_v2 = vadd.f32 %v2163_v50, %v13710_v26  ;;  %v2850_v33 = vsel %vm2816_vm0, %v2747_v27, 0.0  ;;  %2483 = vmatprep.mubr.f32.mxu0 %v17917_v20  ;;  %v709_v26 = vld [vmem:[%s12765_s30 + $0xab0] sm:$0xff]  ;;  %v716_v27 = vld [vmem:[%s12765_s30 + $0xae8] sm:$0xff] }
 0x28c   : > { %2851 = vadd.xlane.f32.xlu1 %v2850_v33  ;;  %v720_v50 = vld [vmem:[%s12765_s30 + $0xb08] sm:$0xff] }
 0x28d   : > { %v2582_v22 = vadd.f32 %v11613_v2, %v13927_v60  ;;  %v2167_v6 = vpop.f32.mrb[28].mxu0  ;;  %1939 = vmatmul.mubr.f32.gmra.mrb[134].mxu1 %v704_v36  ;;  %v2748_v14 = vmul.f32 %v13939_v47, %v2661_v57 }
 0x28e   : > { %v14080_v49 = vadd.f32 %v2167_v6, %v13716_v17  ;;  %v2169_v13 = vpop.f32.mrb[29].mxu0  ;;  %2484 = vmatmul.mubr.f32.gmra.mrb[134].mxu0 %v706_v51  ;;  %1944 = vmatprep.mubr.f32.mxu1 %v710_v58  ;;  %v721_v6 = vld [vmem:[%s12765_s30 + $0xb10] sm:$0xff] }
 0x28f   : > { %v2662_v11 = vmax.f32 %v2582_v22, 0.0  ;;  %v11615_v25 = vadd.f32 %v2169_v13, %v13718_v34  ;;  %v2853_v37 = vsel %vm2816_vm0, %v2748_v14, 0.0  ;;  %2489 = vmatprep.mubr.f32.mxu0 %v17917_v20  ;;  %v714_v34 = vld [vmem:[%s12765_s30 + $0xad8] sm:$0xff]  ;;  %v725_v14 = vld [vmem:[%s12765_s30 + $0xb30] sm:$0xff] }
 0x290   : > { %2854 = vadd.xlane.f32.xlu0 %v2853_v37 }
 0x291   : > { %v2583_v17 = vadd.f32 %v11615_v25, %v13927_v60  ;;  %v2173_v19 = vpop.f32.mrb[30].mxu0  ;;  %1945 = vmatmul.mubr.f32.gmra.mrb[136].mxu1 %v709_v26  ;;  %v2749_v12 = vmul.f32 %v13939_v47, %v2662_v11 }
 0x292   : > { %v14091_v32 = vadd.f32 %v2173_v19, %v13724_v41  ;;  %v2175_v38 = vpop.f32.mrb[31].mxu0  ;;  %2490 = vmatmul.mubr.f32.gmra.mrb[136].mxu0 %v711_v0  ;;  %1950 = vmatprep.mubr.f32.mxu1 %v715_v7  ;;  %v730_v19 = vld [vmem:[%s12765_s30 + $0xb58] sm:$0xff] }
 0x293   : > { %v2663_v29 = vmax.f32 %v2583_v17, 0.0  ;;  %v11617_v18 = vadd.f32 %v2175_v38, %v13726_v48  ;;  %v2856_v45 = vsel %vm2816_vm0, %v2749_v12, 0.0  ;;  %2495 = vmatprep.mubr.f32.mxu0 %v17917_v20  ;;  %v719_v48 = vld [vmem:[%s12765_s30 + $0xb00] sm:$0xff]  ;;  %v726_v17 = vld [vmem:[%s12765_s30 + $0xb38] sm:$0xff] }
 0x294   : > { %2857 = vadd.xlane.f32.xlu1 %v2856_v45 }
 0x295   : > { %v2584_v41 = vadd.f32 %v11617_v18, %v13927_v60  ;;  %v2179_v36 = vpop.f32.mrb[32].mxu0  ;;  %1951 = vmatmul.mubr.f32.gmra.mrb[138].mxu1 %v714_v34  ;;  %v2750_v57 = vmul.f32 %v13939_v47, %v2663_v29 }
 0x296   : > { %v14102_v2 = vadd.f32 %v2179_v36, %v13732_v54  ;;  %v2181_v33 = vpop.f32.mrb[33].mxu0  ;;  %2496 = vmatmul.mubr.f32.gmra.mrb[138].mxu0 %v716_v27  ;;  %1956 = vmatprep.mubr.f32.mxu1 %v720_v50  ;;  %v731_v50 = vld [vmem:[%s12765_s30 + $0xb60] sm:$0xff] }
 0x297   : > { %v2664_v51 = vmax.f32 %v2584_v41, 0.0  ;;  %v11619_v58 = vadd.f32 %v2181_v33, %v13734_v59  ;;  %v2859_v22 = vsel %vm2816_vm0, %v2750_v57, 0.0  ;;  %2501 = vmatprep.mubr.f32.mxu0 %v17917_v20  ;;  %v724_v59 = vld [vmem:[%s12765_s30 + $0xb28] sm:$0xff]  ;;  %v735_v41 = vld [vmem:[%s12765_s30 + $0xb80] sm:$0xff] }
 0x298   : > { %2860 = vadd.xlane.f32.xlu0 %v2859_v22 }
 0x299   : > { %v2585_v54 = vadd.f32 %v11619_v58, %v13927_v60  ;;  %v2185_v13 = vpop.f32.mrb[34].mxu0  ;;  %1957 = vmatmul.mubr.f32.gmra.mrb[140].mxu1 %v719_v48  ;;  %v2751_v26 = vmul.f32 %v13939_v47, %v2664_v51 }
 0x29a   : > { %v14113_v11 = vadd.f32 %v2185_v13, %v13740_v1  ;;  %v2187_v25 = vpop.f32.mrb[35].mxu0  ;;  %2502 = vmatmul.mubr.f32.gmra.mrb[140].mxu0 %v721_v6  ;;  %1962 = vmatprep.mubr.f32.mxu1 %v725_v14  ;;  %v736_v6 = vld [vmem:[%s12765_s30 + $0xb88] sm:$0xff] }
 0x29b   : > { %v2665_v37 = vmax.f32 %v2585_v54, 0.0  ;;  %v11621_v0 = vadd.f32 %v2187_v25, %v13742_v43  ;;  %v2862_v7 = vsel %vm2816_vm0, %v2751_v26, 0.0  ;;  %2507 = vmatprep.mubr.f32.mxu0 %v17917_v20  ;;  %v729_v43 = vld [vmem:[%s12765_s30 + $0xb50] sm:$0xff]  ;;  %v740_v14 = vld [vmem:[%s12765_s30 + $0xba8] sm:$0xff]  ;;  %v12520_v54 = vmov 0  }
 0x29c   : > { %2863 = vadd.xlane.f32.xlu1 %v2862_v7  ;;  %11988 = vset.pattern.permute.xlu0 %v12520_v54 }
 0x29d   : > { %v2586_v1 = vadd.f32 %v11621_v0, %v13927_v60  ;;  %v2191_v12 = vpop.f32.mrb[36].mxu0  ;;  %1963 = vmatmul.mubr.f32.gmra.mrb[142].mxu1 %v724_v59  ;;  %v2752_v38 = vmul.f32 %v13939_v47, %v2665_v37  ;;  %11989 = vset.pattern.permute.xlu1 %v12520_v54  ;;  %v739_v59 = vld [vmem:[%s12765_s30 + $0xba0] sm:$0xff] }
 0x29e   : > { %v14124_v34 = vadd.f32 %v2191_v12, %v13748_v9  ;;  %v2193_v29 = vpop.f32.mrb[37].mxu0  ;;  %2508 = vmatmul.mubr.f32.gmra.mrb[142].mxu0 %v726_v17  ;;  %1968 = vmatprep.mubr.f32.mxu1 %v730_v19  ;;  %v741_v17 = vld [vmem:[%s12765_s30 + $0xbb0] sm:$0xff] }
 0x29f   : > { %v2666_v18 = vmax.f32 %v2586_v1, 0.0  ;;  %v11623_v45 = vadd.f32 %v2193_v29, %v13750_v10  ;;  %v2865_v27 = vsel %vm2816_vm0, %v2752_v38, 0.0  ;;  %2513 = vmatprep.mubr.f32.mxu0 %v17917_v20  ;;  %v734_v10 = vld [vmem:[%s12765_s30 + $0xb78] sm:$0xff]  ;;  %v745_v19 = vld [vmem:[%s12765_s30 + $0xbd0] sm:$0xff] }
 0x2a0   : > { %2866 = vadd.xlane.f32.xlu0 %v2865_v27  ;;  %v746_v27 = vld [vmem:[%s12765_s30 + $0xbd8] sm:$0xff] }
 0x2a1   : > { %v2587_v9 = vadd.f32 %v11623_v45, %v13927_v60  ;;  %v2197_v36 = vpop.f32.mrb[38].mxu0  ;;  %1969 = vmatmul.mubr.f32.gmra.mrb[144].mxu1 %v729_v43  ;;  %v2753_v57 = vmul.f32 %v13939_v47, %v2666_v18 }
 0x2a2   : > { %v14135_v33 = vadd.f32 %v2197_v36, %v13756_v3  ;;  %v2199_v48 = vpop.f32.mrb[39].mxu0  ;;  %2514 = vmatmul.mubr.f32.gmra.mrb[144].mxu0 %v731_v50  ;;  %1974 = vmatprep.mubr.f32.mxu1 %v735_v41  ;;  %v750_v50 = vld [vmem:[%s12765_s30 + $0xbf8] sm:$0xff] }
 0x2a3   : > { %v2667_v51 = vmax.f32 %v2587_v9, 0.0  ;;  %v11625_v58 = vadd.f32 %v2199_v48, %v13758_v16  ;;  %v2868_v22 = vsel %vm2816_vm0, %v2753_v57, 0.0  ;;  %2519 = vmatprep.mubr.f32.mxu0 %v17917_v20 }
 0x2a4   : > { %2869 = vadd.xlane.f32.xlu1 %v2868_v22  ;;  %v755_v22 = vld [vmem:[%s12765_s30 + $0xc20] sm:$0xff] }
 0x2a5   : > { %v2588_v3 = vadd.f32 %v11625_v58, %v13927_v60  ;;  %v2203_v13 = vpop.f32.mrb[40].mxu0  ;;  %1975 = vmatmul.mubr.f32.gmra.mrb[146].mxu1 %v734_v10  ;;  %v2754_v26 = vmul.f32 %v13939_v47, %v2667_v51  ;;  %v751_v58 = vld [vmem:[%s12765_s30 + $0xc00] sm:$0xff] }
 0x2a6   : > { %v14146_v16 = vadd.f32 %v2203_v13, %v13764_v63  ;;  %v2205_v25 = vpop.f32.mrb[41].mxu0  ;;  %2520 = vmatmul.mubr.f32.gmra.mrb[146].mxu0 %v736_v6  ;;  %1980 = vmatprep.mubr.f32.mxu1 %v740_v14 }
 0x2a7   : > { %v2668_v37 = vmax.f32 %v2588_v3, 0.0  ;;  %v11627_v0 = vadd.f32 %v2205_v25, %v13766_v53  ;;  %v2871_v7 = vsel %vm2816_vm0, %v2754_v26, 0.0  ;;  %2525 = vmatprep.mubr.f32.mxu0 %v17917_v20  ;;  %v744_v53 = vld [vmem:[%s12765_s30 + $0xbc8] sm:$0xff] }
 0x2a8   : > { %2872 = vadd.xlane.f32.xlu0 %v2871_v7 }
 0x2a9   : > { %v2589_v63 = vadd.f32 %v11627_v0, %v13927_v60  ;;  %v2209_v1 = vpop.f32.mrb[42].mxu0  ;;  %1981 = vmatmul.mubr.f32.gmra.mrb[148].mxu1 %v739_v59  ;;  %v2755_v12 = vmul.f32 %v13939_v47, %v2668_v37  ;;  %v756_v59 = vld [vmem:[%s12765_s30 + $0xc28] sm:$0xff] }
 0x2aa   : > { %v14157_v38 = vadd.f32 %v2209_v1, %v13772_v39  ;;  %v2211_v29 = vpop.f32.mrb[43].mxu0  ;;  %2526 = vmatmul.mubr.f32.gmra.mrb[148].mxu0 %v741_v17  ;;  %1986 = vmatprep.mubr.f32.mxu1 %v745_v19  ;;  %v760_v37 = vld [vmem:[%s12765_s30 + $0xc48] sm:$0xff] }
 0x2ab   : > { %v2669_v43 = vmax.f32 %v2589_v63, 0.0  ;;  %v11629_v18 = vadd.f32 %v2211_v29, %v13774_v40  ;;  %v2874_v45 = vsel %vm2816_vm0, %v2755_v12, 0.0  ;;  %2531 = vmatprep.mubr.f32.mxu0 %v17917_v20  ;;  %v749_v40 = vld [vmem:[%s12765_s30 + $0xbf0] sm:$0xff] }
 0x2ac   : > { %2875 = vadd.xlane.f32.xlu1 %v2874_v45  ;;  %v761_v29 = vld [vmem:[%s12765_s30 + $0xc50] sm:$0xff] }
 0x2ad   : > { %v2590_v39 = vadd.f32 %v11629_v18, %v13927_v60  ;;  %v2215_v41 = vpop.f32.mrb[44].mxu0  ;;  %1987 = vmatmul.mubr.f32.gmra.mrb[150].mxu1 %v744_v53  ;;  %v2756_v9 = vmul.f32 %v13939_v47, %v2669_v43  ;;  %v765_v53 = vld [vmem:[%s12765_s30 + $0xc70] sm:$0xff] }
 0x2ae   : > { %v14168_v36 = vadd.f32 %v2215_v41, %v13780_v52  ;;  %v2217_v57 = vpop.f32.mrb[45].mxu0  ;;  %2532 = vmatmul.mubr.f32.gmra.mrb[150].mxu0 %v746_v27  ;;  %1992 = vmatprep.mubr.f32.mxu1 %v750_v50 }
 0x2af   : > { %v2670_v48 = vmax.f32 %v2590_v39, 0.0  ;;  %v11631_v10 = vadd.f32 %v2217_v57, %v13782_v55  ;;  %v2877_v51 = vsel %vm2816_vm0, %v2756_v9, 0.0  ;;  %2537 = vmatprep.mubr.f32.mxu0 %v17917_v20  ;;  %v754_v55 = vld [vmem:[%s12765_s30 + $0xc18] sm:$0xff]  ;;  %v17921_v39 = vld [vmem:[#allocation18_spill] sm:$0xff] }
 0x2b0   : > { %2878 = vadd.xlane.f32.xlu0 %v2877_v51  ;;  %v766_v57 = vld [vmem:[%s12765_s30 + $0xc78] sm:$0xff] }
 0x2b1   : > { %v2591_v52 = vadd.f32 %v11631_v10, %v13927_v60  ;;  %v2221_v6 = vpop.f32.mrb[46].mxu0  ;;  %1993 = vmatmul.mubr.f32.gmra.mrb[152].mxu1 %v749_v40  ;;  %v2757_v14 = vmul.f32 %v13939_v47, %v2670_v48  ;;  %v17922_v10 = vld [vmem:[#allocation19_spill] sm:$0xff] }
 0x2b2   : > { %v14179_v54 = vadd.f32 %v2221_v6, %v13788_v5  ;;  %v2223_v3 = vpop.f32.mrb[47].mxu0  ;;  %2538 = vmatmul.mubr.f32.gmra.mrb[152].mxu0 %v751_v58  ;;  %1998 = vmatprep.mubr.f32.mxu1 %v755_v22 }
 0x2b3   : > { %v2671_v13 = vmax.f32 %v2591_v52, 0.0  ;;  %v11633_v26 = vadd.f32 %v2223_v3, %v13790_v8  ;;  %v2880_v25 = vsel %vm2816_vm0, %v2757_v14, 0.0  ;;  %2543 = vmatprep.mubr.f32.mxu0 %v17917_v20  ;;  %v759_v8 = vld [vmem:[%s12765_s30 + $0xc40] sm:$0xff]  ;;  %v17924_v52 = vld [vmem:[#allocation20_spill] sm:$0xff] }
 0x2b4   : > { %17918 = vst [vmem:[#allocation49_spill] sm:$0xff] %v14179_v54  ;;  %2881 = vadd.xlane.f32.xlu1 %v2880_v25 }
 0x2b5   : > { %v2592_v5 = vadd.f32 %v11633_v26, %v13927_v60  ;;  %v2227_v0 = vpop.f32.mrb[48].mxu0  ;;  %1999 = vmatmul.mubr.f32.gmra.mrb[154].mxu1 %v754_v55  ;;  %v2758_v7 = vmul.f32 %v13939_v47, %v2671_v13  ;;  %v17925_v13 = vld [vmem:[#allocation21_spill] sm:$0xff] }
 0x2b6   : > { %v14190_v17 = vadd.f32 %v2227_v0, %v13796_v23  ;;  %v2229_v19 = vpop.f32.mrb[49].mxu0  ;;  %2544 = vmatmul.mubr.f32.gmra.mrb[154].mxu0 %v756_v59  ;;  %2004 = vmatprep.mubr.f32.mxu1 %v760_v37  ;;  %v17927_v37 = vld [vmem:[#allocation22_spill] sm:$0xff] }
 0x2b7   : > { %v2672_v63 = vmax.f32 %v2592_v5, 0.0  ;;  %v11635_v1 = vadd.f32 %v2229_v19, %v13798_v15  ;;  %v2883_v12 = vsel %vm2816_vm0, %v2758_v7, 0.0  ;;  %2549 = vmatprep.mubr.f32.mxu0 %v17917_v20  ;;  %v764_v15 = vld [vmem:[%s12765_s30 + $0xc68] sm:$0xff]  ;;  %s3057_s30 = sld [smem:[#allocation2]] }
 0x2b8   : > { %17919 = vst [vmem:[#allocation50_spill] sm:$0xff] %v14190_v17  ;;  %2884 = vadd.xlane.f32.xlu0 %v2883_v12 }
 0x2b9   : > { %v2593_v43 = vadd.f32 %v11635_v1, %v13927_v60  ;;  %v2233_v23 = vpop.f32.mrb[50].mxu0  ;;  %2005 = vmatmul.mubr.f32.gmra.mrb[156].mxu1 %v759_v8  ;;  %v2759_v18 = vmul.f32 %v13939_v47, %v2672_v63  ;;  %v17928_v63 = vld [vmem:[#allocation23_spill] sm:$0xff] }
 0x2ba   : > { %v14201_v45 = vadd.f32 %v2233_v23, %v13804_v31  ;;  %v2235_v27 = vpop.f32.mrb[51].mxu0  ;;  %2550 = vmatmul.mubr.f32.gmra.mrb[156].mxu0 %v761_v29  ;;  %2010 = vmatprep.mubr.f32.mxu1 %v765_v53  ;;  %v17930_v53 = vld [vmem:[#allocation24_spill] sm:$0xff] }
 0x2bb   : > { %v2673_v50 = vmax.f32 %v2593_v43, 0.0  ;;  %v11637_v41 = vadd.f32 %v2235_v27, %v17921_v39  ;;  %v2886_v9 = vsel %vm2816_vm0, %v2759_v18, 0.0  ;;  %2555 = vmatprep.mubr.f32.mxu0 %v17917_v20 }
 0x2bc   : > { %17920 = vst [vmem:[#allocation51_spill] sm:$0xff] %v14201_v45  ;;  %2887 = vadd.xlane.f32.xlu1 %v2886_v9 }
 0x2bd   : > { %v2594_v40 = vadd.f32 %v11637_v41, %v13927_v60  ;;  %v2239_v48 = vpop.f32.mrb[52].mxu0  ;;  %2011 = vmatmul.mubr.f32.gmra.mrb[158].mxu1 %v764_v15  ;;  %v2760_v31 = vmul.f32 %v13939_v47, %v2673_v50  ;;  %v17931_v50 = vld [vmem:[#allocation25_spill] sm:$0xff] }
 0x2be   : > { %v14211_v51 = vadd.f32 %v2239_v48, %v17922_v10  ;;  %v2241_v58 = vpop.f32.mrb[53].mxu0  ;;  %2556 = vmatmul.mubr.f32.gmra.mrb[158].mxu0 %v766_v57  ;;  %v17933_v57 = vld [vmem:[#allocation26_spill] sm:$0xff] }
 0x2bf   : > { %v2674_v22 = vmax.f32 %v2594_v40, 0.0  ;;  %v11639_v6 = vadd.f32 %v2241_v58, %v17924_v52  ;;  %v2889_v14 = vsel %vm2816_vm0, %v2760_v31, 0.0 }
 0x2c0   : > { %17923 = vst [vmem:[#allocation18_spill] sm:$0xff] %v14211_v51  ;;  %2890 = vadd.xlane.f32.xlu0 %v2889_v14 }
 0x2c1   : > { %v2595_v20 = vadd.f32 %v11639_v6, %v13927_v60  ;;  %v2245_v3 = vpop.f32.mrb[54].mxu0  ;;  %v2761_v55 = vmul.f32 %v13939_v47, %v2674_v22  ;;  %v17934_v22 = vld [vmem:[#allocation27_spill] sm:$0xff] }
 0x2c2   : > { %v14218_v26 = vadd.f32 %v2245_v3, %v17925_v13  ;;  %v2247_v25 = vpop.f32.mrb[55].mxu0 }
 0x2c3   : > { %v2675_v59 = vmax.f32 %v2595_v20, 0.0  ;;  %v11641_v5 = vadd.f32 %v2247_v25, %v17927_v37  ;;  %v2892_v0 = vsel %vm2816_vm0, %v2761_v55, 0.0  ;;  %v17936_v20 = vld [vmem:[#allocation28_spill] sm:$0xff]  ;;  %v17937_v37 = vld [vmem:[#allocation29_spill] sm:$0xff] }
 0x2c4   : > { %17926 = vst [vmem:[#allocation19_spill] sm:$0xff] %v14218_v26  ;;  %2893 = vadd.xlane.f32.xlu1 %v2892_v0 }
 0x2c5   : > { %v2596_v7 = vadd.f32 %v11641_v5, %v13927_v60  ;;  %v2251_v19 = vpop.f32.mrb[56].mxu0  ;;  %v2762_v8 = vmul.f32 %v13939_v47, %v2675_v59 }
 0x2c6   : > { %v14225_v1 = vadd.f32 %v2251_v19, %v17928_v63  ;;  %v2253_v12 = vpop.f32.mrb[57].mxu0  ;;  %v17939_v19 = vld [vmem:[#allocation30_spill] sm:$0xff] }
 0x2c7   : > { %v2676_v29 = vmax.f32 %v2596_v7, 0.0  ;;  %v11643_v43 = vadd.f32 %v2253_v12, %v17930_v53  ;;  %v2895_v23 = vsel %vm2816_vm0, %v2762_v8, 0.0 }
 0x2c8   : > { %17929 = vst [vmem:[#allocation20_spill] sm:$0xff] %v14225_v1  ;;  %2896 = vadd.xlane.f32.xlu0 %v2895_v23 }
 0x2c9   : > { %v2597_v18 = vadd.f32 %v11643_v43, %v13927_v60  ;;  %v2257_v27 = vpop.f32.mrb[58].mxu0  ;;  %v2763_v15 = vmul.f32 %v13939_v47, %v2676_v29  ;;  %v17940_v43 = vld [vmem:[#allocation31_spill] sm:$0xff] }
 0x2ca   : > { %v14232_v39 = vadd.f32 %v2257_v27, %v17931_v50  ;;  %v2259_v41 = vpop.f32.mrb[59].mxu0 }
 0x2cb   : > { %v2677_v9 = vmax.f32 %v2597_v18, 0.0  ;;  %v11645_v40 = vadd.f32 %v2259_v41, %v17933_v57  ;;  %v2898_v48 = vsel %vm2816_vm0, %v2763_v15, 0.0  ;;  %v17942_v15 = vld [vmem:[#allocation32_spill] sm:$0xff] }
 0x2cc   : > { %17932 = vst [vmem:[#allocation21_spill] sm:$0xff] %v14232_v39  ;;  %2899 = vadd.xlane.f32.xlu1 %v2898_v48  ;;  %v17943_v48 = vld [vmem:[#allocation33_spill] sm:$0xff] }
 0x2cd   : > { %v2598_v31 = vadd.f32 %v11645_v40, %v13927_v60  ;;  %v2263_v10 = vpop.f32.mrb[60].mxu0  ;;  %v2764_v58 = vmul.f32 %v13939_v47, %v2677_v9 }
 0x2ce   : > { %v14239_v52 = vadd.f32 %v2263_v10, %v17934_v22  ;;  %v2265_v6 = vpop.f32.mrb[61].mxu0  ;;  %v17945_v22 = vld [vmem:[#allocation34_spill] sm:$0xff] }
 0x2cf   : > { %v2678_v14 = vmax.f32 %v2598_v31, 0.0  ;;  %v11647_v3 = vadd.f32 %v2265_v6, %v17936_v20  ;;  %v2901_v55 = vsel %vm2816_vm0, %v2764_v58, 0.0 }
 0x2d0   : > { %17935 = vst [vmem:[#allocation22_spill] sm:$0xff] %v14239_v52  ;;  %2902 = vadd.xlane.f32.xlu0 %v2901_v55 }
 0x2d1   : > { %v2599_v13 = vadd.f32 %v11647_v3, %v13927_v60  ;;  %v2269_v25 = vpop.f32.mrb[62].mxu0  ;;  %v2765_v59 = vmul.f32 %v13939_v47, %v2678_v14 }
 0x2d2   : > { %v14246_v5 = vadd.f32 %v2269_v25, %v17937_v37  ;;  %v2271_v0 = vpop.f32.mrb[63].mxu0 }
 0x2d3   : > { %v2679_v7 = vmax.f32 %v2599_v13, 0.0  ;;  %v11649_v8 = vadd.f32 %v2271_v0, %v17939_v19  ;;  %v2904_v63 = vsel %vm2816_vm0, %v2765_v59, 0.0  ;;  %v17946_v13 = vld [vmem:[#allocation35_spill] sm:$0xff]  ;;  %v17948_v0 = vld [vmem:[#allocation36_spill] sm:$0xff] }
 0x2d4   : > { %17938 = vst [vmem:[#allocation23_spill] sm:$0xff] %v14246_v5  ;;  %2905 = vadd.xlane.f32.xlu1 %v2904_v63 }
 0x2d5   : > { %v2600_v12 = vadd.f32 %v11649_v8, %v13927_v60  ;;  %v2275_v29 = vpop.f32.mrb[64].mxu0  ;;  %v2766_v53 = vmul.f32 %v13939_v47, %v2679_v7 }
 0x2d6   : > { %v14253_v23 = vadd.f32 %v2275_v29, %v17940_v43  ;;  %v2277_v18 = vpop.f32.mrb[65].mxu0  ;;  %v17949_v29 = vld [vmem:[#allocation37_spill] sm:$0xff] }
 0x2d7   : > { %v2680_v27 = vmax.f32 %v2600_v12, 0.0  ;;  %v11651_v50 = vadd.f32 %v2277_v18, %v17942_v15  ;;  %v2907_v41 = vsel %vm2816_vm0, %v2766_v53, 0.0 }
 0x2d8   : > { %17941 = vst [vmem:[#allocation24_spill] sm:$0xff] %v14253_v23  ;;  %2908 = vadd.xlane.f32.xlu0 %v2907_v41 }
 0x2d9   : > { %v2601_v9 = vadd.f32 %v11651_v50, %v13927_v60  ;;  %v2281_v57 = vpop.f32.mrb[66].mxu0  ;;  %v2767_v40 = vmul.f32 %v13939_v47, %v2680_v27  ;;  %v17951_v27 = vld [vmem:[#allocation38_spill] sm:$0xff] }
 0x2da   : > { %v14260_v31 = vadd.f32 %v2281_v57, %v17943_v48  ;;  %v2283_v10 = vpop.f32.mrb[67].mxu0 }
 0x2db   : > { %v2681_v58 = vmax.f32 %v2601_v9, 0.0  ;;  %v11653_v6 = vadd.f32 %v2283_v10, %v17945_v22  ;;  %v2910_v14 = vsel %vm2816_vm0, %v2767_v40, 0.0  ;;  %v17952_v40 = vld [vmem:[#allocation39_spill] sm:$0xff]  ;;  %v17954_v22 = vld [vmem:[#allocation40_spill] sm:$0xff] }
 0x2dc   : > { %17944 = vst [vmem:[#allocation25_spill] sm:$0xff] %v14260_v31  ;;  %2911 = vadd.xlane.f32.xlu1 %v2910_v14 }
 0x2dd   : > { %v2602_v20 = vadd.f32 %v11653_v6, %v13927_v60  ;;  %v2287_v3 = vpop.f32.mrb[68].mxu0  ;;  %v2768_v55 = vmul.f32 %v13939_v47, %v2681_v58 }
 0x2de   : > { %v14267_v25 = vadd.f32 %v2287_v3, %v17946_v13  ;;  %v2289_v59 = vpop.f32.mrb[69].mxu0  ;;  %v17955_v13 = vld [vmem:[#allocation41_spill] sm:$0xff] }
 0x2df   : > { %v2682_v37 = vmax.f32 %v2602_v20, 0.0  ;;  %v11655_v7 = vadd.f32 %v2289_v59, %v17948_v0  ;;  %v2913_v19 = vsel %vm2816_vm0, %v2768_v55, 0.0 }
 0x2e0   : > { %17947 = vst [vmem:[#allocation26_spill] sm:$0xff] %v14267_v25  ;;  %2914 = vadd.xlane.f32.xlu0 %v2913_v19 }
 0x2e1   : > { %v2603_v8 = vadd.f32 %v11655_v7, %v13927_v60  ;;  %v2293_v63 = vpop.f32.mrb[70].mxu0  ;;  %v2769_v12 = vmul.f32 %v13939_v47, %v2682_v37  ;;  %v17957_v7 = vld [vmem:[#allocation42_spill] sm:$0xff] }
 0x2e2   : > { %v14274_v53 = vadd.f32 %v2293_v63, %v17949_v29  ;;  %v2295_v43 = vpop.f32.mrb[71].mxu0  ;;  %v14292_v63 = vstv %s3057_s30 }
 0x2e3   : > { %v2683_v18 = vmax.f32 %v2603_v8, 0.0  ;;  %v11657_v15 = vadd.f32 %v2295_v43, %v17951_v27  ;;  %v2916_v50 = vsel %vm2816_vm0, %v2769_v12, 0.0  ;;  %17958 = vst [vmem:[#allocation30_spill] sm:$0xff] %v14292_v63  ;;  %v14294_v12 = vld [vmem:[#allocation6] ss:$0 sm:$0xff]  ;;  %v17959_v27 = vld [vmem:[#allocation43_spill] sm:$0xff] }
 0x2e4   : > { %17950 = vst [vmem:[#allocation27_spill] sm:$0xff] %v14274_v53  ;;  %2917 = vadd.xlane.f32.xlu1 %v2916_v50 }
 0x2e5   : > { %v2604_v41 = vadd.f32 %v11657_v15, %v13927_v60  ;;  %v2299_v9 = vpop.f32.mrb[72].mxu0  ;;  %v2770_v57 = vmul.f32 %v13939_v47, %v2683_v18 }
 0x2e6   : > { %v14281_v48 = vadd.f32 %v2299_v9, %v17952_v40  ;;  %v2301_v10 = vpop.f32.mrb[73].mxu0 }
 0x2e7   : > { %v2684_v58 = vmax.f32 %v2604_v41, 0.0  ;;  %v11659_v6 = vadd.f32 %v2301_v10, %v17954_v22  ;;  %v2919_v14 = vsel %vm2816_vm0, %v2770_v57, 0.0  ;;  %v17961_v57 = vld [vmem:[#allocation44_spill] sm:$0xff] }
 0x2e8   : > { %17953 = vst [vmem:[#allocation28_spill] sm:$0xff] %v14281_v48  ;;  %2920 = vadd.xlane.f32.xlu0 %v2919_v14 }
 0x2e9   : > { %v2605_v20 = vadd.f32 %v11659_v6, %v13927_v60  ;;  %v2305_v3 = vpop.f32.mrb[74].mxu0  ;;  %v2771_v55 = vmul.f32 %v13939_v47, %v2684_v58 }
 0x2ea   : > { %v14288_v59 = vadd.f32 %v2305_v3, %v17955_v13  ;;  %v2307_v37 = vpop.f32.mrb[75].mxu0  ;;  %v17962_v3 = vld [vmem:[#allocation45_spill] sm:$0xff] }
 0x2eb   : > { %v2685_v0 = vmax.f32 %v2605_v20, 0.0  ;;  %v11661_v19 = vadd.f32 %v2307_v37, %v17957_v7  ;;  %v2922_v8 = vsel %vm2816_vm0, %v2771_v55, 0.0  ;;  %v14305_v20 = vld [vmem:[#allocation8] ss:$0 sm:$0xff]  ;;  %v17964_v7 = vld [vmem:[#allocation46_spill] sm:$0xff] }
 0x2ec   : > { %17956 = vst [vmem:[#allocation29_spill] sm:$0xff] %v14288_v59  ;;  %2923 = vadd.xlane.f32.xlu1 %v2922_v8 }
 0x2ed   : > { %v2606_v29 = vadd.f32 %v14294_v12, %v11661_v19  ;;  %v2311_v60 = vpop.f32.mrb[76].mxu0  ;;  %v2819_v43 = vpop.xlane.xlu0 %2818  ;;  %v2772_v18 = vmul.f32 %v13939_v47, %v2685_v0 }
 0x2ee   : > { %v14299_v15 = vadd.f32 %v2311_v60, %v17959_v27  ;;  %v3059_v50 = vadd.f32 %v14292_v63, %v2819_v43  ;;  %v2313_v41 = vpop.f32.mrb[77].mxu0 }
 0x2ef   : > { %v2686_v9 = vmax.f32 %v2606_v29, 0.0  ;;  %v11663_v40 = vadd.f32 %v2313_v41, %v17961_v57  ;;  %v2925_v10 = vsel %vm2816_vm0, %v2772_v18, 0.0 }
 0x2f0   : > { %17960 = vst [vmem:[#allocation31_spill] sm:$0xff] %v14299_v15  ;;  %v11305_v58 = vmul.f32 -1.442695, %v3059_v50  ;;  %2926 = vadd.xlane.f32.xlu0 %v2925_v10 }
 0x2f1   : > { %v2607_v22 = vadd.f32 %v14294_v12, %v11663_v40  ;;  %v2317_v6 = vpop.f32.mrb[78].mxu0  ;;  %v2822_v14 = vpop.xlane.xlu0 %2821  ;;  %v2773_v47 = vmul.f32 %v14305_v20, %v2686_v9 }
 0x2f2   : > { %11990 = vpow2.f32 %v11305_v58  ;;  %v14309_v55 = vadd.f32 %v2317_v6, %v17962_v3  ;;  %v3060_v13 = vadd.f32 %v14292_v63, %v2822_v14  ;;  %v2319_v37 = vpop.f32.mrb[79].mxu0 }
 0x2f3   : > { %v2687_v0 = vmax.f32 %v2607_v22, 0.0  ;;  %v11665_v19 = vadd.f32 %v2319_v37, %v17964_v7  ;;  %v2928_v8 = vsel %vm2816_vm0, %v2773_v47, 0.0 }
 0x2f4   : > { %17963 = vst [vmem:[#allocation32_spill] sm:$0xff] %v14309_v55  ;;  %v11306_v29 = vmul.f32 -1.442695, %v3060_v13  ;;  %2929 = vadd.xlane.f32.xlu1 %v2928_v8  ;;  %v1778_v60 = vpop.f32.mrb[80].mxu1 }
 0x2f5   : > { %v2608_v43 = vadd.f32 %v14294_v12, %v11665_v19  ;;  %v2323_v18 = vpop.f32.mrb[80].mxu0  ;;  %v2825_v27 = vpop.xlane.xlu1 %2824  ;;  %v2774_v50 = vmul.f32 %v14305_v20, %v2687_v0 }
 0x2f6   : > { %11992 = vpow2.f32 %v11306_v29  ;;  %v3061_v41 = vadd.f32 %v14292_v63, %v2825_v27  ;;  %v14317_v9 = vadd.f32 %v2323_v18, %v1778_v60  ;;  %v1780_v57 = vpop.f32.mrb[81].mxu1  ;;  %v2325_v40 = vpop.f32.mrb[81].mxu0 }
 0x2f7   : > { %v2688_v10 = vmax.f32 %v2608_v43, 0.0  ;;  %v11667_v58 = vadd.f32 %v2325_v40, %v1780_v57  ;;  %v2931_v22 = vsel %vm2816_vm0, %v2774_v50, 0.0 }
 0x2f8   : > { %17965 = vst [vmem:[#allocation33_spill] sm:$0xff] %v14317_v9  ;;  %v11307_v6 = vmul.f32 -1.442695, %v3061_v41  ;;  %2932 = vadd.xlane.f32.xlu0 %v2931_v22  ;;  %v1784_v14 = vpop.f32.mrb[82].mxu1 }
 0x2f9   : > { %v2609_v47 = vadd.f32 %v14294_v12, %v11667_v58  ;;  %v2329_v3 = vpop.f32.mrb[82].mxu0  ;;  %v2828_v13 = vpop.xlane.xlu1 %2827  ;;  %v2775_v37 = vmul.f32 %v14305_v20, %v2688_v10 }
 0x2fa   : > { %11994 = vpow2.f32 %v11307_v6  ;;  %v3062_v0 = vadd.f32 %v14292_v63, %v2828_v13  ;;  %v14323_v7 = vadd.f32 %v2329_v3, %v1784_v14  ;;  %v1786_v19 = vpop.f32.mrb[83].mxu1  ;;  %v2331_v8 = vpop.f32.mrb[83].mxu0  ;;  %v17733_v3 = vlaneseq }
 0x2fb   : > { %v2689_v29 = vmax.f32 %v2609_v47, 0.0  ;;  %v11669_v60 = vadd.f32 %v2331_v8, %v1786_v19  ;;  %v2934_v43 = vsel %vm2816_vm0, %v2775_v37, 0.0 }
 0x2fc   : > { %17966 = vst [vmem:[#allocation34_spill] sm:$0xff] %v14323_v7  ;;  %v11991_v18 = vpop.eup %11990  ;;  %v11308_v27 = vmul.f32 -1.442695, %v3062_v0  ;;  %2935 = vadd.xlane.f32.xlu1 %v2934_v43  ;;  %v1790_v50 = vpop.f32.mrb[84].mxu1 }
 0x2fd   : > { %v3379_v41 = vadd.f32 1.0, %v11991_v18  ;;  %v2610_v57 = vadd.f32 %v14294_v12, %v11669_v60  ;;  %v2335_v40 = vpop.f32.mrb[84].mxu0  ;;  %v2831_v10 = vpop.xlane.xlu0 %2830  ;;  %v2776_v58 = vmul.f32 %v14305_v20, %v2689_v29 }
 0x2fe   : > { %11996 = vpow2.f32 %v11308_v27  ;;  %v3063_v22 = vadd.f32 %v14292_v63, %v2831_v10  ;;  %v14329_v6 = vadd.f32 %v2335_v40, %v1790_v50  ;;  %v1792_v14 = vpop.f32.mrb[85].mxu1  ;;  %v2337_v47 = vpop.f32.mrb[85].mxu0 }
 0x2ff   : > { %11998 = vrcp.f32 %v3379_v41  ;;  %v2690_v13 = vmax.f32 %v2610_v57, 0.0  ;;  %v11671_v37 = vadd.f32 %v2337_v47, %v1792_v14  ;;  %v2937_v0 = vsel %vm2816_vm0, %v2776_v58, 0.0 }
 0x300   : > { %17967 = vst [vmem:[#allocation35_spill] sm:$0xff] %v14329_v6  ;;  %v11993_v19 = vpop.eup %11992  ;;  %v11309_v8 = vmul.f32 -1.442695, %v3063_v22  ;;  %2938 = vadd.xlane.f32.xlu0 %v2937_v0  ;;  %v1796_v60 = vpop.f32.mrb[86].mxu1  ;;  %v14338_v58 = vshrl.u32 %v17733_v3, 7 }
 0x301   : > { %v3380_v43 = vadd.f32 1.0, %v11993_v19  ;;  %v2611_v29 = vadd.f32 %v14294_v12, %v11671_v37  ;;  %v2341_v18 = vpop.f32.mrb[86].mxu0  ;;  %v2834_v27 = vpop.xlane.xlu1 %2833  ;;  %v2777_v50 = vmul.f32 %v14305_v20, %v2690_v13 }
 0x302   : > { %12000 = vpow2.f32 %v11309_v8  ;;  %v3064_v40 = vadd.f32 %v14292_v63, %v2834_v27  ;;  %v14335_v10 = vadd.f32 %v2341_v18, %v1796_v60  ;;  %v1798_v41 = vpop.f32.mrb[87].mxu1  ;;  %v2343_v57 = vpop.f32.mrb[87].mxu0  ;;  %17969 = vst [vmem:[#allocation37_spill] sm:$0xff] %v14338_v58 }
 0x303   : > { %12002 = vrcp.f32 %v3380_v43  ;;  %v2691_v22 = vmax.f32 %v2611_v29, 0.0  ;;  %v11673_v14 = vadd.f32 %v2343_v57, %v1798_v41  ;;  %v2940_v47 = vsel %vm2816_vm0, %v2777_v50, 0.0 }
 0x304   : > { %17968 = vst [vmem:[#allocation36_spill] sm:$0xff] %v14335_v10  ;;  %v11995_v37 = vpop.eup %11994  ;;  %v11310_v0 = vmul.f32 -1.442695, %v3064_v40  ;;  %2941 = vadd.xlane.f32.xlu1 %v2940_v47  ;;  %v1802_v13 = vpop.f32.mrb[88].mxu1  ;;  %v14347_v50 = vsub.s32 0, %v14338_v58 }
 0x305   : > { %v3381_v19 = vadd.f32 1.0, %v11995_v37  ;;  %v2612_v8 = vadd.f32 %v14294_v12, %v11673_v14  ;;  %v2347_v60 = vpop.f32.mrb[88].mxu0  ;;  %v2837_v18 = vpop.xlane.xlu0 %2836  ;;  %v2778_v27 = vmul.f32 %v14305_v20, %v2691_v22 }
 0x306   : > { %12004 = vpow2.f32 %v11310_v0  ;;  %v3065_v3 = vadd.f32 %v14292_v63, %v2837_v18  ;;  %v14344_v43 = vadd.f32 %v2347_v60, %v1802_v13  ;;  %v1804_v29 = vpop.f32.mrb[89].mxu1  ;;  %v2349_v41 = vpop.f32.mrb[89].mxu0  ;;  %v14352_v0 = vsub.s32 1, %v14338_v58 }
 0x307   : > { %12006 = vrcp.f32 %v3381_v19  ;;  %v2692_v40 = vmax.f32 %v2612_v8, 0.0  ;;  %v11675_v57 = vadd.f32 %v2349_v41, %v1804_v29  ;;  %v2943_v14 = vsel %vm2816_vm0, %v2778_v27, 0.0  ;;  %v14362_v19 = vld [vmem:[#allocation9] ss:$0 sm:$0xff] }
 0x308   : > { %17970 = vst [vmem:[#allocation38_spill] sm:$0xff] %v14344_v43  ;;  %v11997_v47 = vpop.eup %11996  ;;  %v11311_v37 = vmul.f32 -1.442695, %v3065_v3  ;;  %2944 = vadd.xlane.f32.xlu0 %v2943_v14  ;;  %v1808_v22 = vpop.f32.mrb[90].mxu1  ;;  %v14355_v13 = vsub.s32 2, %v14338_v58  ;;  %v14358_v60 = vsub.s32 3, %v14338_v58 }
 0x309   : > { %v14360_v18 = vpop.eup %11998  ;;  %v3382_v8 = vadd.f32 1.0, %v11997_v47  ;;  %v2613_v27 = vadd.f32 %v14294_v12, %v11675_v57  ;;  %v2353_v29 = vpop.f32.mrb[90].mxu0  ;;  %v2779_v41 = vmul.f32 %v14305_v20, %v2692_v40  ;;  %v17971_v14 = vld [vmem:[#allocation47_spill] sm:$0xff] }
 0x30a   : > { %v2840_v3 = vpop.xlane.xlu1 %2839  ;;  %v3619_v43 = vmul.f32 %v14360_v18, %v17971_v14  ;;  %12008 = vpow2.f32 %v11311_v37  ;;  %v14369_v6 = vadd.f32 %v2353_v29, %v1808_v22  ;;  %v1810_v7 = vpop.f32.mrb[91].mxu1  ;;  %v14374_v37 = vsub.s32 4, %v14338_v58 }
 0x30b   : > { %v3066_v10 = vadd.f32 %v14292_v63, %v2840_v3  ;;  %v2355_v9 = vpop.f32.mrb[91].mxu0  ;;  %12010 = vrcp.f32 %v3382_v8  ;;  %v2693_v55 = vmax.f32 %v2613_v27, 0.0  ;;  %v2946_v47 = vsel %vm2816_vm0, %v2779_v41, 0.0 }
 0x30c   : > { %17972 = vst [vmem:[#allocation39_spill] sm:$0xff] %v14369_v6  ;;  %v11677_v15 = vadd.f32 %v2355_v9, %v1810_v7  ;;  %v12001_v57 = vpop.eup %12000  ;;  %v3706_v59 = vadd.f32 %v14362_v19, %v3619_v43  ;;  %2947 = vadd.xlane.f32.xlu1 %v2946_v47  ;;  %v1814_v48 = vpop.f32.mrb[92].mxu1  ;;  %v14377_v22 = vsub.s32 5, %v14338_v58  ;;  %v12521_v41 = vmov 1966171168  }
 0x30d   : > { %v11312_v40 = vmul.f32 -1.442695, %v3066_v10  ;;  %v14379_v29 = vpop.eup %12002  ;;  %v3383_v8 = vadd.f32 1.0, %v12001_v57  ;;  %v2359_v7 = vpop.f32.mrb[92].mxu0  ;;  %v2780_v3 = vmul.f32 %v14305_v20, %v2693_v55  ;;  %v14383_v43 = vunpack.c.l.s4 %v12521_v41  ;;  %v17973_v10 = vld [vmem:[#allocation48_spill] sm:$0xff] }
 0x30e   : > { %v2614_v9 = vadd.f32 %v14294_v12, %v11677_v15  ;;  %v2843_v27 = vpop.xlane.xlu0 %2842  ;;  %3786 = vst [vmem:[%s14387_s19] sm:$0xff] %v3706_v59  ;;  %v3620_v14 = vmul.f32 %v14379_v29, %v17973_v10  ;;  %v14393_v57 = vadd.f32 %v2359_v7, %v1814_v48  ;;  %v1816_v15 = vpop.f32.mrb[93].mxu1  ;;  %v14403_v48 = vsub.s32 7, %v14338_v58 }
 0x30f   : > { %12012 = vpow2.f32 %v11312_v40  ;;  %v3067_v47 = vadd.f32 %v14292_v63, %v2843_v27  ;;  %v2361_v6 = vpop.f32.mrb[93].mxu0  ;;  %v2949_v41 = vsel %vm2816_vm0, %v2780_v3, 0.0  ;;  %v14400_v40 = vsub.s32 6, %v14338_v58 }
 0x310   : > { %17974 = vst [vmem:[#allocation40_spill] sm:$0xff] %v14393_v57  ;;  %12014 = vrcp.f32 %v3383_v8  ;;  %v2694_v55 = vmax.f32 %v2614_v9, 0.0  ;;  %v14395_v53 = vadd.f32 %v2361_v6, %v1816_v15  ;;  %v12005_v25 = vpop.eup %12004  ;;  %v3707_v59 = vadd.f32 %v14362_v19, %v3620_v14  ;;  %2950 = vadd.xlane.f32.xlu0 %v2949_v41  ;;  %v1820_v10 = vpop.f32.mrb[94].mxu1 }
 0x311   : > { %v11313_v31 = vmul.f32 -1.442695, %v3067_v47  ;;  %v14405_v7 = vpop.eup %12006  ;;  %v3384_v8 = vadd.f32 1.0, %v12005_v25  ;;  %v2365_v6 = vpop.f32.mrb[94].mxu0  ;;  %v3981_v3 = vrot.slane %v14379_v29, %v14347_v50  ;;  %v6512_v14 = vunpack.c.0.s8 %v14383_v43 }
 0x312   : > { %v2846_v9 = vpop.xlane.xlu1 %2845  ;;  %v2781_v27 = vmul.f32 %v14305_v20, %v2694_v55  ;;  %3787 = vst [vmem:[%s14387_s19 + $0x8] sm:$0xff] %v3707_v59  ;;  %v3621_v47 = vmul.f32 %v14405_v7, %v13948_v28  ;;  %v14415_v41 = vadd.f32 %v2365_v6, %v1820_v10  ;;  %v1822_v57 = vpop.f32.mrb[95].mxu1  ;;  %v3985_v43 = vrot.slane %v14379_v29, %v14352_v0 }
 0x313   : > { %12016 = vpow2.f32 %v11313_v31  ;;  %v3068_v15 = vadd.f32 %v14292_v63, %v2846_v9  ;;  %v2367_v25 = vpop.f32.mrb[95].mxu0  ;;  %v3989_v10 = vrot.slane %v14379_v29, %v14355_v13  ;;  %v4009_v26 = vrot.slane %v14379_v29, %v14403_v48 }
 0x314   : > { %17975 = vst [vmem:[#allocation41_spill] sm:$0xff] %v14415_v41  ;;  %12018 = vrcp.f32 %v3384_v8  ;;  %v14417_v23 = vadd.f32 %v2367_v25, %v1822_v57  ;;  %v2952_v55 = vsel %vm2816_vm0, %v2781_v27, 0.0  ;;  %v12009_v59 = vpop.eup %12008  ;;  %v3708_v5 = vadd.f32 %v14362_v19, %v3621_v47  ;;  %v1826_v31 = vpop.f32.mrb[96].mxu1 }
 0x315   : > { %v11314_v28 = vmul.f32 -1.442695, %v3068_v15  ;;  %2953 = vadd.xlane.f32.xlu1 %v2952_v55  ;;  %v3993_v8 = vrot.slane %v14379_v29, %v14358_v60  ;;  %v14427_v57 = vpop.eup %12010  ;;  %v3385_v6 = vadd.f32 1.0, %v12009_v59  ;;  %v2371_v9 = vpop.f32.mrb[96].mxu0  ;;  %v3997_v25 = vrot.slane %v14379_v29, %v14374_v37 }
 0x316   : > { %v2849_v27 = vpop.xlane.xlu0 %2848  ;;  %v4001_v47 = vrot.slane %v14379_v29, %v14377_v22  ;;  %v4005_v15 = vrot.slane %v14379_v29, %v14400_v40  ;;  %3788 = vst [vmem:[%s14387_s19 + $0x10] sm:$0xff] %v3708_v5  ;;  %v3622_v55 = vmul.f32 %v14427_v57, %v13959_v44  ;;  %v14439_v52 = vadd.f32 %v2371_v9, %v1826_v31  ;;  %v1828_v59 = vpop.f32.mrb[97].mxu1 }
 0x317   : > { %12020 = vpow2.f32 %v11314_v28  ;;  %v3069_v41 = vadd.f32 %v14292_v63, %v2849_v27  ;;  %v2373_v39 = vpop.f32.mrb[97].mxu0  ;;  %v6555_v44 = vcombine.low %v3981_v3, %v3985_v43  ;;  %v6556_v28 = vcombine.low %v3989_v10, %v3993_v8 }
 0x318   : > { %17976 = vst [vmem:[#allocation42_spill] sm:$0xff] %v14439_v52  ;;  %12022 = vrcp.f32 %v3385_v6  ;;  %v14441_v1 = vadd.f32 %v2373_v39, %v1828_v59  ;;  %v3709_v5 = vadd.f32 %v14362_v19, %v3622_v55  ;;  %v1832_v17 = vpop.f32.mrb[98].mxu1  ;;  %v14449_v6 = vsub.s32 %v6512_v14, %v14338_v58 }
 0x319   : > { %v12013_v51 = vpop.eup %12012  ;;  %v11315_v45 = vmul.f32 -1.442695, %v3069_v41  ;;  %v2377_v9 = vpop.f32.mrb[98].mxu0  ;;  %v6557_v39 = vcombine.low %v3997_v25, %v4001_v47  ;;  %v6558_v59 = vcombine.low %v4005_v15, %v4009_v26 }
 0x31a   : > { %v14446_v54 = vpop.eup %12014  ;;  %v3386_v31 = vadd.f32 1.0, %v12013_v51  ;;  %v2852_v27 = vpop.xlane.xlu1 %2851  ;;  %3789 = vst [vmem:[%s14387_s19 + $0x18] sm:$0xff] %v3709_v5  ;;  %v14455_v55 = vadd.f32 %v2377_v9, %v1832_v17  ;;  %v6565_v14 = vrot.slane %v6555_v44, %v14449_v6  ;;  %v3949_v9 = vrot.slane %v14360_v18, %v14347_v50 }
 0x31b   : > { %v3623_v29 = vmul.f32 %v14446_v54, %v13970_v61  ;;  %12024 = vpow2.f32 %v11315_v45  ;;  %v3070_v41 = vadd.f32 %v14292_v63, %v2852_v27  ;;  %v1834_v3 = vpop.f32.mrb[99].mxu1  ;;  %v2379_v43 = vpop.f32.mrb[99].mxu0  ;;  %v6572_v61 = vrot.slane %v6556_v28, %v14449_v6 }
 0x31c   : > { %17977 = vst [vmem:[#allocation43_spill] sm:$0xff] %v14455_v55  ;;  %12026 = vrcp.f32 %v3386_v31  ;;  %v14457_v51 = vadd.f32 %v2379_v43, %v1834_v3  ;;  %v1838_v25 = vpop.f32.mrb[100].mxu1  ;;  %v6579_v45 = vrot.slane %v6557_v39, %v14449_v6  ;;  %v6586_v31 = vrot.slane %v6558_v59, %v14449_v6 }
 0x31d   : > { %v12017_v10 = vpop.eup %12016  ;;  %v3710_v26 = vadd.f32 %v14362_v19, %v3623_v29  ;;  %v11316_v8 = vmul.f32 -1.442695, %v3070_v41  ;;  %v2383_v15 = vpop.f32.mrb[100].mxu0  ;;  %v6587_v3 = vcombine.low %v6565_v14, %v6572_v61  ;;  %v3953_v59 = vrot.slane %v14360_v18, %v14352_v0 }
 0x31e   : > { %v14463_v47 = vpop.eup %12018  ;;  %v3387_v17 = vadd.f32 1.0, %v12017_v10  ;;  %v2855_v5 = vpop.xlane.xlu0 %2854  ;;  %v14472_v28 = vadd.f32 %v2383_v15, %v1838_v25  ;;  %v3957_v25 = vrot.slane %v14360_v18, %v14355_v13  ;;  %v3961_v14 = vrot.slane %v14360_v18, %v14358_v60 }
 0x31f   : > { %17978 = vst [vmem:[#allocation44_spill] sm:$0xff] %v14463_v47  ;;  %3790 = vst [vmem:[%s14387_s19 + $0x20] sm:$0xff] %v3710_v26  ;;  %v3624_v44 = vmul.f32 %v14463_v47, %v13981_v56  ;;  %12028 = vpow2.f32 %v11316_v8  ;;  %v3071_v27 = vadd.f32 %v14292_v63, %v2855_v5  ;;  %v1840_v39 = vpop.f32.mrb[101].mxu1  ;;  %v2385_v29 = vpop.f32.mrb[101].mxu0  ;;  %v6588_v8 = vcombine.low %v6579_v45, %v6586_v31 }
 0x320   : > { %17979 = vst [vmem:[#allocation45_spill] sm:$0xff] %v14472_v28  ;;  %12030 = vrcp.f32 %v3387_v17  ;;  %v14474_v41 = vadd.f32 %v2385_v29, %v1840_v39  ;;  %v1844_v56 = vpop.f32.mrb[102].mxu1  ;;  %v6595_v29 = vrot.slane %v6587_v3, %v14449_v6  ;;  %v3965_v61 = vrot.slane %v14360_v18, %v14374_v37 }
 0x321   : > { %v12021_v43 = vpop.eup %12020  ;;  %v3711_v10 = vadd.f32 %v14362_v19, %v3624_v44  ;;  %v11317_v26 = vmul.f32 -1.442695, %v3071_v27  ;;  %v2389_v17 = vpop.f32.mrb[102].mxu0  ;;  %v6602_v58 = vrot.slane %v6588_v8, %v14449_v6  ;;  %v3969_v55 = vrot.slane %v14360_v18, %v14377_v22 }
 0x322   : > { %v14481_v15 = vpop.eup %12022  ;;  %v3388_v5 = vadd.f32 1.0, %v12021_v43  ;;  %v2858_v39 = vpop.xlane.xlu1 %2857  ;;  %v14492_v44 = vadd.f32 %v2389_v17, %v1844_v56  ;;  %v3973_v56 = vrot.slane %v14360_v18, %v14400_v40  ;;  %v3977_v17 = vrot.slane %v14360_v18, %v14403_v48 }
 0x323   : > { %17980 = vst [vmem:[#allocation46_spill] sm:$0xff] %v14481_v15  ;;  %3791 = vst [vmem:[%s14387_s19 + $0x28] sm:$0xff] %v3711_v10  ;;  %v3625_v45 = vmul.f32 %v14481_v15, %v13992_v21  ;;  %12032 = vpow2.f32 %v11317_v26  ;;  %v3072_v31 = vadd.f32 %v14292_v63, %v2858_v39  ;;  %v1846_v27 = vpop.f32.mrb[103].mxu1  ;;  %v2391_v43 = vpop.f32.mrb[103].mxu0  ;;  %v6603_v8 = vcombine.low %v6595_v29, %v6602_v58 }
 0x324   : > { %17981 = vst [vmem:[#allocation47_spill] sm:$0xff] %v14492_v44  ;;  %12034 = vrcp.f32 %v3388_v5  ;;  %v14494_v3 = vadd.f32 %v2391_v43, %v1846_v27  ;;  %v1850_v26 = vpop.f32.mrb[104].mxu1  ;;  %v6506_v44 = vcombine.low %v3949_v9, %v3953_v59  ;;  %v6507_v18 = vcombine.low %v3957_v25, %v3961_v14 }
 0x325   : > { %v12025_v10 = vpop.eup %12024  ;;  %v3712_v28 = vadd.f32 %v14362_v19, %v3625_v45  ;;  %v11318_v21 = vmul.f32 -1.442695, %v3072_v31  ;;  %v2395_v27 = vpop.f32.mrb[104].mxu0 }
 0x326   : > { %17982 = vst [vmem:[#allocation48_spill] sm:$0xff] %v14494_v3  ;;  %v14504_v5 = vpop.eup %12026  ;;  %v3389_v39 = vadd.f32 1.0, %v12025_v10  ;;  %v2861_v43 = vpop.xlane.xlu0 %2860  ;;  %v14510_v31 = vadd.f32 %v2395_v27, %v1850_v26  ;;  %10430 = vperm.xlu1 %11989, %v6603_v8   ;;  %v6508_v10 = vcombine.low %v3965_v61, %v3969_v55  ;;  %v6516_v59 = vrot.slane %v6506_v44, %v14449_v6 }
 0x327   : > { %3792 = vst [vmem:[%s14387_s19 + $0x30] sm:$0xff] %v3712_v28  ;;  %v3626_v52 = vmul.f32 %v14504_v5, %v14003_v4  ;;  %12036 = vpow2.f32 %v11318_v21  ;;  %v3073_v45 = vadd.f32 %v14292_v63, %v2861_v43  ;;  %v2397_v15 = vpop.f32.mrb[105].mxu0  ;;  %v1852_v3 = vpop.f32.mrb[105].mxu1  ;;  %v6509_v28 = vcombine.low %v3973_v56, %v3977_v17 }
 0x328   : > { %17983 = vst [vmem:[#allocation52_spill] sm:$0xff] %v14510_v31  ;;  %12038 = vrcp.f32 %v3389_v39  ;;  %v1856_v4 = vpop.f32.mrb[106].mxu1  ;;  %v6523_v26 = vrot.slane %v6507_v18, %v14449_v6  ;;  %v6530_v27 = vrot.slane %v6508_v10, %v14449_v6  ;;  %v14518_v39 = vadd.f32 %v2397_v15, %v1852_v3 }
 0x329   : > { %v12029_v47 = vpop.eup %12028  ;;  %v3713_v58 = vadd.f32 %v14362_v19, %v3626_v52  ;;  %v11319_v9 = vmul.f32 -1.442695, %v3073_v45  ;;  %v2401_v43 = vpop.f32.mrb[106].mxu0  ;;  %v6537_v55 = vrot.slane %v6509_v28, %v14449_v6 }
 0x32a   : > { %v14514_v29 = vpop.eup %12030  ;;  %v3390_v21 = vadd.f32 1.0, %v12029_v47  ;;  %v2864_v25 = vpop.xlane.xlu1 %2863  ;;  %v6538_v44 = vcombine.low %v6516_v59, %v6523_v26  ;;  %v14525_v56 = vadd.f32 %v2401_v43, %v1856_v4 }
 0x32b   : > { %3793 = vst [vmem:[%s14387_s19 + $0x38] sm:$0xff] %v3713_v58  ;;  %v3627_v52 = vmul.f32 %v14514_v29, %v14014_v30  ;;  %12040 = vpow2.f32 %v11319_v9  ;;  %v3074_v14 = vadd.f32 %v14292_v63, %v2864_v25  ;;  %v1858_v61 = vpop.f32.mrb[107].mxu1  ;;  %v2403_v47 = vpop.f32.mrb[107].mxu0  ;;  %v6539_v17 = vcombine.low %v6530_v27, %v6537_v55 }
 0x32c   : > { %12042 = vrcp.f32 %v3390_v21  ;;  %17984 = vst [vmem:[#allocation53_spill] sm:$0xff] %v14525_v56  ;;  %v14528_v45 = vadd.f32 %v2403_v47, %v1858_v61  ;;  %v1862_v30 = vpop.f32.mrb[108].mxu1  ;;  %v6546_v58 = vrot.slane %v6538_v44, %v14449_v6 }
 0x32d   : > { %v12033_v15 = vpop.eup %12032  ;;  %v3714_v3 = vadd.f32 %v14362_v19, %v3627_v52  ;;  %v11320_v8 = vmul.f32 -1.442695, %v3074_v14  ;;  %v2407_v9 = vpop.f32.mrb[108].mxu0  ;;  %v6553_v4 = vrot.slane %v6539_v17, %v14449_v6 }
 0x32e   : > { %v14530_v18 = vpop.eup %12034  ;;  %v3391_v10 = vadd.f32 1.0, %v12033_v15  ;;  %v2867_v28 = vpop.xlane.xlu0 %2866  ;;  %v14538_v43 = vadd.f32 %v2407_v9, %v1862_v30 }
 0x32f   : > { %3794 = vst [vmem:[%s14387_s19 + $0x40] sm:$0xff] %v3714_v3  ;;  %v3628_v59 = vmul.f32 %v14530_v18, %v14025_v35  ;;  %12044 = vpow2.f32 %v11320_v8  ;;  %v1864_v21 = vpop.f32.mrb[109].mxu1  ;;  %v2409_v26 = vpop.f32.mrb[109].mxu0  ;;  %v3075_v27 = vadd.f32 %v14292_v63, %v2867_v28  ;;  %v6554_v14 = vcombine.low %v6546_v58, %v6553_v4 }
 0x330   : > { %12046 = vrcp.f32 %v3391_v10  ;;  %17985 = vst [vmem:[#allocation54_spill] sm:$0xff] %v14538_v43  ;;  %v14540_v25 = vadd.f32 %v2409_v26, %v1864_v21  ;;  %v1868_v61 = vpop.f32.mrb[110].mxu1 }
 0x331   : > { %v12037_v52 = vpop.eup %12036  ;;  %v3715_v55 = vadd.f32 %v14362_v19, %v3628_v59  ;;  %v11321_v44 = vmul.f32 -1.442695, %v3075_v27  ;;  %v2413_v15 = vpop.f32.mrb[110].mxu0  ;;  %10427 = vperm.xlu0 %11988, %v6554_v14  }
 0x332   : > { %v14543_v47 = vpop.eup %12038  ;;  %v3392_v35 = vadd.f32 1.0, %v12037_v52  ;;  %v2870_v3 = vpop.xlane.xlu1 %2869  ;;  %v14549_v30 = vadd.f32 %v2413_v15, %v1868_v61 }
 0x333   : > { %17986 = vst [vmem:[#allocation55_spill] sm:$0xff] %v14543_v47  ;;  %3795 = vst [vmem:[%s14387_s19 + $0x48] sm:$0xff] %v3715_v55  ;;  %v3629_v17 = vmul.f32 %v14543_v47, %v14036_v62  ;;  %v3076_v8 = vadd.f32 %v14292_v63, %v2870_v3  ;;  %v1870_v10 = vpop.f32.mrb[111].mxu1  ;;  %v2415_v9 = vpop.f32.mrb[111].mxu0  ;;  %v2615_v62 = vadd.f32 %v14294_v12, %v14395_v53 }
 0x334   : > { %17987 = vst [vmem:[#allocation56_spill] sm:$0xff] %v14549_v30  ;;  %12048 = vrcp.f32 %v3392_v35  ;;  %v14551_v58 = vadd.f32 %v2415_v9, %v1870_v10  ;;  %v1874_v21 = vpop.f32.mrb[112].mxu1  ;;  %v14566_v3 = vadd.f32 %v14294_v12, %v14417_v23  ;;  %v14577_v10 = vadd.f32 %v14294_v12, %v14474_v41 }
 0x335   : > { %v12041_v28 = vpop.eup %12040  ;;  %v3716_v59 = vadd.f32 %v14362_v19, %v3629_v17  ;;  %12050 = vpow2.f32 %v11321_v44  ;;  %v11322_v4 = vmul.f32 -1.442695, %v3076_v8  ;;  %v2419_v52 = vpop.f32.mrb[112].mxu0  ;;  %v14572_v8 = vadd.f32 %v14294_v12, %v14441_v1 }
 0x336   : > { %17988 = vst [vmem:[#allocation57_spill] sm:$0xff] %v14551_v58  ;;  %v14554_v26 = vpop.eup %12042  ;;  %v3393_v27 = vadd.f32 1.0, %v12041_v28  ;;  %v2873_v55 = vpop.xlane.xlu0 %2872  ;;  %v14562_v35 = vadd.f32 %v2419_v52, %v1874_v21  ;;  %v2695_v23 = vmax.f32 %v2615_v62, 0.0  ;;  %v2696_v62 = vmax.f32 %v14566_v3, 0.0 }
 0x337   : > { %3796 = vst [vmem:[%s14387_s19 + $0x50] sm:$0xff] %v3716_v59  ;;  %v3630_v14 = vmul.f32 %v14554_v26, %v14047_v46  ;;  %12052 = vpow2.f32 %v11322_v4  ;;  %v3077_v61 = vadd.f32 %v14292_v63, %v2873_v55  ;;  %v1876_v44 = vpop.f32.mrb[113].mxu1  ;;  %v2421_v15 = vpop.f32.mrb[113].mxu0  ;;  %v14583_v4 = vadd.f32 %v14294_v12, %v14518_v39 }
 0x338   : > { %17989 = vst [vmem:[#allocation58_spill] sm:$0xff] %v14562_v35  ;;  %12054 = vrcp.f32 %v3393_v27  ;;  %v14568_v53 = vadd.f32 %v2421_v15, %v1876_v44  ;;  %v1880_v28 = vpop.f32.mrb[114].mxu1  ;;  %v2697_v44 = vmax.f32 %v14572_v8, 0.0  ;;  %v14601_v3 = vmul.f32 %v14305_v20, %v2695_v23 }
 0x339   : > { %v12045_v17 = vpop.eup %12044  ;;  %v3717_v46 = vadd.f32 %v14362_v19, %v3630_v14  ;;  %v11323_v9 = vmul.f32 -1.442695, %v3077_v61  ;;  %v2425_v27 = vpop.f32.mrb[114].mxu0  ;;  %v4017_v8 = vrot.slane %v14405_v7, %v14352_v0  ;;  %v4021_v30 = vrot.slane %v14405_v7, %v14355_v13 }
 0x33a   : > { %v14579_v59 = vpop.eup %12046  ;;  %v3394_v21 = vadd.f32 1.0, %v12045_v17  ;;  %v2876_v52 = vpop.xlane.xlu1 %2875  ;;  %v14589_v55 = vadd.f32 %v2425_v27, %v1880_v28 }
 0x33b   : > { %17990 = vst [vmem:[#allocation59_spill] sm:$0xff] %v14579_v59  ;;  %3797 = vst [vmem:[%s14387_s19 + $0x58] sm:$0xff] %v3717_v46  ;;  %v3631_v1 = vmul.f32 %v14579_v59, %v14058_v24  ;;  %12056 = vpow2.f32 %v11323_v9  ;;  %v3078_v41 = vadd.f32 %v14292_v63, %v2876_v52  ;;  %v1882_v14 = vpop.f32.mrb[115].mxu1  ;;  %v2427_v61 = vpop.f32.mrb[115].mxu0 }
 0x33c   : > { %17991 = vst [vmem:[#allocation60_spill] sm:$0xff] %v14589_v55  ;;  %12058 = vrcp.f32 %v3394_v21  ;;  %v14592_v39 = vadd.f32 %v2427_v61, %v1882_v14  ;;  %v1886_v46 = vpop.f32.mrb[116].mxu1  ;;  %v4013_v21 = vrot.slane %v14405_v7, %v14347_v50 }
 0x33d   : > { %v3718_v15 = vadd.f32 %v14362_v19, %v3631_v1  ;;  %v11324_v24 = vmul.f32 -1.442695, %v3078_v41  ;;  %v2431_v27 = vpop.f32.mrb[116].mxu0  ;;  %v2879_v52 = vpop.xlane.xlu0 %2878 }
 0x33e   : > { %17992 = vst [vmem:[#allocation61_spill] sm:$0xff] %v14592_v39  ;;  %v14597_v9 = vpop.eup %12048  ;;  %v3079_v14 = vadd.f32 %v14292_v63, %v2879_v52  ;;  %v14611_v61 = vadd.f32 %v2431_v27, %v1886_v46  ;;  %v1888_v28 = vpop.f32.mrb[117].mxu1  ;;  %v4029_v46 = vrot.slane %v14405_v7, %v14374_v37  ;;  %v4033_v27 = vrot.slane %v14405_v7, %v14377_v22 }
 0x33f   : > { %v12051_v1 = vpop.eup %12050  ;;  %3798 = vst [vmem:[%s14387_s19 + $0x60] sm:$0xff] %v3718_v15  ;;  %v3632_v41 = vmul.f32 %v14597_v9, %v14069_v42  ;;  %12060 = vpow2.f32 %v11324_v24  ;;  %v2433_v17 = vpop.f32.mrb[117].mxu0  ;;  %v4025_v15 = vrot.slane %v14405_v7, %v14358_v60  ;;  %v6604_v58 = vcombine.low %v4013_v21, %v4017_v8 }
 0x340   : > { %17993 = vst [vmem:[#allocation62_spill] sm:$0xff] %v14611_v61  ;;  %v3395_v23 = vadd.f32 1.0, %v12051_v1  ;;  %v14613_v55 = vadd.f32 %v2433_v17, %v1888_v28  ;;  %v11325_v24 = vmul.f32 -1.442695, %v3079_v14  ;;  %v1892_v59 = vpop.f32.mrb[118].mxu1  ;;  %v4037_v61 = vrot.slane %v14405_v7, %v14400_v40 }
 0x341   : > { %v12053_v56 = vpop.eup %12052  ;;  %v3719_v42 = vadd.f32 %v14362_v19, %v3632_v41  ;;  %v2437_v52 = vpop.f32.mrb[118].mxu0  ;;  %v4041_v41 = vrot.slane %v14405_v7, %v14403_v48  ;;  %v6605_v43 = vcombine.low %v4021_v30, %v4025_v15  ;;  %v14647_v21 = vcombine.low %v4029_v46, %v4033_v27 }
 0x342   : > { %v14624_v17 = vpop.eup %12054  ;;  %12062 = vrcp.f32 %v3395_v23  ;;  %v3396_v28 = vadd.f32 1.0, %v12053_v56  ;;  %v2882_v1 = vpop.xlane.xlu1 %2881  ;;  %v14634_v35 = vadd.f32 %v2437_v52, %v1892_v59  ;;  %v2783_v59 = vmul.f32 %v14305_v20, %v2696_v62 }
 0x343   : > { %17994 = vst [vmem:[#allocation63_spill] sm:$0xff] %v14624_v17  ;;  %3799 = vst [vmem:[%s14387_s19 + $0x68] sm:$0xff] %v3719_v42  ;;  %v3633_v14 = vmul.f32 %v14624_v17, %v14080_v49  ;;  %12064 = vpow2.f32 %v11325_v24  ;;  %v3080_v39 = vadd.f32 %v14292_v63, %v2882_v1  ;;  %v1894_v47 = vpop.f32.mrb[119].mxu1  ;;  %v2439_v23 = vpop.f32.mrb[119].mxu0  ;;  %v14641_v42 = vadd.f32 %v14294_v12, %v14540_v25 }
 0x344   : > { %17995 = vst [vmem:[#allocation64_spill] sm:$0xff] %v14634_v35  ;;  %12066 = vrcp.f32 %v3396_v28  ;;  %v14636_v56 = vadd.f32 %v2439_v23, %v1894_v47  ;;  %v1898_v24 = vpop.f32.mrb[120].mxu1  ;;  %v2784_v23 = vmul.f32 %v14305_v20, %v2697_v44  ;;  %v14649_v30 = vcombine.low %v4037_v61, %v4041_v41 }
 0x345   : > { %v12057_v31 = vpop.eup %12056  ;;  %v3720_v7 = vadd.f32 %v14362_v19, %v3633_v14  ;;  %v11326_v49 = vmul.f32 -1.442695, %v3080_v39  ;;  %v2443_v28 = vpop.f32.mrb[120].mxu0  ;;  %v6614_v44 = vrot.slane %v6604_v58, %v14449_v6  ;;  %v6621_v61 = vrot.slane %v6605_v43, %v14449_v6 }
 0x346   : > { %v14644_v52 = vpop.eup %12058  ;;  %v3397_v1 = vadd.f32 1.0, %v12057_v31  ;;  %v2885_v47 = vpop.xlane.xlu0 %2884  ;;  %v14655_v39 = vadd.f32 %v2443_v28, %v1898_v24  ;;  %v2955_v41 = vsel %vm2816_vm0, %v14601_v3, 0.0  ;;  %v14667_v28 = vsel %vm2816_vm0, %v2784_v23, 0.0 }
 0x347   : > { %3800 = vst [vmem:[%s14387_s19 + $0x70] sm:$0xff] %v3720_v7  ;;  %v3634_v12 = vmul.f32 %v14644_v52, %v14091_v32  ;;  %12068 = vpow2.f32 %v11326_v49  ;;  %v3081_v25 = vadd.f32 %v14292_v63, %v2885_v47  ;;  %v1900_v62 = vpop.f32.mrb[121].mxu1  ;;  %v2445_v8 = vpop.f32.mrb[121].mxu0  ;;  %v17997_v43 = vmax.f32 %v14577_v10, 0.0 }
 0x348   : > { %17996 = vst [vmem:[#allocation65_spill] sm:$0xff] %v14655_v39  ;;  %12070 = vrcp.f32 %v3397_v1  ;;  %v14657_v31 = vadd.f32 %v2445_v8, %v1900_v62  ;;  %v1904_v14 = vpop.f32.mrb[122].mxu1  ;;  %v2958_v1 = vsel %vm2816_vm0, %v2783_v59, 0.0  ;;  %v6628_v62 = vrot.slane %v14647_v21, %v14449_v6 }
 0x349   : > { %v12061_v15 = vpop.eup %12060  ;;  %v3721_v46 = vadd.f32 %v14362_v19, %v3634_v12  ;;  %v11327_v27 = vmul.f32 -1.442695, %v3081_v25  ;;  %v2449_v49 = vpop.f32.mrb[122].mxu0  ;;  %v14672_v58 = vmul.f32 %v14305_v20, %v17997_v43  ;;  %v6635_v20 = vrot.slane %v14649_v30, %v14449_v6 }
 0x34a   : > { %v3398_v7 = vadd.f32 1.0, %v12061_v15  ;;  %v2888_v24 = vpop.xlane.xlu1 %2887  ;;  %v14676_v12 = vadd.f32 %v2449_v49, %v1904_v14  ;;  %v1906_v3 = vpop.f32.mrb[123].mxu1  ;;  %2959 = vadd.xlane.f32.xlu1 %v2958_v1  ;;  %v14686_v10 = vcombine.low %v6614_v44, %v6621_v61  ;;  %v4045_v21 = vrot.slane %v14427_v57, %v14347_v50 }
 0x34b   : > { %3801 = vst [vmem:[%s14387_s19 + $0x78] sm:$0xff] %v3721_v46  ;;  %12072 = vpow2.f32 %v11327_v27  ;;  %v3082_v47 = vadd.f32 %v14292_v63, %v2888_v24  ;;  %v2451_v25 = vpop.f32.mrb[123].mxu0  ;;  %v4049_v14 = vrot.slane %v14427_v57, %v14352_v0  ;;  %v4053_v44 = vrot.slane %v14427_v57, %v14355_v13 }
 0x34c   : > { %17998 = vst [vmem:[#allocation66_spill] sm:$0xff] %v14676_v12  ;;  %v14680_v59 = vpop.eup %12062  ;;  %12074 = vrcp.f32 %v3398_v7  ;;  %v14682_v23 = vadd.f32 %v2451_v25, %v1906_v3  ;;  %v1910_v27 = vpop.f32.mrb[124].mxu1  ;;  %v4061_v61 = vrot.slane %v14427_v57, %v14374_v37  ;;  %v4065_v12 = vrot.slane %v14427_v57, %v14377_v22 }
 0x34d   : > { %17999 = vst [vmem:[#allocation67_spill] sm:$0xff] %v14680_v59  ;;  %v12065_v8 = vpop.eup %12064  ;;  %v3635_v15 = vmul.f32 %v14680_v59, %v14102_v2  ;;  %v11328_v46 = vmul.f32 -1.442695, %v3082_v47  ;;  %v2455_v24 = vpop.f32.mrb[124].mxu0  ;;  %v4057_v2 = vrot.slane %v14427_v57, %v14358_v60 }
 0x34e   : > { %18000 = vst [vmem:[#allocation68_spill] sm:$0xff] %v14682_v23  ;;  %v14694_v7 = vpop.eup %12066  ;;  %v3399_v49 = vadd.f32 1.0, %v12065_v8  ;;  %v2891_v30 = vpop.xlane.xlu0 %2890  ;;  %v14706_v8 = vadd.f32 %v2455_v24, %v1910_v27 }
 0x34f   : > { %v3722_v1 = vadd.f32 %v14362_v19, %v3635_v15  ;;  %v3636_v43 = vmul.f32 %v14694_v7, %v14113_v11  ;;  %12076 = vpow2.f32 %v11328_v46  ;;  %v3083_v47 = vadd.f32 %v14292_v63, %v2891_v30  ;;  %v1912_v3 = vpop.f32.mrb[125].mxu1  ;;  %v2457_v25 = vpop.f32.mrb[125].mxu0 }
 0x350   : > { %12078 = vrcp.f32 %v3399_v49  ;;  %18001 = vst [vmem:[#allocation69_spill] sm:$0xff] %v14706_v8  ;;  %v14708_v32 = vadd.f32 %v2457_v25, %v1912_v3  ;;  %v1916_v11 = vpop.f32.mrb[126].mxu1  ;;  %v4069_v46 = vrot.slane %v14427_v57, %v14400_v40  ;;  %v4073_v49 = vrot.slane %v14427_v57, %v14403_v48  ;;  %2956 = vadd.xlane.f32.xlu0 %v2955_v41 }
 0x351   : > { %v12069_v35 = vpop.eup %12068  ;;  %3802 = vst [vmem:[%s14387_s19 + $0x80] sm:$0xff] %v3722_v1  ;;  %v3723_v15 = vadd.f32 %v14362_v19, %v3636_v43  ;;  %v11329_v59 = vmul.f32 -1.442695, %v3083_v47  ;;  %v2461_v30 = vpop.f32.mrb[126].mxu0  ;;  %v6637_v25 = vcombine.low %v6628_v62, %v6635_v20  ;;  %v6653_v8 = vcombine.low %v4045_v21, %v4049_v14 }
 0x352   : > { %v14718_v27 = vpop.eup %12070  ;;  %v3400_v24 = vadd.f32 1.0, %v12069_v35  ;;  %v2894_v3 = vpop.xlane.xlu1 %2893  ;;  %v6654_v23 = vcombine.low %v4053_v44, %v4057_v2  ;;  %v14724_v47 = vadd.f32 %v2461_v30, %v1916_v11  ;;  %v6644_v35 = vrot.slane %v14686_v10, %v14449_v6 }
 0x353   : > { %18002 = vst [vmem:[#allocation70_spill] sm:$0xff] %v14718_v27  ;;  %3803 = vst [vmem:[%s14387_s19 + $0x88] sm:$0xff] %v3723_v15  ;;  %v3637_v1 = vmul.f32 %v14718_v27, %v14124_v34  ;;  %12080 = vpow2.f32 %v11329_v59  ;;  %v3084_v43 = vadd.f32 %v14292_v63, %v2894_v3  ;;  %v1918_v39 = vpop.f32.mrb[127].mxu1  ;;  %v2463_v57 = vpop.f32.mrb[127].mxu0  ;;  %v6655_v41 = vcombine.low %v4061_v61, %v4065_v12 }
 0x354   : > { %18003 = vst [vmem:[#allocation71_spill] sm:$0xff] %v14724_v47  ;;  %12082 = vrcp.f32 %v3400_v24  ;;  %v14726_v17 = vadd.f32 %v2463_v57, %v1918_v39  ;;  %v1922_v34 = vpop.f32.mrb[128].mxu1  ;;  %v6656_v59 = vcombine.low %v4069_v46, %v4073_v49  ;;  %v6663_v14 = vrot.slane %v6653_v8, %v14449_v6  ;;  %2962 = vadd.xlane.f32.xlu0 %v14667_v28  ;;  %v14744_v28 = vld [vmem:[#allocation8] ss:$0 sm:$0xff] }
 0x355   : > { %v12073_v62 = vpop.eup %12072  ;;  %v3724_v20 = vadd.f32 %v14362_v19, %v3637_v1  ;;  %v11330_v21 = vmul.f32 -1.442695, %v3084_v43  ;;  %v2467_v39 = vpop.f32.mrb[128].mxu0  ;;  %v6651_v11 = vrot.slane %v6637_v25, %v14449_v6  ;;  %v6670_v10 = vrot.slane %v6654_v23, %v14449_v6 }
 0x356   : > { %v14732_v44 = vpop.eup %12074  ;;  %v3401_v2 = vadd.f32 1.0, %v12073_v62  ;;  %v2897_v15 = vpop.xlane.xlu0 %2896  ;;  %v6677_v12 = vrot.slane %v6655_v41, %v14449_v6  ;;  %v14742_v46 = vadd.f32 %v2467_v39, %v1922_v34  ;;  %v18005_v30 = vmax.f32 %v14583_v4, 0.0 }
 0x357   : > { %3804 = vst [vmem:[%s14387_s19 + $0x90] sm:$0xff] %v3724_v20  ;;  %v3638_v61 = vmul.f32 %v14732_v44, %v14135_v33  ;;  %12084 = vpow2.f32 %v11330_v21  ;;  %v3085_v8 = vadd.f32 %v14292_v63, %v2897_v15  ;;  %v1924_v49 = vpop.f32.mrb[129].mxu1  ;;  %v2469_v24 = vpop.f32.mrb[129].mxu0  ;;  %v6684_v25 = vrot.slane %v6656_v59, %v14449_v6 }
 0x358   : > { %18004 = vst [vmem:[#allocation72_spill] sm:$0xff] %v14742_v46  ;;  %12086 = vrcp.f32 %v3401_v2  ;;  %v2788_v23 = vmul.f32 %v14744_v28, %v18005_v30  ;;  %v14749_v3 = vadd.f32 %v2469_v24, %v1924_v49  ;;  %v2967_v43 = vsel %vm2816_vm0, %v14672_v58, 0.0  ;;  %v1928_v41 = vpop.f32.mrb[130].mxu1 }
 0x359   : > { %v12077_v33 = vpop.eup %12076  ;;  %v3725_v1 = vadd.f32 %v14362_v19, %v3638_v61  ;;  %v11331_v57 = vmul.f32 -1.442695, %v3085_v8  ;;  %v6685_v62 = vcombine.low %v6663_v14, %v6670_v10  ;;  %2968 = vadd.xlane.f32.xlu0 %v2967_v43  ;;  %v18007_v4 = vmax.f32 %v14641_v42, 0.0  ;;  %v2473_v2 = vpop.f32.mrb[130].mxu0 }
 0x35a   : > { %v14755_v20 = vpop.eup %12078  ;;  %v3402_v21 = vadd.f32 1.0, %v12077_v33  ;;  %v2900_v39 = vpop.xlane.xlu1 %2899  ;;  %v6652_v59 = vcombine.low %v6644_v35, %v6651_v11  ;;  %v6686_v15 = vcombine.low %v6677_v12, %v6684_v25  ;;  %v14764_v14 = vadd.f32 %v2473_v2, %v1928_v41 }
 0x35b   : > { %18006 = vst [vmem:[#allocation73_spill] sm:$0xff] %v14755_v20  ;;  %v2790_v34 = vmul.f32 %v14744_v28, %v18007_v4  ;;  %3805 = vst [vmem:[%s14387_s19 + $0x98] sm:$0xff] %v3725_v1  ;;  %v3639_v61 = vmul.f32 %v14755_v20, %v14146_v16  ;;  %12088 = vpow2.f32 %v11331_v57  ;;  %v3086_v58 = vadd.f32 %v14292_v63, %v2900_v39  ;;  %v2475_v10 = vpop.f32.mrb[131].mxu0  ;;  %v1930_v8 = vpop.f32.mrb[131].mxu1 }
 0x35c   : > { %18008 = vst [vmem:[#allocation74_spill] sm:$0xff] %v14764_v14  ;;  %12090 = vrcp.f32 %v3402_v21  ;;  %v14766_v49 = vadd.f32 %v2475_v10, %v1930_v8  ;;  %v6693_v42 = vrot.slane %v6685_v62, %v14449_v6  ;;  %v2973_v11 = vsel %vm2816_vm0, %v2788_v23, 0.0  ;;  %10433 = vperm.xlu1 %11989, %v6652_v59   ;;  %v1934_v16 = vpop.f32.mrb[132].mxu1 }
 0x35d   : > { %v12081_v24 = vpop.eup %12080  ;;  %v3726_v35 = vadd.f32 %v14362_v19, %v3639_v61  ;;  %v11332_v12 = vmul.f32 -1.442695, %v3086_v58  ;;  %v6700_v30 = vrot.slane %v6686_v15, %v14449_v6  ;;  %2974 = vadd.xlane.f32.xlu0 %v2973_v11  ;;  %v2979_v1 = vsel %vm2816_vm0, %v2790_v34, 0.0  ;;  %v2479_v43 = vpop.f32.mrb[132].mxu0 }
 0x35e   : > { %18009 = vst [vmem:[#allocation75_spill] sm:$0xff] %v14766_v49  ;;  %v14772_v25 = vpop.eup %12082  ;;  %v3403_v33 = vadd.f32 1.0, %v12081_v24  ;;  %v2903_v57 = vpop.xlane.xlu0 %2902  ;;  %v4237_v41 = vrot.slane %v14530_v18, %v14347_v50  ;;  %v4241_v62 = vrot.slane %v14530_v18, %v14352_v0  ;;  %v14783_v4 = vadd.f32 %v2479_v43, %v1934_v16 }
 0x35f   : > { %3806 = vst [vmem:[%s14387_s19 + $0xa0] sm:$0xff] %v3726_v35  ;;  %v3640_v23 = vmul.f32 %v14772_v25, %v14157_v38  ;;  %12092 = vpow2.f32 %v11332_v12  ;;  %v3087_v21 = vadd.f32 %v14292_v63, %v2903_v57  ;;  %v2481_v2 = vpop.f32.mrb[133].mxu0  ;;  %v1936_v39 = vpop.f32.mrb[133].mxu1  ;;  %v6701_v34 = vcombine.low %v6693_v42, %v6700_v30 }
 0x360   : > { %18010 = vst [vmem:[#allocation76_spill] sm:$0xff] %v14783_v4  ;;  %12094 = vrcp.f32 %v3403_v33  ;;  %v14785_v59 = vadd.f32 %v2481_v2, %v1936_v39  ;;  %v4245_v15 = vrot.slane %v14530_v18, %v14355_v13  ;;  %v1940_v38 = vpop.f32.mrb[134].mxu1  ;;  %v4249_v8 = vrot.slane %v14530_v18, %v14358_v60  ;;  %v14810_v39 = vld [vmem:[#allocation9] ss:$0 sm:$0xff] }
 0x361   : > { %v12085_v61 = vpop.eup %12084  ;;  %v3727_v58 = vadd.f32 %v14362_v19, %v3640_v23  ;;  %v11333_v10 = vmul.f32 -1.442695, %v3087_v21  ;;  %v4253_v24 = vrot.slane %v14530_v18, %v14374_v37  ;;  %2980 = vadd.xlane.f32.xlu0 %v2979_v1  ;;  %10436 = vperm.xlu1 %11989, %v6701_v34   ;;  %v2485_v11 = vpop.f32.mrb[134].mxu0  ;;  %v4257_v16 = vrot.slane %v14530_v18, %v14377_v22 }
 0x362   : > { %v14794_v35 = vpop.eup %12086  ;;  %v3404_v42 = vadd.f32 1.0, %v12085_v61  ;;  %v2906_v12 = vpop.xlane.xlu1 %2905  ;;  %v4261_v19 = vrot.slane %v14530_v18, %v14400_v40  ;;  %v4265_v30 = vrot.slane %v14530_v18, %v14403_v48  ;;  %v14806_v1 = vadd.f32 %v2485_v11, %v1940_v38 }
 0x363   : > { %18011 = vst [vmem:[#allocation77_spill] sm:$0xff] %v14794_v35  ;;  %3807 = vst [vmem:[%s14387_s19 + $0xa8] sm:$0xff] %v3727_v58  ;;  %v3641_v33 = vmul.f32 %v14794_v35, %v14168_v36  ;;  %12096 = vpow2.f32 %v11333_v10  ;;  %v3088_v43 = vadd.f32 %v14292_v63, %v2906_v12  ;;  %v1942_v57 = vpop.f32.mrb[135].mxu1  ;;  %v2487_v23 = vpop.f32.mrb[135].mxu0  ;;  %v6947_v58 = vcombine.low %v4237_v41, %v4241_v62 }
 0x364   : > { %18012 = vst [vmem:[#allocation78_spill] sm:$0xff] %v14806_v1  ;;  %12098 = vrcp.f32 %v3404_v42  ;;  %v14808_v21 = vadd.f32 %v2487_v23, %v1942_v57  ;;  %v1946_v61 = vpop.f32.mrb[136].mxu1  ;;  %v6948_v11 = vcombine.low %v4245_v15, %v4249_v8  ;;  %v6949_v1 = vcombine.low %v4253_v24, %v4257_v16  ;;  %v18014_v42 = vld [vmem:[#allocation49_spill] sm:$0xff] }
 0x365   : > { %v12089_v2 = vpop.eup %12088  ;;  %v3728_v18 = vadd.f32 %v14810_v39, %v3641_v33  ;;  %v11334_v34 = vmul.f32 -1.442695, %v3088_v43  ;;  %v2491_v12 = vpop.f32.mrb[136].mxu0  ;;  %v6950_v14 = vcombine.low %v4261_v19, %v4265_v30  ;;  %v6957_v16 = vrot.slane %v6947_v58, %v14449_v6 }
 0x366   : > { %18013 = vst [vmem:[#allocation79_spill] sm:$0xff] %v14808_v21  ;;  %v14813_v36 = vpop.eup %12090  ;;  %v3405_v10 = vadd.f32 1.0, %v12089_v2  ;;  %v2909_v38 = vpop.xlane.xlu0 %2908  ;;  %v14819_v47 = vadd.f32 %v2491_v12, %v1946_v61  ;;  %v6971_v61 = vrot.slane %v6949_v1, %v14449_v6  ;;  %v18017_v12 = vld [vmem:[#allocation50_spill] sm:$0xff]  ;;  %v4101_v21 = vrot.slane %v14446_v54, %v14400_v40 }
 0x367   : > { %3808 = vst [vmem:[%s14387_s19 + $0xb0] sm:$0xff] %v3728_v18  ;;  %v3642_v57 = vmul.f32 %v14813_v36, %v18014_v42  ;;  %12100 = vpow2.f32 %v11334_v34  ;;  %v3089_v23 = vadd.f32 %v14292_v63, %v2909_v38  ;;  %v1948_v33 = vpop.f32.mrb[137].mxu1  ;;  %v2493_v41 = vpop.f32.mrb[137].mxu0  ;;  %v6964_v34 = vrot.slane %v6948_v11, %v14449_v6 }
 0x368   : > { %18015 = vst [vmem:[#allocation49_spill] sm:$0xff] %v14819_v47  ;;  %12102 = vrcp.f32 %v3405_v10  ;;  %v14821_v62 = vadd.f32 %v2493_v41, %v1948_v33  ;;  %v1952_v24 = vpop.f32.mrb[138].mxu1  ;;  %v6978_v10 = vrot.slane %v6950_v14, %v14449_v6 }
 0x369   : > { %v12093_v43 = vpop.eup %12092  ;;  %v3729_v15 = vadd.f32 %v14810_v39, %v3642_v57  ;;  %v11335_v8 = vmul.f32 -1.442695, %v3089_v23  ;;  %v2497_v2 = vpop.f32.mrb[138].mxu0 }
 0x36a   : > { %v14825_v19 = vpop.eup %12094  ;;  %v3406_v30 = vadd.f32 1.0, %v12093_v43  ;;  %v2912_v18 = vpop.xlane.xlu1 %2911  ;;  %v14834_v58 = vadd.f32 %v2497_v2, %v1952_v24  ;;  %v18021_v24 = vld [vmem:[#allocation51_spill] sm:$0xff] }
 0x36b   : > { %18016 = vst [vmem:[#allocation80_spill] sm:$0xff] %v14825_v19  ;;  %3809 = vst [vmem:[%s14387_s19 + $0xb8] sm:$0xff] %v3729_v15  ;;  %v3643_v38 = vmul.f32 %v14825_v19, %v18017_v12  ;;  %12104 = vpow2.f32 %v11335_v8  ;;  %v3090_v42 = vadd.f32 %v14292_v63, %v2912_v18  ;;  %v1954_v57 = vpop.f32.mrb[139].mxu1  ;;  %v2499_v23 = vpop.f32.mrb[139].mxu0  ;;  %v6979_v12 = vcombine.low %v6957_v16, %v6964_v34 }
 0x36c   : > { %18018 = vst [vmem:[#allocation50_spill] sm:$0xff] %v14834_v58  ;;  %12106 = vrcp.f32 %v3406_v30  ;;  %v14836_v33 = vadd.f32 %v2499_v23, %v1954_v57  ;;  %v1958_v14 = vpop.f32.mrb[140].mxu1  ;;  %v6980_v8 = vcombine.low %v6971_v61, %v6978_v10 }
 0x36d   : > { %v12097_v11 = vpop.eup %12096  ;;  %v3730_v1 = vadd.f32 %v14810_v39, %v3643_v38  ;;  %v11336_v41 = vmul.f32 -1.442695, %v3090_v42  ;;  %v2503_v19 = vpop.f32.mrb[140].mxu0 }
 0x36e   : > { %18019 = vst [vmem:[#allocation81_spill] sm:$0xff] %v14836_v33  ;;  %v14839_v43 = vpop.eup %12098  ;;  %v3407_v15 = vadd.f32 1.0, %v12097_v11  ;;  %v2915_v18 = vpop.xlane.xlu0 %2914  ;;  %v14845_v57 = vadd.f32 %v2503_v19, %v1958_v14  ;;  %v6987_v14 = vrot.slane %v6979_v12, %v14449_v6 }
 0x36f   : > { %18020 = vst [vmem:[#allocation82_spill] sm:$0xff] %v14839_v43  ;;  %3810 = vst [vmem:[%s14387_s19 + $0xc0] sm:$0xff] %v3730_v1  ;;  %v3644_v2 = vmul.f32 %v14839_v43, %v18021_v24  ;;  %12108 = vpow2.f32 %v11336_v41  ;;  %v3091_v30 = vadd.f32 %v14292_v63, %v2915_v18  ;;  %v1960_v23 = vpop.f32.mrb[141].mxu1  ;;  %v2505_v38 = vpop.f32.mrb[141].mxu0  ;;  %v14852_v1 = vld [vmem:[#allocation6] ss:$0 sm:$0xff]  ;;  %v6994_v18 = vrot.slane %v6980_v8, %v14449_v6 }
 0x370   : > { %18022 = vst [vmem:[#allocation51_spill] sm:$0xff] %v14845_v57  ;;  %12110 = vrcp.f32 %v3407_v15  ;;  %v14847_v42 = vadd.f32 %v2505_v38, %v1960_v23  ;;  %v1964_v61 = vpop.f32.mrb[142].mxu1  ;;  %v2618_v41 = vadd.f32 %v14852_v1, %v14457_v51  ;;  %v18025_v23 = vld [vmem:[#allocation18_spill] sm:$0xff] }
 0x371   : > { %v12101_v11 = vpop.eup %12100  ;;  %v3731_v16 = vadd.f32 %v14810_v39, %v3644_v2  ;;  %v11337_v34 = vmul.f32 -1.442695, %v3091_v30  ;;  %v2509_v15 = vpop.f32.mrb[142].mxu0 }
 0x372   : > { %18023 = vst [vmem:[#allocation83_spill] sm:$0xff] %v14847_v42  ;;  %v14850_v10 = vpop.eup %12102  ;;  %v3408_v19 = vadd.f32 1.0, %v12101_v11  ;;  %v2918_v24 = vpop.xlane.xlu1 %2917  ;;  %v14862_v38 = vadd.f32 %v2509_v15, %v1964_v61  ;;  %v2698_v47 = vmax.f32 %v2618_v41, 0.0  ;;  %v6995_v15 = vcombine.low %v6987_v14, %v6994_v18 }
 0x373   : > { %18024 = vst [vmem:[#allocation84_spill] sm:$0xff] %v14850_v10  ;;  %3811 = vst [vmem:[%s14387_s19 + $0xc8] sm:$0xff] %v3731_v16  ;;  %v3645_v2 = vmul.f32 %v14850_v10, %v18025_v23  ;;  %12112 = vpow2.f32 %v11337_v34  ;;  %v3092_v30 = vadd.f32 %v14292_v63, %v2918_v24  ;;  %v1966_v58 = vpop.f32.mrb[143].mxu1  ;;  %v2511_v57 = vpop.f32.mrb[143].mxu0  ;;  %v14871_v34 = vadd.f32 %v14852_v1, %v14568_v53 }
 0x374   : > { %18026 = vst [vmem:[#allocation18_spill] sm:$0xff] %v14862_v38  ;;  %12114 = vrcp.f32 %v3408_v19  ;;  %v14864_v51 = vadd.f32 %v2511_v57, %v1966_v58  ;;  %v1970_v33 = vpop.f32.mrb[144].mxu1  ;;  %v18029_v19 = vld [vmem:[#allocation19_spill] sm:$0xff]  ;;  %v4077_v53 = vrot.slane %v14446_v54, %v14347_v50  ;;  %v4081_v14 = vrot.slane %v14446_v54, %v14352_v0 }
 0x375   : > { %v12105_v12 = vpop.eup %12104  ;;  %v3732_v8 = vadd.f32 %v14810_v39, %v3645_v2  ;;  %v11338_v11 = vmul.f32 -1.442695, %v3092_v30  ;;  %v2515_v24 = vpop.f32.mrb[144].mxu0 }
 0x376   : > { %18027 = vst [vmem:[#allocation85_spill] sm:$0xff] %v14864_v51  ;;  %v14867_v16 = vpop.eup %12106  ;;  %v3409_v61 = vadd.f32 1.0, %v12105_v12  ;;  %v2921_v23 = vpop.xlane.xlu0 %2920  ;;  %v14877_v2 = vadd.f32 %v2515_v24, %v1970_v33  ;;  %v4085_v33 = vrot.slane %v14446_v54, %v14355_v13 }
 0x377   : > { %18028 = vst [vmem:[#allocation86_spill] sm:$0xff] %v14867_v16  ;;  %3812 = vst [vmem:[%s14387_s19 + $0xd0] sm:$0xff] %v3732_v8  ;;  %v3646_v58 = vmul.f32 %v14867_v16, %v18029_v19  ;;  %12116 = vpow2.f32 %v11338_v11  ;;  %v3093_v57 = vadd.f32 %v14292_v63, %v2921_v23  ;;  %v1972_v30 = vpop.f32.mrb[145].mxu1  ;;  %v2517_v38 = vpop.f32.mrb[145].mxu0  ;;  %10454 = vperm.xlu0 %11988, %v6995_v15  }
 0x378   : > { %18030 = vst [vmem:[#allocation19_spill] sm:$0xff] %v14877_v2  ;;  %12118 = vrcp.f32 %v3409_v61  ;;  %v14879_v41 = vadd.f32 %v2517_v38, %v1972_v30  ;;  %v1976_v11 = vpop.f32.mrb[146].mxu1  ;;  %v4089_v61 = vrot.slane %v14446_v54, %v14358_v60  ;;  %v2785_v19 = vmul.f32 %v14744_v28, %v2698_v47 }
 0x379   : > { %v12109_v18 = vpop.eup %12108  ;;  %v3733_v12 = vadd.f32 %v14810_v39, %v3646_v58  ;;  %v11339_v8 = vmul.f32 -1.442695, %v3093_v57  ;;  %v2521_v24 = vpop.f32.mrb[146].mxu0  ;;  %v4093_v30 = vrot.slane %v14446_v54, %v14374_v37  ;;  %v4097_v58 = vrot.slane %v14446_v54, %v14377_v22  ;;  %v18033_v57 = vld [vmem:[#allocation20_spill] sm:$0xff] }
 0x37a   : > { %18031 = vst [vmem:[#allocation87_spill] sm:$0xff] %v14879_v41  ;;  %v14890_v38 = vpop.eup %12110  ;;  %v3410_v15 = vadd.f32 1.0, %v12109_v18  ;;  %v2924_v23 = vpop.xlane.xlu1 %2923  ;;  %v14901_v10 = vadd.f32 %v2521_v24, %v1976_v11  ;;  %v14912_v11 = vcombine.low %v4085_v33, %v4089_v61 }
 0x37b   : > { %18032 = vst [vmem:[#allocation88_spill] sm:$0xff] %v14890_v38  ;;  %3813 = vst [vmem:[%s14387_s19 + $0xd8] sm:$0xff] %v3733_v12  ;;  %v3647_v2 = vmul.f32 %v14890_v38, %v18033_v57  ;;  %12120 = vpow2.f32 %v11339_v8  ;;  %v3094_v51 = vadd.f32 %v14292_v63, %v2924_v23  ;;  %v1978_v18 = vpop.f32.mrb[147].mxu1  ;;  %v2523_v35 = vpop.f32.mrb[147].mxu0  ;;  %v4105_v12 = vrot.slane %v14446_v54, %v14403_v48  ;;  %v18037_v54 = vld [vmem:[#allocation21_spill] sm:$0xff] }
 0x37c   : > { %18034 = vst [vmem:[#allocation20_spill] sm:$0xff] %v14901_v10  ;;  %12122 = vrcp.f32 %v3410_v15  ;;  %v14903_v47 = vadd.f32 %v2523_v35, %v1978_v18  ;;  %v1982_v38 = vpop.f32.mrb[148].mxu1  ;;  %v14910_v23 = vcombine.low %v4077_v53, %v4081_v14 }
 0x37d   : > { %v12113_v4 = vpop.eup %12112  ;;  %v3734_v57 = vadd.f32 %v14810_v39, %v3647_v2  ;;  %v11340_v8 = vmul.f32 -1.442695, %v3094_v51  ;;  %v2527_v18 = vpop.f32.mrb[148].mxu0  ;;  %v6705_v61 = vcombine.low %v4101_v21, %v4105_v12  ;;  %v18041_v21 = vld [vmem:[#allocation44_spill] sm:$0xff] }
 0x37e   : > { %18035 = vst [vmem:[#allocation89_spill] sm:$0xff] %v14903_v47  ;;  %v14914_v24 = vpop.eup %12114  ;;  %v3411_v15 = vadd.f32 1.0, %v12113_v4  ;;  %v2927_v10 = vpop.xlane.xlu0 %2926  ;;  %v14917_v47 = vcombine.low %v4093_v30, %v4097_v58  ;;  %v14923_v2 = vadd.f32 %v2527_v18, %v1982_v38  ;;  %v2964_v4 = vsel %vm2816_vm0, %v2785_v19, 0.0 }
 0x37f   : > { %18036 = vst [vmem:[#allocation90_spill] sm:$0xff] %v14914_v24  ;;  %3814 = vst [vmem:[%s14387_s19 + $0xe0] sm:$0xff] %v3734_v57  ;;  %v3648_v16 = vmul.f32 %v14914_v24, %v18037_v54  ;;  %12124 = vpow2.f32 %v11340_v8  ;;  %v3095_v51 = vadd.f32 %v14292_v63, %v2927_v10  ;;  %v1984_v53 = vpop.f32.mrb[149].mxu1  ;;  %v2529_v14 = vpop.f32.mrb[149].mxu0  ;;  %v6712_v8 = vrot.slane %v14910_v23, %v14449_v6 }
 0x380   : > { %18038 = vst [vmem:[#allocation21_spill] sm:$0xff] %v14923_v2  ;;  %12126 = vrcp.f32 %v3411_v15  ;;  %v14925_v33 = vadd.f32 %v2529_v14, %v1984_v53  ;;  %v1988_v35 = vpop.f32.mrb[150].mxu1  ;;  %v6719_v10 = vrot.slane %v14912_v11, %v14449_v6  ;;  %v6726_v19 = vrot.slane %v14917_v47, %v14449_v6 }
 0x381   : > { %v12117_v30 = vpop.eup %12116  ;;  %v3735_v58 = vadd.f32 %v14810_v39, %v3648_v16  ;;  %v11341_v57 = vmul.f32 -1.442695, %v3095_v51  ;;  %v2533_v18 = vpop.f32.mrb[150].mxu0  ;;  %v4109_v12 = vrot.slane %v18041_v21, %v14347_v50  ;;  %v4113_v16 = vrot.slane %v18041_v21, %v14352_v0  ;;  %v18042_v51 = vld [vmem:[#allocation22_spill] sm:$0xff] }
 0x382   : > { %18039 = vst [vmem:[#allocation91_spill] sm:$0xff] %v14925_v33  ;;  %v14933_v38 = vpop.eup %12118  ;;  %v3412_v15 = vadd.f32 1.0, %v12117_v30  ;;  %v2930_v54 = vpop.xlane.xlu1 %2929  ;;  %v14945_v53 = vadd.f32 %v2533_v18, %v1988_v35  ;;  %v4117_v47 = vrot.slane %v18041_v21, %v14355_v13  ;;  %v4125_v35 = vrot.slane %v18041_v21, %v14374_v37 }
 0x383   : > { %18040 = vst [vmem:[#allocation92_spill] sm:$0xff] %v14933_v38  ;;  %3815 = vst [vmem:[%s14387_s19 + $0xe8] sm:$0xff] %v3735_v58  ;;  %v3649_v23 = vmul.f32 %v14933_v38, %v18042_v51  ;;  %12128 = vpow2.f32 %v11341_v57  ;;  %v3096_v11 = vadd.f32 %v14292_v63, %v2930_v54  ;;  %v2535_v14 = vpop.f32.mrb[151].mxu0  ;;  %v1990_v30 = vpop.f32.mrb[151].mxu1  ;;  %v4121_v58 = vrot.slane %v18041_v21, %v14358_v60 }
 0x384   : > { %18043 = vst [vmem:[#allocation44_spill] sm:$0xff] %v14945_v53  ;;  %12130 = vrcp.f32 %v3412_v15  ;;  %v14947_v2 = vadd.f32 %v2535_v14, %v1990_v30  ;;  %v1994_v38 = vpop.f32.mrb[152].mxu1  ;;  %v4129_v15 = vrot.slane %v18041_v21, %v14377_v22  ;;  %v6733_v53 = vrot.slane %v6705_v61, %v14449_v6 }
 0x385   : > { %v12121_v24 = vpop.eup %12120  ;;  %v3736_v51 = vadd.f32 %v14810_v39, %v3649_v23  ;;  %v11342_v57 = vmul.f32 -1.442695, %v3096_v11  ;;  %2965 = vadd.xlane.f32.xlu1 %v2964_v4  ;;  %v2539_v14 = vpop.f32.mrb[152].mxu0  ;;  %v4137_v23 = vrot.slane %v18041_v21, %v14403_v48  ;;  %v18046_v11 = vld [vmem:[#allocation23_spill] sm:$0xff]  ;;  %v6734_v61 = vcombine.low %v6712_v8, %v6719_v10 }
 0x386   : > { %18044 = vst [vmem:[#allocation22_spill] sm:$0xff] %v14947_v2  ;;  %v14958_v18 = vpop.eup %12122  ;;  %v3413_v54 = vadd.f32 1.0, %v12121_v24  ;;  %v2933_v30 = vpop.xlane.xlu0 %2932  ;;  %v4133_v2 = vrot.slane %v18041_v21, %v14400_v40  ;;  %v14969_v41 = vadd.f32 %v2539_v14, %v1994_v38  ;;  %v6751_v46 = vcombine.low %v4109_v12, %v4113_v16 }
 0x387   : > { %18045 = vst [vmem:[#allocation93_spill] sm:$0xff] %v14958_v18  ;;  %3816 = vst [vmem:[%s14387_s19 + $0xf0] sm:$0xff] %v3736_v51  ;;  %v3650_v33 = vmul.f32 %v14958_v18, %v18046_v11  ;;  %12132 = vpow2.f32 %v11342_v57  ;;  %v3097_v20 = vadd.f32 %v14292_v63, %v2933_v30  ;;  %v1996_v24 = vpop.f32.mrb[153].mxu1  ;;  %v2541_v4 = vpop.f32.mrb[153].mxu0  ;;  %v6752_v42 = vcombine.low %v4117_v47, %v4121_v58 }
 0x388   : > { %18047 = vst [vmem:[#allocation23_spill] sm:$0xff] %v14969_v41  ;;  %12134 = vrcp.f32 %v3413_v54  ;;  %v14971_v49 = vadd.f32 %v2541_v4, %v1996_v24  ;;  %v2000_v27 = vpop.f32.mrb[154].mxu1  ;;  %v6753_v11 = vcombine.low %v4125_v35, %v4129_v15  ;;  %v6735_v41 = vcombine.low %v6726_v19, %v6733_v53  ;;  %v18049_v24 = vld [vmem:[#allocation24_spill] sm:$0xff] }
 0x389   : > { %v12125_v43 = vpop.eup %12124  ;;  %v3737_v21 = vadd.f32 %v14810_v39, %v3650_v33  ;;  %v11343_v51 = vmul.f32 -1.442695, %v3097_v20  ;;  %v2545_v38 = vpop.f32.mrb[154].mxu0  ;;  %v6754_v18 = vcombine.low %v4133_v2, %v4137_v23  ;;  %v6761_v54 = vrot.slane %v6751_v46, %v14449_v6 }
 0x38a   : > { %v14974_v57 = vpop.eup %12126  ;;  %v3414_v30 = vadd.f32 1.0, %v12125_v43  ;;  %v2936_v14 = vpop.xlane.xlu1 %2935  ;;  %v14981_v20 = vadd.f32 %v2545_v38, %v2000_v27  ;;  %v18051_v43 = vmax.f32 %v14871_v34, 0.0  ;;  %v6768_v46 = vrot.slane %v6752_v42, %v14449_v6  ;;  %v18053_v42 = vld [vmem:[#allocation25_spill] sm:$0xff] }
 0x38b   : > { %18048 = vst [vmem:[#allocation94_spill] sm:$0xff] %v14974_v57  ;;  %3817 = vst [vmem:[%s14387_s19 + $0xf8] sm:$0xff] %v3737_v21  ;;  %v3651_v8 = vmul.f32 %v14974_v57, %v18049_v24  ;;  %12136 = vpow2.f32 %v11343_v51  ;;  %v3098_v33 = vadd.f32 %v14292_v63, %v2936_v14  ;;  %v2547_v10 = vpop.f32.mrb[155].mxu0  ;;  %v2002_v12 = vpop.f32.mrb[155].mxu1  ;;  %v6775_v27 = vrot.slane %v6753_v11, %v14449_v6 }
 0x38c   : > { %18050 = vst [vmem:[#allocation24_spill] sm:$0xff] %v14981_v20  ;;  %12138 = vrcp.f32 %v3414_v30  ;;  %v2792_v16 = vmul.f32 %v14744_v28, %v18051_v43  ;;  %v14986_v2 = vadd.f32 %v2547_v10, %v2002_v12  ;;  %v2006_v58 = vpop.f32.mrb[156].mxu1  ;;  %v6782_v35 = vrot.slane %v6754_v18, %v14449_v6 }
 0x38d   : > { %v12129_v19 = vpop.eup %12128  ;;  %v3738_v53 = vadd.f32 %v14810_v39, %v3651_v8  ;;  %v11344_v47 = vmul.f32 -1.442695, %v3098_v33  ;;  %v2551_v34 = vpop.f32.mrb[156].mxu0  ;;  %v6742_v21 = vrot.slane %v6734_v61, %v14449_v6  ;;  %v6749_v51 = vrot.slane %v6735_v41, %v14449_v6 }
 0x38e   : > { %18052 = vst [vmem:[#allocation95_spill] sm:$0xff] %v14986_v2  ;;  %v14992_v15 = vpop.eup %12130  ;;  %v3415_v23 = vadd.f32 1.0, %v12129_v19  ;;  %v2939_v4 = vpop.xlane.xlu0 %2938  ;;  %v6783_v30 = vcombine.low %v6761_v54, %v6768_v46  ;;  %v15000_v11 = vadd.f32 %v2551_v34, %v2006_v58  ;;  %v6784_v33 = vcombine.low %v6775_v27, %v6782_v35  ;;  %v18056_v27 = vld [vmem:[#allocation26_spill] sm:$0xff] }
 0x38f   : > { %3818 = vst [vmem:[%s14387_s19 + $0x100] sm:$0xff] %v3738_v53  ;;  %v3652_v38 = vmul.f32 %v14992_v15, %v18053_v42  ;;  %12140 = vpow2.f32 %v11344_v47  ;;  %v3099_v14 = vadd.f32 %v14292_v63, %v2939_v4  ;;  %v2008_v18 = vpop.f32.mrb[157].mxu1  ;;  %v2553_v24 = vpop.f32.mrb[157].mxu0  ;;  %v2985_v54 = vsel %vm2816_vm0, %v2792_v16, 0.0 }
 0x390   : > { %18054 = vst [vmem:[#allocation25_spill] sm:$0xff] %v15000_v11  ;;  %12142 = vrcp.f32 %v3415_v23  ;;  %v15002_v8 = vadd.f32 %v2553_v24, %v2008_v18  ;;  %v2012_v12 = vpop.f32.mrb[158].mxu1  ;;  %v6750_v47 = vcombine.low %v6742_v21, %v6749_v51  ;;  %v6791_v58 = vrot.slane %v6783_v30, %v14449_v6 }
 0x391   : > { %v12133_v61 = vpop.eup %12132  ;;  %v3739_v41 = vadd.f32 %v14810_v39, %v3652_v38  ;;  %v11345_v10 = vmul.f32 -1.442695, %v3099_v14  ;;  %v2557_v19 = vpop.f32.mrb[158].mxu0  ;;  %v4301_v23 = vrot.slane %v14554_v26, %v14347_v50  ;;  %v6798_v21 = vrot.slane %v6784_v33, %v14449_v6 }
 0x392   : > { %v15006_v43 = vpop.eup %12134  ;;  %v3416_v46 = vadd.f32 1.0, %v12133_v61  ;;  %v2942_v53 = vpop.xlane.xlu1 %2941  ;;  %v15015_v34 = vadd.f32 %v2557_v19, %v2012_v12  ;;  %v4305_v51 = vrot.slane %v14554_v26, %v14352_v0  ;;  %v4309_v24 = vrot.slane %v14554_v26, %v14355_v13 }
 0x393   : > { %18055 = vst [vmem:[#allocation96_spill] sm:$0xff] %v15006_v43  ;;  %3819 = vst [vmem:[%s14387_s19 + $0x108] sm:$0xff] %v3739_v41  ;;  %v3653_v35 = vmul.f32 %v15006_v43, %v18056_v27  ;;  %12144 = vpow2.f32 %v11345_v10  ;;  %v3100_v16 = vadd.f32 %v14292_v63, %v2942_v53  ;;  %v2014_v4 = vpop.f32.mrb[159].mxu1  ;;  %v2559_v42 = vpop.f32.mrb[159].mxu0  ;;  %v4313_v61 = vrot.slane %v14554_v26, %v14358_v60  ;;  %v18059_v53 = vld [vmem:[#allocation27_spill] sm:$0xff] }
 0x394   : > { %18057 = vst [vmem:[#allocation26_spill] sm:$0xff] %v15015_v34  ;;  %12146 = vrcp.f32 %v3416_v46  ;;  %v15017_v38 = vadd.f32 %v2559_v42, %v2014_v4  ;;  %v4317_v33 = vrot.slane %v14554_v26, %v14374_v37  ;;  %v4321_v46 = vrot.slane %v14554_v26, %v14377_v22 }
 0x395   : > { %v12137_v30 = vpop.eup %12136  ;;  %v3740_v14 = vadd.f32 %v14810_v39, %v3653_v35  ;;  %v11346_v18 = vmul.f32 -1.442695, %v3100_v16  ;;  %v2945_v12 = vpop.xlane.xlu0 %2944  ;;  %v4325_v19 = vrot.slane %v14554_v26, %v14400_v40  ;;  %v4329_v16 = vrot.slane %v14554_v26, %v14403_v48 }
 0x396   : > { %18058 = vst [vmem:[#allocation97_spill] sm:$0xff] %v15017_v38  ;;  %v15027_v41 = vpop.eup %12138  ;;  %v3417_v10 = vadd.f32 1.0, %v12137_v30  ;;  %2986 = vadd.xlane.f32.xlu0 %v2985_v54  ;;  %10439 = vperm.xlu1 %11989, %v6750_v47   ;;  %v3101_v35 = vadd.f32 %v14292_v63, %v2945_v12  ;;  %v6799_v34 = vcombine.low %v6791_v58, %v6798_v21  ;;  %v18061_v47 = vld [vmem:[#allocation28_spill] sm:$0xff] }
 0x397   : > { %3820 = vst [vmem:[%s14387_s19 + $0x110] sm:$0xff] %v3740_v14  ;;  %v3654_v27 = vmul.f32 %v15027_v41, %v18059_v53  ;;  %12148 = vpow2.f32 %v11346_v18  ;;  %v7045_v53 = vcombine.low %v4301_v23, %v4305_v51  ;;  %v7046_v54 = vcombine.low %v4309_v24, %v4313_v61 }
 0x398   : > { %12150 = vrcp.f32 %v3417_v10  ;;  %v11347_v30 = vmul.f32 -1.442695, %v3101_v35  ;;  %v7047_v43 = vcombine.low %v4317_v33, %v4321_v46  ;;  %v7048_v10 = vcombine.low %v4325_v19, %v4329_v16 }
 0x399   : > { %v12141_v4 = vpop.eup %12140  ;;  %v3741_v42 = vadd.f32 %v14810_v39, %v3654_v27  ;;  %v2948_v11 = vpop.xlane.xlu1 %2947  ;;  %v7055_v24 = vrot.slane %v7045_v53, %v14449_v6  ;;  %v7062_v61 = vrot.slane %v7046_v54, %v14449_v6  ;;  %v18064_v53 = vld [vmem:[#allocation31_spill] sm:$0xff] }
 0x39a   : > { %v15042_v20 = vpop.eup %12142  ;;  %v3418_v14 = vadd.f32 1.0, %v12141_v4  ;;  %12152 = vpow2.f32 %v11347_v30  ;;  %10442 = vperm.xlu1 %11989, %v6799_v34   ;;  %v3102_v26 = vadd.f32 %v14292_v63, %v2948_v11  ;;  %v7069_v33 = vrot.slane %v7047_v43, %v14449_v6  ;;  %v18062_v34 = vld [vmem:[#allocation29_spill] sm:$0xff] }
 0x39b   : > { %18060 = vst [vmem:[#allocation27_spill] sm:$0xff] %v15042_v20  ;;  %3821 = vst [vmem:[%s14387_s19 + $0x118] sm:$0xff] %v3741_v42  ;;  %v3655_v18 = vmul.f32 %v15042_v20, %v18061_v47  ;;  %v7076_v19 = vrot.slane %v7048_v10, %v14449_v6 }
 0x39c   : > { %12154 = vrcp.f32 %v3418_v14  ;;  %v11348_v21 = vmul.f32 -1.442695, %v3102_v26  ;;  %v7077_v14 = vcombine.low %v7055_v24, %v7062_v61 }
 0x39d   : > { %v12145_v12 = vpop.eup %12144  ;;  %v3742_v58 = vadd.f32 %v14810_v39, %v3655_v18  ;;  %v2951_v51 = vpop.xlane.xlu0 %2950  ;;  %v7078_v47 = vcombine.low %v7069_v33, %v7076_v19  ;;  %v18067_v19 = vld [vmem:[#allocation33_spill] sm:$0xff] }
 0x39e   : > { %v15049_v27 = vpop.eup %12146  ;;  %v3419_v23 = vadd.f32 1.0, %v12145_v12  ;;  %12156 = vpow2.f32 %v11348_v21  ;;  %v3103_v46 = vadd.f32 %v14292_v63, %v2951_v51  ;;  %v7085_v24 = vrot.slane %v7077_v14, %v14449_v6 }
 0x39f   : > { %3822 = vst [vmem:[%s14387_s19 + $0x120] sm:$0xff] %v3742_v58  ;;  %v3656_v11 = vmul.f32 %v15049_v27, %v18062_v34  ;;  %v7092_v61 = vrot.slane %v7078_v47, %v14449_v6  ;;  %v18069_v47 = vld [vmem:[#allocation34_spill] sm:$0xff] }
 0x3a0   : > { %12158 = vrcp.f32 %v3419_v23  ;;  %v11349_v4 = vmul.f32 -1.442695, %v3103_v46  ;;  %v18065_v23 = vld [vmem:[#allocation32_spill] sm:$0xff] }
 0x3a1   : > { %v12149_v35 = vpop.eup %12148  ;;  %v3743_v16 = vadd.f32 %v14810_v39, %v3656_v11 }
 0x3a2   : > { %v15060_v42 = vpop.eup %12150  ;;  %v3420_v30 = vadd.f32 1.0, %v12149_v35  ;;  %v2954_v43 = vpop.xlane.xlu1 %2953  ;;  %12160 = vpow2.f32 %v11349_v4 }
 0x3a3   : > { %18063 = vst [vmem:[#allocation28_spill] sm:$0xff] %v15060_v42  ;;  %3823 = vst [vmem:[%s14387_s19 + $0x128] sm:$0xff] %v3743_v16  ;;  %v3657_v54 = vmul.f32 %v15060_v42, %v18064_v53  ;;  %v3104_v18 = vadd.f32 %v14292_v63, %v2954_v43  ;;  %v7093_v16 = vcombine.low %v7085_v24, %v7092_v61  ;;  %v18068_v43 = vld [vmem:[#allocation48_spill] sm:$0xff] }
 0x3a4   : > { %12162 = vrcp.f32 %v3420_v30  ;;  %v12153_v26 = vpop.eup %12152  ;;  %v2620_v53 = vadd.f32 %v14852_v1, %v18068_v43  ;;  %v4177_v42 = vrot.slane %v14504_v5, %v14352_v0 }
 0x3a5   : > { %v3744_v10 = vadd.f32 %v14810_v39, %v3657_v54  ;;  %v11350_v12 = vmul.f32 -1.442695, %v3104_v18  ;;  %v3421_v21 = vadd.f32 1.0, %v12153_v26 }
 0x3a6   : > { %v15067_v58 = vpop.eup %12154 }
 0x3a7   : > { %3824 = vst [vmem:[%s14387_s19 + $0x130] sm:$0xff] %v3744_v10  ;;  %v3658_v51 = vmul.f32 %v15067_v58, %v18065_v23  ;;  %12164 = vpow2.f32 %v11350_v12 }
 0x3a8   : > { %12166 = vrcp.f32 %v3421_v21  ;;  %v12157_v33 = vpop.eup %12156  ;;  %v2700_v21 = vmax.f32 %v2620_v53, 0.0 }
 0x3a9   : > { %v3745_v34 = vadd.f32 %v14810_v39, %v3658_v51  ;;  %v3422_v46 = vadd.f32 1.0, %v12157_v33  ;;  %v18071_v51 = vld [vmem:[#allocation35_spill] sm:$0xff] }
 0x3aa   : > { %v15075_v11 = vpop.eup %12158 }
 0x3ab   : > { %18066 = vst [vmem:[#allocation29_spill] sm:$0xff] %v15075_v11  ;;  %3825 = vst [vmem:[%s14387_s19 + $0x138] sm:$0xff] %v3745_v34  ;;  %v3659_v35 = vmul.f32 %v15075_v11, %v18067_v19  ;;  %12168 = vrcp.f32 %v3422_v46  ;;  %v2787_v34 = vmul.f32 %v14744_v28, %v2700_v21  ;;  %v18072_v46 = vld [vmem:[#allocation46_spill] sm:$0xff]  ;;  %v2627_v21 = vadd.f32 %v14852_v1, %v14613_v55 }
 0x3ac   : > { %v12161_v4 = vpop.eup %12160  ;;  %10460 = vperm.xlu0 %11988, %v7093_v16   ;;  %v4141_v19 = vrot.slane %v18072_v46, %v14347_v50  ;;  %v4153_v43 = vrot.slane %v18072_v46, %v14358_v60  ;;  %v4157_v53 = vrot.slane %v18072_v46, %v14374_v37  ;;  %v4181_v55 = vrot.slane %v14504_v5, %v14355_v13 }
 0x3ad   : > { %v3746_v30 = vadd.f32 %v14810_v39, %v3659_v35  ;;  %v3423_v54 = vadd.f32 1.0, %v12161_v4  ;;  %v18073_v35 = vld [vmem:[#allocation36_spill] sm:$0xff]  ;;  %v4145_v4 = vrot.slane %v18072_v46, %v14352_v0 }
 0x3ae   : > { %v15081_v14 = vpop.eup %12162 }
 0x3af   : > { %3826 = vst [vmem:[%s14387_s19 + $0x140] sm:$0xff] %v3746_v30  ;;  %v3660_v18 = vmul.f32 %v15081_v14, %v18069_v47  ;;  %12170 = vrcp.f32 %v3423_v54  ;;  %v4149_v30 = vrot.slane %v18072_v46, %v14355_v13  ;;  %v4161_v54 = vrot.slane %v18072_v46, %v14377_v22 }
 0x3b0   : > { %v4165_v47 = vrot.slane %v18072_v46, %v14400_v40 }
 0x3b1   : > { %v12165_v26 = vpop.eup %12164  ;;  %v3747_v10 = vadd.f32 %v14810_v39, %v3660_v18  ;;  %v4169_v18 = vrot.slane %v18072_v46, %v14403_v48  ;;  %v4173_v46 = vrot.slane %v14504_v5, %v14347_v50 }
 0x3b2   : > { %v15089_v12 = vpop.eup %12166  ;;  %v3424_v23 = vadd.f32 1.0, %v12165_v26 }
 0x3b3   : > { %18070 = vst [vmem:[#allocation31_spill] sm:$0xff] %v15089_v12  ;;  %3827 = vst [vmem:[%s14387_s19 + $0x148] sm:$0xff] %v3747_v10  ;;  %v3661_v24 = vmul.f32 %v15089_v12, %v18071_v51  ;;  %v6802_v12 = vcombine.low %v4157_v53, %v4161_v54  ;;  %v6803_v11 = vcombine.low %v4165_v47, %v4169_v18  ;;  %v2707_v54 = vmax.f32 %v2627_v21, 0.0 }
 0x3b4   : > { %12172 = vrcp.f32 %v3424_v23  ;;  %v18075_v23 = vld [vmem:[#allocation38_spill] sm:$0xff]  ;;  %v6849_v38 = vcombine.low %v4173_v46, %v4177_v42 }
 0x3b5   : > { %v3748_v61 = vadd.f32 %v14810_v39, %v3661_v24  ;;  %v15095_v33 = vpop.eup %12168  ;;  %v2970_v24 = vsel %vm2816_vm0, %v2787_v34, 0.0  ;;  %v4189_v34 = vrot.slane %v14504_v5, %v14374_v37  ;;  %v6831_v20 = vrot.slane %v6803_v11, %v14449_v6 }
 0x3b6   : > { %v3662_v16 = vmul.f32 %v15095_v33, %v18073_v35  ;;  %v6801_v35 = vcombine.low %v4149_v30, %v4153_v43  ;;  %v4201_v30 = vrot.slane %v14504_v5, %v14403_v48  ;;  %v18076_v43 = vld [vmem:[#allocation39_spill] sm:$0xff]  ;;  %v6859_v21 = vrot.slane %v6849_v38, %v14449_v6 }
 0x3b7   : > { %3828 = vst [vmem:[%s14387_s19 + $0x150] sm:$0xff] %v3748_v61  ;;  %v6800_v61 = vcombine.low %v4141_v19, %v4145_v4  ;;  %v4193_v19 = vrot.slane %v14504_v5, %v14377_v22  ;;  %v4197_v4 = vrot.slane %v14504_v5, %v14400_v40  ;;  %v4381_v38 = vrot.slane %v14597_v9, %v14374_v37 }
 0x3b8   : > { %v3749_v26 = vadd.f32 %v14810_v39, %v3662_v16 }
 0x3b9   : > { %v15118_v10 = vpop.eup %12170  ;;  %v6810_v47 = vrot.slane %v6800_v61, %v14449_v6  ;;  %v6851_v57 = vcombine.low %v4189_v34, %v4193_v19  ;;  %v4393_v34 = vrot.slane %v14597_v9, %v14403_v48 }
 0x3ba   : > { %18074 = vst [vmem:[#allocation32_spill] sm:$0xff] %v15118_v10  ;;  %3829 = vst [vmem:[%s14387_s19 + $0x158] sm:$0xff] %v3749_v26  ;;  %v3663_v51 = vmul.f32 %v15118_v10, %v18075_v23  ;;  %v4185_v26 = vrot.slane %v14504_v5, %v14358_v60  ;;  %v6824_v10 = vrot.slane %v6802_v12, %v14449_v6 }
 0x3bb   : > { %v6852_v5 = vcombine.low %v4197_v4, %v4201_v30 }
 0x3bc   : > { %v3750_v16 = vadd.f32 %v14810_v39, %v3663_v51  ;;  %v6817_v51 = vrot.slane %v6801_v35, %v14449_v6  ;;  %v6850_v2 = vcombine.low %v4181_v55, %v4185_v26  ;;  %v4389_v26 = vrot.slane %v14597_v9, %v14400_v40 }
 0x3bd   : > { %v6880_v35 = vrot.slane %v6852_v5, %v14449_v6 }
 0x3be   : > { %v15135_v23 = vpop.eup %12172  ;;  %3830 = vst [vmem:[%s14387_s19 + $0x160] sm:$0xff] %v3750_v16  ;;  %2971 = vadd.xlane.f32.xlu1 %v2970_v24  ;;  %v2794_v16 = vmul.f32 %v14744_v28, %v2707_v54  ;;  %v6833_v24 = vcombine.low %v6824_v10, %v6831_v20  ;;  %v6866_v61 = vrot.slane %v6850_v2, %v14449_v6 }
 0x3bf   : > { %v3664_v53 = vmul.f32 %v15135_v23, %v18076_v43  ;;  %v6832_v43 = vcombine.low %v6810_v47, %v6817_v51  ;;  %v4365_v28 = vrot.slane %v14597_v9, %v14347_v50  ;;  %v4369_v20 = vrot.slane %v14597_v9, %v14352_v0 }
 0x3c0   : > { %v2991_v12 = vsel %vm2816_vm0, %v2794_v16, 0.0  ;;  %v6847_v11 = vrot.slane %v6833_v24, %v14449_v6  ;;  %v6881_v46 = vcombine.low %v6859_v21, %v6866_v61  ;;  %v4373_v2 = vrot.slane %v14597_v9, %v14355_v13  ;;  %v15184_v24 = vpop.permute.xlu1 %10430 }
 0x3c1   : > { %v3751_v18 = vadd.f32 %v14810_v39, %v3664_v53  ;;  %v6873_v39 = vrot.slane %v6851_v57, %v14449_v6  ;;  %v6840_v42 = vrot.slane %v6832_v43, %v14449_v6  ;;  %v4377_v57 = vrot.slane %v14597_v9, %v14358_v60 }
 0x3c2   : > { %v4385_v10 = vrot.slane %v14597_v9, %v14377_v22  ;;  %v6889_v4 = vrot.slane %v6881_v46, %v14449_v6  ;;  %v7143_v53 = vcombine.low %v4365_v28, %v4369_v20 }
 0x3c3   : > { %3831 = vst [vmem:[%s14387_s19 + $0x168] sm:$0xff] %v3751_v18  ;;  %v6882_v55 = vcombine.low %v6873_v39, %v6880_v35  ;;  %v6848_v19 = vcombine.low %v6840_v42, %v6847_v11  ;;  %v7144_v54 = vcombine.low %v4373_v2, %v4377_v57  ;;  %v7146_v18 = vcombine.low %v4389_v26, %v4393_v34 }
 0x3c4   : > { %v7145_v47 = vcombine.low %v4381_v38, %v4385_v10  ;;  %v7153_v5 = vrot.slane %v7143_v53, %v14449_v6 }
 0x3c5   : > { %v6896_v30 = vrot.slane %v6882_v55, %v14449_v6  ;;  %v7160_v16 = vrot.slane %v7144_v54, %v14449_v6  ;;  %v7174_v9 = vrot.slane %v7146_v18, %v14449_v6 }
 0x3c6   : > { %v7167_v43 = vrot.slane %v7145_v47, %v14449_v6 }
 0x3c7   : > { %v6897_v51 = vcombine.low %v6889_v4, %v6896_v30  ;;  %v7175_v21 = vcombine.low %v7153_v5, %v7160_v16  ;;  %v2622_v4 = vadd.f32 %v14852_v1, %v14528_v45  ;;  %v15200_v45 = vld [vmem:[#allocation8] ss:$0 sm:$0xff] }
 0x3c8   : > { %v7176_v61 = vcombine.low %v7167_v43, %v7174_v9  ;;  %v2629_v9 = vadd.f32 %v14852_v1, %v14657_v31  ;;  %v4217_v31 = vrot.slane %v14514_v29, %v14358_v60  ;;  %v4221_v1 = vrot.slane %v14514_v29, %v14374_v37 }
 0x3c9   : > { %v7183_v42 = vrot.slane %v7175_v21, %v14449_v6  ;;  %v2702_v18 = vmax.f32 %v2622_v4, 0.0 }
 0x3ca   : > { %v7190_v11 = vrot.slane %v7176_v61, %v14449_v6 }
 0x3cb   : > { %2992 = vadd.xlane.f32.xlu0 %v2991_v12  ;;  %v15187_v12 = vpop.permute.xlu0 %10427  ;;  %v2789_v61 = vmul.f32 %v15200_v45, %v2702_v18  ;;  %v15224_v18 = vld [vmem:[#allocation9] ss:$0 sm:$0xff] }
 0x3cc   : > { %v7191_v20 = vcombine.low %v7183_v42, %v7190_v11 }
 0x3cf   : > { %10445 = vperm.xlu1 %11989, %v6848_v19  }
 0x3d3   : > { %10448 = vperm.xlu1 %11989, %v6897_v51  }
 0x3d7   : > { %v2960_v39 = vpop.xlane.xlu1 %2959 }
 0x3d8   : > { %v3106_v35 = vadd.f32 %v14292_v63, %v2960_v39  ;;  %v4205_v39 = vrot.slane %v14514_v29, %v14347_v50 }
 0x3da   : > { %v11352_v46 = vmul.f32 -1.442695, %v3106_v35  ;;  %v4209_v35 = vrot.slane %v14514_v29, %v14352_v0 }
 0x3dc   : > { %12174 = vpow2.f32 %v11352_v46  ;;  %v4213_v46 = vrot.slane %v14514_v29, %v14355_v13  ;;  %v6898_v4 = vcombine.low %v4205_v39, %v4209_v35  ;;  %v18079_v35 = vld [vmem:[#allocation40_spill] sm:$0xff] }
 0x3dd   : > { %v2957_v55 = vpop.xlane.xlu0 %2956 }
 0x3de   : > { %v3105_v28 = vadd.f32 %v14292_v63, %v2957_v55 }
 0x3e0   : > { %v11351_v2 = vmul.f32 -1.442695, %v3105_v28  ;;  %v4225_v28 = vrot.slane %v14514_v29, %v14377_v22 }
 0x3e1   : > { %10466 = vperm.xlu0 %11988, %v7191_v20   ;;  %v2963_v57 = vpop.xlane.xlu0 %2962  ;;  %v4229_v20 = vrot.slane %v14514_v29, %v14400_v40 }
 0x3e2   : > { %12176 = vpow2.f32 %v11351_v2  ;;  %v3107_v38 = vadd.f32 %v14292_v63, %v2963_v57  ;;  %v4233_v2 = vrot.slane %v14514_v29, %v14403_v48 }
 0x3e4   : > { %v11353_v10 = vmul.f32 -1.442695, %v3107_v38 }
 0x3e6   : > { %v2969_v26 = vpop.xlane.xlu0 %2968  ;;  %v12175_v34 = vpop.eup %12174  ;;  %12178 = vpow2.f32 %v11353_v10  ;;  %v2709_v10 = vmax.f32 %v2629_v9, 0.0 }
 0x3e7   : > { %v3109_v19 = vadd.f32 %v14292_v63, %v2969_v26  ;;  %v3426_v30 = vadd.f32 1.0, %v12175_v34  ;;  %v18077_v26 = vld [vmem:[#allocation41_spill] sm:$0xff] }
 0x3e9   : > { %v11355_v53 = vmul.f32 -1.442695, %v3109_v19  ;;  %12180 = vrcp.f32 %v3426_v30  ;;  %v2976_v19 = vsel %vm2816_vm0, %v2789_v61, 0.0 }
 0x3ea   : > { %v2975_v54 = vpop.xlane.xlu0 %2974 }
 0x3eb   : > { %12182 = vpow2.f32 %v11355_v53  ;;  %v3111_v47 = vadd.f32 %v14292_v63, %v2975_v54  ;;  %v6899_v53 = vcombine.low %v4213_v46, %v4217_v31  ;;  %v6900_v54 = vcombine.low %v4221_v1, %v4225_v28 }
 0x3ec   : > { %v12177_v51 = vpop.eup %12176  ;;  %v4429_v1 = vrot.slane %v14644_v52, %v14347_v50 }
 0x3ed   : > { %v11357_v5 = vmul.f32 -1.442695, %v3111_v47  ;;  %v3425_v16 = vadd.f32 1.0, %v12177_v51  ;;  %v6901_v47 = vcombine.low %v4229_v20, %v4233_v2  ;;  %v6922_v61 = vrot.slane %v6900_v54, %v14449_v6 }
 0x3ee   : > { %v2981_v43 = vpop.xlane.xlu0 %2980  ;;  %v4457_v54 = vrot.slane %v14644_v52, %v14403_v48 }
 0x3ef   : > { %12184 = vpow2.f32 %v11357_v5  ;;  %v3113_v21 = vadd.f32 %v14292_v63, %v2981_v43  ;;  %v2796_v5 = vmul.f32 %v15200_v45, %v2709_v10  ;;  %v6929_v39 = vrot.slane %v6901_v47, %v14449_v6  ;;  %v18081_v10 = vld [vmem:[#allocation42_spill] sm:$0xff] }
 0x3f0   : > { %12186 = vrcp.f32 %v3425_v16  ;;  %v12179_v42 = vpop.eup %12178  ;;  %v6908_v16 = vrot.slane %v6898_v4, %v14449_v6  ;;  %v4445_v4 = vrot.slane %v14644_v52, %v14374_v37 }
 0x3f1   : > { %v11359_v11 = vmul.f32 -1.442695, %v3113_v21  ;;  %v3427_v55 = vadd.f32 1.0, %v12179_v42  ;;  %v6915_v21 = vrot.slane %v6899_v53, %v14449_v6  ;;  %v2997_v31 = vsel %vm2816_vm0, %v2796_v5, 0.0 }
 0x3f2   : > { %v6931_v2 = vcombine.low %v6922_v61, %v6929_v39  ;;  %v4453_v53 = vrot.slane %v14644_v52, %v14400_v40 }
 0x3f3   : > { %12188 = vpow2.f32 %v11359_v11  ;;  %v15219_v57 = vpop.eup %12180  ;;  %v6930_v20 = vcombine.low %v6908_v16, %v6915_v21  ;;  %v18083_v16 = vld [vmem:[#allocation45_spill] sm:$0xff] }
 0x3f4   : > { %12190 = vrcp.f32 %v3427_v55  ;;  %v3666_v34 = vmul.f32 %v15219_v57, %v18077_v26  ;;  %v6945_v5 = vrot.slane %v6931_v2, %v14449_v6 }
 0x3f5   : > { %v12183_v38 = vpop.eup %12182 }
 0x3f6   : > { %v3429_v30 = vadd.f32 1.0, %v12183_v38  ;;  %v3753_v29 = vadd.f32 %v15224_v18, %v3666_v34  ;;  %v4433_v38 = vrot.slane %v14644_v52, %v14352_v0  ;;  %v4437_v34 = vrot.slane %v14644_v52, %v14355_v13 }
 0x3f7   : > { %2977 = vadd.xlane.f32.xlu1 %v2976_v19  ;;  %v4441_v19 = vrot.slane %v14644_v52, %v14358_v60 }
 0x3f8   : > { %12192 = vrcp.f32 %v3429_v30  ;;  %3833 = vst [vmem:[%s14387_s19 + $0x178] sm:$0xff] %v3753_v29  ;;  %v4449_v30 = vrot.slane %v14644_v52, %v14377_v22  ;;  %v7241_v21 = vcombine.low %v4429_v1, %v4433_v38 }
 0x3f9   : > { %v12185_v51 = vpop.eup %12184  ;;  %v7242_v61 = vcombine.low %v4437_v34, %v4441_v19  ;;  %v18087_v34 = vld [vmem:[#allocation54_spill] sm:$0xff] }
 0x3fa   : > { %v15230_v43 = vpop.eup %12186  ;;  %v3431_v9 = vadd.f32 1.0, %v12185_v51  ;;  %v6938_v51 = vrot.slane %v6930_v20, %v14449_v6  ;;  %v7243_v39 = vcombine.low %v4445_v4, %v4449_v30  ;;  %v7251_v20 = vrot.slane %v7241_v21, %v14449_v6 }
 0x3fb   : > { %18078 = vst [vmem:[#allocation33_spill] sm:$0xff] %v15230_v43  ;;  %v3665_v42 = vmul.f32 %v15230_v43, %v18079_v35  ;;  %v7244_v35 = vcombine.low %v4453_v53, %v4457_v54  ;;  %v7258_v1 = vrot.slane %v7242_v61, %v14449_v6  ;;  %v15293_v61 = vld [vmem:[#allocation6] ss:$0 sm:$0xff] }
 0x3fc   : > { %12194 = vrcp.f32 %v3431_v9  ;;  %v7265_v2 = vrot.slane %v7243_v39, %v14449_v6  ;;  %v18088_v39 = vld [vmem:[#allocation57_spill] sm:$0xff] }
 0x3fd   : > { %v12189_v11 = vpop.eup %12188  ;;  %v3752_v46 = vadd.f32 %v15224_v18, %v3665_v42  ;;  %v7272_v38 = vrot.slane %v7244_v35, %v14449_v6  ;;  %v7273_v4 = vcombine.low %v7251_v20, %v7258_v1  ;;  %v2624_v35 = vadd.f32 %v15293_v61, %v18088_v39 }
 0x3fe   : > { %v15241_v55 = vpop.eup %12190  ;;  %v3433_v28 = vadd.f32 1.0, %v12189_v11  ;;  %v6946_v11 = vcombine.low %v6938_v51, %v6945_v5 }
 0x3ff   : > { %18080 = vst [vmem:[#allocation48_spill] sm:$0xff] %v15241_v55  ;;  %3832 = vst [vmem:[%s14387_s19 + $0x170] sm:$0xff] %v3752_v46  ;;  %v3667_v26 = vmul.f32 %v15241_v55, %v18081_v10  ;;  %v18085_v46 = vld [vmem:[#allocation52_spill] sm:$0xff]  ;;  %v7274_v30 = vcombine.low %v7265_v2, %v7272_v38  ;;  %v2631_v2 = vadd.f32 %v15293_v61, %v14708_v32 }
 0x400   : > { %12196 = vrcp.f32 %v3433_v28  ;;  %2998 = vadd.xlane.f32.xlu0 %v2997_v31  ;;  %v15274_v28 = vpop.permute.xlu1 %10433 }
 0x401   : > { %v3754_v47 = vadd.f32 %v15224_v18, %v3667_v26  ;;  %v7288_v51 = vrot.slane %v7274_v30, %v14449_v6 }
 0x402   : > { %v15261_v29 = vpop.eup %12192 }
 0x403   : > { %18082 = vst [vmem:[#allocation34_spill] sm:$0xff] %v15261_v29  ;;  %3834 = vst [vmem:[%s14387_s19 + $0x180] sm:$0xff] %v3754_v47  ;;  %v3669_v9 = vmul.f32 %v15261_v29, %v18083_v16  ;;  %v7281_v47 = vrot.slane %v7273_v4, %v14449_v6 }
 0x404   : > { %v15287_v54 = vpop.permute.xlu1 %10436 }
 0x405   : > { %v3756_v42 = vadd.f32 %v15224_v18, %v3669_v9  ;;  %v7289_v9 = vcombine.low %v7281_v47, %v7288_v51 }
 0x406   : > { %v15269_v52 = vpop.eup %12194 }
 0x407   : > { %18084 = vst [vmem:[#allocation35_spill] sm:$0xff] %v15269_v52  ;;  %3836 = vst [vmem:[%s14387_s19 + $0x190] sm:$0xff] %v3756_v42  ;;  %v3671_v31 = vmul.f32 %v15269_v52, %v18085_v46  ;;  %v15297_v42 = vpop.permute.xlu0 %10454  ;;  %v2704_v46 = vmax.f32 %v2624_v35, 0.0 }
 0x408   : > { %10451 = vperm.xlu1 %11989, %v6946_v11  }
 0x409   : > { %v3758_v10 = vadd.f32 %v15224_v18, %v3671_v31  ;;  %v2791_v38 = vmul.f32 %v15200_v45, %v2704_v46 }
 0x40a   : > { %v15281_v26 = vpop.eup %12196 }
 0x40b   : > { %18086 = vst [vmem:[#allocation46_spill] sm:$0xff] %v15281_v26  ;;  %3838 = vst [vmem:[%s14387_s19 + $0x1a0] sm:$0xff] %v3758_v10  ;;  %v3673_v19 = vmul.f32 %v15281_v26, %v18087_v34  ;;  %v18089_v10 = vld [vmem:[#allocation55_spill] sm:$0xff] }
 0x40c   : > { %v4269_v34 = vrot.slane %v18089_v10, %v14347_v50  ;;  %v4273_v4 = vrot.slane %v18089_v10, %v14352_v0  ;;  %v4277_v30 = vrot.slane %v18089_v10, %v14355_v13  ;;  %v4285_v47 = vrot.slane %v18089_v10, %v14374_v37 }
 0x40d   : > { %v3760_v53 = vadd.f32 %v15224_v18, %v3673_v19  ;;  %v4289_v32 = vrot.slane %v18089_v10, %v14377_v22  ;;  %v4293_v51 = vrot.slane %v18089_v10, %v14400_v40 }
 0x40f   : > { %3840 = vst [vmem:[%s14387_s19 + $0x1b0] sm:$0xff] %v3760_v53  ;;  %v4281_v53 = vrot.slane %v18089_v10, %v14358_v60  ;;  %v6998_v35 = vcombine.low %v4285_v47, %v4289_v32  ;;  %v4493_v32 = vrot.slane %v14694_v7, %v14347_v50 }
 0x411   : > { %v6997_v39 = vcombine.low %v4277_v30, %v4281_v53 }
 0x412   : > { %v2966_v5 = vpop.xlane.xlu1 %2965 }
 0x413   : > { %v3108_v16 = vadd.f32 %v14292_v63, %v2966_v5  ;;  %v4297_v5 = vrot.slane %v18089_v10, %v14403_v48  ;;  %v7013_v10 = vrot.slane %v6997_v39, %v14449_v6  ;;  %v4521_v39 = vrot.slane %v14694_v7, %v14403_v48 }
 0x415   : > { %v11354_v21 = vmul.f32 -1.442695, %v3108_v16  ;;  %v2711_v16 = vmax.f32 %v2631_v2, 0.0  ;;  %v7020_v2 = vrot.slane %v6998_v35, %v14449_v6 }
 0x416   : > { %10472 = vperm.xlu0 %11988, %v7289_v9   ;;  %v6996_v9 = vcombine.low %v4269_v34, %v4273_v4 }
 0x417   : > { %12198 = vpow2.f32 %v11354_v21  ;;  %v2982_v21 = vsel %vm2816_vm0, %v2791_v38, 0.0 }
 0x421   : > { %v12199_v11 = vpop.eup %12198 }
 0x422   : > { %v3428_v31 = vadd.f32 1.0, %v12199_v11  ;;  %v6999_v11 = vcombine.low %v4293_v51, %v4297_v5  ;;  %v4497_v51 = vrot.slane %v14694_v7, %v14352_v0  ;;  %v4501_v5 = vrot.slane %v14694_v7, %v14355_v13 }
 0x423   : > { %v2987_v20 = vpop.xlane.xlu0 %2986 }
 0x424   : > { %12200 = vrcp.f32 %v3428_v31  ;;  %v3115_v1 = vadd.f32 %v14292_v63, %v2987_v20  ;;  %v2798_v31 = vmul.f32 %v15200_v45, %v2711_v16  ;;  %v7006_v20 = vrot.slane %v6996_v9, %v14449_v6 }
 0x425   : > { %v7027_v34 = vrot.slane %v6999_v11, %v14449_v6  ;;  %v4505_v16 = vrot.slane %v14694_v7, %v14358_v60  ;;  %v4513_v9 = vrot.slane %v14694_v7, %v14377_v22 }
 0x426   : > { %v11361_v19 = vmul.f32 -1.442695, %v3115_v1  ;;  %v18091_v1 = vld [vmem:[#allocation43_spill] sm:$0xff]  ;;  %v3003_v4 = vsel %vm2816_vm0, %v2798_v31, 0.0  ;;  %v7028_v53 = vcombine.low %v7006_v20, %v7013_v10  ;;  %v7339_v31 = vcombine.low %v4493_v32, %v4497_v51 }
 0x427   : > { %v7029_v47 = vcombine.low %v7020_v2, %v7027_v34  ;;  %v7340_v20 = vcombine.low %v4501_v5, %v4505_v16 }
 0x428   : > { %12202 = vpow2.f32 %v11361_v19  ;;  %v7036_v35 = vrot.slane %v7028_v53, %v14449_v6  ;;  %v7349_v34 = vrot.slane %v7339_v31, %v14449_v6  ;;  %v18094_v31 = vld [vmem:[#allocation61_spill] sm:$0xff] }
 0x429   : > { %v7043_v11 = vrot.slane %v7029_v47, %v14449_v6  ;;  %v15358_v47 = vpop.permute.xlu1 %10439 }
 0x42b   : > { %v7044_v2 = vcombine.low %v7036_v35, %v7043_v11 }
 0x42c   : > { %2983 = vadd.xlane.f32.xlu1 %v2982_v21  ;;  %v4517_v21 = vrot.slane %v14694_v7, %v14400_v40 }
 0x42e   : > { %v15320_v46 = vpop.eup %12200  ;;  %v7342_v10 = vcombine.low %v4517_v21, %v4521_v39 }
 0x42f   : > { %18090 = vst [vmem:[#allocation36_spill] sm:$0xff] %v15320_v46  ;;  %v3668_v26 = vmul.f32 %v15320_v46, %v18091_v1 }
 0x431   : > { %v3755_v38 = vadd.f32 %v15224_v18, %v3668_v26  ;;  %v4509_v26 = vrot.slane %v14694_v7, %v14374_v37 }
 0x432   : > { %v12203_v19 = vpop.eup %12202 }
 0x433   : > { %3835 = vst [vmem:[%s14387_s19 + $0x188] sm:$0xff] %v3755_v38  ;;  %v3435_v30 = vadd.f32 1.0, %v12203_v19  ;;  %v7341_v1 = vcombine.low %v4509_v26, %v4513_v9  ;;  %v7356_v38 = vrot.slane %v7340_v20, %v14449_v6  ;;  %v15364_v9 = vpop.permute.xlu1 %10442  ;;  %v2626_v20 = vadd.f32 %v15293_v61, %v18094_v31 }
 0x435   : > { %12204 = vrcp.f32 %v3435_v30  ;;  %3004 = vadd.xlane.f32.xlu0 %v3003_v4  ;;  %v7363_v19 = vrot.slane %v7341_v1, %v14449_v6  ;;  %v7370_v4 = vrot.slane %v7342_v10, %v14449_v6  ;;  %v18093_v30 = vld [vmem:[#allocation58_spill] sm:$0xff]  ;;  %v7371_v32 = vcombine.low %v7349_v34, %v7356_v38  ;;  %v15369_v1 = vpop.permute.xlu0 %10460 }
 0x436   : > { %v2706_v10 = vmax.f32 %v2626_v20, 0.0 }
 0x437   : > { %v7372_v51 = vcombine.low %v7363_v19, %v7370_v4  ;;  %v7379_v16 = vrot.slane %v7371_v32, %v14449_v6  ;;  %v2633_v19 = vadd.f32 %v15293_v61, %v14749_v3 }
 0x438   : > { %v2793_v4 = vmul.f32 %v15200_v45, %v2706_v10 }
 0x439   : > { %v7386_v26 = vrot.slane %v7372_v51, %v14449_v6 }
 0x43a   : > { %v2988_v31 = vsel %vm2816_vm0, %v2793_v4, 0.0  ;;  %v4557_v4 = vrot.slane %v14732_v44, %v14347_v50 }
 0x43b   : > { %v7387_v21 = vcombine.low %v7379_v16, %v7386_v26 }
 0x43d   : > { %10457 = vperm.xlu1 %11989, %v7044_v2  }
 0x43f   : > { %v15354_v7 = vpop.eup %12204 }
 0x440   : > { %18092 = vst [vmem:[#allocation38_spill] sm:$0xff] %v15354_v7  ;;  %v3675_v53 = vmul.f32 %v15354_v7, %v18093_v30  ;;  %v18095_v30 = vld [vmem:[#allocation59_spill] sm:$0xff] }
 0x441   : > { %v4337_v32 = vrot.slane %v18095_v30, %v14352_v0  ;;  %v4341_v16 = vrot.slane %v18095_v30, %v14355_v13  ;;  %v4345_v26 = vrot.slane %v18095_v30, %v14358_v60  ;;  %v4353_v3 = vrot.slane %v18095_v30, %v14377_v22 }
 0x442   : > { %v3762_v5 = vadd.f32 %v15224_v18, %v3675_v53  ;;  %v4333_v53 = vrot.slane %v18095_v30, %v14347_v50 }
 0x443   : > { %v7095_v10 = vcombine.low %v4341_v16, %v4345_v26 }
 0x444   : > { %3842 = vst [vmem:[%s14387_s19 + $0x1c0] sm:$0xff] %v3762_v5  ;;  %v7094_v20 = vcombine.low %v4333_v53, %v4337_v32  ;;  %v18097_v32 = vld [vmem:[#allocation47_spill] sm:$0xff] }
 0x445   : > { %v7111_v52 = vrot.slane %v7095_v10, %v14449_v6 }
 0x446   : > { %v7104_v7 = vrot.slane %v7094_v20, %v14449_v6 }
 0x448   : > { %v7126_v16 = vcombine.low %v7104_v7, %v7111_v52  ;;  %v4577_v52 = vrot.slane %v14732_v44, %v14377_v22  ;;  %v4585_v7 = vrot.slane %v14732_v44, %v14403_v48 }
 0x44a   : > { %v7134_v20 = vrot.slane %v7126_v16, %v14449_v6 }
 0x44b   : > { %10478 = vperm.xlu0 %11988, %v7387_v21   ;;  %v2972_v39 = vpop.xlane.xlu1 %2971  ;;  %v4349_v21 = vrot.slane %v18095_v30, %v14374_v37 }
 0x44c   : > { %v3110_v35 = vadd.f32 %v14292_v63, %v2972_v39  ;;  %v4357_v39 = vrot.slane %v18095_v30, %v14400_v40 }
 0x44e   : > { %v11356_v11 = vmul.f32 -1.442695, %v3110_v35  ;;  %v4361_v35 = vrot.slane %v18095_v30, %v14403_v48 }
 0x450   : > { %12206 = vpow2.f32 %v11356_v11  ;;  %v2713_v11 = vmax.f32 %v2633_v19, 0.0 }
 0x458   : > { %v2993_v2 = vpop.xlane.xlu0 %2992 }
 0x459   : > { %v3117_v34 = vadd.f32 %v14292_v63, %v2993_v2  ;;  %v7096_v2 = vcombine.low %v4349_v21, %v4353_v3  ;;  %v4561_v21 = vrot.slane %v14732_v44, %v14352_v0 }
 0x45a   : > { %v12207_v38 = vpop.eup %12206 }
 0x45b   : > { %v3430_v51 = vadd.f32 1.0, %v12207_v38  ;;  %v11363_v5 = vmul.f32 -1.442695, %v3117_v34  ;;  %v7097_v34 = vcombine.low %v4357_v39, %v4361_v35  ;;  %v2800_v38 = vmul.f32 %v15200_v45, %v2713_v11 }
 0x45c   : > { %v7118_v29 = vrot.slane %v7096_v2, %v14449_v6  ;;  %v4565_v39 = vrot.slane %v14732_v44, %v14355_v13  ;;  %v4569_v35 = vrot.slane %v14732_v44, %v14358_v60  ;;  %v4573_v11 = vrot.slane %v14732_v44, %v14374_v37 }
 0x45d   : > { %12208 = vrcp.f32 %v3430_v51  ;;  %v7125_v30 = vrot.slane %v7097_v34, %v14449_v6  ;;  %v3009_v19 = vsel %vm2816_vm0, %v2800_v38, 0.0  ;;  %v7437_v2 = vcombine.low %v4557_v4, %v4561_v21  ;;  %v18100_v4 = vld [vmem:[#allocation62_spill] sm:$0xff] }
 0x45e   : > { %12210 = vpow2.f32 %v11363_v5  ;;  %v7438_v34 = vcombine.low %v4565_v39, %v4569_v35  ;;  %v7439_v38 = vcombine.low %v4573_v11, %v4577_v52 }
 0x45f   : > { %v7127_v26 = vcombine.low %v7118_v29, %v7125_v30  ;;  %v4581_v29 = vrot.slane %v14732_v44, %v14400_v40 }
 0x461   : > { %2989 = vadd.xlane.f32.xlu1 %v2988_v31  ;;  %v7141_v10 = vrot.slane %v7127_v26, %v14449_v6  ;;  %v7440_v30 = vcombine.low %v4581_v29, %v4585_v7  ;;  %v10446_v7 = vpop.permute.xlu1 %10445 }
 0x463   : > { %v7468_v44 = vrot.slane %v7440_v30, %v14449_v6 }
 0x467   : > { %v15397_v51 = vpop.eup %12208 }
 0x468   : > { %18096 = vst [vmem:[#allocation39_spill] sm:$0xff] %v15397_v51  ;;  %v12211_v53 = vpop.eup %12210  ;;  %v3670_v5 = vmul.f32 %v15397_v51, %v18097_v32  ;;  %v7454_v32 = vrot.slane %v7438_v34, %v14449_v6  ;;  %v18101_v34 = vld [vmem:[#allocation37_spill] sm:$0xff] }
 0x469   : > { %v3437_v3 = vadd.f32 1.0, %v12211_v53  ;;  %v7447_v53 = vrot.slane %v7437_v2, %v14449_v6 }
 0x46a   : > { %v3757_v31 = vadd.f32 %v15224_v18, %v3670_v5  ;;  %3010 = vadd.xlane.f32.xlu0 %v3009_v19  ;;  %v7142_v19 = vcombine.low %v7134_v20, %v7141_v10  ;;  %v7461_v5 = vrot.slane %v7439_v38, %v14449_v6 }
 0x46b   : > { %12212 = vrcp.f32 %v3437_v3  ;;  %v18098_v3 = vlaneseq  ;;  %v7469_v21 = vcombine.low %v7447_v53, %v7454_v32 }
 0x46c   : > { %3837 = vst [vmem:[%s14387_s19 + $0x198] sm:$0xff] %v3757_v31  ;;  %v7470_v39 = vcombine.low %v7461_v5, %v7468_v44 }
 0x46d   : > { %v15427_v31 = vand.u32 127, %v18098_v3  ;;  %v7477_v20 = vrot.slane %v7469_v21, %v14449_v6 }
 0x46e   : > { %v7484_v10 = vrot.slane %v7470_v39, %v14449_v6 }
 0x46f   : > { %v10672_v35 = vadd.s32 4294967288, %v15427_v31  ;;  %v10679_v52 = vadd.s32 4294967280, %v15427_v31  ;;  %v10686_v29 = vadd.s32 4294967272, %v15427_v31  ;;  %v10693_v2 = vadd.s32 4294967264, %v15427_v31 }
 0x470   : > { %v15443_v38 = vsub.s32 %v15427_v31, %v18101_v34  ;;  %v10707_v32 = vadd.s32 4294967248, %v15427_v31  ;;  %v10714_v44 = vadd.s32 4294967240, %v15427_v31 }
 0x471   : > { %v15446_v30 = vsub.s32 %v10672_v35, %v18101_v34  ;;  %v15450_v53 = vsub.s32 %v10679_v52, %v18101_v34  ;;  %v15454_v5 = vsub.s32 %v10686_v29, %v18101_v34 }
 0x472   : > { %10463 = vperm.xlu1 %11989, %v7142_v19   ;;  %18102 = vst [vmem:[#allocation40_spill] sm:$0xff] %v15443_v38  ;;  %v10700_v19 = vadd.s32 4294967256, %v15427_v31  ;;  %v10671_v21 = vrot.slane %v15187_v12, %v15443_v38  ;;  %v15470_v29 = vsub.s32 %v10707_v32, %v18101_v34 }
 0x473   : > { %18103 = vst [vmem:[#allocation42_spill] sm:$0xff] %v15446_v30  ;;  %18104 = vst [vmem:[#allocation45_spill] sm:$0xff] %v15450_v53  ;;  %v10676_v39 = vrot.slane %v15184_v24, %v15446_v30  ;;  %v10683_v52 = vrot.slane %v15274_v28, %v15450_v53  ;;  %v10690_v12 = vrot.slane %v15287_v54, %v15454_v5  ;;  %v10728_v24 = vadd.s32 4294967224, %v15427_v31 }
 0x474   : > { %18105 = vst [vmem:[#allocation52_spill] sm:$0xff] %v15454_v5  ;;  %v15465_v35 = vsub.s32 %v10700_v19, %v18101_v34  ;;  %18108 = vst [vmem:[#allocation55_spill] sm:$0xff] %v15470_v29  ;;  %v10711_v54 = vrot.slane %v10446_v7, %v15470_v29 }
 0x475   : > { %v15429_v16 = vpop.eup %12212  ;;  %v10678_v28 = vsel %vm10677_vm1, %v10676_v39, %v10671_v21 }
 0x476   : > { %18099 = vst [vmem:[#allocation41_spill] sm:$0xff] %v15429_v16  ;;  %v3677_v26 = vmul.f32 %v15429_v16, %v18100_v4  ;;  %v7485_v4 = vcombine.low %v7477_v20, %v7484_v10  ;;  %18107 = vst [vmem:[#allocation57_spill] sm:$0xff] %v15465_v35  ;;  %v10721_v20 = vadd.s32 4294967232, %v15427_v31  ;;  %v15477_v10 = vsub.s32 %v10714_v44, %v18101_v34 }
 0x477   : > { %v10704_v19 = vrot.slane %v15364_v9, %v15465_v35  ;;  %v2628_v9 = vadd.f32 %v15293_v61, %v14636_v56 }
 0x478   : > { %v3764_v11 = vadd.f32 %v15224_v18, %v3677_v26  ;;  %v15458_v26 = vsub.s32 %v10693_v2, %v18101_v34  ;;  %18109 = vst [vmem:[#allocation43_spill] sm:$0xff] %v15477_v10  ;;  %v15488_v44 = vsub.s32 %v10721_v20, %v18101_v34 }
 0x47a   : > { %3844 = vst [vmem:[%s14387_s19 + $0x1d0] sm:$0xff] %v3764_v11  ;;  %18106 = vst [vmem:[#allocation54_spill] sm:$0xff] %v15458_v26  ;;  %v10449_v11 = vpop.permute.xlu1 %10448  ;;  %v10697_v2 = vrot.slane %v15358_v47, %v15458_v26  ;;  %v15492_v47 = vsub.s32 %v10728_v24, %v18101_v34 }
 0x47b   : > { %18110 = vst [vmem:[#allocation58_spill] sm:$0xff] %v15488_v44  ;;  %v10718_v21 = vrot.slane %v10449_v11, %v15477_v10 }
 0x47c   : > { %18111 = vst [vmem:[#allocation61_spill] sm:$0xff] %v15492_v47  ;;  %v10732_v11 = vrot.slane %v15297_v42, %v15492_v47 }
 0x480   : > { %10484 = vperm.xlu0 %11988, %v7485_v4   ;;  %v10685_v4 = vsel %vm10684_vm2, %v10683_v52, %v10678_v28 }
 0x481   : > { %v10692_v16 = vsel %vm10691_vm3, %v10690_v12, %v10685_v4  ;;  %v15500_v12 = vpop.permute.xlu0 %10466  ;;  %v2635_v4 = vadd.f32 %v15293_v61, %v14785_v59 }
 0x482   : > { %v10699_v39 = vsel %vm10698_vm4, %v10697_v2, %v10692_v16  ;;  %v2708_v16 = vmax.f32 %v2628_v9, 0.0 }
 0x483   : > { %v10706_v52 = vsel %vm10705_vm5, %v10704_v19, %v10699_v39  ;;  %v18112_v39 = vld [vmem:[#allocation63_spill] sm:$0xff] }
 0x484   : > { %v2978_v32 = vpop.xlane.xlu1 %2977  ;;  %v10713_v28 = vsel %vm10712_vm6, %v10711_v54, %v10706_v52  ;;  %v2795_v54 = vmul.f32 %v15200_v45, %v2708_v16  ;;  %v4405_v9 = vrot.slane %v18112_v39, %v14355_v13  ;;  %v4409_v52 = vrot.slane %v18112_v39, %v14358_v60 }
 0x485   : > { %v3112_v3 = vadd.f32 %v14292_v63, %v2978_v32  ;;  %v10720_v56 = vsel %vm10719_vm7, %v10718_v21, %v10713_v28  ;;  %v4401_v21 = vrot.slane %v18112_v39, %v14352_v0  ;;  %v4417_v59 = vrot.slane %v18112_v39, %v14377_v22 }
 0x486   : > { %v4421_v28 = vrot.slane %v18112_v39, %v14400_v40 }
 0x487   : > { %v11358_v7 = vmul.f32 -1.442695, %v3112_v3 }
 0x488   : > { %v10452_v20 = vpop.permute.xlu1 %10451 }
 0x489   : > { %12214 = vpow2.f32 %v11358_v7  ;;  %v10725_v24 = vrot.slane %v10452_v20, %v15488_v44  ;;  %v4397_v7 = vrot.slane %v18112_v39, %v14347_v50  ;;  %v4413_v20 = vrot.slane %v18112_v39, %v14374_v37 }
 0x48b   : > { %v10727_v3 = vsel %vm10726_vm8, %v10725_v24, %v10720_v56  ;;  %v4425_v24 = vrot.slane %v18112_v39, %v14403_v48  ;;  %v2715_v56 = vmax.f32 %v2635_v4, 0.0  ;;  %v7194_v55 = vcombine.low %v4413_v20, %v4417_v59 }
 0x48c   : > { %v15508_v2 = vsel %vm10733_vm9, %v10732_v11, %v10727_v3  ;;  %v2994_v3 = vsel %vm2816_vm0, %v2795_v54, 0.0  ;;  %v4629_v20 = vrot.slane %v14772_v25, %v14355_v13 }
 0x48d   : > { %v2999_v19 = vpop.xlane.xlu0 %2998  ;;  %v7195_v43 = vcombine.low %v4421_v28, %v4425_v24  ;;  %v2802_v47 = vmul.f32 %v15200_v45, %v2715_v56  ;;  %v7216_v39 = vrot.slane %v7194_v55, %v14449_v6  ;;  %v4633_v55 = vrot.slane %v14772_v25, %v14358_v60  ;;  %v18114_v28 = vld [vmem:[#allocation53_spill] sm:$0xff] }
 0x48e   : > { %v3119_v32 = vadd.f32 %v14292_v63, %v2999_v19  ;;  %v7192_v19 = vcombine.low %v4397_v7, %v4401_v21 }
 0x490   : > { %v11365_v42 = vmul.f32 -1.442695, %v3119_v32  ;;  %v7193_v32 = vcombine.low %v4405_v9, %v4409_v52  ;;  %v7202_v44 = vrot.slane %v7192_v19, %v14449_v6  ;;  %v4621_v9 = vrot.slane %v14772_v25, %v14347_v50 }
 0x491   : > { %v4625_v52 = vrot.slane %v14772_v25, %v14352_v0 }
 0x492   : > { %12216 = vpow2.f32 %v11365_v42  ;;  %v7209_v10 = vrot.slane %v7193_v32, %v14449_v6  ;;  %v7223_v42 = vrot.slane %v7195_v43, %v14449_v6  ;;  %v4637_v43 = vrot.slane %v14772_v25, %v14374_v37 }
 0x493   : > { %v12215_v11 = vpop.eup %12214  ;;  %v7536_v32 = vcombine.low %v4629_v20, %v4633_v55 }
 0x494   : > { %v3432_v16 = vadd.f32 1.0, %v12215_v11  ;;  %v3015_v11 = vsel %vm2816_vm0, %v2802_v47, 0.0  ;;  %v7224_v7 = vcombine.low %v7202_v44, %v7209_v10  ;;  %v7225_v21 = vcombine.low %v7216_v39, %v7223_v42 }
 0x495   : > { %v4641_v10 = vrot.slane %v14772_v25, %v14377_v22  ;;  %v4645_v44 = vrot.slane %v14772_v25, %v14400_v40  ;;  %v4649_v47 = vrot.slane %v14772_v25, %v14403_v48 }
 0x496   : > { %12218 = vrcp.f32 %v3432_v16  ;;  %2995 = vadd.xlane.f32.xlu1 %v2994_v3  ;;  %v7232_v56 = vrot.slane %v7224_v7, %v14449_v6  ;;  %v7239_v16 = vrot.slane %v7225_v21, %v14449_v6  ;;  %v7535_v3 = vcombine.low %v4621_v9, %v4625_v52  ;;  %v18116_v21 = vld [vmem:[#allocation65_spill] sm:$0xff] }
 0x497   : > { %v7537_v39 = vcombine.low %v4637_v43, %v4641_v10  ;;  %v7538_v42 = vcombine.low %v4645_v44, %v4649_v47  ;;  %v10735_v47 = vadd.s32 4294967216, %v15427_v31 }
 0x498   : > { %v7545_v25 = vrot.slane %v7535_v3, %v14449_v6 }
 0x499   : > { %v7566_v7 = vrot.slane %v7538_v42, %v14449_v6  ;;  %v15577_v3 = vsub.s32 %v10735_v47, %v18101_v34 }
 0x49b   : > { %18117 = vst [vmem:[#allocation62_spill] sm:$0xff] %v15577_v3 }
 0x49c   : > { %v12217_v4 = vpop.eup %12216 }
 0x49d   : > { %v3439_v54 = vadd.f32 1.0, %v12217_v4  ;;  %v7240_v4 = vcombine.low %v7232_v56, %v7239_v16 }
 0x49f   : > { %12220 = vrcp.f32 %v3439_v54  ;;  %3016 = vadd.xlane.f32.xlu0 %v3015_v11  ;;  %v7552_v11 = vrot.slane %v7536_v32, %v14449_v6  ;;  %v7559_v54 = vrot.slane %v7537_v39, %v14449_v6  ;;  %v18119_v32 = vld [vmem:[#allocation68_spill] sm:$0xff] }
 0x4a0   : > { %v15553_v59 = vpop.eup %12218  ;;  %v2630_v39 = vadd.f32 %v15293_v61, %v18119_v32 }
 0x4a1   : > { %18113 = vst [vmem:[#allocation59_spill] sm:$0xff] %v15553_v59  ;;  %v3672_v24 = vmul.f32 %v15553_v59, %v18114_v28  ;;  %v7567_v52 = vcombine.low %v7545_v25, %v7552_v11  ;;  %v7568_v20 = vcombine.low %v7559_v54, %v7566_v7  ;;  %v15584_v25 = vpop.permute.xlu0 %10472 }
 0x4a2   : > { %v2710_v7 = vmax.f32 %v2630_v39, 0.0 }
 0x4a3   : > { %v3759_v19 = vadd.f32 %v15224_v18, %v3672_v24  ;;  %v7575_v43 = vrot.slane %v7567_v52, %v14449_v6  ;;  %v7582_v10 = vrot.slane %v7568_v20, %v14449_v6  ;;  %v10742_v24 = vadd.s32 4294967208, %v15427_v31 }
 0x4a5   : > { %3839 = vst [vmem:[%s14387_s19 + $0x1a8] sm:$0xff] %v3759_v19  ;;  %v7583_v44 = vcombine.low %v7575_v43, %v7582_v10  ;;  %v15580_v19 = vsub.s32 %v10742_v24, %v18101_v34  ;;  %v2797_v43 = vmul.f32 %v15200_v45, %v2710_v7  ;;  %v18120_v10 = vld [vmem:[#allocation67_spill] sm:$0xff] }
 0x4a6   : > { %v4473_v24 = vrot.slane %v18120_v10, %v14358_v60  ;;  %v4489_v32 = vrot.slane %v18120_v10, %v14403_v48 }
 0x4a7   : > { %10469 = vperm.xlu1 %11989, %v7240_v4   ;;  %18118 = vst [vmem:[#allocation37_spill] sm:$0xff] %v15580_v19  ;;  %v10746_v54 = vrot.slane %v15369_v1, %v15580_v19  ;;  %v4465_v1 = vrot.slane %v18120_v10, %v14352_v0 }
 0x4a9   : > { %v15565_v28 = vpop.eup %12220 }
 0x4aa   : > { %18115 = vst [vmem:[#allocation47_spill] sm:$0xff] %v15565_v28  ;;  %v3679_v9 = vmul.f32 %v15565_v28, %v18116_v21 }
 0x4ac   : > { %v3766_v55 = vadd.f32 %v15224_v18, %v3679_v9 }
 0x4ae   : > { %3846 = vst [vmem:[%s14387_s19 + $0x1e0] sm:$0xff] %v3766_v55  ;;  %v2637_v55 = vadd.f32 %v15293_v61, %v14821_v62  ;;  %v4481_v62 = vrot.slane %v18120_v10, %v14377_v22 }
 0x4b5   : > { %10490 = vperm.xlu0 %11988, %v7583_v44   ;;  %v4461_v44 = vrot.slane %v18120_v10, %v14347_v50 }
 0x4b9   : > { %v2984_v56 = vpop.xlane.xlu1 %2983 }
 0x4ba   : > { %v3114_v16 = vadd.f32 %v14292_v63, %v2984_v56  ;;  %v4477_v56 = vrot.slane %v18120_v10, %v14374_v37 }
 0x4bc   : > { %v11360_v42 = vmul.f32 -1.442695, %v3114_v16  ;;  %v4485_v16 = vrot.slane %v18120_v10, %v14400_v40 }
 0x4bd   : > { %v10458_v4 = vpop.permute.xlu1 %10457 }
 0x4be   : > { %12222 = vpow2.f32 %v11360_v42  ;;  %v10739_v11 = vrot.slane %v10458_v4, %v15577_v3  ;;  %v2717_v42 = vmax.f32 %v2637_v55, 0.0  ;;  %v5417_v3 = vrot.slane %v15135_v23, %v14403_v48 }
 0x4c0   : > { %v10741_v21 = vsel %vm10740_vm10, %v10739_v11, %v15508_v2  ;;  %v4469_v2 = vrot.slane %v18120_v10, %v14355_v13  ;;  %v3000_v11 = vsel %vm2816_vm0, %v2797_v43, 0.0 }
 0x4c1   : > { %v15592_v9 = vsel %vm10747_vm11, %v10746_v54, %v10741_v21  ;;  %v7290_v54 = vcombine.low %v4461_v44, %v4465_v1  ;;  %v7292_v21 = vcombine.low %v4477_v56, %v4481_v62  ;;  %v4693_v56 = vrot.slane %v14813_v36, %v14355_v13 }
 0x4c2   : > { %v3005_v52 = vpop.xlane.xlu0 %3004  ;;  %v7291_v7 = vcombine.low %v4469_v2, %v4473_v24  ;;  %v4685_v2 = vrot.slane %v14813_v36, %v14347_v50  ;;  %v4689_v24 = vrot.slane %v14813_v36, %v14352_v0  ;;  %v4697_v62 = vrot.slane %v14813_v36, %v14358_v60 }
 0x4c3   : > { %v3121_v20 = vadd.f32 %v14292_v63, %v3005_v52  ;;  %v7293_v52 = vcombine.low %v4485_v16, %v4489_v32  ;;  %v7300_v28 = vrot.slane %v7290_v54, %v14449_v6  ;;  %v7314_v10 = vrot.slane %v7292_v21, %v14449_v6 }
 0x4c4   : > { %v7307_v19 = vrot.slane %v7291_v7, %v14449_v6  ;;  %v4701_v16 = vrot.slane %v14813_v36, %v14374_v37  ;;  %v4713_v32 = vrot.slane %v14813_v36, %v14403_v48  ;;  %v7633_v21 = vcombine.low %v4685_v2, %v4689_v24 }
 0x4c5   : > { %v11367_v47 = vmul.f32 -1.442695, %v3121_v20  ;;  %v2804_v20 = vmul.f32 %v15200_v45, %v2717_v42 }
 0x4c6   : > { %v7322_v44 = vcombine.low %v7300_v28, %v7307_v19  ;;  %v4705_v28 = vrot.slane %v14813_v36, %v14377_v22  ;;  %v4709_v19 = vrot.slane %v14813_v36, %v14400_v40  ;;  %v7643_v36 = vrot.slane %v7633_v21, %v14449_v6 }
 0x4c7   : > { %12224 = vpow2.f32 %v11367_v47  ;;  %v7321_v47 = vrot.slane %v7293_v52, %v14449_v6 }
 0x4c8   : > { %v12223_v39 = vpop.eup %12222  ;;  %v7330_v54 = vrot.slane %v7322_v44, %v14449_v6 }
 0x4c9   : > { %v3434_v4 = vadd.f32 1.0, %v12223_v39  ;;  %v3021_v39 = vsel %vm2816_vm0, %v2804_v20, 0.0  ;;  %v7323_v1 = vcombine.low %v7314_v10, %v7321_v47  ;;  %v7634_v20 = vcombine.low %v4693_v56, %v4697_v62 }
 0x4ca   : > { %v7635_v10 = vcombine.low %v4701_v16, %v4705_v28  ;;  %v7636_v47 = vcombine.low %v4709_v19, %v4713_v32  ;;  %v10749_v32 = vadd.s32 4294967200, %v15427_v31 }
 0x4cb   : > { %12226 = vrcp.f32 %v3434_v4  ;;  %3001 = vadd.xlane.f32.xlu1 %v3000_v11  ;;  %v18122_v4 = vld [vmem:[#allocation56_spill] sm:$0xff]  ;;  %v7337_v7 = vrot.slane %v7323_v1, %v14449_v6  ;;  %v18124_v1 = vld [vmem:[#allocation69_spill] sm:$0xff] }
 0x4cc   : > { %v7664_v44 = vrot.slane %v7636_v47, %v14449_v6  ;;  %v15661_v21 = vsub.s32 %v10749_v32, %v18101_v34 }
 0x4ce   : > { %18125 = vst [vmem:[#allocation65_spill] sm:$0xff] %v15661_v21 }
 0x4d1   : > { %v12225_v55 = vpop.eup %12224 }
 0x4d2   : > { %v3441_v43 = vadd.f32 1.0, %v12225_v55  ;;  %v7338_v55 = vcombine.low %v7330_v54, %v7337_v7 }
 0x4d4   : > { %12228 = vrcp.f32 %v3441_v43  ;;  %3022 = vadd.xlane.f32.xlu0 %v3021_v39  ;;  %v7650_v39 = vrot.slane %v7634_v20, %v14449_v6  ;;  %v7657_v43 = vrot.slane %v7635_v10, %v14449_v6  ;;  %v2632_v20 = vadd.f32 %v15293_v61, %v14726_v17 }
 0x4d5   : > { %v15637_v42 = vpop.eup %12226 }
 0x4d6   : > { %18121 = vst [vmem:[#allocation63_spill] sm:$0xff] %v15637_v42  ;;  %v3674_v11 = vmul.f32 %v15637_v42, %v18122_v4  ;;  %v7665_v24 = vcombine.low %v7643_v36, %v7650_v39  ;;  %v7666_v56 = vcombine.low %v7657_v43, %v7664_v44  ;;  %v2712_v43 = vmax.f32 %v2632_v20, 0.0 }
 0x4d8   : > { %v3761_v52 = vadd.f32 %v15224_v18, %v3674_v11  ;;  %v7673_v16 = vrot.slane %v7665_v24, %v14449_v6  ;;  %v7680_v28 = vrot.slane %v7666_v56, %v14449_v6  ;;  %v10756_v11 = vadd.s32 4294967192, %v15427_v31  ;;  %v18127_v24 = vld [vmem:[#allocation83_spill] sm:$0xff] }
 0x4d9   : > { %v2639_v56 = vadd.f32 %v15293_v61, %v18127_v24 }
 0x4da   : > { %3841 = vst [vmem:[%s14387_s19 + $0x1b8] sm:$0xff] %v3761_v52  ;;  %v7681_v19 = vcombine.low %v7673_v16, %v7680_v28  ;;  %v15664_v52 = vsub.s32 %v10756_v11, %v18101_v34  ;;  %v18128_v16 = vld [vmem:[#allocation70_spill] sm:$0xff] }
 0x4db   : > { %v4525_v28 = vrot.slane %v18128_v16, %v14347_v50  ;;  %v4537_v32 = vrot.slane %v18128_v16, %v14358_v60  ;;  %v4541_v11 = vrot.slane %v18128_v16, %v14374_v37  ;;  %v4553_v20 = vrot.slane %v18128_v16, %v14403_v48 }
 0x4dc   : > { %10475 = vperm.xlu1 %11989, %v7338_v55   ;;  %18126 = vst [vmem:[#allocation68_spill] sm:$0xff] %v15664_v52  ;;  %v15668_v55 = vpop.permute.xlu0 %10478  ;;  %v10760_v39 = vrot.slane %v15500_v12, %v15664_v52  ;;  %v4529_v12 = vrot.slane %v18128_v16, %v14352_v0 }
 0x4de   : > { %v15649_v4 = vpop.eup %12228 }
 0x4df   : > { %18123 = vst [vmem:[#allocation53_spill] sm:$0xff] %v15649_v4  ;;  %v3681_v2 = vmul.f32 %v15649_v4, %v18124_v1 }
 0x4e1   : > { %v3768_v62 = vadd.f32 %v15224_v18, %v3681_v2 }
 0x4e3   : > { %3848 = vst [vmem:[%s14387_s19 + $0x1f0] sm:$0xff] %v3768_v62  ;;  %v2799_v62 = vmul.f32 %v15200_v45, %v2712_v43  ;;  %v7388_v43 = vcombine.low %v4525_v28, %v4529_v12 }
 0x4e5   : > { %v7398_v4 = vrot.slane %v7388_v43, %v14449_v6 }
 0x4ea   : > { %10496 = vperm.xlu0 %11988, %v7681_v19  }
 0x4ee   : > { %v2990_v54 = vpop.xlane.xlu1 %2989 }
 0x4ef   : > { %v3116_v7 = vadd.f32 %v14292_v63, %v2990_v54  ;;  %v4545_v54 = vrot.slane %v18128_v16, %v14377_v22 }
 0x4f1   : > { %v11362_v10 = vmul.f32 -1.442695, %v3116_v7  ;;  %v4549_v7 = vrot.slane %v18128_v16, %v14400_v40 }
 0x4f2   : > { %v10464_v47 = vpop.permute.xlu1 %10463 }
 0x4f3   : > { %12230 = vpow2.f32 %v11362_v10  ;;  %v10753_v36 = vrot.slane %v10464_v47, %v15661_v21  ;;  %v2719_v47 = vmax.f32 %v2639_v56, 0.0  ;;  %v5413_v21 = vrot.slane %v15135_v23, %v14400_v40 }
 0x4f5   : > { %v10755_v44 = vsel %vm10754_vm12, %v10753_v36, %v15592_v9  ;;  %v4533_v9 = vrot.slane %v18128_v16, %v14355_v13  ;;  %v2806_v24 = vmul.f32 %v15200_v45, %v2719_v47 }
 0x4f6   : > { %v15676_v1 = vsel %vm10761_vm13, %v10760_v39, %v10755_v44  ;;  %v3006_v39 = vsel %vm2816_vm0, %v2799_v62, 0.0 }
 0x4f7   : > { %v3011_v17 = vpop.xlane.xlu0 %3010  ;;  %v7389_v44 = vcombine.low %v4533_v9, %v4537_v32  ;;  %v18129_v9 = vld [vmem:[#allocation82_spill] sm:$0xff] }
 0x4f8   : > { %v3123_v2 = vadd.f32 %v14292_v63, %v3011_v17  ;;  %v7390_v17 = vcombine.low %v4541_v11, %v4545_v54  ;;  %v4749_v32 = vrot.slane %v18129_v9, %v14347_v50  ;;  %v4753_v45 = vrot.slane %v18129_v9, %v14352_v0 }
 0x4f9   : > { %v7405_v52 = vrot.slane %v7389_v44, %v14449_v6  ;;  %v4757_v11 = vrot.slane %v18129_v9, %v14355_v13  ;;  %v4761_v54 = vrot.slane %v18129_v9, %v14358_v60 }
 0x4fa   : > { %v11369_v19 = vmul.f32 -1.442695, %v3123_v2  ;;  %v7391_v2 = vcombine.low %v4549_v7, %v4553_v20  ;;  %v7412_v16 = vrot.slane %v7390_v17, %v14449_v6  ;;  %v4765_v7 = vrot.slane %v18129_v9, %v14374_v37 }
 0x4fb   : > { %v7420_v28 = vcombine.low %v7398_v4, %v7405_v52  ;;  %v4769_v4 = vrot.slane %v18129_v9, %v14377_v22  ;;  %v4773_v52 = vrot.slane %v18129_v9, %v14400_v40  ;;  %v4777_v20 = vrot.slane %v18129_v9, %v14403_v48 }
 0x4fc   : > { %12232 = vpow2.f32 %v11369_v19  ;;  %v7419_v19 = vrot.slane %v7391_v2, %v14449_v6  ;;  %v7731_v17 = vcombine.low %v4749_v32, %v4753_v45 }
 0x4fd   : > { %v12231_v10 = vpop.eup %12230  ;;  %v7428_v43 = vrot.slane %v7420_v28, %v14449_v6 }
 0x4fe   : > { %v3436_v36 = vadd.f32 1.0, %v12231_v10  ;;  %v3027_v10 = vsel %vm2816_vm0, %v2806_v24, 0.0  ;;  %v7421_v12 = vcombine.low %v7412_v16, %v7419_v19  ;;  %v7732_v24 = vcombine.low %v4757_v11, %v4761_v54  ;;  %v15737_v11 = vld [vmem:[#allocation9] ss:$0 sm:$0xff] }
 0x4ff   : > { %v7733_v16 = vcombine.low %v4765_v7, %v4769_v4  ;;  %v7734_v19 = vcombine.low %v4773_v52, %v4777_v20  ;;  %v10763_v20 = vadd.s32 4294967184, %v15427_v31 }
 0x500   : > { %12234 = vrcp.f32 %v3436_v36  ;;  %3007 = vadd.xlane.f32.xlu1 %v3006_v39  ;;  %v18131_v36 = vld [vmem:[#allocation60_spill] sm:$0xff]  ;;  %v7435_v44 = vrot.slane %v7421_v12, %v14449_v6 }
 0x501   : > { %v7755_v9 = vrot.slane %v7733_v16, %v14449_v6  ;;  %v7762_v28 = vrot.slane %v7734_v19, %v14449_v6  ;;  %v18133_v12 = vld [vmem:[#allocation72_spill] sm:$0xff] }
 0x503   : > { %v7764_v45 = vcombine.low %v7755_v9, %v7762_v28 }
 0x505   : > { %v7778_v4 = vrot.slane %v7764_v45, %v14449_v6 }
 0x506   : > { %v12233_v56 = vpop.eup %12232 }
 0x507   : > { %v3443_v62 = vadd.f32 1.0, %v12233_v56  ;;  %v7436_v56 = vcombine.low %v7428_v43, %v7435_v44 }
 0x509   : > { %12236 = vrcp.f32 %v3443_v62  ;;  %3028 = vadd.xlane.f32.xlu0 %v3027_v10  ;;  %v7741_v10 = vrot.slane %v7731_v17, %v14449_v6  ;;  %v7748_v62 = vrot.slane %v7732_v24, %v14449_v6  ;;  %v15747_v17 = vsub.s32 %v10763_v20, %v18101_v34  ;;  %v18136_v24 = vld [vmem:[#allocation75_spill] sm:$0xff] }
 0x50a   : > { %v15721_v47 = vpop.eup %12234  ;;  %v2634_v16 = vadd.f32 %v15293_v61, %v18136_v24 }
 0x50b   : > { %18130 = vst [vmem:[#allocation67_spill] sm:$0xff] %v15721_v47  ;;  %v3676_v39 = vmul.f32 %v15721_v47, %v18131_v36  ;;  %v7763_v32 = vcombine.low %v7741_v10, %v7748_v62  ;;  %18134 = vst [vmem:[#allocation69_spill] sm:$0xff] %v15747_v17  ;;  %v15754_v10 = vpop.permute.xlu0 %10484 }
 0x50c   : > { %v2714_v9 = vmax.f32 %v2634_v16, 0.0 }
 0x50d   : > { %v3763_v2 = vadd.f32 %v15224_v18, %v3676_v39  ;;  %v7771_v7 = vrot.slane %v7763_v32, %v14449_v6  ;;  %v10770_v39 = vadd.s32 4294967176, %v15427_v31  ;;  %v18138_v32 = vld [vmem:[#allocation87_spill] sm:$0xff] }
 0x50e   : > { %v2641_v45 = vadd.f32 %v15293_v61, %v18138_v32 }
 0x50f   : > { %3843 = vst [vmem:[%s14387_s19 + $0x1c8] sm:$0xff] %v3763_v2  ;;  %v7779_v52 = vcombine.low %v7771_v7, %v7778_v4  ;;  %v15750_v2 = vsub.s32 %v10770_v39, %v18101_v34  ;;  %v18140_v4 = vld [vmem:[#allocation73_spill] sm:$0xff] }
 0x510   : > { %v4597_v20 = vrot.slane %v18140_v4, %v14355_v13  ;;  %v4601_v39 = vrot.slane %v18140_v4, %v14358_v60  ;;  %v4605_v61 = vrot.slane %v18140_v4, %v14374_v37  ;;  %v4617_v24 = vrot.slane %v18140_v4, %v14403_v48 }
 0x511   : > { %10481 = vperm.xlu1 %11989, %v7436_v56   ;;  %18135 = vst [vmem:[#allocation83_spill] sm:$0xff] %v15750_v2  ;;  %v10774_v62 = vrot.slane %v15584_v25, %v15750_v2  ;;  %v4589_v25 = vrot.slane %v18140_v4, %v14347_v50 }
 0x513   : > { %v15733_v36 = vpop.eup %12236 }
 0x514   : > { %18132 = vst [vmem:[#allocation56_spill] sm:$0xff] %v15733_v36  ;;  %v3683_v18 = vmul.f32 %v15733_v36, %v18133_v12 }
 0x516   : > { %v3770_v54 = vadd.f32 %v15737_v11, %v3683_v18 }
 0x518   : > { %3850 = vst [vmem:[%s14387_s19 + $0x200] sm:$0xff] %v3770_v54  ;;  %v15767_v54 = vld [vmem:[#allocation8] ss:$0 sm:$0xff] }
 0x519   : > { %18139 = vst [vmem:[#allocation82_spill] sm:$0xff] %v15767_v54  ;;  %v2801_v7 = vmul.f32 %v15767_v54, %v2714_v9  ;;  %v7487_v9 = vcombine.low %v4597_v20, %v4601_v39  ;;  %v18141_v20 = vld [vmem:[#allocation86_spill] sm:$0xff] }
 0x51a   : > { %v4813_v39 = vrot.slane %v18141_v20, %v14347_v50 }
 0x51f   : > { %10502 = vperm.xlu0 %11988, %v7779_v52  }
 0x523   : > { %v2996_v43 = vpop.xlane.xlu1 %2995 }
 0x524   : > { %v3118_v44 = vadd.f32 %v14292_v63, %v2996_v43  ;;  %v4609_v43 = vrot.slane %v18140_v4, %v14377_v22 }
 0x526   : > { %v11364_v19 = vmul.f32 -1.442695, %v3118_v44  ;;  %v4613_v44 = vrot.slane %v18140_v4, %v14400_v40 }
 0x527   : > { %v10470_v56 = vpop.permute.xlu1 %10469 }
 0x528   : > { %12238 = vpow2.f32 %v11364_v19  ;;  %v10767_v31 = vrot.slane %v10470_v56, %v15747_v17  ;;  %v2721_v19 = vmax.f32 %v2641_v45, 0.0  ;;  %v5405_v17 = vrot.slane %v15135_v23, %v14374_v37 }
 0x52a   : > { %v10769_v34 = vsel %vm10768_vm14, %v10767_v31, %v15676_v1  ;;  %v4593_v1 = vrot.slane %v18140_v4, %v14352_v0  ;;  %v3012_v31 = vsel %vm2816_vm0, %v2801_v7, 0.0 }
 0x52b   : > { %v15762_v28 = vsel %vm10775_vm15, %v10774_v62, %v10769_v34  ;;  %v7488_v34 = vcombine.low %v4605_v61, %v4609_v43  ;;  %v4817_v61 = vrot.slane %v18141_v20, %v14352_v0  ;;  %v4821_v43 = vrot.slane %v18141_v20, %v14355_v13 }
 0x52c   : > { %18137 = vst [vmem:[#allocation70_spill] sm:$0xff] %v15762_v28  ;;  %v3017_v12 = vpop.xlane.xlu0 %3016  ;;  %v7486_v62 = vcombine.low %v4589_v25, %v4593_v1  ;;  %v7503_v28 = vrot.slane %v7487_v9, %v14449_v6 }
 0x52d   : > { %v3125_v18 = vadd.f32 %v14292_v63, %v3017_v12  ;;  %v7489_v12 = vcombine.low %v4613_v44, %v4617_v24  ;;  %v7510_v4 = vrot.slane %v7488_v34, %v14449_v6  ;;  %v4825_v44 = vrot.slane %v18141_v20, %v14358_v60 }
 0x52e   : > { %v7496_v32 = vrot.slane %v7486_v62, %v14449_v6  ;;  %v4829_v24 = vrot.slane %v18141_v20, %v14374_v37  ;;  %v18143_v62 = vld [vmem:[#allocation64_spill] sm:$0xff] }
 0x52f   : > { %v11371_v52 = vmul.f32 -1.442695, %v3125_v18  ;;  %v2808_v18 = vmul.f32 %v15767_v54, %v2721_v19  ;;  %v4837_v19 = vrot.slane %v18141_v20, %v14400_v40 }
 0x530   : > { %v7518_v25 = vcombine.low %v7496_v32, %v7503_v28  ;;  %v4833_v28 = vrot.slane %v18141_v20, %v14377_v22 }
 0x531   : > { %12240 = vpow2.f32 %v11371_v52  ;;  %v7517_v52 = vrot.slane %v7489_v12, %v14449_v6 }
 0x532   : > { %v12239_v16 = vpop.eup %12238  ;;  %v7526_v34 = vrot.slane %v7518_v25, %v14449_v6 }
 0x533   : > { %v3438_v56 = vadd.f32 1.0, %v12239_v16  ;;  %v3033_v16 = vsel %vm2816_vm0, %v2808_v18, 0.0  ;;  %v7519_v1 = vcombine.low %v7510_v4, %v7517_v52  ;;  %v7829_v18 = vcombine.low %v4813_v39, %v4817_v61 }
 0x534   : > { %v7830_v4 = vcombine.low %v4821_v43, %v4825_v44  ;;  %v7831_v52 = vcombine.low %v4829_v24, %v4833_v28 }
 0x535   : > { %12242 = vrcp.f32 %v3438_v56  ;;  %3013 = vadd.xlane.f32.xlu1 %v3012_v31  ;;  %v4841_v56 = vrot.slane %v18141_v20, %v14403_v48  ;;  %v7533_v12 = vrot.slane %v7519_v1, %v14449_v6  ;;  %v18145_v1 = vld [vmem:[#allocation76_spill] sm:$0xff] }
 0x536   : > { %v7846_v20 = vrot.slane %v7830_v4, %v14449_v6 }
 0x53b   : > { %v12241_v45 = vpop.eup %12240 }
 0x53c   : > { %v3445_v7 = vadd.f32 1.0, %v12241_v45  ;;  %v7832_v45 = vcombine.low %v4837_v19, %v4841_v56 }
 0x53e   : > { %12244 = vrcp.f32 %v3445_v7  ;;  %3034 = vadd.xlane.f32.xlu0 %v3033_v16  ;;  %v7534_v16 = vcombine.low %v7526_v34, %v7533_v12  ;;  %v7839_v7 = vrot.slane %v7829_v18, %v14449_v6  ;;  %v7860_v25 = vrot.slane %v7832_v45, %v14449_v6  ;;  %v15830_v34 = vld [vmem:[#allocation6] ss:$0 sm:$0xff]  ;;  %v18146_v12 = vld [vmem:[#allocation79_spill] sm:$0xff]  ;;  %v15836_v45 = vpop.permute.xlu0 %10490 }
 0x53f   : > { %v15809_v31 = vpop.eup %12242  ;;  %v2636_v18 = vadd.f32 %v15830_v34, %v18146_v12 }
 0x540   : > { %18142 = vst [vmem:[#allocation60_spill] sm:$0xff] %v15809_v31  ;;  %v3678_v9 = vmul.f32 %v15809_v31, %v18143_v62  ;;  %v7853_v62 = vrot.slane %v7831_v52, %v14449_v6  ;;  %v7861_v61 = vcombine.low %v7839_v7, %v7846_v20  ;;  %v10784_v52 = vrot.slane %v15668_v55, %v15446_v30 }
 0x541   : > { %v2716_v7 = vmax.f32 %v2636_v18, 0.0 }
 0x542   : > { %v3765_v32 = vadd.f32 %v15737_v11, %v3678_v9  ;;  %v7862_v43 = vcombine.low %v7853_v62, %v7860_v25  ;;  %v7869_v24 = vrot.slane %v7861_v61, %v14449_v6 }
 0x543   : > { %v2803_v61 = vmul.f32 %v15767_v54, %v2716_v7 }
 0x544   : > { %3845 = vst [vmem:[%s14387_s19 + $0x1d8] sm:$0xff] %v3765_v32  ;;  %v7876_v28 = vrot.slane %v7862_v43, %v14449_v6  ;;  %v18148_v43 = vld [vmem:[#allocation77_spill] sm:$0xff] }
 0x545   : > { %v4653_v55 = vrot.slane %v18148_v43, %v14347_v50  ;;  %v4677_v12 = vrot.slane %v18148_v43, %v14400_v40  ;;  %v4681_v18 = vrot.slane %v18148_v43, %v14403_v48 }
 0x546   : > { %10487 = vperm.xlu1 %11989, %v7534_v16   ;;  %v7877_v19 = vcombine.low %v7869_v24, %v7876_v28  ;;  %v4657_v24 = vrot.slane %v18148_v43, %v14352_v0  ;;  %v4661_v28 = vrot.slane %v18148_v43, %v14355_v13 }
 0x548   : > { %v15821_v2 = vpop.eup %12244  ;;  %v7584_v7 = vcombine.low %v4653_v55, %v4657_v24 }
 0x549   : > { %18144 = vst [vmem:[#allocation72_spill] sm:$0xff] %v15821_v2  ;;  %v3685_v39 = vmul.f32 %v15821_v2, %v18145_v1  ;;  %v18147_v1 = vld [vmem:[#allocation91_spill] sm:$0xff] }
 0x54a   : > { %v7594_v30 = vrot.slane %v7584_v7, %v14449_v6 }
 0x54b   : > { %v3772_v44 = vadd.f32 %v15737_v11, %v3685_v39  ;;  %v2643_v39 = vadd.f32 %v15830_v34, %v18147_v1  ;;  %v7587_v1 = vcombine.low %v4677_v12, %v4681_v18 }
 0x54d   : > { %3852 = vst [vmem:[%s14387_s19 + $0x210] sm:$0xff] %v3772_v44 }
 0x554   : > { %10508 = vperm.xlu0 %11988, %v7877_v19   ;;  %v4665_v19 = vrot.slane %v18148_v43, %v14358_v60 }
 0x558   : > { %v3002_v56 = vpop.xlane.xlu1 %3001 }
 0x559   : > { %v3120_v9 = vadd.f32 %v14292_v63, %v3002_v56  ;;  %v4669_v56 = vrot.slane %v18148_v43, %v14374_v37 }
 0x55b   : > { %v11366_v32 = vmul.f32 -1.442695, %v3120_v9  ;;  %v4673_v9 = vrot.slane %v18148_v43, %v14377_v22 }
 0x55c   : > { %v10476_v4 = vpop.permute.xlu1 %10475 }
 0x55d   : > { %12246 = vpow2.f32 %v11366_v32  ;;  %v10780_v16 = vrot.slane %v10476_v4, %v15443_v38  ;;  %v2723_v4 = vmax.f32 %v2643_v39, 0.0 }
 0x55f   : > { %v15840_v20 = vsel %vm10677_vm1, %v10784_v52, %v10780_v16  ;;  %v3018_v16 = vsel %vm2816_vm0, %v2803_v61, 0.0  ;;  %v2810_v38 = vmul.f32 %v15767_v54, %v2723_v4 }
 0x561   : > { %v3023_v62 = vpop.xlane.xlu0 %3022 }
 0x562   : > { %v3127_v25 = vadd.f32 %v14292_v63, %v3023_v62  ;;  %v7585_v62 = vcombine.low %v4661_v28, %v4665_v19  ;;  %v18149_v28 = vld [vmem:[#allocation90_spill] sm:$0xff] }
 0x563   : > { %v4877_v19 = vrot.slane %v18149_v28, %v14347_v50  ;;  %v4889_v12 = vrot.slane %v18149_v28, %v14358_v60  ;;  %v4893_v18 = vrot.slane %v18149_v28, %v14374_v37 }
 0x564   : > { %v11373_v44 = vmul.f32 -1.442695, %v3127_v25  ;;  %v7586_v25 = vcombine.low %v4669_v56, %v4673_v9  ;;  %v7601_v2 = vrot.slane %v7585_v62, %v14449_v6  ;;  %v4881_v56 = vrot.slane %v18149_v28, %v14352_v0 }
 0x565   : > { %v4885_v9 = vrot.slane %v18149_v28, %v14355_v13 }
 0x566   : > { %12248 = vpow2.f32 %v11373_v44  ;;  %v7608_v43 = vrot.slane %v7586_v25, %v14449_v6  ;;  %v7615_v44 = vrot.slane %v7587_v1, %v14449_v6  ;;  %v7616_v55 = vcombine.low %v7594_v30, %v7601_v2 }
 0x567   : > { %v12247_v32 = vpop.eup %12246  ;;  %v4901_v30 = vrot.slane %v18149_v28, %v14400_v40  ;;  %v4905_v2 = vrot.slane %v18149_v28, %v14403_v48  ;;  %v7927_v25 = vcombine.low %v4877_v19, %v4881_v56 }
 0x568   : > { %v3440_v52 = vadd.f32 1.0, %v12247_v32  ;;  %v3039_v32 = vsel %vm2816_vm0, %v2810_v38, 0.0  ;;  %v7617_v24 = vcombine.low %v7608_v43, %v7615_v44  ;;  %v4897_v38 = vrot.slane %v18149_v28, %v14377_v22 }
 0x569   : > { %v7624_v7 = vrot.slane %v7616_v55, %v14449_v6  ;;  %v7928_v43 = vcombine.low %v4885_v9, %v4889_v12 }
 0x56a   : > { %12250 = vrcp.f32 %v3440_v52  ;;  %3019 = vadd.xlane.f32.xlu1 %v3018_v16  ;;  %v18151_v52 = vld [vmem:[#allocation66_spill] sm:$0xff]  ;;  %v7631_v62 = vrot.slane %v7617_v24, %v14449_v6  ;;  %v7929_v44 = vcombine.low %v4893_v18, %v4897_v38  ;;  %v18153_v24 = vld [vmem:[#allocation49_spill] sm:$0xff] }
 0x56b   : > { %v7944_v28 = vrot.slane %v7928_v43, %v14449_v6  ;;  %v15908_v43 = vpop.permute.xlu0 %10496 }
 0x56c   : > { %18155 = vst [vmem:[#allocation73_spill] sm:$0xff] %v15908_v43 }
 0x570   : > { %v12249_v39 = vpop.eup %12248 }
 0x571   : > { %v3447_v61 = vadd.f32 1.0, %v12249_v39  ;;  %v7930_v39 = vcombine.low %v4901_v30, %v4905_v2 }
 0x573   : > { %12252 = vrcp.f32 %v3447_v61  ;;  %3040 = vadd.xlane.f32.xlu0 %v3039_v32  ;;  %v7632_v32 = vcombine.low %v7624_v7, %v7631_v62  ;;  %v7937_v61 = vrot.slane %v7927_v25, %v14449_v6  ;;  %v7958_v55 = vrot.slane %v7930_v39, %v14449_v6  ;;  %v18154_v7 = vld [vmem:[#allocation81_spill] sm:$0xff] }
 0x574   : > { %v15885_v4 = vpop.eup %12250  ;;  %v2638_v62 = vadd.f32 %v15830_v34, %v18154_v7  ;;  %v10794_v39 = vrot.slane %v15754_v10, %v15454_v5 }
 0x575   : > { %18150 = vst [vmem:[#allocation75_spill] sm:$0xff] %v15885_v4  ;;  %v3680_v16 = vmul.f32 %v15885_v4, %v18151_v52  ;;  %v7951_v52 = vrot.slane %v7929_v44, %v14449_v6  ;;  %v7959_v56 = vcombine.low %v7937_v61, %v7944_v28 }
 0x577   : > { %v3767_v1 = vadd.f32 %v15737_v11, %v3680_v16  ;;  %v7960_v9 = vcombine.low %v7951_v52, %v7958_v55  ;;  %v7967_v18 = vrot.slane %v7959_v56, %v14449_v6  ;;  %v18156_v56 = vld [vmem:[#allocation80_spill] sm:$0xff] }
 0x578   : > { %v4721_v10 = vrot.slane %v18156_v56, %v14352_v0 }
 0x579   : > { %3847 = vst [vmem:[%s14387_s19 + $0x1e8] sm:$0xff] %v3767_v1  ;;  %v7974_v38 = vrot.slane %v7960_v9, %v14449_v6  ;;  %v4717_v9 = vrot.slane %v18156_v56, %v14347_v50 }
 0x57b   : > { %10493 = vperm.xlu1 %11989, %v7632_v32   ;;  %v7975_v30 = vcombine.low %v7967_v18, %v7974_v38  ;;  %v2718_v32 = vmax.f32 %v2638_v62, 0.0  ;;  %v4729_v18 = vrot.slane %v18156_v56, %v14358_v60  ;;  %v4733_v38 = vrot.slane %v18156_v56, %v14374_v37 }
 0x57d   : > { %v15897_v4 = vpop.eup %12252 }
 0x57e   : > { %18152 = vst [vmem:[#allocation87_spill] sm:$0xff] %v15897_v4  ;;  %v3687_v19 = vmul.f32 %v15897_v4, %v18153_v24  ;;  %v2645_v24 = vadd.f32 %v15830_v34, %v14971_v49  ;;  %v4737_v49 = vrot.slane %v18156_v56, %v14377_v22 }
 0x580   : > { %v3774_v12 = vadd.f32 %v15737_v11, %v3687_v19  ;;  %v2805_v19 = vmul.f32 %v15767_v54, %v2718_v32  ;;  %v2725_v7 = vmax.f32 %v2645_v24, 0.0 }
 0x582   : > { %3854 = vst [vmem:[%s14387_s19 + $0x220] sm:$0xff] %v3774_v12 }
 0x589   : > { %10514 = vperm.xlu0 %11988, %v7975_v30   ;;  %v4741_v30 = vrot.slane %v18156_v56, %v14400_v40 }
 0x58d   : > { %v3008_v2 = vpop.xlane.xlu1 %3007 }
 0x58e   : > { %v3122_v16 = vadd.f32 %v14292_v63, %v3008_v2  ;;  %v4745_v2 = vrot.slane %v18156_v56, %v14403_v48 }
 0x590   : > { %v11368_v25 = vmul.f32 -1.442695, %v3122_v16  ;;  %v7685_v32 = vcombine.low %v4741_v30, %v4745_v2 }
 0x591   : > { %v10482_v1 = vpop.permute.xlu1 %10481 }
 0x592   : > { %12254 = vpow2.f32 %v11368_v25  ;;  %v10789_v44 = vrot.slane %v10482_v1, %v15450_v53  ;;  %v3024_v25 = vsel %vm2816_vm0, %v2805_v19, 0.0  ;;  %v7682_v1 = vcombine.low %v4717_v9, %v4721_v10 }
 0x594   : > { %v10790_v61 = vsel %vm10684_vm2, %v10789_v44, %v15840_v20  ;;  %v4725_v20 = vrot.slane %v18156_v56, %v14355_v13 }
 0x595   : > { %v15916_v28 = vsel %vm10691_vm3, %v10794_v39, %v10790_v61  ;;  %v7684_v39 = vcombine.low %v4733_v38, %v4737_v49  ;;  %v2812_v61 = vmul.f32 %v15767_v54, %v2725_v7 }
 0x596   : > { %v3029_v52 = vpop.xlane.xlu0 %3028  ;;  %v7683_v44 = vcombine.low %v4725_v20, %v4729_v18  ;;  %v18157_v20 = vld [vmem:[#allocation93_spill] sm:$0xff] }
 0x597   : > { %v3129_v55 = vadd.f32 %v14292_v63, %v3029_v52  ;;  %v7692_v52 = vrot.slane %v7682_v1, %v14449_v6  ;;  %v7706_v56 = vrot.slane %v7684_v39, %v14449_v6  ;;  %v4941_v18 = vrot.slane %v18157_v20, %v14347_v50 }
 0x598   : > { %v4945_v38 = vrot.slane %v18157_v20, %v14352_v0  ;;  %v4949_v49 = vrot.slane %v18157_v20, %v14355_v13  ;;  %v4953_v30 = vrot.slane %v18157_v20, %v14358_v60  ;;  %v4957_v2 = vrot.slane %v18157_v20, %v14374_v37 }
 0x599   : > { %v11375_v12 = vmul.f32 -1.442695, %v3129_v55  ;;  %v7699_v55 = vrot.slane %v7683_v44, %v14449_v6  ;;  %v4961_v7 = vrot.slane %v18157_v20, %v14377_v22  ;;  %v18159_v44 = vld [vmem:[#allocation71_spill] sm:$0xff] }
 0x59b   : > { %12256 = vpow2.f32 %v11375_v12  ;;  %v7713_v12 = vrot.slane %v7685_v32, %v14449_v6  ;;  %v7714_v9 = vcombine.low %v7692_v52, %v7699_v55  ;;  %v8025_v52 = vcombine.low %v4941_v18, %v4945_v38  ;;  %v18162_v38 = vld [vmem:[#allocation84_spill] sm:$0xff] }
 0x59c   : > { %v12255_v16 = vpop.eup %12254 }
 0x59d   : > { %v3442_v62 = vadd.f32 1.0, %v12255_v16  ;;  %v3045_v16 = vsel %vm2816_vm0, %v2812_v61, 0.0  ;;  %v7715_v10 = vcombine.low %v7706_v56, %v7713_v12  ;;  %v7722_v32 = vrot.slane %v7714_v9, %v14449_v6 }
 0x59e   : > { %v8026_v56 = vcombine.low %v4949_v49, %v4953_v30  ;;  %v8027_v12 = vcombine.low %v4957_v2, %v4961_v7  ;;  %v4781_v49 = vrot.slane %v18162_v38, %v14347_v50  ;;  %v4785_v30 = vrot.slane %v18162_v38, %v14352_v0 }
 0x59f   : > { %12258 = vrcp.f32 %v3442_v62  ;;  %3025 = vadd.xlane.f32.xlu1 %v3024_v25  ;;  %v4965_v62 = vrot.slane %v18157_v20, %v14400_v40  ;;  %v4969_v25 = vrot.slane %v18157_v20, %v14403_v48  ;;  %v7729_v61 = vrot.slane %v7715_v10, %v14449_v6  ;;  %v18161_v10 = vld [vmem:[#allocation51_spill] sm:$0xff] }
 0x5a0   : > { %v8042_v20 = vrot.slane %v8026_v56, %v14449_v6 }
 0x5a5   : > { %v12257_v24 = vpop.eup %12256 }
 0x5a6   : > { %v3449_v19 = vadd.f32 1.0, %v12257_v24  ;;  %v8028_v24 = vcombine.low %v4965_v62, %v4969_v25  ;;  %v4789_v62 = vrot.slane %v18162_v38, %v14355_v13  ;;  %v4793_v25 = vrot.slane %v18162_v38, %v14358_v60 }
 0x5a8   : > { %12260 = vrcp.f32 %v3449_v19  ;;  %3046 = vadd.xlane.f32.xlu0 %v3045_v16  ;;  %v7730_v16 = vcombine.low %v7722_v32, %v7729_v61  ;;  %v8035_v19 = vrot.slane %v8025_v52, %v14449_v6  ;;  %v8056_v9 = vrot.slane %v8028_v24, %v14449_v6 }
 0x5a9   : > { %v15961_v1 = vpop.eup %12258  ;;  %v4797_v32 = vrot.slane %v18162_v38, %v14374_v37  ;;  %v4801_v61 = vrot.slane %v18162_v38, %v14377_v22  ;;  %v4805_v52 = vrot.slane %v18162_v38, %v14400_v40  ;;  %v7780_v24 = vcombine.low %v4781_v49, %v4785_v30 }
 0x5aa   : > { %18158 = vst [vmem:[#allocation86_spill] sm:$0xff] %v15961_v1  ;;  %v3682_v39 = vmul.f32 %v15961_v1, %v18159_v44  ;;  %v8049_v44 = vrot.slane %v8027_v12, %v14449_v6  ;;  %v8057_v2 = vcombine.low %v8035_v19, %v8042_v20  ;;  %v18163_v19 = vld [vmem:[#allocation85_spill] sm:$0xff]  ;;  %v5009_v30 = vrot.slane %v14992_v15, %v14352_v0 }
 0x5ab   : > { %v2640_v20 = vadd.f32 %v15830_v34, %v18163_v19 }
 0x5ac   : > { %v3769_v55 = vadd.f32 %v15737_v11, %v3682_v39  ;;  %v8058_v7 = vcombine.low %v8049_v44, %v8056_v9  ;;  %v8065_v56 = vrot.slane %v8057_v2, %v14449_v6  ;;  %v18164_v44 = vld [vmem:[#allocation89_spill] sm:$0xff] }
 0x5ad   : > { %v16001_v9 = vadd.f32 %v15830_v34, %v18164_v44 }
 0x5ae   : > { %3849 = vst [vmem:[%s14387_s19 + $0x1f8] sm:$0xff] %v3769_v55  ;;  %v4809_v55 = vrot.slane %v18162_v38, %v14403_v48  ;;  %v8072_v12 = vrot.slane %v8058_v7, %v14449_v6  ;;  %v5005_v38 = vrot.slane %v14992_v15, %v14347_v50  ;;  %v7790_v7 = vrot.slane %v7780_v24, %v14449_v6 }
 0x5af   : > { %18165 = vst [vmem:[#allocation76_spill] sm:$0xff] %v16001_v9 }
 0x5b0   : > { %10499 = vperm.xlu1 %11989, %v7730_v16   ;;  %v7781_v16 = vcombine.low %v4789_v62, %v4793_v25  ;;  %v8073_v2 = vcombine.low %v8065_v56, %v8072_v12  ;;  %v5013_v62 = vrot.slane %v14992_v15, %v14355_v13  ;;  %v5017_v25 = vrot.slane %v14992_v15, %v14358_v60 }
 0x5b2   : > { %v15973_v5 = vpop.eup %12260  ;;  %v7797_v49 = vrot.slane %v7781_v16, %v14449_v6  ;;  %v8123_v16 = vcombine.low %v5005_v38, %v5009_v30  ;;  %v8124_v44 = vcombine.low %v5013_v62, %v5017_v25  ;;  %v5085_v62 = vrot.slane %v15027_v41, %v14374_v37 }
 0x5b3   : > { %18160 = vst [vmem:[#allocation64_spill] sm:$0xff] %v15973_v5  ;;  %v3689_v18 = vmul.f32 %v15973_v5, %v18161_v10  ;;  %v2647_v10 = vadd.f32 %v15830_v34, %v15002_v8  ;;  %v5021_v8 = vrot.slane %v14992_v15, %v14374_v37  ;;  %v5025_v34 = vrot.slane %v14992_v15, %v14377_v22 }
 0x5b4   : > { %v16025_v24 = vcombine.low %v7790_v7, %v7797_v49  ;;  %v8133_v30 = vrot.slane %v8123_v16, %v14449_v6  ;;  %v5089_v25 = vrot.slane %v15027_v41, %v14377_v22 }
 0x5b5   : > { %v3776_v39 = vadd.f32 %v15737_v11, %v3689_v18  ;;  %v7782_v18 = vcombine.low %v4797_v32, %v4801_v61  ;;  %v5029_v32 = vrot.slane %v14992_v15, %v14400_v40  ;;  %v5033_v61 = vrot.slane %v14992_v15, %v14403_v48 }
 0x5b6   : > { %v8125_v53 = vcombine.low %v5021_v8, %v5025_v34  ;;  %v5073_v15 = vrot.slane %v15027_v41, %v14352_v0  ;;  %v7820_v49 = vrot.slane %v16025_v24, %v14449_v6  ;;  %v5093_v34 = vrot.slane %v15027_v41, %v14400_v40  ;;  %v16055_v24 = vpop.permute.xlu0 %10502 }
 0x5b7   : > { %3856 = vst [vmem:[%s14387_s19 + $0x230] sm:$0xff] %v3776_v39  ;;  %v7783_v39 = vcombine.low %v4805_v52, %v4809_v55  ;;  %v2720_v52 = vmax.f32 %v2640_v20, 0.0  ;;  %v2727_v55 = vmax.f32 %v2647_v10, 0.0  ;;  %v7804_v56 = vrot.slane %v7782_v18, %v14449_v6  ;;  %18166 = vst [vmem:[#allocation79_spill] sm:$0xff] %v16055_v24 }
 0x5b8   : > { %v8126_v4 = vcombine.low %v5029_v32, %v5033_v61  ;;  %v5077_v20 = vrot.slane %v15027_v41, %v14355_v13  ;;  %v5081_v10 = vrot.slane %v15027_v41, %v14358_v60  ;;  %v5097_v32 = vrot.slane %v15027_v41, %v14403_v48 }
 0x5b9   : > { %v7811_v12 = vrot.slane %v7783_v39, %v14449_v6  ;;  %v2807_v39 = vmul.f32 %v15767_v54, %v2720_v52  ;;  %v2814_v38 = vmul.f32 %v15767_v54, %v2727_v55  ;;  %v8147_v52 = vrot.slane %v8125_v53, %v14449_v6  ;;  %v18168_v54 = vld [vmem:[#allocation74_spill] sm:$0xff] }
 0x5ba   : > { %v8154_v55 = vrot.slane %v8126_v4, %v14449_v6  ;;  %v8223_v19 = vcombine.low %v5085_v62, %v5089_v25  ;;  %v5141_v53 = vrot.slane %v15049_v27, %v14355_v13  ;;  %v5145_v4 = vrot.slane %v15049_v27, %v14358_v60 }
 0x5bb   : > { %v16039_v7 = vcombine.low %v7804_v56, %v7811_v12  ;;  %v8222_v12 = vcombine.low %v5077_v20, %v5081_v10  ;;  %v8224_v10 = vcombine.low %v5093_v34, %v5097_v32  ;;  %v5149_v62 = vrot.slane %v15049_v27, %v14374_v37 }
 0x5bc   : > { %v16088_v32 = vcombine.low %v8147_v52, %v8154_v55  ;;  %v5213_v52 = vrot.slane %v15067_v58, %v14374_v37  ;;  %v3030_v31 = vsel %vm2816_vm0, %v2807_v39, 0.0  ;;  %v5341_v39 = vrot.slane %v15095_v33, %v14374_v37 }
 0x5be   : > { %10520 = vperm.xlu0 %11988, %v8073_v2   ;;  %v5069_v2 = vrot.slane %v15027_v41, %v14347_v50  ;;  %v10804_v41 = vrot.slane %v15836_v45, %v15465_v35  ;;  %v8238_v45 = vrot.slane %v8222_v12, %v14449_v6  ;;  %v8320_v12 = vcombine.low %v5141_v53, %v5145_v4 }
 0x5c0   : > { %v8221_v56 = vcombine.low %v5069_v2, %v5073_v15  ;;  %v7827_v15 = vrot.slane %v16039_v7, %v14449_v6  ;;  %v5157_v7 = vrot.slane %v15049_v27, %v14400_v40  ;;  %v8336_v35 = vrot.slane %v8320_v12, %v14449_v6 }
 0x5c2   : > { %v3014_v1 = vpop.xlane.xlu1 %3013 }
 0x5c3   : > { %v3124_v18 = vadd.f32 %v14292_v63, %v3014_v1  ;;  %v8140_v1 = vrot.slane %v8124_v44, %v14449_v6  ;;  %v5133_v44 = vrot.slane %v15049_v27, %v14347_v50 }
 0x5c5   : > { %v11370_v8 = vmul.f32 -1.442695, %v3124_v18  ;;  %v5137_v18 = vrot.slane %v15049_v27, %v14352_v0  ;;  %v16072_v20 = vcombine.low %v8133_v30, %v8140_v1  ;;  %v5161_v30 = vrot.slane %v15049_v27, %v14403_v48 }
 0x5c6   : > { %v10488_v61 = vpop.permute.xlu1 %10487 }
 0x5c7   : > { %12262 = vpow2.f32 %v11370_v8  ;;  %v10799_v16 = vrot.slane %v10488_v61, %v15458_v26  ;;  %v8231_v8 = vrot.slane %v8221_v56, %v14449_v6  ;;  %v8319_v1 = vcombine.low %v5133_v44, %v5137_v18 }
 0x5c8   : > { %v8245_v56 = vrot.slane %v8223_v19, %v14449_v6  ;;  %v8252_v18 = vrot.slane %v8224_v10, %v14449_v6  ;;  %v5217_v19 = vrot.slane %v15067_v58, %v14377_v22  ;;  %v16108_v4 = vcombine.low %v5157_v7, %v5161_v30 }
 0x5c9   : > { %v10800_v2 = vsel %vm10698_vm4, %v10799_v16, %v15916_v28  ;;  %v5153_v28 = vrot.slane %v15049_v27, %v14377_v22  ;;  %v5197_v16 = vrot.slane %v15067_v58, %v14347_v50  ;;  %v5209_v27 = vrot.slane %v15067_v58, %v14358_v60 }
 0x5ca   : > { %v16079_v25 = vsel %vm10705_vm5, %v10804_v41, %v10800_v2  ;;  %v5201_v41 = vrot.slane %v15067_v58, %v14352_v0  ;;  %v5205_v2 = vrot.slane %v15067_v58, %v14355_v13  ;;  %v16104_v55 = vcombine.low %v8231_v8, %v8238_v45 }
 0x5cb   : > { %18167 = vst [vmem:[#allocation91_spill] sm:$0xff] %v16079_v25  ;;  %v3035_v61 = vpop.xlane.xlu0 %3034  ;;  %v16106_v53 = vcombine.low %v5149_v62, %v5153_v28  ;;  %v5221_v10 = vrot.slane %v15067_v58, %v14400_v40  ;;  %v3051_v8 = vsel %vm2816_vm0, %v2814_v38, 0.0  ;;  %v16122_v7 = vcombine.low %v7820_v49, %v7827_v15 }
 0x5cc   : > { %v3131_v34 = vadd.f32 %v14292_v63, %v3035_v61  ;;  %v8329_v61 = vrot.slane %v8319_v1, %v14449_v6  ;;  %v16118_v45 = vcombine.low %v5197_v16, %v5201_v41  ;;  %v16120_v62 = vcombine.low %v5205_v2, %v5209_v27 }
 0x5cd   : > { %v16126_v1 = vcombine.low %v5213_v52, %v5217_v19  ;;  %v16130_v12 = vcombine.low %v8245_v56, %v8252_v18  ;;  %v5261_v41 = vrot.slane %v15081_v14, %v14347_v50  ;;  %v5265_v2 = vrot.slane %v15081_v14, %v14352_v0 }
 0x5ce   : > { %v11377_v44 = vmul.f32 -1.442695, %v3131_v34  ;;  %v5225_v34 = vrot.slane %v15067_v58, %v14403_v48  ;;  %v16138_v49 = vcombine.low %v8329_v61, %v8336_v35  ;;  %v5269_v35 = vrot.slane %v15081_v14, %v14355_v13 }
 0x5cf   : > { %v5273_v27 = vrot.slane %v15081_v14, %v14358_v60  ;;  %v5281_v18 = vrot.slane %v15081_v14, %v14377_v22  ;;  %v5285_v52 = vrot.slane %v15081_v14, %v14400_v40  ;;  %v5289_v19 = vrot.slane %v15081_v14, %v14403_v48 }
 0x5d0   : > { %12264 = vpow2.f32 %v11377_v44  ;;  %v16140_v15 = vcombine.low %v5221_v10, %v5225_v34  ;;  %v5277_v44 = vrot.slane %v15081_v14, %v14374_v37  ;;  %v5325_v61 = vrot.slane %v15095_v33, %v14347_v50 }
 0x5d1   : > { %v12263_v26 = vpop.eup %12262  ;;  %v5329_v10 = vrot.slane %v15095_v33, %v14352_v0  ;;  %v5333_v34 = vrot.slane %v15095_v33, %v14355_v13  ;;  %v5345_v30 = vrot.slane %v15095_v33, %v14377_v22  ;;  %v5349_v14 = vrot.slane %v15095_v33, %v14400_v40 }
 0x5d2   : > { %v3444_v28 = vadd.f32 1.0, %v12263_v26  ;;  %v5353_v58 = vrot.slane %v15095_v33, %v14403_v48  ;;  %v5393_v56 = vrot.slane %v15135_v23, %v14352_v0  ;;  %v5397_v38 = vrot.slane %v15135_v23, %v14355_v13 }
 0x5d3   : > { %v5401_v26 = vrot.slane %v15135_v23, %v14358_v60  ;;  %v8448_v5 = vrot.slane %v16140_v15, %v14449_v6  ;;  %v8515_v24 = vcombine.low %v5261_v41, %v5265_v2  ;;  %v8516_v47 = vcombine.low %v5269_v35, %v5273_v27 }
 0x5d4   : > { %12266 = vrcp.f32 %v3444_v28  ;;  %3031 = vadd.xlane.f32.xlu1 %v3030_v31  ;;  %v5337_v28 = vrot.slane %v15095_v33, %v14358_v60  ;;  %v5389_v31 = vrot.slane %v15135_v23, %v14347_v50  ;;  %v5409_v33 = vrot.slane %v15135_v23, %v14377_v22 }
 0x5d5   : > { %v8517_v42 = vcombine.low %v5277_v44, %v5281_v18  ;;  %v8518_v25 = vcombine.low %v5285_v52, %v5289_v19  ;;  %v8613_v43 = vcombine.low %v5325_v61, %v5329_v10  ;;  %v8615_v59 = vcombine.low %v5341_v39, %v5345_v30 }
 0x5d6   : > { %v8616_v63 = vcombine.low %v5349_v14, %v5353_v58  ;;  %v8711_v51 = vcombine.low %v5389_v31, %v5393_v56  ;;  %v8712_v46 = vcombine.low %v5397_v38, %v5401_v26  ;;  %v8713_v9 = vcombine.low %v5405_v17, %v5409_v33 }
 0x5d7   : > { %v8714_v15 = vcombine.low %v5413_v21, %v5417_v3  ;;  %v5453_v41 = vrot.slane %v15219_v57, %v14347_v50  ;;  %v5465_v30 = vrot.slane %v15219_v57, %v14358_v60  ;;  %v5469_v58 = vrot.slane %v15219_v57, %v14374_v37 }
 0x5d8   : > { %v5473_v3 = vrot.slane %v15219_v57, %v14377_v22  ;;  %v5477_v21 = vrot.slane %v15219_v57, %v14400_v40  ;;  %v5481_v17 = vrot.slane %v15219_v57, %v14403_v48  ;;  %v8525_v39 = vrot.slane %v8515_v24, %v14449_v6 }
 0x5d9   : > { %v8532_v38 = vrot.slane %v8516_v47, %v14449_v6  ;;  %v8539_v26 = vrot.slane %v8517_v42, %v14449_v6  ;;  %v8546_v56 = vrot.slane %v8518_v25, %v14449_v6  ;;  %v8623_v2 = vrot.slane %v8613_v43, %v14449_v6 }
 0x5da   : > { %v12265_v16 = vpop.eup %12264  ;;  %v8637_v35 = vrot.slane %v8615_v59, %v14449_v6  ;;  %v8644_v27 = vrot.slane %v8616_v63, %v14449_v6  ;;  %v8721_v44 = vrot.slane %v8711_v51, %v14449_v6  ;;  %v8735_v24 = vrot.slane %v8713_v9, %v14449_v6 }
 0x5db   : > { %v3451_v36 = vadd.f32 1.0, %v12265_v16  ;;  %v8614_v16 = vcombine.low %v5333_v34, %v5337_v28  ;;  %v8742_v47 = vrot.slane %v8714_v15, %v14449_v6  ;;  %v8811_v18 = vcombine.low %v5469_v58, %v5473_v3  ;;  %v18174_v28 = vld [vmem:[#allocation19_spill] sm:$0xff] }
 0x5dc   : > { %v8812_v43 = vcombine.low %v5477_v21, %v5481_v17  ;;  %v8268_v52 = vrot.slane %v16130_v12, %v14449_v6  ;;  %v18169_v63 = vrot.slane %v16108_v4, %v14449_v6  ;;  %v18170_v51 = vrot.slane %v16106_v53, %v14449_v6 }
 0x5dd   : > { %12268 = vrcp.f32 %v3451_v36  ;;  %3052 = vadd.xlane.f32.xlu0 %v3051_v8  ;;  %v5457_v36 = vrot.slane %v15219_v57, %v14352_v0  ;;  %v5461_v8 = vrot.slane %v15219_v57, %v14355_v13  ;;  %v8630_v31 = vrot.slane %v8614_v16, %v14449_v6 }
 0x5de   : > { %v16198_v29 = vpop.eup %12266  ;;  %v8728_v57 = vrot.slane %v8712_v46, %v14449_v6  ;;  %v8352_v46 = vcombine.low %v18170_v51, %v18169_v63  ;;  %v18171_v59 = vrot.slane %v16120_v62, %v14449_v6  ;;  %v18172_v9 = vrot.slane %v16118_v45, %v14449_v6 }
 0x5df   : > { %v3684_v23 = vmul.f32 %v16198_v29, %v18168_v54  ;;  %v8809_v42 = vcombine.low %v5453_v41, %v5457_v36  ;;  %v8810_v25 = vcombine.low %v5461_v8, %v5465_v30  ;;  %v18173_v19 = vrot.slane %v16126_v1, %v14449_v6  ;;  %v18175_v8 = vld [vmem:[#allocation88_spill] sm:$0xff] }
 0x5e0   : > { %v8359_v4 = vrot.slane %v16138_v49, %v14449_v6  ;;  %v8547_v12 = vcombine.low %v8525_v39, %v8532_v38  ;;  %v8548_v34 = vcombine.low %v8539_v26, %v8546_v56  ;;  %v8645_v53 = vcombine.low %v8623_v2, %v8630_v31 }
 0x5e1   : > { %v3771_v54 = vadd.f32 %v15737_v11, %v3684_v23  ;;  %v8450_v61 = vcombine.low %v18173_v19, %v8448_v5  ;;  %v8646_v62 = vcombine.low %v8637_v35, %v8644_v27  ;;  %v8743_v33 = vcombine.low %v8721_v44, %v8728_v57 }
 0x5e2   : > { %v8744_v45 = vcombine.low %v8735_v24, %v8742_v47  ;;  %v8819_v16 = vrot.slane %v8809_v42, %v14449_v6  ;;  %v8826_v1 = vrot.slane %v8810_v25, %v14449_v6  ;;  %v8833_v5 = vrot.slane %v8811_v18, %v14449_v6 }
 0x5e3   : > { %3851 = vst [vmem:[%s14387_s19 + $0x208] sm:$0xff] %v3771_v54  ;;  %v8840_v23 = vrot.slane %v8812_v43, %v14449_v6  ;;  %v8366_v15 = vrot.slane %v8352_v46, %v14449_v6  ;;  %v8464_v36 = vrot.slane %v8450_v61, %v14449_v6  ;;  %v4845_v30 = vrot.slane %v18175_v8, %v14347_v50 }
 0x5e4   : > { %v4849_v58 = vrot.slane %v18175_v8, %v14352_v0  ;;  %v4853_v54 = vrot.slane %v18175_v8, %v14355_v13  ;;  %v4857_v3 = vrot.slane %v18175_v8, %v14358_v60  ;;  %v8562_v21 = vrot.slane %v8548_v34, %v14449_v6 }
 0x5e5   : > { %10505 = vperm.xlu1 %11989, %v16122_v7   ;;  %v8449_v7 = vcombine.low %v18172_v9, %v18171_v59  ;;  %v8653_v17 = vrot.slane %v8645_v53, %v14449_v6  ;;  %v8660_v39 = vrot.slane %v8646_v62, %v14449_v6  ;;  %v8751_v38 = vrot.slane %v8743_v33, %v14449_v6 }
 0x5e6   : > { %v8758_v26 = vrot.slane %v8744_v45, %v14449_v6  ;;  %v8841_v56 = vcombine.low %v8819_v16, %v8826_v1  ;;  %v8842_v2 = vcombine.low %v8833_v5, %v8840_v23  ;;  %v4861_v31 = vrot.slane %v18175_v8, %v14374_v37  ;;  %v18183_v23 = vld [vmem:[#allocation39_spill] sm:$0xff] }
 0x5e7   : > { %v16250_v10 = vpop.eup %12268  ;;  %v8457_v41 = vrot.slane %v8449_v7, %v14449_v6  ;;  %v4865_v35 = vrot.slane %v18175_v8, %v14377_v22  ;;  %v4869_v27 = vrot.slane %v18175_v8, %v14400_v40  ;;  %v4873_v44 = vrot.slane %v18175_v8, %v14403_v48  ;;  %v18179_v7 = vld [vmem:[#allocation76_spill] sm:$0xff] }
 0x5e8   : > { %v3691_v14 = vmul.f32 %v16250_v10, %v18174_v28  ;;  %v7878_v57 = vcombine.low %v4845_v30, %v4849_v58  ;;  %v7879_v24 = vcombine.low %v4853_v54, %v4857_v3  ;;  %v18176_v47 = vrot.slane %v16088_v32, %v14449_v6  ;;  %v18181_v32 = vld [vmem:[#allocation82_spill] sm:$0xff] }
 0x5e9   : > { %v18177_v42 = vrot.slane %v16072_v20, %v14449_v6  ;;  %v18178_v18 = vrot.slane %v16104_v55, %v14449_v6  ;;  %v8367_v63 = vcombine.low %v8359_v4, %v8366_v15  ;;  %v16296_v51 = vcombine.low %v8457_v41, %v8464_v36 }
 0x5ea   : > { %v3778_v49 = vadd.f32 %v15737_v11, %v3691_v14  ;;  %v8555_v11 = vrot.slane %v8547_v12, %v14449_v6  ;;  %v16300_v59 = vcombine.low %v8653_v17, %v8660_v39  ;;  %v16302_v9 = vcombine.low %v8751_v38, %v8758_v26  ;;  %v18184_v17 = vld [vmem:[#allocation30_spill] sm:$0xff] }
 0x5eb   : > { %v8171_v25 = vcombine.low %v18177_v42, %v18176_v47  ;;  %v8269_v43 = vcombine.low %v18178_v18, %v8268_v52  ;;  %v18180_v19 = vmax.f32 %v18179_v7, 0.0  ;;  %v8849_v20 = vrot.slane %v8841_v56, %v14449_v6  ;;  %v18182_v52 = vld [vmem:[#allocation36_spill] sm:$0xff]  ;;  %v18185_v18 = vld [vmem:[#allocation59_spill] sm:$0xff] }
 0x5ec   : > { %3858 = vst [vmem:[%s14387_s19 + $0x240] sm:$0xff] %v3778_v49  ;;  %v16298_v46 = vcombine.low %v8555_v11, %v8562_v21  ;;  %v8856_v12 = vrot.slane %v8842_v2, %v14449_v6  ;;  %v16309_v34 = vcombine.low %v4861_v31, %v4865_v35  ;;  %v16311_v55 = vcombine.low %v4869_v27, %v4873_v44 }
 0x5ed   : > { %v2809_v61 = vmul.f32 %v18181_v32, %v18180_v19  ;;  %v5517_v4 = vrot.slane %v18182_v52, %v14347_v50  ;;  %v5521_v53 = vrot.slane %v18182_v52, %v14352_v0  ;;  %v7888_v28 = vrot.slane %v7878_v57, %v14449_v6  ;;  %v16365_v32 = vpop.permute.xlu0 %10508 }
 0x5ee   : > { %v7895_v14 = vrot.slane %v7879_v24, %v14449_v6  ;;  %v5525_v62 = vrot.slane %v18182_v52, %v14355_v13  ;;  %v5529_v33 = vrot.slane %v18182_v52, %v14358_v60  ;;  %v5533_v45 = vrot.slane %v18182_v52, %v14374_v37 }
 0x5ef   : > { %v5537_v16 = vrot.slane %v18182_v52, %v14377_v22  ;;  %v5541_v1 = vrot.slane %v18182_v52, %v14400_v40  ;;  %v5545_v5 = vrot.slane %v18182_v52, %v14403_v48  ;;  %v5581_v49 = vrot.slane %v18183_v23, %v14347_v50 }
 0x5f0   : > { %v5585_v15 = vrot.slane %v18183_v23, %v14352_v0  ;;  %v5589_v41 = vrot.slane %v18183_v23, %v14355_v13  ;;  %v5593_v36 = vrot.slane %v18183_v23, %v14358_v60  ;;  %v5597_v8 = vrot.slane %v18183_v23, %v14374_v37 }
 0x5f1   : > { %v5601_v30 = vrot.slane %v18183_v23, %v14377_v22  ;;  %v16343_v54 = vcombine.low %v8849_v20, %v8856_v12  ;;  %v16346_v3 = vsel %vm2816_vm0, %v2809_v61, 0.0  ;;  %v5605_v11 = vrot.slane %v18183_v23, %v14400_v40  ;;  %v18186_v61 = vld [vmem:[#allocation55_spill] sm:$0xff] }
 0x5f2   : > { %v5609_v21 = vrot.slane %v18183_v23, %v14403_v48  ;;  %v7902_v38 = vrot.slane %v16309_v34, %v14449_v6  ;;  %v7909_v26 = vrot.slane %v16311_v55, %v14449_v6  ;;  %v16357_v56 = vcombine.low %v7888_v28, %v7895_v14  ;;  %v18187_v34 = vld [vmem:[#allocation43_spill] sm:$0xff]  ;;  %v18188_v55 = vld [vmem:[#allocation73_spill] sm:$0xff] }
 0x5f3   : > { %10526 = vperm.xlu0 %11988, %v8171_v25   ;;  %v8907_v2 = vcombine.low %v5517_v4, %v5521_v53  ;;  %v8908_v31 = vcombine.low %v5525_v62, %v5529_v33  ;;  %v8909_v35 = vcombine.low %v5533_v45, %v5537_v16  ;;  %v8910_v27 = vcombine.low %v5541_v1, %v5545_v5  ;;  %v18189_v14 = vld [vmem:[#allocation91_spill] sm:$0xff] }
 0x5f4   : > { %v9005_v57 = vcombine.low %v5581_v49, %v5585_v15  ;;  %v9006_v24 = vcombine.low %v5589_v41, %v5593_v36  ;;  %v9007_v47 = vcombine.low %v5597_v8, %v5601_v30  ;;  %v9008_v25 = vcombine.low %v5605_v11, %v5609_v21  ;;  %v18190_v21 = vld [vmem:[#allocation63_spill] sm:$0xff] }
 0x5f5   : > { %v5649_v7 = vrot.slane %v18185_v18, %v14352_v0  ;;  %v5653_v19 = vrot.slane %v18185_v18, %v14355_v13  ;;  %v5657_v12 = vrot.slane %v18185_v18, %v14358_v60  ;;  %v10814_v52 = vrot.slane %v18188_v55, %v18187_v34 }
 0x5f6   : > { %v5665_v4 = vrot.slane %v18185_v18, %v14377_v22  ;;  %v5669_v53 = vrot.slane %v18185_v18, %v14400_v40  ;;  %v5673_v28 = vrot.slane %v18185_v18, %v14403_v48  ;;  %v8917_v33 = vrot.slane %v8907_v2, %v14449_v6 }
 0x5f7   : > { %10532 = vperm.xlu0 %11988, %v8269_v43   ;;  %v3020_v58 = vpop.xlane.xlu1 %3019  ;;  %v5645_v43 = vrot.slane %v18185_v18, %v14347_v50  ;;  %v8924_v45 = vrot.slane %v8908_v31, %v14449_v6  ;;  %v8931_v16 = vrot.slane %v8909_v35, %v14449_v6  ;;  %v8938_v1 = vrot.slane %v8910_v27, %v14449_v6 }
 0x5f8   : > { %v3126_v39 = vadd.f32 %v18184_v17, %v3020_v58  ;;  %v9015_v5 = vrot.slane %v9005_v57, %v14449_v6  ;;  %v9022_v23 = vrot.slane %v9006_v24, %v14449_v6  ;;  %v9029_v41 = vrot.slane %v9007_v47, %v14449_v6 }
 0x5f9   : > { %v9036_v36 = vrot.slane %v9008_v25, %v14449_v6  ;;  %v9103_v8 = vcombine.low %v5645_v43, %v5649_v7  ;;  %v9104_v30 = vcombine.low %v5653_v19, %v5657_v12  ;;  %v5713_v2 = vrot.slane %v18190_v21, %v14352_v0 }
 0x5fa   : > { %v11372_v44 = vmul.f32 -1.442695, %v3126_v39  ;;  %v5709_v39 = vrot.slane %v18190_v21, %v14347_v50  ;;  %v5717_v31 = vrot.slane %v18190_v21, %v14355_v13  ;;  %v5721_v35 = vrot.slane %v18190_v21, %v14358_v60 }
 0x5fb   : > { %10538 = vperm.xlu0 %11988, %v8367_v63   ;;  %v10494_v42 = vpop.permute.xlu1 %10493  ;;  %v5661_v63 = vrot.slane %v18185_v18, %v14374_v37  ;;  %v5725_v27 = vrot.slane %v18190_v21, %v14374_v37  ;;  %v5729_v57 = vrot.slane %v18190_v21, %v14377_v22  ;;  %v5733_v24 = vrot.slane %v18190_v21, %v14400_v40 }
 0x5fc   : > { %12270 = vpow2.f32 %v11372_v44  ;;  %v10809_v20 = vrot.slane %v10494_v42, %v18186_v61  ;;  %v5737_v47 = vrot.slane %v18190_v21, %v14403_v48  ;;  %v8939_v42 = vcombine.low %v8917_v33, %v8924_v45 }
 0x5fd   : > { %v9105_v11 = vcombine.low %v5661_v63, %v5665_v4  ;;  %v8940_v25 = vcombine.low %v8931_v16, %v8938_v1  ;;  %v9037_v18 = vcombine.low %v9015_v5, %v9022_v23  ;;  %v16412_v43 = vcombine.low %v7902_v38, %v7909_v26  ;;  %v18191_v38 = vld [vmem:[#allocation67_spill] sm:$0xff] }
 0x5fe   : > { %v10810_v62 = vsel %vm10712_vm6, %v10809_v20, %v18189_v14  ;;  %v9038_v7 = vcombine.low %v9029_v41, %v9036_v36  ;;  %v9113_v19 = vrot.slane %v9103_v8, %v14449_v6  ;;  %v9201_v55 = vcombine.low %v5709_v39, %v5713_v2 }
 0x5ff   : > { %10544 = vperm.xlu0 %11988, %v16296_v51   ;;  %v16390_v49 = vsel %vm10719_vm7, %v10814_v52, %v10810_v62  ;;  %v9106_v51 = vcombine.low %v5669_v53, %v5673_v28  ;;  %v9127_v12 = vrot.slane %v9105_v11, %v14449_v6  ;;  %v9202_v52 = vcombine.low %v5717_v31, %v5721_v35 }
 0x600   : > { %v3041_v15 = vpop.xlane.xlu0 %3040  ;;  %v9203_v53 = vcombine.low %v5725_v27, %v5729_v57  ;;  %v9204_v28 = vcombine.low %v5733_v24, %v5737_v47  ;;  %v5773_v26 = vrot.slane %v18191_v38, %v14347_v50  ;;  %v5777_v14 = vrot.slane %v18191_v38, %v14352_v0 }
 0x601   : > { %v3133_v58 = vadd.f32 %v18184_v17, %v3041_v15  ;;  %v9134_v63 = vrot.slane %v9106_v51, %v14449_v6  ;;  %v5781_v62 = vrot.slane %v18191_v38, %v14355_v13  ;;  %v5785_v33 = vrot.slane %v18191_v38, %v14358_v60 }
 0x602   : > { %v5789_v45 = vrot.slane %v18191_v38, %v14374_v37  ;;  %v5797_v16 = vrot.slane %v18191_v38, %v14400_v40  ;;  %v5801_v1 = vrot.slane %v18191_v38, %v14403_v48  ;;  %v8947_v5 = vrot.slane %v8939_v42, %v14449_v6 }
 0x603   : > { %v11379_v44 = vmul.f32 -1.442695, %v3133_v58  ;;  %10550 = vperm.xlu0 %11988, %v16298_v46   ;;  %v9120_v46 = vrot.slane %v9104_v30, %v14449_v6  ;;  %v8954_v23 = vrot.slane %v8940_v25, %v14449_v6  ;;  %v7918_v15 = vrot.slane %v16357_v56, %v14449_v6 }
 0x604   : > { %v7925_v41 = vrot.slane %v16412_v43, %v14449_v6  ;;  %v9052_v36 = vrot.slane %v9038_v7, %v14449_v6  ;;  %v9136_v30 = vcombine.low %v9127_v12, %v9134_v63  ;;  %v9211_v58 = vrot.slane %v9201_v55, %v14449_v6 }
 0x605   : > { %12272 = vpow2.f32 %v11379_v44  ;;  %v9135_v8 = vcombine.low %v9113_v19, %v9120_v46  ;;  %v9218_v11 = vrot.slane %v9202_v52, %v14449_v6  ;;  %v9225_v51 = vrot.slane %v9203_v53, %v14449_v6 }
 0x606   : > { %v12271_v20 = vpop.eup %12270  ;;  %v9232_v21 = vrot.slane %v9204_v28, %v14449_v6  ;;  %v9299_v56 = vcombine.low %v5773_v26, %v5777_v14  ;;  %v9300_v39 = vcombine.low %v5781_v62, %v5785_v33  ;;  %v9302_v31 = vcombine.low %v5797_v16, %v5801_v1  ;;  %v18192_v26 = vld [vmem:[#allocation78_spill] sm:$0xff] }
 0x607   : > { %v3446_v4 = vadd.f32 1.0, %v12271_v20  ;;  %10556 = vperm.xlu0 %11988, %v16300_v59   ;;  %v5793_v59 = vrot.slane %v18191_v38, %v14377_v22  ;;  %v6033_v35 = vrot.slane %v16198_v29, %v14352_v0  ;;  %v6037_v27 = vrot.slane %v16198_v29, %v14355_v13 }
 0x608   : > { %v6041_v44 = vrot.slane %v16198_v29, %v14358_v60  ;;  %v6045_v24 = vrot.slane %v16198_v29, %v14374_v37  ;;  %v6049_v47 = vrot.slane %v16198_v29, %v14377_v22  ;;  %v6053_v42 = vrot.slane %v16198_v29, %v14400_v40 }
 0x609   : > { %12274 = vrcp.f32 %v3446_v4  ;;  %3037 = vadd.xlane.f32.xlu1 %v16346_v3  ;;  %v9045_v3 = vrot.slane %v9037_v18, %v14449_v6  ;;  %v9301_v2 = vcombine.low %v5789_v45, %v5793_v59  ;;  %v6057_v25 = vrot.slane %v16198_v29, %v14403_v48 }
 0x60a   : > { %v8955_v43 = vcombine.low %v8947_v5, %v8954_v23  ;;  %v9143_v19 = vrot.slane %v9135_v8, %v14449_v6  ;;  %v9150_v46 = vrot.slane %v9136_v30, %v14449_v6  ;;  %v9234_v20 = vcombine.low %v9225_v51, %v9232_v21  ;;  %v16480_v23 = vld [vmem:[#allocation9] ss:$0 sm:$0xff] }
 0x60b   : > { %10562 = vperm.xlu0 %11988, %v16302_v9   ;;  %v6029_v9 = vrot.slane %v16198_v29, %v14347_v50  ;;  %v9053_v7 = vcombine.low %v9045_v3, %v9052_v36  ;;  %v9309_v12 = vrot.slane %v9299_v56, %v14449_v6  ;;  %v9316_v63 = vrot.slane %v9300_v39, %v14449_v6 }
 0x60c   : > { %v9323_v55 = vrot.slane %v9301_v2, %v14449_v6  ;;  %v9330_v52 = vrot.slane %v9302_v31, %v14449_v6  ;;  %v9692_v53 = vcombine.low %v6037_v27, %v6041_v44  ;;  %v9693_v28 = vcombine.low %v6045_v24, %v6049_v47  ;;  %18193 = vst [vmem:[#allocation77_spill] sm:$0xff] %v16480_v23 }
 0x60d   : > { %v9691_v29 = vcombine.low %v6029_v9, %v6033_v35  ;;  %v9694_v38 = vcombine.low %v6053_v42, %v6057_v25  ;;  %v7926_v8 = vcombine.low %v7918_v15, %v7925_v41  ;;  %v9151_v9 = vcombine.low %v9143_v19, %v9150_v46 }
 0x60e   : > { %v9332_v51 = vcombine.low %v9323_v55, %v9330_v52  ;;  %v9708_v56 = vrot.slane %v9692_v53, %v14449_v6  ;;  %v9715_v39 = vrot.slane %v9693_v28, %v14449_v6 }
 0x60f   : > { %v12273_v57 = vpop.eup %12272  ;;  %10568 = vperm.xlu0 %11988, %v16343_v54   ;;  %v9233_v54 = vcombine.low %v9211_v58, %v9218_v11  ;;  %v9248_v58 = vrot.slane %v9234_v20, %v14449_v6  ;;  %v9331_v11 = vcombine.low %v9309_v12, %v9316_v63  ;;  %v9701_v21 = vrot.slane %v9691_v29, %v14449_v6 }
 0x610   : > { %v3453_v18 = vadd.f32 1.0, %v12273_v57  ;;  %v9722_v2 = vrot.slane %v9694_v38, %v14449_v6  ;;  %v9346_v24 = vrot.slane %v9332_v51, %v14449_v6 }
 0x611   : > { %v9241_v36 = vrot.slane %v9233_v54, %v14449_v6  ;;  %v9339_v44 = vrot.slane %v9331_v11, %v14449_v6  ;;  %v9723_v47 = vcombine.low %v9701_v21, %v9708_v56  ;;  %v18199_v11 = vld [vmem:[#allocation92_spill] sm:$0xff] }
 0x612   : > { %12276 = vrcp.f32 %v3453_v18  ;;  %v9724_v42 = vcombine.low %v9715_v39, %v9722_v2  ;;  %v18194_v18 = vld [vmem:[#allocation21_spill] sm:$0xff]  ;;  %v4909_v51 = vrot.slane %v18199_v11, %v14347_v50  ;;  %v4913_v39 = vrot.slane %v18199_v11, %v14352_v0 }
 0x613   : > { %v12275_v4 = vpop.eup %12274  ;;  %10574 = vperm.xlu0 %11988, %v8955_v43   ;;  %v9249_v27 = vcombine.low %v9241_v36, %v9248_v58  ;;  %v9347_v20 = vcombine.low %v9339_v44, %v9346_v24  ;;  %v9731_v12 = vrot.slane %v9723_v47, %v14449_v6  ;;  %v18198_v36 = vld [vmem:[#allocation79_spill] sm:$0xff]  ;;  %v4917_v2 = vrot.slane %v18199_v11, %v14355_v13  ;;  %v16539_v44 = vld [vmem:[#allocation8] ss:$0 sm:$0xff] }
 0x614   : > { %v3686_v14 = vmul.f32 %v12275_v4, %v18192_v26  ;;  %v6093_v62 = vrot.slane %v12275_v4, %v14347_v50  ;;  %v6097_v33 = vrot.slane %v12275_v4, %v14352_v0  ;;  %v6101_v45 = vrot.slane %v12275_v4, %v14355_v13 }
 0x615   : > { %v6105_v59 = vrot.slane %v12275_v4, %v14358_v60  ;;  %v6109_v16 = vrot.slane %v12275_v4, %v14374_v37  ;;  %v6113_v1 = vrot.slane %v12275_v4, %v14377_v22  ;;  %v6117_v5 = vrot.slane %v12275_v4, %v14400_v40 }
 0x616   : > { %v3773_v3 = vadd.f32 %v16480_v23, %v3686_v14  ;;  %v6121_v30 = vrot.slane %v12275_v4, %v14403_v48  ;;  %v9789_v31 = vcombine.low %v6093_v62, %v6097_v33  ;;  %v9738_v63 = vrot.slane %v9724_v42, %v14449_v6  ;;  %v16508_v62 = vld [vmem:[#allocation6] ss:$0 sm:$0xff]  ;;  %v18195_v33 = vld [vmem:[#allocation22_spill] sm:$0xff] }
 0x617   : > { %10580 = vperm.xlu0 %11988, %v9053_v7   ;;  %v9790_v35 = vcombine.low %v6101_v45, %v6105_v59  ;;  %v9791_v15 = vcombine.low %v6109_v16, %v6113_v1  ;;  %v2644_v45 = vadd.f32 %v16508_v62, %v18195_v33  ;;  %v16512_v16 = vpop.permute.xlu0 %10514  ;;  %v18196_v1 = vld [vmem:[#allocation58_spill] sm:$0xff]  ;;  %v7976_v47 = vcombine.low %v4909_v51, %v4913_v39 }
 0x618   : > { %3853 = vst [vmem:[%s14387_s19 + $0x218] sm:$0xff] %v3773_v3  ;;  %v9792_v41 = vcombine.low %v6117_v5, %v6121_v30  ;;  %v9799_v25 = vrot.slane %v9789_v31, %v14449_v6  ;;  %v9739_v4 = vcombine.low %v9731_v12, %v9738_v63  ;;  %v18197_v3 = vld [vmem:[#allocation61_spill] sm:$0xff]  ;;  %v4921_v31 = vrot.slane %v18199_v11, %v14358_v60 }
 0x619   : > { %v9806_v7 = vrot.slane %v9790_v35, %v14449_v6  ;;  %v9813_v19 = vrot.slane %v9791_v15, %v14449_v6  ;;  %v2724_v58 = vmax.f32 %v2644_v45, 0.0  ;;  %v4929_v35 = vrot.slane %v18199_v11, %v14377_v22 }
 0x61a   : > { %10511 = vperm.xlu1 %11989, %v7926_v8   ;;  %v9820_v46 = vrot.slane %v9792_v41, %v14449_v6  ;;  %v10824_v8 = vrot.slane %v18198_v36, %v18197_v3  ;;  %v4933_v15 = vrot.slane %v18199_v11, %v14400_v40  ;;  %v4937_v41 = vrot.slane %v18199_v11, %v14403_v48 }
 0x61b   : > { %10586 = vperm.xlu0 %11988, %v9151_v9   ;;  %v9821_v55 = vcombine.low %v9799_v25, %v9806_v7  ;;  %v2811_v24 = vmul.f32 %v16539_v44, %v2724_v58  ;;  %v7977_v42 = vcombine.low %v4917_v2, %v4921_v31 }
 0x61c   : > { %v16492_v57 = vpop.eup %12276  ;;  %v9822_v52 = vcombine.low %v9813_v19, %v9820_v46  ;;  %v7986_v46 = vrot.slane %v7976_v47, %v14449_v6 }
 0x61d   : > { %v3693_v43 = vmul.f32 %v16492_v57, %v18194_v18  ;;  %v9829_v29 = vrot.slane %v9821_v55, %v14449_v6  ;;  %v7979_v18 = vcombine.low %v4933_v15, %v4937_v41  ;;  %v3042_v19 = vsel %vm2816_vm0, %v2811_v24, 0.0 }
 0x61e   : > { %v9836_v53 = vrot.slane %v9822_v52, %v14449_v6  ;;  %v18200_v52 = vld [vmem:[#allocation64_spill] sm:$0xff] }
 0x61f   : > { %v3780_v54 = vadd.f32 %v16480_v23, %v3693_v43  ;;  %10592 = vperm.xlu0 %11988, %v9249_v27   ;;  %v8007_v12 = vrot.slane %v7979_v18, %v14449_v6  ;;  %v6213_v33 = vrot.slane %v18200_v52, %v14400_v40  ;;  %v6217_v45 = vrot.slane %v18200_v52, %v14403_v48 }
 0x620   : > { %v9837_v28 = vcombine.low %v9829_v29, %v9836_v53  ;;  %v6193_v29 = vrot.slane %v18200_v52, %v14352_v0  ;;  %v6197_v53 = vrot.slane %v18200_v52, %v14355_v13 }
 0x621   : > { %3860 = vst [vmem:[%s14387_s19 + $0x250] sm:$0xff] %v3780_v54  ;;  %v7993_v54 = vrot.slane %v7977_v42, %v14449_v6  ;;  %v9939_v51 = vcombine.low %v6213_v33, %v6217_v45 }
 0x623   : > { %10598 = vperm.xlu0 %11988, %v9347_v20   ;;  %v8008_v63 = vcombine.low %v7986_v46, %v7993_v54 }
 0x627   : > { %10622 = vperm.xlu0 %11988, %v9739_v4   ;;  %v6189_v4 = vrot.slane %v18200_v52, %v14347_v50 }
 0x62b   : > { %10628 = vperm.xlu0 %11988, %v9837_v28   ;;  %v6201_v28 = vrot.slane %v18200_v52, %v14358_v60 }
 0x62c   : > { %v3026_v38 = vpop.xlane.xlu1 %3025 }
 0x62d   : > { %v3128_v26 = vadd.f32 %v18184_v17, %v3026_v38  ;;  %v9937_v58 = vcombine.low %v6197_v53, %v6201_v28 }
 0x62f   : > { %v11374_v14 = vmul.f32 -1.442695, %v3128_v26  ;;  %v6205_v26 = vrot.slane %v18200_v52, %v14374_v37 }
 0x630   : > { %v10500_v59 = vpop.permute.xlu1 %10499 }
 0x631   : > { %12278 = vpow2.f32 %v11374_v14  ;;  %v10819_v5 = vrot.slane %v10500_v59, %v18196_v1  ;;  %v6209_v14 = vrot.slane %v18200_v52, %v14377_v22 }
 0x633   : > { %v10820_v30 = vsel %vm10726_vm8, %v10819_v5, %v16390_v49  ;;  %v4925_v49 = vrot.slane %v18199_v11, %v14374_v37  ;;  %v8016_v5 = vrot.slane %v8008_v63, %v14449_v6  ;;  %v9938_v11 = vcombine.low %v6205_v26, %v6209_v14 }
 0x634   : > { %v16522_v21 = vsel %vm10733_vm9, %v10824_v8, %v10820_v30  ;;  %v9936_v30 = vcombine.low %v6189_v4, %v6193_v29 }
 0x635   : > { %v3047_v56 = vpop.xlane.xlu0 %3046  ;;  %v7978_v25 = vcombine.low %v4925_v49, %v4929_v35  ;;  %v9960_v54 = vrot.slane %v9938_v11, %v14449_v6 }
 0x636   : > { %v3135_v9 = vadd.f32 %v18184_v17, %v3047_v56  ;;  %v18201_v56 = vld [vmem:[#allocation50_spill] sm:$0xff] }
 0x637   : > { %v8000_v20 = vrot.slane %v7978_v25, %v14449_v6 }
 0x638   : > { %v11381_v27 = vmul.f32 -1.442695, %v3135_v9 }
 0x639   : > { %v8009_v55 = vcombine.low %v8000_v20, %v8007_v12  ;;  %v9967_v20 = vrot.slane %v9939_v51, %v14449_v6 }
 0x63a   : > { %12280 = vpow2.f32 %v11381_v27 }
 0x63b   : > { %v12279_v43 = vpop.eup %12278  ;;  %v8023_v36 = vrot.slane %v8009_v55, %v14449_v6  ;;  %v9969_v28 = vcombine.low %v9960_v54, %v9967_v20  ;;  %v18207_v54 = vld [vmem:[#allocation96_spill] sm:$0xff] }
 0x63c   : > { %v3448_v7 = vadd.f32 1.0, %v12279_v43  ;;  %v9946_v43 = vrot.slane %v9936_v30, %v14449_v6  ;;  %v5037_v20 = vrot.slane %v18207_v54, %v14347_v50 }
 0x63d   : > { %v8024_v24 = vcombine.low %v8016_v5, %v8023_v36  ;;  %v9983_v36 = vrot.slane %v9969_v28, %v14449_v6 }
 0x63e   : > { %12282 = vrcp.f32 %v3448_v7  ;;  %3043 = vadd.xlane.f32.xlu1 %v3042_v19  ;;  %v9953_v7 = vrot.slane %v9937_v58, %v14449_v6 }
 0x640   : > { %v9968_v53 = vcombine.low %v9946_v43, %v9953_v7 }
 0x642   : > { %v9976_v5 = vrot.slane %v9968_v53, %v14449_v6 }
 0x644   : > { %v12281_v38 = vpop.eup %12280 }
 0x645   : > { %v3455_v59 = vadd.f32 1.0, %v12281_v38  ;;  %v18203_v38 = vld [vmem:[#allocation23_spill] sm:$0xff] }
 0x647   : > { %12284 = vrcp.f32 %v3455_v59 }
 0x648   : > { %v12283_v8 = vpop.eup %12282 }
 0x649   : > { %v3688_v39 = vmul.f32 %v12283_v8, %v18201_v56  ;;  %v6157_v2 = vrot.slane %v12283_v8, %v14347_v50  ;;  %v6161_v31 = vrot.slane %v12283_v8, %v14352_v0  ;;  %v6165_v49 = vrot.slane %v12283_v8, %v14355_v13 }
 0x64a   : > { %v6169_v9 = vrot.slane %v12283_v8, %v14358_v60  ;;  %v6173_v35 = vrot.slane %v12283_v8, %v14374_v37  ;;  %v6177_v15 = vrot.slane %v12283_v8, %v14377_v22  ;;  %v6181_v41 = vrot.slane %v12283_v8, %v14400_v40 }
 0x64b   : > { %v3775_v27 = vadd.f32 %v16480_v23, %v3688_v39  ;;  %v6185_v47 = vrot.slane %v12283_v8, %v14403_v48  ;;  %v9887_v42 = vcombine.low %v6157_v2, %v6161_v31  ;;  %v18204_v8 = vld [vmem:[#allocation94_spill] sm:$0xff]  ;;  %v9984_v39 = vcombine.low %v9976_v5, %v9983_v36  ;;  %v16643_v5 = vpop.permute.xlu0 %10520 }
 0x64c   : > { %v9888_v25 = vcombine.low %v6165_v49, %v6169_v9  ;;  %v9889_v18 = vcombine.low %v6173_v35, %v6177_v15  ;;  %v4973_v30 = vrot.slane %v18204_v8, %v14347_v50  ;;  %v4977_v58 = vrot.slane %v18204_v8, %v14352_v0  ;;  %v18205_v9 = vld [vmem:[#allocation95_spill] sm:$0xff]  ;;  %18208 = vst [vmem:[#allocation66_spill] sm:$0xff] %v16643_v5  ;;  %v18209_v36 = vld [vmem:[#allocation62_spill] sm:$0xff] }
 0x64d   : > { %3855 = vst [vmem:[%s14387_s19 + $0x228] sm:$0xff] %v3775_v27  ;;  %v9890_v19 = vcombine.low %v6181_v41, %v6185_v47  ;;  %v9897_v46 = vrot.slane %v9887_v42, %v14449_v6  ;;  %v4981_v11 = vrot.slane %v18204_v8, %v14355_v13  ;;  %v4985_v51 = vrot.slane %v18204_v8, %v14358_v60  ;;  %v18206_v47 = vld [vmem:[#allocation97_spill] sm:$0xff] }
 0x64e   : > { %v9904_v12 = vrot.slane %v9888_v25, %v14449_v6  ;;  %v9911_v63 = vrot.slane %v9889_v18, %v14449_v6  ;;  %v4989_v56 = vrot.slane %v18204_v8, %v14374_v37  ;;  %v4993_v2 = vrot.slane %v18204_v8, %v14377_v22 }
 0x64f   : > { %10517 = vperm.xlu1 %11989, %v8024_v24   ;;  %v9918_v55 = vrot.slane %v9890_v19, %v14449_v6  ;;  %v4997_v31 = vrot.slane %v18204_v8, %v14400_v40  ;;  %v5001_v49 = vrot.slane %v18204_v8, %v14403_v48  ;;  %v2646_v35 = vadd.f32 %v16508_v62, %v18205_v9 }
 0x650   : > { %v9919_v52 = vcombine.low %v9897_v46, %v9904_v12  ;;  %v8074_v15 = vcombine.low %v4973_v30, %v4977_v58  ;;  %v8075_v41 = vcombine.low %v4981_v11, %v4985_v51  ;;  %v8076_v27 = vcombine.low %v4989_v56, %v4993_v2  ;;  %v18210_v11 = vld [vmem:[#allocation37_spill] sm:$0xff]  ;;  %v18211_v56 = vld [vmem:[#allocation27_spill] sm:$0xff] }
 0x651   : > { %v16584_v4 = vpop.eup %12284  ;;  %v9920_v29 = vcombine.low %v9911_v63, %v9918_v55  ;;  %v8077_v24 = vcombine.low %v4997_v31, %v5001_v49  ;;  %v16614_v42 = vadd.f32 %v16508_v62, %v18206_v47  ;;  %v2726_v25 = vmax.f32 %v2646_v35, 0.0 }
 0x652   : > { %18202 = vst [vmem:[#allocation90_spill] sm:$0xff] %v16584_v4  ;;  %v3695_v26 = vmul.f32 %v16584_v4, %v18203_v38  ;;  %v9927_v14 = vrot.slane %v9919_v52, %v14449_v6  ;;  %v8084_v18 = vrot.slane %v8074_v15, %v14449_v6  ;;  %v8091_v43 = vrot.slane %v8075_v41, %v14449_v6 }
 0x653   : > { %v9934_v33 = vrot.slane %v9920_v29, %v14449_v6  ;;  %v8098_v19 = vrot.slane %v8076_v27, %v14449_v6  ;;  %v8105_v46 = vrot.slane %v8077_v24, %v14449_v6  ;;  %v5041_v63 = vrot.slane %v18207_v54, %v14352_v0 }
 0x654   : > { %v3782_v45 = vadd.f32 %v16480_v23, %v3695_v26  ;;  %v5045_v62 = vrot.slane %v18207_v54, %v14355_v13  ;;  %v5049_v55 = vrot.slane %v18207_v54, %v14358_v60  ;;  %v2813_v53 = vmul.f32 %v16539_v44, %v2726_v25 }
 0x655   : > { %v9935_v59 = vcombine.low %v9927_v14, %v9934_v33  ;;  %v16631_v28 = vcombine.low %v8084_v18, %v8091_v43  ;;  %v5053_v38 = vrot.slane %v18207_v54, %v14374_v37  ;;  %v16635_v14 = vcombine.low %v8098_v19, %v8105_v46 }
 0x656   : > { %3862 = vst [vmem:[%s14387_s19 + $0x260] sm:$0xff] %v3782_v45  ;;  %v5057_v33 = vrot.slane %v18207_v54, %v14377_v22  ;;  %v5061_v45 = vrot.slane %v18207_v54, %v14400_v40  ;;  %v8172_v30 = vcombine.low %v5037_v20, %v5041_v63  ;;  %v8173_v58 = vcombine.low %v5045_v62, %v5049_v55 }
 0x657   : > { %10634 = vperm.xlu0 %11988, %v9935_v59   ;;  %v5065_v59 = vrot.slane %v18207_v54, %v14403_v48  ;;  %v10834_v51 = vrot.slane %v16365_v32, %v18210_v11  ;;  %v5105_v2 = vrot.slane %v18211_v56, %v14352_v0  ;;  %v5109_v31 = vrot.slane %v18211_v56, %v14355_v13 }
 0x658   : > { %v5113_v9 = vrot.slane %v18211_v56, %v14358_v60  ;;  %v5117_v35 = vrot.slane %v18211_v56, %v14374_v37  ;;  %v5121_v32 = vrot.slane %v18211_v56, %v14377_v22  ;;  %v5125_v41 = vrot.slane %v18211_v56, %v14400_v40 }
 0x659   : > { %v5129_v27 = vrot.slane %v18211_v56, %v14403_v48  ;;  %v8175_v63 = vcombine.low %v5061_v45, %v5065_v59  ;;  %v8182_v62 = vrot.slane %v8172_v30, %v14449_v6  ;;  %v8189_v55 = vrot.slane %v8173_v58, %v14449_v6 }
 0x65a   : > { %v8114_v11 = vrot.slane %v16631_v28, %v14449_v6  ;;  %v8121_v45 = vrot.slane %v16635_v14, %v14449_v6  ;;  %v18213_v14 = vld [vmem:[#allocation29_spill] sm:$0xff] }
 0x65b   : > { %10637 = vperm.xlu0 %11988, %v9984_v39   ;;  %v5101_v39 = vrot.slane %v18211_v56, %v14347_v50  ;;  %v3048_v56 = vsel %vm2816_vm0, %v2813_v53, 0.0  ;;  %v8203_v30 = vrot.slane %v8175_v63, %v14449_v6  ;;  %v16695_v58 = vcombine.low %v8182_v62, %v8189_v55 }
 0x661   : > { %v3032_v7 = vpop.xlane.xlu1 %3031 }
 0x662   : > { %v3130_v12 = vadd.f32 %v18184_v17, %v3032_v7 }
 0x664   : > { %v11376_v29 = vmul.f32 -1.442695, %v3130_v12  ;;  %v8174_v12 = vcombine.low %v5053_v38, %v5057_v33 }
 0x665   : > { %v10506_v26 = vpop.permute.xlu1 %10505 }
 0x666   : > { %12286 = vpow2.f32 %v11376_v29  ;;  %v10829_v8 = vrot.slane %v10506_v26, %v18209_v36  ;;  %v8270_v26 = vcombine.low %v5101_v39, %v5105_v2  ;;  %v8196_v59 = vrot.slane %v8174_v12, %v14449_v6 }
 0x668   : > { %v10830_v49 = vsel %vm10740_vm10, %v10829_v8, %v16522_v21  ;;  %v18212_v21 = vld [vmem:[#allocation28_spill] sm:$0xff]  ;;  %v8271_v8 = vcombine.low %v5109_v31, %v5113_v9  ;;  %v8280_v39 = vrot.slane %v8270_v26, %v14449_v6  ;;  %v6257_v26 = vrot.slane %v16250_v10, %v14352_v0 }
 0x669   : > { %v16663_v15 = vsel %vm10747_vm11, %v10834_v51, %v10830_v49  ;;  %v5165_v24 = vrot.slane %v18212_v21, %v14347_v50  ;;  %v5169_v25 = vrot.slane %v18212_v21, %v14352_v0  ;;  %v5173_v18 = vrot.slane %v18212_v21, %v14355_v13 }
 0x66a   : > { %v3053_v47 = vpop.xlane.xlu0 %3052  ;;  %v5177_v43 = vrot.slane %v18212_v21, %v14358_v60  ;;  %v5181_v7 = vrot.slane %v18212_v21, %v14374_v37  ;;  %v5185_v46 = vrot.slane %v18212_v21, %v14377_v22  ;;  %v5189_v54 = vrot.slane %v18212_v21, %v14400_v40 }
 0x66b   : > { %v3137_v19 = vadd.f32 %v18184_v17, %v3053_v47  ;;  %v5193_v20 = vrot.slane %v18212_v21, %v14403_v48  ;;  %v8272_v51 = vcombine.low %v5117_v35, %v5121_v32  ;;  %v8273_v49 = vcombine.low %v5125_v41, %v5129_v27 }
 0x66c   : > { %v8368_v47 = vcombine.low %v5165_v24, %v5169_v25  ;;  %v8369_v52 = vcombine.low %v5173_v18, %v5177_v43  ;;  %v8370_v21 = vcombine.low %v5181_v7, %v5185_v46  ;;  %v8287_v2 = vrot.slane %v8271_v8, %v14449_v6 }
 0x66d   : > { %v11383_v29 = vmul.f32 -1.442695, %v3137_v19  ;;  %v8371_v38 = vcombine.low %v5189_v54, %v5193_v20  ;;  %v8294_v31 = vrot.slane %v8272_v51, %v14449_v6  ;;  %v8301_v28 = vrot.slane %v8273_v49, %v14449_v6 }
 0x66e   : > { %v8378_v9 = vrot.slane %v8368_v47, %v14449_v6  ;;  %v8385_v35 = vrot.slane %v8369_v52, %v14449_v6  ;;  %v5229_v32 = vrot.slane %v18213_v14, %v14347_v50  ;;  %v8392_v41 = vrot.slane %v8370_v21, %v14449_v6 }
 0x66f   : > { %12288 = vpow2.f32 %v11383_v29  ;;  %v8399_v27 = vrot.slane %v8371_v38, %v14449_v6  ;;  %v5233_v24 = vrot.slane %v18213_v14, %v14352_v0  ;;  %v16709_v25 = vcombine.low %v8114_v11, %v8121_v45 }
 0x670   : > { %v12287_v33 = vpop.eup %12286  ;;  %v18214_v18 = vmax.f32 %v16614_v42, 0.0  ;;  %v16716_v52 = vcombine.low %v8196_v59, %v8203_v30  ;;  %v16720_v19 = vcombine.low %v8280_v39, %v8287_v2  ;;  %v5237_v46 = vrot.slane %v18213_v14, %v14355_v13 }
 0x671   : > { %v3450_v53 = vadd.f32 1.0, %v12287_v33  ;;  %v5241_v54 = vrot.slane %v18213_v14, %v14358_v60  ;;  %v5245_v11 = vrot.slane %v18213_v14, %v14374_v37  ;;  %v5253_v42 = vrot.slane %v18213_v14, %v14400_v40 }
 0x672   : > { %v16714_v43 = vmul.f32 %v16539_v44, %v18214_v18  ;;  %v5249_v44 = vrot.slane %v18213_v14, %v14377_v22  ;;  %v5257_v20 = vrot.slane %v18213_v14, %v14403_v48  ;;  %v16734_v12 = vcombine.low %v8294_v31, %v8301_v28  ;;  %v18216_v18 = vld [vmem:[#allocation18_spill] sm:$0xff] }
 0x673   : > { %12290 = vrcp.f32 %v3450_v53  ;;  %3049 = vadd.xlane.f32.xlu1 %v3048_v56  ;;  %v16736_v63 = vcombine.low %v8378_v9, %v8385_v35  ;;  %v16738_v62 = vcombine.low %v8392_v41, %v8399_v27  ;;  %v16740_v55 = vcombine.low %v5229_v32, %v5233_v24  ;;  %v18215_v53 = vld [vmem:[#allocation31_spill] sm:$0xff] }
 0x674   : > { %v6253_v29 = vrot.slane %v16250_v10, %v14347_v50  ;;  %v6261_v8 = vrot.slane %v16250_v10, %v14355_v13  ;;  %v6265_v51 = vrot.slane %v16250_v10, %v14358_v60  ;;  %v6269_v49 = vrot.slane %v16250_v10, %v14374_v37 }
 0x675   : > { %v6273_v47 = vrot.slane %v16250_v10, %v14377_v22  ;;  %v6277_v21 = vrot.slane %v16250_v10, %v14400_v40  ;;  %v6281_v38 = vrot.slane %v16250_v10, %v14403_v48  ;;  %v16758_v45 = vcombine.low %v5237_v46, %v5241_v54 }
 0x676   : > { %v16760_v59 = vcombine.low %v5245_v11, %v5249_v44  ;;  %v16762_v30 = vcombine.low %v5253_v42, %v5257_v20  ;;  %v5293_v39 = vrot.slane %v18215_v53, %v14347_v50  ;;  %v5297_v2 = vrot.slane %v18215_v53, %v14352_v0 }
 0x677   : > { %v5301_v31 = vrot.slane %v18215_v53, %v14355_v13  ;;  %v5305_v28 = vrot.slane %v18215_v53, %v14358_v60  ;;  %v5309_v10 = vrot.slane %v18215_v53, %v14374_v37  ;;  %v5313_v9 = vrot.slane %v18215_v53, %v14377_v22 }
 0x678   : > { %v5317_v35 = vrot.slane %v18215_v53, %v14400_v40  ;;  %v10034_v32 = vcombine.low %v6253_v29, %v6257_v26  ;;  %v10035_v41 = vcombine.low %v6261_v8, %v6265_v51  ;;  %v10036_v27 = vcombine.low %v6269_v49, %v6273_v47 }
 0x679   : > { %v12289_v56 = vpop.eup %12288  ;;  %v10037_v24 = vcombine.low %v6277_v21, %v6281_v38  ;;  %v5321_v29 = vrot.slane %v18215_v53, %v14403_v48 }
 0x67a   : > { %v3457_v33 = vadd.f32 1.0, %v12289_v56  ;;  %v10044_v38 = vrot.slane %v10034_v32, %v14449_v6  ;;  %v10058_v36 = vrot.slane %v10036_v27, %v14449_v6  ;;  %v8483_v27 = vrot.slane %v16758_v45, %v14449_v6 }
 0x67b   : > { %v10065_v53 = vrot.slane %v10037_v24, %v14449_v6  ;;  %v8490_v24 = vrot.slane %v16760_v59, %v14449_v6 }
 0x67c   : > { %12292 = vrcp.f32 %v3457_v33  ;;  %v10051_v33 = vrot.slane %v10035_v41, %v14449_v6  ;;  %v8476_v41 = vrot.slane %v16740_v55, %v14449_v6 }
 0x67d   : > { %v12291_v14 = vpop.eup %12290 }
 0x67e   : > { %v3690_v46 = vmul.f32 %v12291_v14, %v18216_v18  ;;  %v6221_v54 = vrot.slane %v12291_v14, %v14347_v50  ;;  %v6225_v11 = vrot.slane %v12291_v14, %v14352_v0  ;;  %v6229_v44 = vrot.slane %v12291_v14, %v14355_v13 }
 0x67f   : > { %v6233_v42 = vrot.slane %v12291_v14, %v14358_v60  ;;  %v6237_v20 = vrot.slane %v12291_v14, %v14374_v37  ;;  %v6241_v56 = vrot.slane %v12291_v14, %v14377_v22  ;;  %v6245_v8 = vrot.slane %v12291_v14, %v14400_v40 }
 0x680   : > { %v3777_v26 = vadd.f32 %v16480_v23, %v3690_v46  ;;  %v6249_v51 = vrot.slane %v12291_v14, %v14403_v48  ;;  %v9985_v49 = vcombine.low %v6221_v54, %v6225_v11  ;;  %v8564_v14 = vcombine.low %v5293_v39, %v5297_v2 }
 0x681   : > { %v9986_v47 = vcombine.low %v6229_v44, %v6233_v42  ;;  %v9987_v21 = vcombine.low %v6237_v20, %v6241_v56  ;;  %v8565_v54 = vcombine.low %v5301_v31, %v5305_v28  ;;  %v8566_v11 = vcombine.low %v5309_v10, %v5313_v9  ;;  %v18218_v20 = vld [vmem:[#allocation32_spill] sm:$0xff]  ;;  %v18219_v10 = vld [vmem:[#allocation25_spill] sm:$0xff] }
 0x682   : > { %3857 = vst [vmem:[%s14387_s19 + $0x238] sm:$0xff] %v3777_v26  ;;  %v9988_v18 = vcombine.low %v6245_v8, %v6249_v51  ;;  %v9995_v7 = vrot.slane %v9985_v49, %v14449_v6  ;;  %v8567_v44 = vcombine.low %v5317_v35, %v5321_v29  ;;  %v8497_v39 = vrot.slane %v16762_v30, %v14449_v6 }
 0x683   : > { %v10002_v46 = vrot.slane %v9986_v47, %v14449_v6  ;;  %v10009_v3 = vrot.slane %v9987_v21, %v14449_v6  ;;  %v10066_v31 = vcombine.low %v10044_v38, %v10051_v33  ;;  %v10067_v28 = vcombine.low %v10058_v36, %v10065_v53 }
 0x684   : > { %10523 = vperm.xlu1 %11989, %v16709_v25   ;;  %v10016_v32 = vrot.slane %v9988_v18, %v14449_v6  ;;  %v5357_v55 = vrot.slane %v18218_v20, %v14347_v50  ;;  %v8574_v9 = vrot.slane %v8564_v14, %v14449_v6  ;;  %v8581_v59 = vrot.slane %v8565_v54, %v14449_v6 }
 0x685   : > { %v10017_v42 = vcombine.low %v9995_v7, %v10002_v46  ;;  %v8588_v35 = vrot.slane %v8566_v11, %v14449_v6  ;;  %v5361_v36 = vrot.slane %v18218_v20, %v14352_v0  ;;  %v5365_v29 = vrot.slane %v18218_v20, %v14355_v13 }
 0x686   : > { %v16808_v2 = vpop.eup %12292  ;;  %v10018_v25 = vcombine.low %v10009_v3, %v10016_v32  ;;  %v8595_v3 = vrot.slane %v8567_v44, %v14449_v6  ;;  %v5369_v26 = vrot.slane %v18218_v20, %v14358_v60  ;;  %v5373_v8 = vrot.slane %v18218_v20, %v14374_v37 }
 0x687   : > { %18217 = vst [vmem:[#allocation49_spill] sm:$0xff] %v16808_v2  ;;  %v3697_v7 = vmul.f32 %v16808_v2, %v18219_v10  ;;  %v10025_v45 = vrot.slane %v10017_v42, %v14449_v6  ;;  %v10074_v49 = vrot.slane %v10066_v31, %v14449_v6  ;;  %v10081_v47 = vrot.slane %v10067_v28, %v14449_v6  ;;  %v18227_v2 = vld [vmem:[#allocation65_spill] sm:$0xff] }
 0x688   : > { %v10032_v30 = vrot.slane %v10018_v25, %v14449_v6  ;;  %v5377_v21 = vrot.slane %v18218_v20, %v14377_v22  ;;  %v8219_v38 = vrot.slane %v16716_v52, %v14449_v6  ;;  %v8310_v33 = vrot.slane %v16720_v19, %v14449_v6 }
 0x689   : > { %v3784_v56 = vadd.f32 %v16480_v23, %v3697_v7  ;;  %v5381_v18 = vrot.slane %v18218_v20, %v14400_v40  ;;  %v5385_v53 = vrot.slane %v18218_v20, %v14403_v48  ;;  %v8317_v46 = vrot.slane %v16734_v12, %v14449_v6 }
 0x68a   : > { %v10033_v51 = vcombine.low %v10025_v45, %v10032_v30  ;;  %v8408_v14 = vrot.slane %v16736_v63, %v14449_v6  ;;  %v8415_v54 = vrot.slane %v16738_v62, %v14449_v6  ;;  %v16848_v52 = vcombine.low %v8476_v41, %v8483_v27 }
 0x68b   : > { %3864 = vst [vmem:[%s14387_s19 + $0x270] sm:$0xff] %v3784_v56  ;;  %v16850_v32 = vcombine.low %v8490_v24, %v8497_v39  ;;  %v16852_v19 = vcombine.low %v8574_v9, %v8581_v59  ;;  %v16854_v11 = vcombine.low %v8588_v35, %v8595_v3  ;;  %v10082_v44 = vcombine.low %v10074_v49, %v10081_v47 }
 0x68c   : > { %10640 = vperm.xlu0 %11988, %v10033_v51   ;;  %v8662_v42 = vcombine.low %v5357_v55, %v5361_v36  ;;  %v8663_v25 = vcombine.low %v5365_v29, %v5369_v26  ;;  %v8664_v31 = vcombine.low %v5373_v8, %v5377_v21  ;;  %v16858_v12 = vsel %vm2816_vm0, %v16714_v43, 0.0  ;;  %v18225_v26 = vld [vmem:[#allocation48_spill] sm:$0xff] }
 0x68d   : > { %v8665_v63 = vcombine.low %v5381_v18, %v5385_v53  ;;  %v18220_v62 = vrot.slane %v16695_v58, %v14449_v6  ;;  %v16865_v27 = vcombine.low %v8310_v33, %v8317_v46  ;;  %v16867_v24 = vcombine.low %v8408_v14, %v8415_v54  ;;  %v18224_v58 = vld [vmem:[#allocation33_spill] sm:$0xff]  ;;  %v18226_v46 = vld [vmem:[#allocation34_spill] sm:$0xff] }
 0x68e   : > { %v5421_v55 = vrot.slane %v18224_v58, %v14347_v50  ;;  %v8672_v10 = vrot.slane %v8662_v42, %v14449_v6  ;;  %v8679_v7 = vrot.slane %v8663_v25, %v14449_v6  ;;  %v8686_v45 = vrot.slane %v8664_v31, %v14449_v6 }
 0x68f   : > { %v16863_v41 = vcombine.low %v18220_v62, %v8219_v38  ;;  %18222 = vst [vmem:[#allocation80_spill] sm:$0xff] %v16865_v27  ;;  %18223 = vst [vmem:[#allocation93_spill] sm:$0xff] %v16867_v24  ;;  %v5425_v9 = vrot.slane %v18224_v58, %v14352_v0  ;;  %v8693_v59 = vrot.slane %v8665_v63, %v14449_v6  ;;  %v18228_v24 = vld [vmem:[#allocation68_spill] sm:$0xff] }
 0x690   : > { %10643 = vperm.xlu0 %11988, %v10082_v44   ;;  %v5429_v30 = vrot.slane %v18224_v58, %v14355_v13  ;;  %v5433_v35 = vrot.slane %v18224_v58, %v14358_v60  ;;  %v5437_v3 = vrot.slane %v18224_v58, %v14374_v37  ;;  %v5441_v36 = vrot.slane %v18224_v58, %v14377_v22 }
 0x691   : > { %18221 = vst [vmem:[#allocation81_spill] sm:$0xff] %v16863_v41  ;;  %v5445_v56 = vrot.slane %v18224_v58, %v14400_v40  ;;  %v5449_v29 = vrot.slane %v18224_v58, %v14403_v48  ;;  %v5485_v8 = vrot.slane %v18225_v26, %v14347_v50  ;;  %v5489_v51 = vrot.slane %v18225_v26, %v14352_v0 }
 0x692   : > { %v5493_v49 = vrot.slane %v18225_v26, %v14355_v13  ;;  %v5497_v47 = vrot.slane %v18225_v26, %v14358_v60  ;;  %v5501_v21 = vrot.slane %v18225_v26, %v14374_v37  ;;  %v5505_v33 = vrot.slane %v18225_v26, %v14377_v22 }
 0x693   : > { %v5509_v18 = vrot.slane %v18225_v26, %v14400_v40  ;;  %v5513_v53 = vrot.slane %v18225_v26, %v14403_v48  ;;  %v5549_v14 = vrot.slane %v18226_v46, %v14347_v50  ;;  %v5553_v44 = vrot.slane %v18226_v46, %v14352_v0 }
 0x694   : > { %v5557_v42 = vrot.slane %v18226_v46, %v14355_v13  ;;  %v5561_v25 = vrot.slane %v18226_v46, %v14358_v60  ;;  %v5565_v31 = vrot.slane %v18226_v46, %v14374_v37  ;;  %v5569_v63 = vrot.slane %v18226_v46, %v14377_v22 }
 0x695   : > { %v5573_v62 = vrot.slane %v18226_v46, %v14400_v40  ;;  %v5577_v58 = vrot.slane %v18226_v46, %v14403_v48  ;;  %v8761_v43 = vcombine.low %v5429_v30, %v5433_v35  ;;  %v8762_v20 = vcombine.low %v5437_v3, %v5441_v36 }
 0x696   : > { %v3038_v38 = vpop.xlane.xlu1 %3037  ;;  %v8763_v28 = vcombine.low %v5445_v56, %v5449_v29  ;;  %v8858_v1 = vcombine.low %v5485_v8, %v5489_v51  ;;  %v8859_v34 = vcombine.low %v5493_v49, %v5497_v47  ;;  %v8860_v61 = vcombine.low %v5501_v21, %v5505_v33 }
 0x697   : > { %v3132_v54 = vadd.f32 %v18184_v17, %v3038_v38  ;;  %v8760_v38 = vcombine.low %v5421_v55, %v5425_v9  ;;  %v8861_v5 = vcombine.low %v5509_v18, %v5513_v53  ;;  %v8956_v17 = vcombine.low %v5549_v14, %v5553_v44 }
 0x698   : > { %v10844_v27 = vrot.slane %v16512_v16, %v18228_v24  ;;  %v8957_v41 = vcombine.low %v5557_v42, %v5561_v25  ;;  %v8958_v23 = vcombine.low %v5565_v31, %v5569_v63  ;;  %v8959_v46 = vcombine.low %v5573_v62, %v5577_v58 }
 0x699   : > { %v11378_v26 = vmul.f32 -1.442695, %v3132_v54  ;;  %v8694_v9 = vcombine.low %v8672_v10, %v8679_v7  ;;  %v8695_v30 = vcombine.low %v8686_v45, %v8693_v59  ;;  %v8770_v35 = vrot.slane %v8760_v38, %v14449_v6 }
 0x69a   : > { %v10512_v39 = vpop.permute.xlu1 %10511  ;;  %v8784_v36 = vrot.slane %v8762_v20, %v14449_v6  ;;  %v8791_v56 = vrot.slane %v8763_v28, %v14449_v6  ;;  %v8868_v16 = vrot.slane %v8858_v1, %v14449_v6  ;;  %v8875_v29 = vrot.slane %v8859_v34, %v14449_v6  ;;  %v18229_v20 = vld [vmem:[#allocation35_spill] sm:$0xff] }
 0x69b   : > { %12294 = vpow2.f32 %v11378_v26  ;;  %v10839_v4 = vrot.slane %v10512_v39, %v18227_v2  ;;  %v8777_v39 = vrot.slane %v8761_v43, %v14449_v6  ;;  %v8882_v8 = vrot.slane %v8860_v61, %v14449_v6  ;;  %v18234_v26 = vld [vmem:[#allocation46_spill] sm:$0xff] }
 0x69c   : > { %v8973_v10 = vrot.slane %v8957_v41, %v14449_v6  ;;  %v8987_v43 = vrot.slane %v8959_v46, %v14449_v6  ;;  %v5613_v7 = vrot.slane %v18229_v20, %v14347_v50  ;;  %v5617_v1 = vrot.slane %v18229_v20, %v14352_v0 }
 0x69d   : > { %v10840_v55 = vsel %vm10754_vm12, %v10839_v4, %v16663_v15  ;;  %v8889_v4 = vrot.slane %v8861_v5, %v14449_v6  ;;  %v8966_v15 = vrot.slane %v8956_v17, %v14449_v6  ;;  %v5621_v34 = vrot.slane %v18229_v20, %v14355_v13 }
 0x69e   : > { %v16937_v3 = vsel %vm10761_vm13, %v10844_v27, %v10840_v55  ;;  %v8980_v27 = vrot.slane %v8958_v23, %v14449_v6  ;;  %v5625_v61 = vrot.slane %v18229_v20, %v14358_v60  ;;  %v8702_v17 = vrot.slane %v8694_v9, %v14449_v6 }
 0x69f   : > { %v8709_v5 = vrot.slane %v8695_v30, %v14449_v6  ;;  %v16960_v41 = vcombine.low %v8770_v35, %v8777_v39  ;;  %v16962_v23 = vcombine.low %v8784_v36, %v8791_v56  ;;  %v18230_v28 = vrot.slane %v16850_v32, %v14449_v6 }
 0x6a0   : > { %v18231_v45 = vrot.slane %v16848_v52, %v14449_v6  ;;  %v18232_v51 = vrot.slane %v16854_v11, %v14449_v6  ;;  %v18233_v49 = vrot.slane %v16852_v19, %v14449_v6  ;;  %v16980_v21 = vcombine.low %v8868_v16, %v8875_v29 }
 0x6a1   : > { %v16982_v33 = vcombine.low %v8882_v8, %v8889_v4  ;;  %v16984_v18 = vcombine.low %v8966_v15, %v8973_v10  ;;  %v16986_v32 = vcombine.low %v8980_v27, %v8987_v43  ;;  %v5629_v52 = vrot.slane %v18229_v20, %v14374_v37  ;;  %v18235_v10 = vld [vmem:[#allocation38_spill] sm:$0xff] }
 0x6a2   : > { %v16970_v59 = vcombine.low %v18231_v45, %v18230_v28  ;;  %v16978_v47 = vcombine.low %v18233_v49, %v18232_v51  ;;  %v5633_v53 = vrot.slane %v18229_v20, %v14377_v22  ;;  %v5637_v19 = vrot.slane %v18229_v20, %v14400_v40 }
 0x6a3   : > { %v5641_v14 = vrot.slane %v18229_v20, %v14403_v48  ;;  %v9054_v54 = vcombine.low %v5613_v7, %v5617_v1  ;;  %v9055_v44 = vcombine.low %v5621_v34, %v5625_v61  ;;  %v16996_v25 = vcombine.low %v8702_v17, %v8709_v5 }
 0x6a4   : > { %v8800_v31 = vrot.slane %v16960_v41, %v14449_v6  ;;  %v8807_v63 = vrot.slane %v16962_v23, %v14449_v6  ;;  %v5677_v38 = vrot.slane %v18234_v26, %v14347_v50  ;;  %v5681_v46 = vrot.slane %v18234_v26, %v14352_v0  ;;  %v18248_v23 = vld [vmem:[#allocation30_spill] sm:$0xff] }
 0x6a5   : > { %v12295_v11 = vpop.eup %12294  ;;  %v17015_v30 = vcombine.low %v5629_v52, %v5633_v53  ;;  %v17017_v35 = vcombine.low %v5637_v19, %v5641_v14  ;;  %v9064_v39 = vrot.slane %v9054_v54, %v14449_v6  ;;  %v9071_v36 = vrot.slane %v9055_v44, %v14449_v6 }
 0x6a6   : > { %v3452_v42 = vadd.f32 1.0, %v12295_v11  ;;  %v5685_v56 = vrot.slane %v18234_v26, %v14355_v13  ;;  %v5693_v16 = vrot.slane %v18234_v26, %v14374_v37  ;;  %v5697_v29 = vrot.slane %v18234_v26, %v14377_v22 }
 0x6a7   : > { %v5701_v8 = vrot.slane %v18234_v26, %v14400_v40  ;;  %v5705_v4 = vrot.slane %v18234_v26, %v14403_v48  ;;  %v17033_v15 = vcombine.low %v5677_v38, %v5681_v46  ;;  %v5741_v27 = vrot.slane %v18235_v10, %v14347_v50 }
 0x6a8   : > { %12296 = vrcp.f32 %v3452_v42  ;;  %3055 = vadd.xlane.f32.xlu1 %v16858_v12  ;;  %v5689_v12 = vrot.slane %v18234_v26, %v14358_v60  ;;  %v5745_v43 = vrot.slane %v18235_v10, %v14352_v0  ;;  %v5749_v20 = vrot.slane %v18235_v10, %v14355_v13 }
 0x6a9   : > { %v5753_v7 = vrot.slane %v18235_v10, %v14358_v60  ;;  %v5757_v1 = vrot.slane %v18235_v10, %v14374_v37  ;;  %v5761_v34 = vrot.slane %v18235_v10, %v14377_v22  ;;  %v6317_v61 = vrot.slane %v16492_v57, %v14347_v50 }
 0x6aa   : > { %v6321_v17 = vrot.slane %v16492_v57, %v14352_v0  ;;  %v6325_v5 = vrot.slane %v16492_v57, %v14355_v13  ;;  %v6329_v28 = vrot.slane %v16492_v57, %v14358_v60  ;;  %v6333_v45 = vrot.slane %v16492_v57, %v14374_v37 }
 0x6ab   : > { %v6337_v51 = vrot.slane %v16492_v57, %v14377_v22  ;;  %v6341_v49 = vrot.slane %v16492_v57, %v14400_v40  ;;  %v6345_v52 = vrot.slane %v16492_v57, %v14403_v48  ;;  %v9078_v53 = vrot.slane %v17015_v30, %v14449_v6 }
 0x6ac   : > { %v9085_v11 = vrot.slane %v17017_v35, %v14449_v6  ;;  %v17067_v19 = vcombine.low %v9064_v39, %v9071_v36  ;;  %v17069_v14 = vcombine.low %v5685_v56, %v5689_v12  ;;  %v17071_v54 = vcombine.low %v5693_v16, %v5697_v29 }
 0x6ad   : > { %v17073_v44 = vcombine.low %v5701_v8, %v5705_v4  ;;  %v9162_v42 = vrot.slane %v17033_v15, %v14449_v6  ;;  %v5765_v57 = vrot.slane %v18235_v10, %v14400_v40  ;;  %v5769_v26 = vrot.slane %v18235_v10, %v14403_v48  ;;  %v18236_v8 = vld [vmem:[#allocation20_spill] sm:$0xff] }
 0x6ae   : > { %v17081_v38 = vcombine.low %v5741_v27, %v5745_v43  ;;  %v17083_v46 = vcombine.low %v5749_v20, %v5753_v7  ;;  %v17085_v39 = vcombine.low %v5757_v1, %v5761_v34  ;;  %v10132_v56 = vcombine.low %v6317_v61, %v6321_v17  ;;  %v18237_v1 = vld [vmem:[#allocation77_spill] sm:$0xff] }
 0x6af   : > { %v10133_v12 = vcombine.low %v6325_v5, %v6329_v28  ;;  %v10134_v16 = vcombine.low %v6333_v45, %v6337_v51  ;;  %v10135_v29 = vcombine.low %v6341_v49, %v6345_v52  ;;  %v9253_v5 = vcombine.low %v5765_v57, %v5769_v26  ;;  %v18239_v26 = vld [vmem:[#allocation81_spill] sm:$0xff] }
 0x6b0   : > { %v10142_v51 = vrot.slane %v10132_v56, %v14449_v6 }
 0x6b1   : > { %v10149_v49 = vrot.slane %v10133_v12, %v14449_v6  ;;  %v10156_v62 = vrot.slane %v10134_v16, %v14449_v6  ;;  %v10163_v58 = vrot.slane %v10135_v29, %v14449_v6 }
 0x6b2   : > { %v12297_v36 = vpop.eup %12296 }
 0x6b3   : > { %v3692_v4 = vmul.f32 %v12297_v36, %v18236_v8  ;;  %v6285_v55 = vrot.slane %v12297_v36, %v14347_v50  ;;  %v6289_v9 = vrot.slane %v12297_v36, %v14352_v0  ;;  %v6293_v10 = vrot.slane %v12297_v36, %v14355_v13 }
 0x6b4   : > { %v6297_v27 = vrot.slane %v12297_v36, %v14358_v60  ;;  %v6301_v43 = vrot.slane %v12297_v36, %v14374_v37  ;;  %v6305_v20 = vrot.slane %v12297_v36, %v14377_v22  ;;  %v6309_v7 = vrot.slane %v12297_v36, %v14400_v40 }
 0x6b5   : > { %v3779_v34 = vadd.f32 %v18237_v1, %v3692_v4  ;;  %v6313_v61 = vrot.slane %v12297_v36, %v14403_v48  ;;  %v10083_v17 = vcombine.low %v6285_v55, %v6289_v9  ;;  %v18238_v55 = vld [vmem:[#allocation41_spill] sm:$0xff]  ;;  %v10164_v1 = vcombine.low %v10142_v51, %v10149_v49 }
 0x6b6   : > { %v10084_v28 = vcombine.low %v6293_v10, %v6297_v27  ;;  %v10085_v45 = vcombine.low %v6301_v43, %v6305_v20  ;;  %v5805_v9 = vrot.slane %v18238_v55, %v14347_v50  ;;  %v5809_v57 = vrot.slane %v18238_v55, %v14352_v0 }
 0x6b7   : > { %3859 = vst [vmem:[%s14387_s19 + $0x248] sm:$0xff] %v3779_v34  ;;  %v10086_v52 = vcombine.low %v6309_v7, %v6313_v61  ;;  %v10093_v8 = vrot.slane %v10083_v17, %v14449_v6  ;;  %v5813_v12 = vrot.slane %v18238_v55, %v14355_v13  ;;  %v5817_v16 = vrot.slane %v18238_v55, %v14358_v60 }
 0x6b8   : > { %v10100_v4 = vrot.slane %v10084_v28, %v14449_v6  ;;  %v10107_v36 = vrot.slane %v10085_v45, %v14449_v6  ;;  %v5821_v29 = vrot.slane %v18238_v55, %v14374_v37  ;;  %v5825_v27 = vrot.slane %v18238_v55, %v14377_v22 }
 0x6b9   : > { %10529 = vperm.xlu1 %11989, %v18239_v26   ;;  %v10114_v56 = vrot.slane %v10086_v52, %v14449_v6  ;;  %v5829_v43 = vrot.slane %v18238_v55, %v14400_v40  ;;  %v5833_v20 = vrot.slane %v18238_v55, %v14403_v48  ;;  %v10165_v34 = vcombine.low %v10156_v62, %v10163_v58  ;;  %v18241_v26 = vld [vmem:[#allocation47_spill] sm:$0xff] }
 0x6ba   : > { %v10115_v10 = vcombine.low %v10093_v8, %v10100_v4  ;;  %v9169_v61 = vrot.slane %v17069_v14, %v14449_v6  ;;  %v9176_v28 = vrot.slane %v17071_v54, %v14449_v6  ;;  %v9183_v45 = vrot.slane %v17073_v44, %v14449_v6  ;;  %v18240_v8 = vld [vmem:[#allocation80_spill] sm:$0xff] }
 0x6bb   : > { %v10116_v7 = vcombine.low %v10107_v36, %v10114_v56  ;;  %v9260_v52 = vrot.slane %v17081_v38, %v14449_v6  ;;  %v9267_v62 = vrot.slane %v17083_v46, %v14449_v6  ;;  %v9274_v58 = vrot.slane %v17085_v39, %v14449_v6 }
 0x6bc   : > { %v10123_v17 = vrot.slane %v10115_v10, %v14449_v6  ;;  %v9281_v14 = vrot.slane %v9253_v5, %v14449_v6  ;;  %v9348_v51 = vcombine.low %v5805_v9, %v5809_v57  ;;  %v9349_v54 = vcombine.low %v5813_v12, %v5817_v16  ;;  %v18242_v57 = vld [vmem:[#allocation93_spill] sm:$0xff] }
 0x6bd   : > { %10535 = vperm.xlu1 %11989, %v18240_v8   ;;  %v10130_v4 = vrot.slane %v10116_v7, %v14449_v6  ;;  %v9350_v49 = vcombine.low %v5821_v29, %v5825_v27  ;;  %v9351_v36 = vcombine.low %v5829_v43, %v5833_v20  ;;  %v10172_v55 = vrot.slane %v10164_v1, %v14449_v6 }
 0x6be   : > { %v10179_v38 = vrot.slane %v10165_v34, %v14449_v6  ;;  %v5869_v56 = vrot.slane %v18241_v26, %v14347_v50  ;;  %v5873_v46 = vrot.slane %v18241_v26, %v14352_v0  ;;  %v5877_v39 = vrot.slane %v18241_v26, %v14355_v13 }
 0x6bf   : > { %v10131_v44 = vcombine.low %v10123_v17, %v10130_v4  ;;  %v5881_v5 = vrot.slane %v18241_v26, %v14358_v60  ;;  %v5885_v9 = vrot.slane %v18241_v26, %v14374_v37  ;;  %v5889_v12 = vrot.slane %v18241_v26, %v14377_v22 }
 0x6c0   : > { %v5893_v16 = vrot.slane %v18241_v26, %v14400_v40  ;;  %v5897_v29 = vrot.slane %v18241_v26, %v14403_v48  ;;  %v9087_v10 = vcombine.low %v9078_v53, %v9085_v11  ;;  %v9184_v27 = vcombine.low %v9162_v42, %v9169_v61 }
 0x6c1   : > { %10646 = vperm.xlu0 %11988, %v10131_v44   ;;  %10541 = vperm.xlu1 %11989, %v18242_v57   ;;  %v9185_v43 = vcombine.low %v9176_v28, %v9183_v45  ;;  %v9282_v20 = vcombine.low %v9260_v52, %v9267_v62  ;;  %v10180_v7 = vcombine.low %v10172_v55, %v10179_v38  ;;  %v18243_v45 = vld [vmem:[#allocation53_spill] sm:$0xff] }
 0x6c2   : > { %v9283_v1 = vcombine.low %v9274_v58, %v9281_v14  ;;  %v9358_v34 = vrot.slane %v9348_v51, %v14449_v6  ;;  %v9365_v17 = vrot.slane %v9349_v54, %v14449_v6  ;;  %v9094_v8 = vrot.slane %v17067_v19, %v14449_v6 }
 0x6c3   : > { %v9372_v35 = vrot.slane %v9350_v49, %v14449_v6  ;;  %v9379_v30 = vrot.slane %v9351_v36, %v14449_v6  ;;  %v9446_v53 = vcombine.low %v5869_v56, %v5873_v46  ;;  %v9447_v15 = vcombine.low %v5877_v39, %v5881_v5 }
 0x6c4   : > { %v9448_v11 = vcombine.low %v5885_v9, %v5889_v12  ;;  %v9449_v42 = vcombine.low %v5893_v16, %v5897_v29  ;;  %v9101_v61 = vrot.slane %v9087_v10, %v14449_v6  ;;  %v9192_v28 = vrot.slane %v9184_v27, %v14449_v6 }
 0x6c5   : > { %10649 = vperm.xlu0 %11988, %v10180_v7   ;;  %10547 = vperm.xlu1 %11989, %v16970_v59   ;;  %v5933_v52 = vrot.slane %v18243_v45, %v14347_v50  ;;  %v5937_v19 = vrot.slane %v18243_v45, %v14352_v0  ;;  %v9199_v4 = vrot.slane %v9185_v43, %v14449_v6 }
 0x6c6   : > { %v9290_v62 = vrot.slane %v9282_v20, %v14449_v6  ;;  %v9297_v58 = vrot.slane %v9283_v1, %v14449_v6  ;;  %v17183_v59 = vcombine.low %v9358_v34, %v9365_v17  ;;  %v17185_v14 = vcombine.low %v9372_v35, %v9379_v30 }
 0x6c7   : > { %v9456_v51 = vrot.slane %v9446_v53, %v14449_v6  ;;  %v5941_v54 = vrot.slane %v18243_v45, %v14355_v13  ;;  %v5945_v49 = vrot.slane %v18243_v45, %v14358_v60  ;;  %v9463_v36 = vrot.slane %v9447_v15, %v14449_v6  ;;  %v18250_v15 = vld [vmem:[#allocation69_spill] sm:$0xff] }
 0x6c8   : > { %v9470_v44 = vrot.slane %v9448_v11, %v14449_v6  ;;  %v9477_v55 = vrot.slane %v9449_v42, %v14449_v6  ;;  %v5949_v38 = vrot.slane %v18243_v45, %v14374_v37  ;;  %v5953_v26 = vrot.slane %v18243_v45, %v14377_v22  ;;  %v18251_v42 = vld [vmem:[#allocation60_spill] sm:$0xff] }
 0x6c9   : > { %10553 = vperm.xlu1 %11989, %v16978_v47   ;;  %v5957_v56 = vrot.slane %v18243_v45, %v14400_v40  ;;  %v5961_v46 = vrot.slane %v18243_v45, %v14403_v48  ;;  %v9544_v39 = vcombine.low %v5933_v52, %v5937_v19  ;;  %v8808_v5 = vcombine.low %v8800_v31, %v8807_v63  ;;  %v18252_v45 = vld [vmem:[#allocation83_spill] sm:$0xff]  ;;  %v18253_v52 = vld [vmem:[#allocation66_spill] sm:$0xff] }
 0x6ca   : > { %v18244_v9 = vrot.slane %v16982_v33, %v14449_v6  ;;  %v18245_v57 = vrot.slane %v16980_v21, %v14449_v6  ;;  %v18246_v16 = vrot.slane %v16986_v32, %v14449_v6  ;;  %v18247_v29 = vrot.slane %v16984_v18, %v14449_v6 }
 0x6cb   : > { %v3044_v47 = vpop.xlane.xlu1 %3043  ;;  %v17222_v27 = vcombine.low %v9094_v8, %v9101_v61  ;;  %v17225_v41 = vcombine.low %v9192_v28, %v9199_v4  ;;  %v17227_v31 = vcombine.low %v9290_v62, %v9297_v58  ;;  %v9545_v33 = vcombine.low %v5941_v54, %v5945_v49 }
 0x6cc   : > { %v8906_v12 = vcombine.low %v18245_v57, %v18244_v9  ;;  %v9004_v10 = vcombine.low %v18247_v29, %v18246_v16  ;;  %v3134_v43 = vadd.f32 %v18248_v23, %v3044_v47  ;;  %v9388_v21 = vrot.slane %v17183_v59, %v14449_v6 }
 0x6cd   : > { %10559 = vperm.xlu1 %11989, %v16996_v25   ;;  %v9395_v32 = vrot.slane %v17185_v14, %v14449_v6  ;;  %v17234_v63 = vcombine.low %v9456_v51, %v9463_v36  ;;  %v17236_v18 = vcombine.low %v9470_v44, %v9477_v55  ;;  %v17238_v7 = vcombine.low %v5949_v38, %v5953_v26  ;;  %v18249_v25 = vld [vmem:[#allocation56_spill] sm:$0xff] }
 0x6ce   : > { %v11380_v20 = vmul.f32 -1.442695, %v3134_v43  ;;  %v17240_v1 = vcombine.low %v5957_v56, %v5961_v46  ;;  %v9554_v34 = vrot.slane %v9544_v39, %v14449_v6  ;;  %v5997_v8 = vrot.slane %v18249_v25, %v14347_v50  ;;  %v18254_v56 = vld [vmem:[#allocation70_spill] sm:$0xff] }
 0x6cf   : > { %v10518_v17 = vpop.permute.xlu1 %10517  ;;  %v6001_v35 = vrot.slane %v18249_v25, %v14352_v0  ;;  %v6005_v30 = vrot.slane %v18249_v25, %v14355_v13  ;;  %v6009_v53 = vrot.slane %v18249_v25, %v14358_v60  ;;  %v5837_v61 = vrot.slane %v18251_v42, %v14347_v50 }
 0x6d0   : > { %12298 = vpow2.f32 %v11380_v20  ;;  %v10849_v11 = vrot.slane %v10518_v17, %v18250_v15  ;;  %v9561_v28 = vrot.slane %v9545_v33, %v14449_v6  ;;  %v10854_v19 = vrot.slane %v18253_v52, %v18252_v45 }
 0x6d1   : > { %10565 = vperm.xlu1 %11989, %v8808_v5   ;;  %v5841_v4 = vrot.slane %v18251_v42, %v14352_v0  ;;  %v5845_v62 = vrot.slane %v18251_v42, %v14355_v13  ;;  %v5849_v58 = vrot.slane %v18251_v42, %v14358_v60  ;;  %v6013_v54 = vrot.slane %v18249_v25, %v14374_v37 }
 0x6d2   : > { %v10850_v51 = vsel %vm10768_vm14, %v10849_v11, %v16937_v3  ;;  %v6017_v49 = vrot.slane %v18249_v25, %v14377_v22  ;;  %v6021_v36 = vrot.slane %v18249_v25, %v14400_v40  ;;  %v6025_v55 = vrot.slane %v18249_v25, %v14403_v48  ;;  %v18256_v11 = vld [vmem:[#allocation75_spill] sm:$0xff] }
 0x6d3   : > { %v17272_v44 = vsel %vm10775_vm15, %v10854_v19, %v10850_v51  ;;  %v9642_v38 = vcombine.low %v5997_v8, %v6001_v35  ;;  %v9643_v26 = vcombine.low %v6005_v30, %v6009_v53  ;;  %v5853_v46 = vrot.slane %v18251_v42, %v14374_v37  ;;  %v18255_v35 = vld [vmem:[#allocation72_spill] sm:$0xff] }
 0x6d4   : > { %v5857_v39 = vrot.slane %v18251_v42, %v14377_v22  ;;  %v9486_v47 = vrot.slane %v17234_v63, %v14449_v6  ;;  %v5861_v5 = vrot.slane %v18251_v42, %v14400_v40  ;;  %v5865_v9 = vrot.slane %v18251_v42, %v14403_v48 }
 0x6d5   : > { %10571 = vperm.xlu1 %11989, %v8906_v12   ;;  %v9397_v57 = vcombine.low %v5837_v61, %v5841_v4  ;;  %v9398_v16 = vcombine.low %v5845_v62, %v5849_v58  ;;  %v9493_v29 = vrot.slane %v17236_v18, %v14449_v6  ;;  %v9568_v43 = vrot.slane %v17238_v7, %v14449_v6 }
 0x6d6   : > { %v9575_v33 = vrot.slane %v17240_v1, %v14449_v6  ;;  %v17294_v20 = vcombine.low %v9554_v34, %v9561_v28  ;;  %v9644_v12 = vcombine.low %v6013_v54, %v6017_v49  ;;  %v9645_v63 = vcombine.low %v6021_v36, %v6025_v55 }
 0x6d7   : > { %v9652_v17 = vrot.slane %v9642_v38, %v14449_v6  ;;  %v9659_v25 = vrot.slane %v9643_v26, %v14449_v6  ;;  %v9399_v8 = vcombine.low %v5853_v46, %v5857_v39  ;;  %v6061_v30 = vrot.slane %v18255_v35, %v14347_v50 }
 0x6d8   : > { %v6065_v18 = vrot.slane %v18255_v35, %v14352_v0  ;;  %v6069_v7 = vrot.slane %v18255_v35, %v14355_v13  ;;  %v9400_v1 = vcombine.low %v5861_v5, %v5865_v9  ;;  %v9407_v34 = vrot.slane %v9397_v57, %v14449_v6 }
 0x6d9   : > { %10577 = vperm.xlu1 %11989, %v9004_v10   ;;  %v9414_v53 = vrot.slane %v9398_v16, %v14449_v6  ;;  %v5901_v42 = vrot.slane %v18256_v11, %v14347_v50  ;;  %v5905_v28 = vrot.slane %v18256_v11, %v14352_v0  ;;  %v5909_v52 = vrot.slane %v18256_v11, %v14355_v13 }
 0x6da   : > { %v12299_v61 = vpop.eup %12298  ;;  %v5913_v19 = vrot.slane %v18256_v11, %v14358_v60  ;;  %v5917_v10 = vrot.slane %v18256_v11, %v14374_v37  ;;  %v5921_v62 = vrot.slane %v18256_v11, %v14377_v22  ;;  %v5925_v58 = vrot.slane %v18256_v11, %v14400_v40 }
 0x6db   : > { %v3454_v4 = vadd.f32 1.0, %v12299_v61  ;;  %v5929_v51 = vrot.slane %v18256_v11, %v14403_v48  ;;  %v9421_v54 = vrot.slane %v9399_v8, %v14449_v6  ;;  %v6073_v49 = vrot.slane %v18255_v35, %v14358_v60 }
 0x6dc   : > { %v6077_v36 = vrot.slane %v18255_v35, %v14374_v37  ;;  %v6081_v55 = vrot.slane %v18255_v35, %v14377_v22  ;;  %v9428_v38 = vrot.slane %v9400_v1, %v14449_v6  ;;  %v6085_v26 = vrot.slane %v18255_v35, %v14400_v40 }
 0x6dd   : > { %12300 = vrcp.f32 %v3454_v4  ;;  %10583 = vperm.xlu1 %11989, %v17222_v27   ;;  %v6089_v46 = vrot.slane %v18255_v35, %v14403_v48  ;;  %v17335_v39 = vcombine.low %v9568_v43, %v9575_v33  ;;  %v9666_v5 = vrot.slane %v9644_v12, %v14449_v6 }
 0x6de   : > { %v9673_v9 = vrot.slane %v9645_v63, %v14449_v6  ;;  %v17339_v57 = vcombine.low %v9652_v17, %v9659_v25  ;;  %v9495_v16 = vcombine.low %v5901_v42, %v5905_v28  ;;  %v9496_v8 = vcombine.low %v5909_v52, %v5913_v19 }
 0x6df   : > { %v9497_v11 = vcombine.low %v5917_v10, %v5921_v62  ;;  %v9498_v27 = vcombine.low %v5925_v58, %v5929_v51  ;;  %v9429_v61 = vcombine.low %v9407_v34, %v9414_v53  ;;  %v17341_v1 = vcombine.low %v6061_v30, %v6065_v18  ;;  %v18257_v53 = vld [vmem:[#allocation87_spill] sm:$0xff] }
 0x6e0   : > { %v17343_v4 = vcombine.low %v6069_v7, %v6073_v49  ;;  %v17345_v3 = vcombine.low %v6077_v36, %v6081_v55  ;;  %v9396_v43 = vcombine.low %v9388_v21, %v9395_v32  ;;  %v9430_v33 = vcombine.low %v9421_v54, %v9428_v38  ;;  %v18258_v49 = vld [vmem:[#allocation44_spill] sm:$0xff] }
 0x6e1   : > { %10589 = vperm.xlu1 %11989, %v17225_v41   ;;  %v17354_v12 = vcombine.low %v9486_v47, %v9493_v29  ;;  %v17356_v63 = vcombine.low %v6085_v26, %v6089_v46  ;;  %v9584_v17 = vrot.slane %v17294_v20, %v14449_v6  ;;  %v9591_v25 = vrot.slane %v17335_v39, %v14449_v6 }
 0x6e2   : > { %v17362_v35 = vcombine.low %v9666_v5, %v9673_v9  ;;  %v9682_v14 = vrot.slane %v17339_v57, %v14449_v6  ;;  %v9505_v41 = vrot.slane %v9495_v16, %v14449_v6  ;;  %v9512_v59 = vrot.slane %v9496_v8, %v14449_v6  ;;  %v17405_v8 = vld [vmem:[#allocation9] ss:$0 sm:$0xff] }
 0x6e3   : > { %v9519_v21 = vrot.slane %v9497_v11, %v14449_v6  ;;  %v9526_v32 = vrot.slane %v9498_v27, %v14449_v6  ;;  %v9437_v47 = vrot.slane %v9429_v61, %v14449_v6  ;;  %v9750_v29 = vrot.slane %v17341_v1, %v14449_v6 }
 0x6e4   : > { %v9757_v30 = vrot.slane %v17343_v4, %v14449_v6  ;;  %v9764_v18 = vrot.slane %v17345_v3, %v14449_v6  ;;  %v9444_v7 = vrot.slane %v9430_v33, %v14449_v6  ;;  %v9771_v34 = vrot.slane %v17356_v63, %v14449_v6 }
 0x6e5   : > { %10595 = vperm.xlu1 %11989, %v17227_v31   ;;  %v6125_v42 = vrot.slane %v18257_v53, %v14347_v50  ;;  %v6129_v28 = vrot.slane %v18257_v53, %v14352_v0  ;;  %v6133_v52 = vrot.slane %v18257_v53, %v14355_v13  ;;  %v6137_v19 = vrot.slane %v18257_v53, %v14358_v60 }
 0x6e6   : > { %v6141_v31 = vrot.slane %v18257_v53, %v14374_v37  ;;  %v6145_v3 = vrot.slane %v18257_v53, %v14377_v22  ;;  %v9527_v62 = vcombine.low %v9505_v41, %v9512_v59  ;;  %v9528_v58 = vcombine.low %v9519_v21, %v9526_v32 }
 0x6e7   : > { %v12301_v10 = vpop.eup %12300  ;;  %v6149_v51 = vrot.slane %v18257_v53, %v14400_v40  ;;  %v6153_v54 = vrot.slane %v18257_v53, %v14403_v48  ;;  %v9445_v27 = vcombine.low %v9437_v47, %v9444_v7  ;;  %v9838_v63 = vcombine.low %v6125_v42, %v6129_v28  ;;  %v18259_v42 = vld [vmem:[#allocation86_spill] sm:$0xff] }
 0x6e8   : > { %v3694_v36 = vmul.f32 %v12301_v10, %v18258_v49  ;;  %v6349_v55 = vrot.slane %v12301_v10, %v14347_v50  ;;  %v6353_v38 = vrot.slane %v12301_v10, %v14352_v0  ;;  %v6357_v26 = vrot.slane %v12301_v10, %v14355_v13 }
 0x6e9   : > { %10601 = vperm.xlu1 %11989, %v9396_v43   ;;  %v6361_v46 = vrot.slane %v12301_v10, %v14358_v60  ;;  %v6365_v5 = vrot.slane %v12301_v10, %v14374_v37  ;;  %v6369_v9 = vrot.slane %v12301_v10, %v14377_v22  ;;  %v6373_v16 = vrot.slane %v12301_v10, %v14400_v40 }
 0x6ea   : > { %v3781_v11 = vadd.f32 %v17405_v8, %v3694_v36  ;;  %v6377_v61 = vrot.slane %v12301_v10, %v14403_v48  ;;  %v10181_v1 = vcombine.low %v6349_v55, %v6353_v38  ;;  %v9839_v43 = vcombine.low %v6133_v52, %v6137_v19 }
 0x6eb   : > { %v10182_v4 = vcombine.low %v6357_v26, %v6361_v46  ;;  %v10183_v33 = vcombine.low %v6365_v5, %v6369_v9  ;;  %v9535_v21 = vrot.slane %v9527_v62, %v14449_v6  ;;  %v9840_v32 = vcombine.low %v6141_v31, %v6145_v3 }
 0x6ec   : > { %3861 = vst [vmem:[%s14387_s19 + $0x258] sm:$0xff] %v3781_v11  ;;  %v10184_v41 = vcombine.low %v6373_v16, %v6377_v61  ;;  %v10191_v59 = vrot.slane %v10181_v1, %v14449_v6  ;;  %v9542_v47 = vrot.slane %v9528_v58, %v14449_v6  ;;  %v9841_v7 = vcombine.low %v6149_v51, %v6153_v54 }
 0x6ed   : > { %10604 = vperm.xlu1 %11989, %v9445_v27   ;;  %v10198_v53 = vrot.slane %v10182_v4, %v14449_v6  ;;  %v10205_v49 = vrot.slane %v10183_v33, %v14449_v6  ;;  %v5965_v28 = vrot.slane %v18259_v42, %v14347_v50  ;;  %v5969_v52 = vrot.slane %v18259_v42, %v14352_v0 }
 0x6ee   : > { %v10212_v10 = vrot.slane %v10184_v41, %v14449_v6  ;;  %v5973_v19 = vrot.slane %v18259_v42, %v14355_v13  ;;  %v5977_v3 = vrot.slane %v18259_v42, %v14358_v60  ;;  %v5981_v62 = vrot.slane %v18259_v42, %v14374_v37  ;;  %v18260_v41 = vld [vmem:[#allocation90_spill] sm:$0xff] }
 0x6ef   : > { %v10213_v31 = vcombine.low %v10191_v59, %v10198_v53  ;;  %v5985_v58 = vrot.slane %v18259_v42, %v14377_v22  ;;  %v9689_v54 = vrot.slane %v17362_v35, %v14449_v6  ;;  %v5989_v36 = vrot.slane %v18259_v42, %v14400_v40 }
 0x6f0   : > { %v10214_v51 = vcombine.low %v10205_v49, %v10212_v10  ;;  %v5993_v55 = vrot.slane %v18259_v42, %v14403_v48  ;;  %v9772_v26 = vcombine.low %v9750_v29, %v9757_v30  ;;  %v9773_v46 = vcombine.low %v9764_v18, %v9771_v34 }
 0x6f1   : > { %10607 = vperm.xlu1 %11989, %v17354_v12   ;;  %v10221_v38 = vrot.slane %v10213_v31, %v14449_v6  ;;  %v9848_v5 = vrot.slane %v9838_v63, %v14449_v6  ;;  %v9855_v16 = vrot.slane %v9839_v43, %v14449_v6  ;;  %v9862_v35 = vrot.slane %v9840_v32, %v14449_v6 }
 0x6f2   : > { %v10228_v9 = vrot.slane %v10214_v51, %v14449_v6  ;;  %v9869_v11 = vrot.slane %v9841_v7, %v14449_v6  ;;  %v9543_v27 = vcombine.low %v9535_v21, %v9542_v47  ;;  %v9593_v61 = vcombine.low %v5965_v28, %v5969_v52  ;;  %v18261_v28 = vld [vmem:[#allocation49_spill] sm:$0xff] }
 0x6f3   : > { %v9594_v1 = vcombine.low %v5973_v19, %v5977_v3  ;;  %v9595_v4 = vcombine.low %v5981_v62, %v5985_v58  ;;  %v9596_v12 = vcombine.low %v5989_v36, %v5993_v55  ;;  %v6381_v29 = vrot.slane %v18260_v41, %v14347_v50 }
 0x6f4   : > { %v10229_v33 = vcombine.low %v10221_v38, %v10228_v9  ;;  %v6385_v30 = vrot.slane %v18260_v41, %v14352_v0  ;;  %v6389_v18 = vrot.slane %v18260_v41, %v14355_v13  ;;  %v6393_v34 = vrot.slane %v18260_v41, %v14358_v60 }
 0x6f5   : > { %10610 = vperm.xlu1 %11989, %v9543_v27   ;;  %v6397_v63 = vrot.slane %v18260_v41, %v14374_v37  ;;  %v6401_v43 = vrot.slane %v18260_v41, %v14377_v22  ;;  %v9592_v59 = vcombine.low %v9584_v17, %v9591_v25  ;;  %v9690_v21 = vcombine.low %v9682_v14, %v9689_v54 }
 0x6f6   : > { %10652 = vperm.xlu0 %11988, %v10229_v33   ;;  %v6405_v32 = vrot.slane %v18260_v41, %v14400_v40  ;;  %v6409_v53 = vrot.slane %v18260_v41, %v14403_v48  ;;  %v9780_v49 = vrot.slane %v9772_v26, %v14449_v6  ;;  %v9787_v47 = vrot.slane %v9773_v46, %v14449_v6 }
 0x6f7   : > { %v9870_v7 = vcombine.low %v9848_v5, %v9855_v16  ;;  %v9871_v39 = vcombine.low %v9862_v35, %v9869_v11  ;;  %v9603_v10 = vrot.slane %v9593_v61, %v14449_v6  ;;  %v9610_v20 = vrot.slane %v9594_v1, %v14449_v6 }
 0x6f8   : > { %v9617_v17 = vrot.slane %v9595_v4, %v14449_v6  ;;  %v9624_v57 = vrot.slane %v9596_v12, %v14449_v6  ;;  %v10230_v25 = vcombine.low %v6381_v29, %v6385_v30  ;;  %v10231_v14 = vcombine.low %v6389_v18, %v6393_v34  ;;  %v10527_v30 = vpop.permute.xlu0 %10526 }
 0x6f9   : > { %10613 = vperm.xlu1 %11989, %v9592_v59   ;;  %v10232_v42 = vcombine.low %v6397_v63, %v6401_v43  ;;  %v6445_v52 = vrot.slane %v18261_v28, %v14347_v50  ;;  %v10233_v19 = vcombine.low %v6405_v32, %v6409_v53  ;;  %v6449_v31 = vrot.slane %v18261_v28, %v14352_v0 }
 0x6fa   : > { %v6453_v3 = vrot.slane %v18261_v28, %v14355_v13  ;;  %v6457_v62 = vrot.slane %v18261_v28, %v14358_v60  ;;  %v6461_v58 = vrot.slane %v18261_v28, %v14374_v37  ;;  %v6465_v51 = vrot.slane %v18261_v28, %v14377_v22 }
 0x6fb   : > { %v6469_v54 = vrot.slane %v18261_v28, %v14400_v40  ;;  %v6473_v36 = vrot.slane %v18261_v28, %v14403_v48  ;;  %v9878_v55 = vrot.slane %v9870_v7, %v14449_v6  ;;  %v9885_v38 = vrot.slane %v9871_v39, %v14449_v6  ;;  %v18263_v39 = vld [vmem:[#allocation40_spill] sm:$0xff] }
 0x6fc   : > { %v9625_v26 = vcombine.low %v9603_v10, %v9610_v20  ;;  %v9626_v46 = vcombine.low %v9617_v17, %v9624_v57  ;;  %v10240_v5 = vrot.slane %v10230_v25, %v14449_v6  ;;  %v10247_v9 = vrot.slane %v10231_v14, %v14449_v6 }
 0x6fd   : > { %10619 = vperm.xlu1 %11989, %v9690_v21   ;;  %v10254_v16 = vrot.slane %v10232_v42, %v14449_v6  ;;  %v10261_v35 = vrot.slane %v10233_v19, %v14449_v6  ;;  %v10328_v11 = vcombine.low %v6445_v52, %v6449_v31  ;;  %v9788_v27 = vcombine.low %v9780_v49, %v9787_v47  ;;  %v18262_v47 = vld [vmem:[#allocation42_spill] sm:$0xff] }
 0x6fe   : > { %v10329_v61 = vcombine.low %v6453_v3, %v6457_v62  ;;  %v10330_v1 = vcombine.low %v6461_v58, %v6465_v51  ;;  %v10331_v4 = vcombine.low %v6469_v54, %v6473_v36  ;;  %v9886_v41 = vcombine.low %v9878_v55, %v9885_v38  ;;  %v18264_v51 = vld [vmem:[#allocation24_spill] sm:$0xff] }
 0x6ff   : > { %v9633_v29 = vrot.slane %v9625_v26, %v14449_v6  ;;  %v9640_v18 = vrot.slane %v9626_v46, %v14449_v6  ;;  %v10262_v34 = vcombine.low %v10240_v5, %v10247_v9  ;;  %v10263_v63 = vcombine.low %v10254_v16, %v10261_v35 }
 0x700   : > { %v3050_v33 = vpop.xlane.xlu1 %3049  ;;  %v10338_v43 = vrot.slane %v10328_v11, %v14449_v6  ;;  %v10345_v21 = vrot.slane %v10329_v61, %v14449_v6  ;;  %v10352_v32 = vrot.slane %v10330_v1, %v14449_v6  ;;  %v10359_v53 = vrot.slane %v10331_v4, %v14449_v6 }
 0x701   : > { %v3136_v12 = vadd.f32 %v18248_v23, %v3050_v33  ;;  %10625 = vperm.xlu1 %11989, %v9788_v27   ;;  %v10863_v7 = vrot.slane %v10527_v30, %v18262_v47  ;;  %v9641_v20 = vcombine.low %v9633_v29, %v9640_v18  ;;  %v10270_v17 = vrot.slane %v10262_v34, %v14449_v6 }
 0x702   : > { %v10277_v25 = vrot.slane %v10263_v63, %v14449_v6  ;;  %v10360_v14 = vcombine.low %v10338_v43, %v10345_v21  ;;  %v10361_v42 = vcombine.low %v10352_v32, %v10359_v53  ;;  %v10533_v43 = vpop.permute.xlu0 %10532 }
 0x703   : > { %v11382_v59 = vmul.f32 -1.442695, %v3136_v12 }
 0x704   : > { %v10524_v49 = vpop.permute.xlu1 %10523  ;;  %v10278_v28 = vcombine.low %v10270_v17, %v10277_v25  ;;  %v10368_v52 = vrot.slane %v10360_v14, %v14449_v6  ;;  %v10375_v19 = vrot.slane %v10361_v42, %v14449_v6 }
 0x705   : > { %12302 = vpow2.f32 %v11382_v59  ;;  %v10859_v10 = vrot.slane %v10524_v49, %v18263_v39  ;;  %10631 = vperm.xlu1 %11989, %v9886_v41  }
 0x706   : > { %v10376_v3 = vcombine.low %v10368_v52, %v10375_v19  ;;  %v10539_v21 = vpop.permute.xlu0 %10538  ;;  %v18267_v52 = vld [vmem:[#allocation54_spill] sm:$0xff] }
 0x707   : > { %v10864_v57 = vsel %vm10677_vm1, %v10863_v7, %v10859_v10  ;;  %v18265_v7 = vld [vmem:[#allocation45_spill] sm:$0xff] }
 0x709   : > { %10616 = vperm.xlu1 %11989, %v9641_v20   ;;  %v18266_v20 = vld [vmem:[#allocation52_spill] sm:$0xff] }
 0x70a   : > { %v10873_v17 = vrot.slane %v10533_v43, %v18266_v20  ;;  %v10545_v25 = vpop.permute.xlu0 %10544 }
 0x70d   : > { %10655 = vperm.xlu1 %11989, %v10278_v28  }
 0x70f   : > { %v12303_v31 = vpop.eup %12302 }
 0x710   : > { %v3456_v62 = vadd.f32 1.0, %v12303_v31  ;;  %v18268_v31 = vld [vmem:[#allocation57_spill] sm:$0xff] }
 0x711   : > { %10661 = vperm.xlu1 %11989, %v10376_v3   ;;  %v10883_v3 = vrot.slane %v10539_v21, %v18268_v31  ;;  %v18275_v21 = vld [vmem:[#allocation26_spill] sm:$0xff] }
 0x712   : > { %12304 = vrcp.f32 %v3456_v62 }
 0x71c   : > { %v12305_v58 = vpop.eup %12304 }
 0x71d   : > { %v3696_v54 = vmul.f32 %v12305_v58, %v18264_v51  ;;  %v6413_v36 = vrot.slane %v12305_v58, %v14347_v50  ;;  %v6417_v55 = vrot.slane %v12305_v58, %v14352_v0  ;;  %v6421_v38 = vrot.slane %v12305_v58, %v14355_v13  ;;  %v10551_v51 = vpop.permute.xlu0 %10550 }
 0x71e   : > { %v6425_v26 = vrot.slane %v12305_v58, %v14358_v60  ;;  %v6429_v46 = vrot.slane %v12305_v58, %v14374_v37  ;;  %v6433_v5 = vrot.slane %v12305_v58, %v14377_v22  ;;  %v6437_v9 = vrot.slane %v12305_v58, %v14400_v40 }
 0x71f   : > { %v3783_v16 = vadd.f32 %v17405_v8, %v3696_v54  ;;  %v6441_v35 = vrot.slane %v12305_v58, %v14403_v48  ;;  %v10279_v11 = vcombine.low %v6413_v36, %v6417_v55  ;;  %v18269_v54 = vld [vmem:[#allocation55_spill] sm:$0xff] }
 0x720   : > { %v10280_v27 = vcombine.low %v6421_v38, %v6425_v26  ;;  %v10281_v61 = vcombine.low %v6429_v46, %v6433_v5  ;;  %v18270_v55 = vld [vmem:[#allocation43_spill] sm:$0xff] }
 0x721   : > { %3863 = vst [vmem:[%s14387_s19 + $0x268] sm:$0xff] %v3783_v16  ;;  %v10282_v1 = vcombine.low %v6437_v9, %v6441_v35  ;;  %v10289_v4 = vrot.slane %v10279_v11, %v14449_v6  ;;  %v10893_v38 = vrot.slane %v10545_v25, %v18270_v55  ;;  %v18271_v16 = vld [vmem:[#allocation58_spill] sm:$0xff]  ;;  %v18272_v11 = vld [vmem:[#allocation61_spill] sm:$0xff] }
 0x722   : > { %v10296_v33 = vrot.slane %v10280_v27, %v14449_v6  ;;  %v10303_v12 = vrot.slane %v10281_v61, %v14449_v6  ;;  %v10903_v27 = vrot.slane %v10551_v51, %v18272_v11  ;;  %v10557_v61 = vpop.permute.xlu0 %10556 }
 0x723   : > { %v10310_v41 = vrot.slane %v10282_v1, %v14449_v6 }
 0x724   : > { %v10311_v29 = vcombine.low %v10289_v4, %v10296_v33 }
 0x725   : > { %v10312_v30 = vcombine.low %v10303_v12, %v10310_v41  ;;  %v18273_v12 = vld [vmem:[#allocation62_spill] sm:$0xff] }
 0x726   : > { %v10319_v18 = vrot.slane %v10311_v29, %v14449_v6  ;;  %v18274_v29 = vld [vmem:[#allocation37_spill] sm:$0xff] }
 0x727   : > { %v10326_v34 = vrot.slane %v10312_v30, %v14449_v6  ;;  %v10913_v30 = vrot.slane %v10557_v61, %v18274_v29 }
 0x729   : > { %v10327_v63 = vcombine.low %v10319_v18, %v10326_v34 }
 0x72b   : > { %10658 = vperm.xlu0 %11988, %v10327_v63  }
 0x735   : > { %v3056_v59 = vpop.xlane.xlu1 %3055 }
 0x736   : > { %v3138_v32 = vadd.f32 %v18248_v23, %v3056_v59 }
 0x738   : > { %v11384_v53 = vmul.f32 -1.442695, %v3138_v32 }
 0x739   : > { %v10530_v49 = vpop.permute.xlu1 %10529 }
 0x73a   : > { %12306 = vpow2.f32 %v11384_v53  ;;  %v10868_v10 = vrot.slane %v10530_v49, %v18265_v7 }
 0x73c   : > { %v10869_v14 = vsel %vm10684_vm2, %v10868_v10, %v10864_v57 }
 0x73d   : > { %v10874_v42 = vsel %vm10691_vm3, %v10873_v17, %v10869_v14  ;;  %v10536_v28 = vpop.permute.xlu1 %10535 }
 0x73e   : > { %v10878_v19 = vrot.slane %v10536_v28, %v18267_v52 }
 0x740   : > { %v10879_v62 = vsel %vm10698_vm4, %v10878_v19, %v10874_v42 }
 0x741   : > { %v10884_v23 = vsel %vm10705_vm5, %v10883_v3, %v10879_v62  ;;  %v10542_v58 = vpop.permute.xlu1 %10541 }
 0x742   : > { %v10888_v36 = vrot.slane %v10542_v58, %v18269_v54 }
 0x744   : > { %v12307_v26 = vpop.eup %12306  ;;  %v10889_v57 = vsel %vm10712_vm6, %v10888_v36, %v10884_v23  ;;  %v10563_v36 = vpop.permute.xlu0 %10562 }
 0x745   : > { %v3458_v46 = vadd.f32 1.0, %v12307_v26  ;;  %v10894_v5 = vsel %vm10719_vm7, %v10893_v38, %v10889_v57  ;;  %v10548_v9 = vpop.permute.xlu1 %10547 }
 0x746   : > { %v10898_v35 = vrot.slane %v10548_v9, %v18271_v16 }
 0x747   : > { %12308 = vrcp.f32 %v3458_v46 }
 0x748   : > { %v10899_v1 = vsel %vm10726_vm8, %v10898_v35, %v10894_v5  ;;  %v10569_v46 = vpop.permute.xlu0 %10568 }
 0x749   : > { %v10904_v4 = vsel %vm10733_vm9, %v10903_v27, %v10899_v1  ;;  %v10554_v33 = vpop.permute.xlu1 %10553 }
 0x74a   : > { %v10908_v41 = vrot.slane %v10554_v33, %v18273_v12 }
 0x74c   : > { %v10909_v18 = vsel %vm10740_vm10, %v10908_v41, %v10904_v4  ;;  %v10575_v9 = vpop.permute.xlu0 %10574 }
 0x74d   : > { %v17546_v34 = vsel %vm10747_vm11, %v10913_v30, %v10909_v18  ;;  %v17548_v63 = vpop.permute.xlu1 %10559  ;;  %v10942_v41 = vrot.slane %v10575_v9, %v18262_v47 }
 0x750   : > { %v10581_v61 = vpop.permute.xlu0 %10580 }
 0x751   : > { %v12309_v43 = vpop.eup %12308  ;;  %v17550_v59 = vpop.permute.xlu1 %10565 }
 0x752   : > { %v3698_v32 = vmul.f32 %v12309_v43, %v18275_v21  ;;  %v6477_v53 = vrot.slane %v12309_v43, %v14347_v50  ;;  %v6481_v49 = vrot.slane %v12309_v43, %v14352_v0  ;;  %v6485_v10 = vrot.slane %v12309_v43, %v14355_v13 }
 0x753   : > { %v6489_v17 = vrot.slane %v12309_v43, %v14358_v60  ;;  %v6493_v25 = vrot.slane %v12309_v43, %v14374_v37  ;;  %v6497_v14 = vrot.slane %v12309_v43, %v14377_v22  ;;  %v6501_v28 = vrot.slane %v12309_v43, %v14400_v40 }
 0x754   : > { %v3785_v42 = vadd.f32 %v17405_v8, %v3698_v32  ;;  %v6505_v19 = vrot.slane %v12309_v43, %v14403_v48  ;;  %v10377_v62 = vcombine.low %v6477_v53, %v6481_v49  ;;  %v10587_v30 = vpop.permute.xlu0 %10586  ;;  %v10952_v53 = vrot.slane %v10581_v61, %v18266_v20 }
 0x755   : > { %v10572_v3 = vpop.permute.xlu1 %10571  ;;  %v10378_v23 = vcombine.low %v6485_v10, %v6489_v17  ;;  %v10379_v50 = vcombine.low %v6493_v25, %v6497_v14 }
 0x756   : > { %3865 = vst [vmem:[%s14387_s19 + $0x278] sm:$0xff] %v3785_v42  ;;  %v10380_v0 = vcombine.low %v6501_v28, %v6505_v19  ;;  %v10387_v13 = vrot.slane %v10377_v62, %v14449_v6  ;;  %v10938_v4 = vrot.slane %v10572_v3, %v18263_v39  ;;  %v10962_v42 = vrot.slane %v10587_v30, %v18268_v31 }
 0x757   : > { %v10394_v60 = vrot.slane %v10378_v23, %v14449_v6  ;;  %v10401_v37 = vrot.slane %v10379_v50, %v14449_v6 }
 0x758   : > { %v10408_v22 = vrot.slane %v10380_v0, %v14449_v6  ;;  %v10943_v43 = vsel %vm10677_vm1, %v10942_v41, %v10938_v4  ;;  %v10593_v17 = vpop.permute.xlu0 %10592  ;;  %v10918_v0 = vrot.slane %v17548_v63, %v18227_v2 }
 0x759   : > { %v10578_v58 = vpop.permute.xlu1 %10577  ;;  %v10409_v8 = vcombine.low %v10387_v13, %v10394_v60  ;;  %v10972_v23 = vrot.slane %v10593_v17, %v18270_v55 }
 0x75a   : > { %v10410_v51 = vcombine.low %v10401_v37, %v10408_v22  ;;  %v10947_v33 = vrot.slane %v10578_v58, %v18265_v7 }
 0x75b   : > { %v10417_v40 = vrot.slane %v10409_v8, %v14449_v6 }
 0x75c   : > { %v10424_v48 = vrot.slane %v10410_v51, %v14449_v6  ;;  %v10948_v21 = vsel %vm10684_vm2, %v10947_v33, %v10943_v43  ;;  %v10599_v50 = vpop.permute.xlu0 %10598  ;;  %v10919_v51 = vsel %vm10754_vm12, %v10918_v0, %v17546_v34  ;;  %v18276_v43 = vcombine.low %v18254_v56, %v17272_v44 }
 0x75d   : > { %v10584_v38 = vpop.permute.xlu1 %10583  ;;  %v10953_v10 = vsel %vm10691_vm3, %v10952_v53, %v10948_v21  ;;  %v10982_v58 = vrot.slane %v10599_v50, %v18272_v11 }
 0x75e   : > { %v10425_v26 = vcombine.low %v10417_v40, %v10424_v48  ;;  %v10957_v32 = vrot.slane %v10584_v38, %v18267_v52  ;;  %v10928_v40 = vrot.slane %v17550_v59, %v18250_v15  ;;  %v10923_v38 = vrot.slane %v10563_v36, %v18228_v24 }
 0x75f   : > { %v11101_v21 = vrot.slane %v18276_v43, %v14449_v6 }
 0x760   : > { %10664 = vperm.xlu0 %11988, %v10425_v26   ;;  %v10958_v25 = vsel %vm10698_vm4, %v10957_v32, %v10953_v10 }
 0x761   : > { %v10590_v57 = vpop.permute.xlu1 %10589  ;;  %v10963_v19 = vsel %vm10705_vm5, %v10962_v42, %v10958_v25 }
 0x762   : > { %v10967_v14 = vrot.slane %v10590_v57, %v18269_v54 }
 0x764   : > { %v10968_v3 = vsel %vm10712_vm6, %v10967_v14, %v10963_v19 }
 0x765   : > { %v10596_v5 = vpop.permute.xlu1 %10595  ;;  %v10973_v60 = vsel %vm10719_vm7, %v10972_v23, %v10968_v3 }
 0x766   : > { %v10977_v62 = vrot.slane %v10596_v5, %v18271_v16 }
 0x768   : > { %v10978_v37 = vsel %vm10726_vm8, %v10977_v62, %v10973_v60 }
 0x769   : > { %v10602_v35 = vpop.permute.xlu1 %10601  ;;  %v10983_v26 = vsel %vm10733_vm9, %v10982_v58, %v10978_v37 }
 0x76a   : > { %v10987_v22 = vrot.slane %v10602_v35, %v18273_v12  ;;  %v10924_v35 = vsel %vm10761_vm13, %v10923_v38, %v10919_v51 }
 0x76c   : > { %v10988_v5 = vsel %vm10740_vm10, %v10987_v22, %v10983_v26 }
 0x76d   : > { %v10605_v27 = vpop.permute.xlu1 %10604 }
 0x76e   : > { %v10992_v8 = vrot.slane %v10605_v27, %v18274_v29  ;;  %v10929_v27 = vsel %vm10768_vm14, %v10928_v40, %v10924_v35 }
 0x770   : > { %v10993_v34 = vsel %vm10747_vm11, %v10992_v8, %v10988_v5 }
 0x771   : > { %v10608_v1 = vpop.permute.xlu1 %10607 }
 0x772   : > { %v10997_v48 = vrot.slane %v10608_v1, %v18227_v2  ;;  %v10933_v1 = vrot.slane %v10569_v46, %v18252_v45  ;;  %v10623_v46 = vpop.permute.xlu0 %10622 }
 0x773   : > { %v11021_v42 = vrot.slane %v10623_v46, %v18262_v47 }
 0x774   : > { %v10998_v59 = vsel %vm10754_vm12, %v10997_v48, %v10993_v34  ;;  %v10934_v41 = vsel %vm10775_vm15, %v10933_v1, %v10929_v27  ;;  %v18277_v27 = vlaneseq }
 0x775   : > { %v10611_v18 = vpop.permute.xlu1 %10610 }
 0x776   : > { %v11002_v57 = vrot.slane %v10611_v18, %v18228_v24  ;;  %vm11135_vm0 = vcmp.lt.s32.totalorder %v18277_v27, 640 }
 0x778   : > { %v11003_v36 = vsel %vm10761_vm13, %v11002_v57, %v10998_v59 }
 0x779   : > { %v10614_v49 = vpop.permute.xlu1 %10613 }
 0x77a   : > { %v11007_v9 = vrot.slane %v10614_v49, %v18250_v15  ;;  %v10629_v49 = vpop.permute.xlu0 %10628 }
 0x77b   : > { %v11031_v56 = vrot.slane %v10629_v49, %v18266_v20 }
 0x77c   : > { %v11008_v33 = vsel %vm10768_vm14, %v11007_v9, %v11003_v36 }
 0x77d   : > { %v10620_v28 = vpop.permute.xlu1 %10619 }
 0x77e   : > { %v10635_v10 = vpop.permute.xlu0 %10634  ;;  %v11017_v25 = vrot.slane %v10620_v28, %v18263_v39 }
 0x77f   : > { %v11041_v39 = vrot.slane %v10635_v10, %v18268_v31 }
 0x780   : > { %v11022_v3 = vsel %vm10677_vm1, %v11021_v42, %v11017_v25 }
 0x781   : > { %v10626_v13 = vpop.permute.xlu1 %10625 }
 0x782   : > { %v10638_v17 = vpop.permute.xlu0 %10637  ;;  %v11026_v14 = vrot.slane %v10626_v13, %v18265_v7 }
 0x783   : > { %v11046_v47 = vrot.slane %v10638_v17, %v18269_v54 }
 0x784   : > { %v11027_v62 = vsel %vm10684_vm2, %v11026_v14, %v11022_v3 }
 0x785   : > { %v10632_v63 = vpop.permute.xlu1 %10631  ;;  %v11032_v23 = vsel %vm10691_vm3, %v11031_v56, %v11027_v62 }
 0x786   : > { %v10641_v19 = vpop.permute.xlu0 %10640  ;;  %v11036_v44 = vrot.slane %v10632_v63, %v18267_v52 }
 0x787   : > { %v11051_v60 = vrot.slane %v10641_v19, %v18270_v55 }
 0x788   : > { %v11037_v0 = vsel %vm10698_vm4, %v11036_v44, %v11032_v23 }
 0x789   : > { %v10617_v61 = vpop.permute.xlu1 %10616  ;;  %v11042_v7 = vsel %vm10705_vm5, %v11041_v39, %v11037_v0 }
 0x78a   : > { %v11012_v4 = vrot.slane %v10617_v61, %v18252_v45  ;;  %v10644_v50 = vpop.permute.xlu0 %10643  ;;  %v11047_v13 = vsel %vm10712_vm6, %v11046_v47, %v11042_v7 }
 0x78b   : > { %v11052_v52 = vsel %vm10719_vm7, %v11051_v60, %v11047_v13  ;;  %v11056_v20 = vrot.slane %v10644_v50, %v18271_v16 }
 0x78c   : > { %v11013_v30 = vsel %vm10775_vm15, %v11012_v4, %v11008_v33 }
 0x78d   : > { %v11094_v18 = vcombine.low %v10934_v41, %v11013_v30  ;;  %v11057_v22 = vsel %vm10726_vm8, %v11056_v20, %v11052_v52  ;;  %v10656_v51 = vpop.permute.xlu1 %10655 }
 0x78e   : > { %v10647_v28 = vpop.permute.xlu0 %10646  ;;  %v11076_v63 = vrot.slane %v10656_v51, %v18227_v2 }
 0x78f   : > { %v11108_v32 = vrot.slane %v11094_v18, %v14449_v6  ;;  %v11061_v58 = vrot.slane %v10647_v28, %v18272_v11 }
 0x791   : > { %v11116_v53 = vcombine.low %v11101_v21, %v11108_v32  ;;  %v11062_v8 = vsel %vm10733_vm9, %v11061_v58, %v11057_v22  ;;  %v10662_v26 = vpop.permute.xlu1 %10661 }
 0x792   : > { %v10650_v37 = vpop.permute.xlu0 %10649 }
 0x793   : > { %v11066_v54 = vrot.slane %v10650_v37, %v18273_v12  ;;  %v11086_v12 = vrot.slane %v10662_v26, %v18250_v15  ;;  %v11123_v35 = vrot.slane %v11116_v53, %v14449_v6 }
 0x795   : > { %v11067_v40 = vsel %vm10740_vm10, %v11066_v54, %v11062_v8 }
 0x796   : > { %v10653_v31 = vpop.permute.xlu0 %10652 }
 0x797   : > { %v11071_v55 = vrot.slane %v10653_v31, %v18274_v29 }
 0x799   : > { %v11072_v16 = vsel %vm10747_vm11, %v11071_v55, %v11067_v40 }
 0x79a   : > { %v11077_v11 = vsel %vm10754_vm12, %v11076_v63, %v11072_v16 }
 0x7aa   : > { %v10659_v48 = vpop.permute.xlu0 %10658 }
 0x7ab   : > { %v11081_v38 = vrot.slane %v10659_v48, %v18228_v24 }
 0x7ad   : > { %v11082_v57 = vsel %vm10761_vm13, %v11081_v38, %v11077_v11 }
 0x7ae   : > { %v11087_v29 = vsel %vm10768_vm14, %v11086_v12, %v11082_v57 }
 0x7df   : > { %v10665_v5 = vpop.permute.xlu0 %10664 }
 0x7e0   : > { %v11091_v9 = vrot.slane %v10665_v5, %v18252_v45 }
 0x7e2   : > { %v11092_v2 = vsel %vm10775_vm15, %v11091_v9, %v11087_v29 }
 0x7e3   : > { %v11115_v24 = vrot.slane %v11092_v2, %v14449_v6  ;;  %11149 = sbr.rel (!%p18278_p3) target bundleno = 2054 (0x806), region = 64 }
 0x7e5   : > { %v11130_v34 = vrot.slane %v11115_v24, %v14449_v6 }
 0x7e7   : > { %v11131_v15 = vcombine.low %v11123_v35, %v11130_v34 }
 0x7e9   : > { %11137 = vst.msk [vmem:[%s365_s18] sm:$0x1f] %vm11135_vm0, %v11131_v15 }
 0x7ea   : > { %s18290_s17 = smov (!%p11152_p2, %s11151_s17), 80 }
 0x7eb   : > { %s17659_s10 = sshll.u32 %s18290_s17, 7 }
 0x7ec   : > { %s11156_s16 = ssub.s32 10240, %s17659_s10 }
 0x7ed   : > { %11157 = vsyncadd %s11139_s8, %s11156_s16  ;;  %p11387_p6 = scmp.ne.s32.totalorder %s17659_s10, 0  ;;  %s11393_s14 = smul.u32 10240, %s12589_s4 }
 0x7ee   : > { %s11162_s21 = sshll.u32 %s14387_s19, 4  ;;  %s12522_s20 = smov [#allocation11]   ;;  %s17672_s21 = int_to_ptr.vmem [resolvable:$true] %s11162_s21 }
 0x7ef   : > { %s17670_s13 = scalar_lea.hbm %s17724_s6, %s11393_s14  ;;  %s12437_s30 = scalar_lea.vmem %s17672_s21, %s17659_s10 }
 0x7f0   : > { %p12438_p5 = scmp.ne.s32.totalorder %s17672_s21, %s12437_s30  ;;  %s12441_s23 = sshll.u32 %s12522_s20, 4  ;;  %s12442_s23 = int_to_ptr.vmem [resolvable:$false] %s12441_s23 }
 0x7f1   : > { %s12443_s4 = scalar_lea.vmem %s12442_s23, 20480  ;;  %p12444_p11 = scmp.lt.s32.totalorder %s17672_s21, %s12442_s23 }
 0x7f2   : > { %p12439_p12 = pnand %p12438_p5, %p11387_p6  ;;  %p12445_p7 = scmp.lt.s32.totalorder %s12443_s4, %s12437_s30 }
 0x7f4   : > { %p12440_p13 = pneg %p12439_p12  ;;  %p12446_p0 = por %p12445_p7, %p12444_p11 }
 0x7f6   : > { %p12447_p8 = pnand %p12446_p0, %p12440_p13 }
 0x7f8   : > { %12450 = shalt.err (!%p12447_p8)
}
 0x7f9   : > { %s12451_s19 = scalar_lea.hbm %s17670_s13, %s17659_s10  ;;  %s12455_s18 = scalar_lea.hbm %s17724_s6, 19200 }
 0x7fa   : > { %p12452_p9 = scmp.ne.s32.totalorder %s17670_s13, %s12451_s19  ;;  %p12456_p3 = scmp.lt.u32.totalorder %s17670_s13, %s17724_s6 }
 0x7fb   : > { %p12457_p2 = scmp.lt.u32.totalorder %s12455_s18, %s12451_s19  ;;  %p12459_p12 = scmp.lt.u32.totalorder %s12451_s19, %s17670_s13 }
 0x7fc   : > { %p12453_p10 = pnand %p12452_p9, %p11387_p6 }
 0x7fd   : > { %p12458_p5 = por %p12457_p2, %p12456_p3 }
 0x7fe   : > { %p12454_p1 = pneg %p12453_p10 }
 0x7ff   : > { %p12460_p13 = por %p12459_p12, %p12458_p5 }
 0x801   : > { %p12461_p11 = pnand %p12460_p13, %p12454_p1 }
 0x803   : > { %12464 = shalt.err (!%p12461_p11)
}
 0x804   : > { %s12523_s16 = smov 128   ;;  %s12524_s14 = smov 8  }
 0x805   : > { %11168 = dma.vmem_to_hbm [thread:$0]  (%p11387_p6), %s17672_s21, %s17659_s10, %s17670_s13, %s11139_s8, %s12523_s16, %s12523_s16, %s12524_s14  }
 0x806 PF: > { %s11181_s22 = sand.u32 1, %s12499_s26   ;;  %p18279_p7 = scmp.ne.s32.totalorder %s17875_s15, 0 }
 0x807   : > { %s11182_s25 = scalar_lea.sflag [#allocation5], %s11181_s22 }
 0x808   : > { %p11935_p0 = pnand %p11293_p4, %p18279_p7 }
 0x80a   : > { %12494 = dma.done.wait (!%p11935_p0), %s11182_s25, 10240  }
 0x80b   : > { %12496 = vsyncadd (!%p11935_p0), %s11182_s25, 4294957056  ;;  %s18280_s29 = sld [smem:[#allocation16_spill]]  ;;  %s18281_s30 = sld [smem:[#allocation17_spill]] }
 0x80c   : > { %s18282_s26 = smov %s12503_s27  ;;  %s18283_s27 = smov %s12507_s28 }
 0x811   : > { %p24_p8 = scmp.ge.s32.totalorder %s18280_s29, 4   ;;  %s18284_s28 = smov %s18281_s30 }
 0x813   :  { %26 = sbr.rel (!%p24_p8) target bundleno = 9 (0x9), region = 113 }
 0x81a   :  { %11194 = vsyncpa [#allocation4], 1 }
 0x81b   :  { %11196 = vsyncpa [#allocation4 + $0x1], 1 }
 0x81c   :  { %11197 = vsyncpa [#allocation7], 1 }
 0x81d   :  { %11198 = vsyncpa [#allocation10], 1 }
 0x81e   :  { %11199 = vsyncpa [#allocation5], 1 }
 0x81f   :  { %11201 = vsyncpa [#allocation5 + $0x1], 1 }

</bundles_post_ra>
